<compile_context>
chip_gen: v7x
topology: tpu7x:2x2x1
jax: 0.10.0
libtpu: 0.0.40
codegen_flags: <defaults>
</compile_context>

<pallas_src>
import functools

import jax
import jax.numpy as jnp
from jax.experimental import pallas as pl
from jax.experimental.pallas import tpu as pltpu

EPS = 1e-6
NUM_GROUPS = 32


def _round_up(v, m):
    return ((v + m - 1) // m) * m


def _group_pad(a, axis, c_real, c_pad):
    """Zero-pad a channel axis c_real -> c_pad in group-blocked layout.

    Real channel c (group g = c // cpg, offset r = c % cpg) lands at slot
    g * (c_pad // 32) + r, so every group's slots are contiguous and exact
    per-group reductions are plain reshapes inside the kernel.
    """
    cpg = c_real // NUM_GROUPS
    cpgp = c_pad // NUM_GROUPS
    if cpg == cpgp:
        return a
    shape = list(a.shape)
    a = a.reshape(shape[:axis] + [NUM_GROUPS, cpg] + shape[axis + 1:])
    pad = [(0, 0)] * a.ndim
    pad[axis + 1] = (0, cpgp - cpg)
    a = jnp.pad(a, pad)
    return a.reshape(shape[:axis] + [c_pad] + shape[axis + 1:])


def _group_unpad(a, axis, c_real, c_pad):
    cpg = c_real // NUM_GROUPS
    cpgp = c_pad // NUM_GROUPS
    if cpg == cpgp:
        return a
    shape = list(a.shape)
    a = a.reshape(shape[:axis] + [NUM_GROUPS, cpgp] + shape[axis + 1:])
    idx = tuple([slice(None)] * (axis + 1) + [slice(0, cpg)])
    a = a[idx]
    return a.reshape(shape[:axis] + [c_real] + shape[axis + 1:])


def _group_avg_matrix(c_real, c_pad):
    """(c_pad, c_pad) 0/1 matrix: A[i, j] = 1 iff i and j are *real* channel slots
    of the same group.  `ch_sums @ A` both sums each group and broadcasts the group
    value back to every real slot of that group (padded slots stay exactly 0)."""
    cpg = c_real // NUM_GROUPS
    cpgp = c_pad // NUM_GROUPS
    ch = jnp.arange(c_pad)
    grp = ch // cpgp
    real = (ch % cpgp) < cpg
    same = (grp[:, None] == grp[None, :]) & real[:, None] & real[None, :]
    return same.astype(jnp.float32)


def resnet_block_kernel(*refs, nb, hdim, wdim, cpg_in, cpg_out, use_projection):
    if use_projection:
        (x_ref, avg1_ref, avg2_ref, g1_ref, be1_ref, g2_ref, be2_ref,
         w1_ref, b1_ref, w2_ref, b2_ref, ws_ref, bs_ref,
         o_ref, cols1_ref, cols2_ref) = refs
    else:
        (x_ref, avg1_ref, avg2_ref, g1_ref, be1_ref, g2_ref, be2_ref,
         w1_ref, b1_ref, w2_ref, b2_ref,
         o_ref, cols1_ref, cols2_ref) = refs

    HW = hdim * wdim
    M = nb * HW

    # x-boundary masks for the kx = +/-1 shifts (computed once, shared by both convs)
    x_pos = jax.lax.broadcasted_iota(jnp.int32, (M, 1), 0) % wdim
    mask_l = (x_pos > 0).astype(jnp.float32)            # zero where x == 0
    mask_r = (x_pos < wdim - 1).astype(jnp.float32)     # zero where x == W - 1

    def group_norm(t, avg_ref, gamma_ref, beta_ref, cpg_real):
        # t: (M, C_p) f32, channels in group-blocked padded layout.
        # H*W reductions are exact f32 adds; only the tiny (nb, C_p) @ (C_p, C_p)
        # 0/1 group-combine matmul touches the MXU (negligible, no precision risk
        # on the large reduction).
        c_p = t.shape[-1]
        inv_cnt = 1.0 / float(HW * cpg_real)
        t3 = t.reshape(nb, HW, c_p)
        ch_sum = jnp.sum(t3, axis=1)                                   # (nb, C_p)
        mean_c = jnp.dot(ch_sum, avg_ref[...],
                         preferred_element_type=jnp.float32) * inv_cnt
        d = t3 - mean_c[:, None, :]                                    # padded slots stay 0
        sq_sum = jnp.sum(d * d, axis=1)                                # (nb, C_p)
        var_c = jnp.dot(sq_sum, avg_ref[...],
                        preferred_element_type=jnp.float32) * inv_cnt
        scale = jax.lax.rsqrt(var_c + EPS) * gamma_ref[...]            # (nb, C_p)
        y = d * scale[:, None, :] + beta_ref[...].reshape(1, 1, c_p)
        return y.reshape(M, c_p)

    def swish(t):
        return t * jax.nn.sigmoid(t)

    def conv3x3(t, cols_ref, w_ref, b_ref):
        # t: (M, C_p) f32 -> (M, Cout_p) f32.
        # kx-only im2col (M, 3*C_p) built from two rolls + masks (aligned stores);
        # ky taps are sublane-aligned +/-W row views of the guard-row buffer, each
        # feeding one accumulating big-K (K = 3*C_p) bf16 matmul.
        c_p = t.shape[-1]
        center = t.astype(jnp.bfloat16)
        left = (pltpu.roll(t, 1, 0) * mask_l).astype(jnp.bfloat16)       # in[y, x-1]
        right = (pltpu.roll(t, M - 1, 0) * mask_r).astype(jnp.bfloat16)  # in[y, x+1]
        cols_ref[:, 1:hdim + 1, :, 0 * c_p:1 * c_p] = left.reshape(nb, hdim, wdim, c_p)
        cols_ref[:, 1:hdim + 1, :, 1 * c_p:2 * c_p] = center.reshape(nb, hdim, wdim, c_p)
        cols_ref[:, 1:hdim + 1, :, 2 * c_p:3 * c_p] = right.reshape(nb, hdim, wdim, c_p)
        guard = jnp.zeros((nb, 1, wdim, 3 * c_p), jnp.bfloat16)
        cols_ref[:, 0:1, :, :] = guard                     # y = -1 tap reads zeros
        cols_ref[:, hdim + 1:hdim + 2, :, :] = guard       # y = H  tap reads zeros
        out = None
        for ky in range(3):
            lhs = cols_ref[:, ky:ky + hdim, :, :].reshape(M, 3 * c_p)
            part = jnp.dot(lhs, w_ref[ky], preferred_element_type=jnp.float32)
            out = part if out is None else out + part
        return out + b_ref[...]

    x_f32 = x_ref[...].astype(jnp.float32)                 # (M, Cin_p)

    h = group_norm(x_f32, avg1_ref, g1_ref, be1_ref, cpg_in)
    h = swish(h)
    h = conv3x3(h, cols1_ref, w1_ref, b1_ref)
    h = group_norm(h, avg2_ref, g2_ref, be2_ref, cpg_out)
    h = swish(h)
    # TODO(synk): nn.Dropout(p=0.0) / eval mode is the identity; training-mode
    # dropout (p > 0) is not implemented.
    h = conv3x3(h, cols2_ref, w2_ref, b2_ref)

    if use_projection:
        xs = jnp.dot(x_ref[...], ws_ref[...],
                     preferred_element_type=jnp.float32) + bs_ref[...]
    else:
        xs = x_f32
    o_ref[...] = (xs + h).astype(o_ref.dtype)


def resnet_block_pallas(x_nchw, params, *, batch_block=None):
    """x_nchw: (N, Cin, H, W) f32 -> (N, Cout, H, W) f32."""
    N, Cin, H, W = x_nchw.shape
    Cout = params["w1"].shape[-1]
    HW = H * W
    assert Cin % NUM_GROUPS == 0 and Cout % NUM_GROUPS == 0
    # lane/sublane-friendly layout: each image row occupies whole sublane tiles
    assert W % 8 == 0, "this kernel assumes W is a multiple of 8"

    Cin_p = _round_up(Cin, 128)
    Cout_p = _round_up(Cout, 128)
    cpg_in = Cin // NUM_GROUPS
    cpg_out = Cout // NUM_GROUPS
    use_projection = Cin != Cout
    # TODO(synk): conv_shortcut=True (3x3 projection shortcut) variant is not
    # implemented; identity (Cin == Cout) and 1x1 nin_shortcut paths are covered.

    # ---- operands (group-blocked channel padding; bf16 matmul operands) ----
    x2d = jnp.transpose(x_nchw, (0, 2, 3, 1)).astype(jnp.float32).reshape(N * HW, Cin)
    x2d = _group_pad(x2d, 1, Cin, Cin_p).astype(jnp.bfloat16)

    def prep_conv_w(w9, cin, cin_p):
        w = _group_pad(w9.astype(jnp.float32), 1, cin, cin_p)        # (9, cin_p, Cout)
        w = _group_pad(w, 2, Cout, Cout_p)                           # (9, cin_p, Cout_p)
        # (ky, kx, ci, co) -> (ky, kx*cin_p + ci, co): K blocks match the im2col layout
        w = w.reshape(3, 3, cin_p, Cout_p).reshape(3, 3 * cin_p, Cout_p)
        return w.astype(jnp.bfloat16)

    def prep_vec(v, c, c_p):
        return _group_pad(v.astype(jnp.float32), 1, c, c_p)          # (1, c_p) f32

    w1 = prep_conv_w(params["w1"], Cin, Cin_p)
    w2 = prep_conv_w(params["w2"], Cout, Cout_p)
    b1 = prep_vec(params["b1"], Cout, Cout_p)
    b2 = prep_vec(params["b2"], Cout, Cout_p)
    g1 = prep_vec(params["g1"], Cin, Cin_p)
    be1 = prep_vec(params["be1"], Cin, Cin_p)
    g2 = prep_vec(params["g2"], Cout, Cout_p)
    be2 = prep_vec(params["be2"], Cout, Cout_p)
    avg1 = _group_avg_matrix(Cin, Cin_p)
    avg2 = _group_avg_matrix(Cout, Cout_p)

    const_ops = [avg1, avg2, g1, be1, g2, be2, w1, b1, w2, b2]
    if use_projection:
        ws = _group_pad(_group_pad(params["ws"].astype(jnp.float32), 0, Cin, Cin_p),
                        1, Cout, Cout_p).astype(jnp.bfloat16)
        bs = prep_vec(params["bs"], Cout, Cout_p)
        const_ops += [ws, bs]

    # ---- generation-aware VMEM budget and batch-block (M = nb*H*W rows) choice ----
    try:
        vmem_cap = int(pltpu.get_tpu_info().vmem_capacity_bytes)
    except Exception:
        vmem_cap = 128 * 1024 * 1024
    # ~48 MiB headroom-capped on 64 MiB parts (v7x), ~100 MiB on 128 MiB parts (v5e/v6e)
    budget = int(vmem_cap * (0.75 if vmem_cap <= 64 * 1024 * 1024 else 0.80))

    param_bytes = 2 * sum(int(o.size) * o.dtype.itemsize for o in const_ops)

    def step_bytes(nb):
        m = nb * HW
        io = 2 * m * (Cin_p + Cout_p) * 2                       # bf16 in/out, double buffered
        cols = nb * (H + 2) * W * 3 * (Cin_p + Cout_p) * 2      # kx-only im2col scratches
        temps = 4 * m * max(Cin_p, Cout_p) * 4                  # live f32 intermediates
        return io + cols + temps + param_bytes

    if batch_block is None:
        nb = 1
        for cand in range(1, N + 1):
            if N % cand:
                continue
            if N >= 2 and (N // cand) < 2:
                continue                                        # keep >= 2 steps for 2 TCs
            if step_bytes(cand) <= budget:
                nb = cand
    else:
        nb = batch_block
    assert N % nb == 0
    M = nb * HW

    kernel = functools.partial(
        resnet_block_kernel, nb=nb, hdim=H, wdim=W,
        cpg_in=cpg_in, cpg_out=cpg_out, use_projection=use_projection)

    operands = (x2d, *const_ops)

    def build(single_buffer_consts):
        def const_spec(shape):
            nd = len(shape)
            imap = lambda i, nd=nd: (0,) * nd
            if single_buffer_consts:
                # grid-invariant blocks: one resident VMEM copy instead of two
                return pl.BlockSpec(shape, imap, pipeline_mode=pl.Buffered(1))
            return pl.BlockSpec(shape, imap)

        in_specs = [pl.BlockSpec((M, Cin_p), lambda i: (i, 0))]
        in_specs += [const_spec(tuple(op.shape)) for op in const_ops]

        return pl.pallas_call(
            kernel,
            out_shape=jax.ShapeDtypeStruct((N * HW, Cout_p), jnp.bfloat16),
            grid_spec=pltpu.PrefetchScalarGridSpec(
                num_scalar_prefetch=0,
                grid=(N // nb,),
                in_specs=in_specs,
                out_specs=pl.BlockSpec((M, Cout_p), lambda i: (i, 0)),
                scratch_shapes=[
                    pltpu.VMEM((nb, H + 2, W, 3 * Cin_p), jnp.bfloat16),   # conv1 im2col
                    pltpu.VMEM((nb, H + 2, W, 3 * Cout_p), jnp.bfloat16),  # conv2 im2col
                ],
            ),
            compiler_params=pltpu.CompilerParams(
                dimension_semantics=("parallel",),       # batch-block axis -> megacore
                vmem_limit_bytes=budget),
        )

    try:
        out2d = jax.block_until_ready(build(True)(*operands))
    except Exception:
        # older JAX without BlockSpec(pipeline_mode=...): fall back to double buffering
        out2d = jax.block_until_ready(build(False)(*operands))

    out = _group_unpad(out2d.astype(jnp.float32), 1, Cout, Cout_p)
    out = out.reshape(N, H, W, Cout)
    return jnp.transpose(out, (0, 3, 1, 2))


# ------------------------- pure-JAX reference -------------------------
def resnet_block_ref(x_nchw, params):
    x = jnp.transpose(x_nchw, (0, 2, 3, 1)).astype(jnp.float32)  # NHWC

    def gn(h, gamma, beta):
        n, hh, ww, c = h.shape
        cpg = c // NUM_GROUPS
        hr = h.reshape(n, hh, ww, NUM_GROUPS, cpg)
        mean = hr.mean(axis=(1, 2, 4), keepdims=True)
        var = hr.var(axis=(1, 2, 4), keepdims=True)
        hr = (hr - mean) / jnp.sqrt(var + EPS)
        h = hr.reshape(n, hh, ww, c)
        return h * gamma.reshape(1, 1, 1, c) + beta.reshape(1, 1, 1, c)

    def swish(h):
        return h * jax.nn.sigmoid(h)

    def conv3(h, w9, b):  # w9: (9, Cin, Cout) -> HWIO (3, 3, Cin, Cout)
        w = w9.reshape(3, 3, w9.shape[1], w9.shape[2])
        out = jax.lax.conv_general_dilated(
            h, w, window_strides=(1, 1), padding="SAME",
            dimension_numbers=("NHWC", "HWIO", "NHWC"),
            precision=jax.lax.Precision.HIGHEST)
        return out + b.reshape(1, 1, 1, -1)

    h = gn(x, params["g1"], params["be1"])
    h = swish(h)
    h = conv3(h, params["w1"], params["b1"])
    h = gn(h, params["g2"], params["be2"])
    h = swish(h)
    h = conv3(h, params["w2"], params["b2"])
    if "ws" in params:
        x = jnp.einsum("nhwc,cd->nhwd", x, params["ws"],
                       precision=jax.lax.Precision.HIGHEST) + params["bs"].reshape(1, 1, 1, -1)
    return jnp.transpose(x + h, (0, 3, 1, 2))


if __name__ == "__main__":
    key = jax.random.PRNGKey(0)
    ks = jax.random.split(key, 8)

    def make_params(kk, cin, cout, with_proj):
        p = {
            "w1": jax.random.normal(kk[0], (9, cin, cout), jnp.float32) * 0.05,
            "b1": jax.random.normal(kk[1], (1, cout), jnp.float32) * 0.05,
            "w2": jax.random.normal(kk[2], (9, cout, cout), jnp.float32) * 0.05,
            "b2": jax.random.normal(kk[3], (1, cout), jnp.float32) * 0.05,
            "g1": 1.0 + 0.1 * jax.random.normal(kk[4], (1, cin), jnp.float32),
            "be1": 0.1 * jax.random.normal(kk[5], (1, cin), jnp.float32),
            "g2": 1.0 + 0.1 * jax.random.normal(kk[6], (1, cout), jnp.float32),
            "be2": 0.1 * jax.random.normal(kk[7], (1, cout), jnp.float32),
        }
        if with_proj:
            p["ws"] = jax.random.normal(kk[8], (cin, cout), jnp.float32) * 0.1
            p["bs"] = jax.random.normal(kk[9], (1, cout), jnp.float32) * 0.05
        return p

    # 1) nin_shortcut (1x1 projection) path: in_channels=32 -> out_channels=64
    n, cin, cout, hh, ww = 4, 32, 64, 8, 8
    params = make_params(jax.random.split(ks[0], 10), cin, cout, True)
    x = jax.random.normal(ks[1], (n, cin, hh, ww), jnp.float32)
    out = jax.block_until_ready(resnet_block_pallas(x, params))
    ref = resnet_block_ref(x, params)
    assert out.shape == (n, cout, hh, ww)
    err = float(jnp.max(jnp.abs(out - ref)))
    # bf16 streamed activations + bf16 MXU operands (f32 accumulation) vs f32 reference
    assert jnp.allclose(out, ref, atol=5e-2, rtol=5e-2), f"projection path max err {err}"

    # 2) identity-shortcut path: in_channels == out_channels = 64 (no ws/bs operands)
    n2, c2, hh2, ww2 = 2, 64, 8, 8
    params_id = make_params(jax.random.split(ks[2], 10), c2, c2, False)
    x_id = jax.random.normal(ks[3], (n2, c2, hh2, ww2), jnp.float32)
    out_id = jax.block_until_ready(resnet_block_pallas(x_id, params_id))
    ref_id = resnet_block_ref(x_id, params_id)
    err_id = float(jnp.max(jnp.abs(out_id - ref_id)))
    assert jnp.allclose(out_id, ref_id, atol=5e-2, rtol=5e-2), f"identity path max err {err_id}"

    print("KERNEL_OK")
</pallas_src>

<mosaic_0001>
module attributes {stable_mosaic.version = 11 : i64} {
  func.func @resnet_block_kernel(%arg0: i32, %arg1: memref<128x128xbf16, #tpu.memory_space<vmem>>, %arg2: memref<128x128xf32, #tpu.memory_space<vmem>>, %arg3: memref<128x128xf32, #tpu.memory_space<vmem>>, %arg4: memref<1x128xf32, #tpu.memory_space<vmem>>, %arg5: memref<1x128xf32, #tpu.memory_space<vmem>>, %arg6: memref<1x128xf32, #tpu.memory_space<vmem>>, %arg7: memref<1x128xf32, #tpu.memory_space<vmem>>, %arg8: memref<3x384x128xbf16, #tpu.memory_space<vmem>>, %arg9: memref<1x128xf32, #tpu.memory_space<vmem>>, %arg10: memref<3x384x128xbf16, #tpu.memory_space<vmem>>, %arg11: memref<1x128xf32, #tpu.memory_space<vmem>>, %arg12: memref<128x128xbf16, #tpu.memory_space<vmem>>, %arg13: memref<1x128xf32, #tpu.memory_space<vmem>>, %arg14: memref<128x128xbf16, #tpu.memory_space<vmem>>, %arg15: memref<2x10x8x384xbf16, #tpu.memory_space<vmem>>, %arg16: memref<2x10x8x384xbf16, #tpu.memory_space<vmem>>) attributes {dimension_semantics = [#tpu.dimension_semantics<parallel>], iteration_bounds = array<i64: 2>, scalar_prefetch = 0 : i64, scratch_operands = 2 : i64, tpu.core_type = #tpu.core_type<tc>, window_params = [{transform_indices = @transform_0, window_bounds = array<i64: 128, 128>}, {pipeline_mode = #tpu.pipeline_mode<synchronous>, transform_indices = @transform_1, window_bounds = array<i64: 128, 128>}, {pipeline_mode = #tpu.pipeline_mode<synchronous>, transform_indices = @transform_2, window_bounds = array<i64: 128, 128>}, {pipeline_mode = #tpu.pipeline_mode<synchronous>, transform_indices = @transform_3, window_bounds = array<i64: 1, 128>}, {pipeline_mode = #tpu.pipeline_mode<synchronous>, transform_indices = @transform_4, window_bounds = array<i64: 1, 128>}, {pipeline_mode = #tpu.pipeline_mode<synchronous>, transform_indices = @transform_5, window_bounds = array<i64: 1, 128>}, {pipeline_mode = #tpu.pipeline_mode<synchronous>, transform_indices = @transform_6, window_bounds = array<i64: 1, 128>}, {pipeline_mode = #tpu.pipeline_mode<synchronous>, transform_indices = @transform_7, window_bounds = array<i64: 3, 384, 128>}, {pipeline_mode = #tpu.pipeline_mode<synchronous>, transform_indices = @transform_8, window_bounds = array<i64: 1, 128>}, {pipeline_mode = #tpu.pipeline_mode<synchronous>, transform_indices = @transform_9, window_bounds = array<i64: 3, 384, 128>}, {pipeline_mode = #tpu.pipeline_mode<synchronous>, transform_indices = @transform_10, window_bounds = array<i64: 1, 128>}, {pipeline_mode = #tpu.pipeline_mode<synchronous>, transform_indices = @transform_11, window_bounds = array<i64: 128, 128>}, {pipeline_mode = #tpu.pipeline_mode<synchronous>, transform_indices = @transform_12, window_bounds = array<i64: 1, 128>}, {transform_indices = @transform_13, window_bounds = array<i64: 128, 128>}]} {
    %0 = tpu.iota {dimensions = array<i32: 0>} : vector<128x1xi32>
    %c8_i32 = arith.constant 8 : i32
    %c0_i32 = arith.constant 0 : i32
    %1 = arith.cmpi eq, %c8_i32, %c0_i32 : i32
    %c1_i32 = arith.constant 1 : i32
    %2 = arith.select %1, %c1_i32, %c8_i32 : i32
    %3 = vector.broadcast %2 : i32 to vector<128x1xi32>
    %4 = arith.remsi %0, %3 : vector<128x1xi32>
    %c0_i32_0 = arith.constant 0 : i32
    %5 = vector.broadcast %c0_i32_0 : i32 to vector<128x1xi32>
    %6 = arith.cmpi ne, %4, %5 : vector<128x1xi32>
    %c0_i32_1 = arith.constant 0 : i32
    %7 = vector.broadcast %c0_i32_1 : i32 to vector<128x1xi32>
    %8 = arith.cmpi slt, %4, %7 : vector<128x1xi32>
    %c0_i32_2 = arith.constant 0 : i32
    %9 = arith.cmpi slt, %2, %c0_i32_2 : i32
    %10 = vector.broadcast %9 : i1 to vector<128x1xi1>
    %11 = vector.broadcast %10 : vector<128x1xi1> to vector<128x1xi1>
    %12 = arith.xori %8, %11 : vector<128x1xi1>
    %13 = arith.andi %12, %6 : vector<128x1xi1>
    %14 = vector.broadcast %2 : i32 to vector<128x1xi32>
    %15 = arith.addi %4, %14 : vector<128x1xi32>
    %16 = arith.select %13, %15, %4 : vector<128x1xi1>, vector<128x1xi32>
    %c0_i32_3 = arith.constant 0 : i32
    %17 = vector.broadcast %c0_i32_3 : i32 to vector<128x1xi32>
    %18 = arith.cmpi sgt, %16, %17 : vector<128x1xi32>
    %19 = arith.extui %18 : vector<128x1xi1> to vector<128x1xi32>
    %20 = arith.sitofp %19 : vector<128x1xi32> to vector<128x1xf32>
    %c7_i32 = arith.constant 7 : i32
    %21 = vector.broadcast %c7_i32 : i32 to vector<128x1xi32>
    %22 = arith.cmpi slt, %16, %21 : vector<128x1xi32>
    %23 = arith.extui %22 : vector<128x1xi1> to vector<128x1xi32>
    %24 = arith.sitofp %23 : vector<128x1xi32> to vector<128x1xf32>
    %c0 = arith.constant 0 : index
    %c0_4 = arith.constant 0 : index
    %25 = vector.load %arg1[%c0, %c0_4] : memref<128x128xbf16, #tpu.memory_space<vmem>>, vector<128x128xbf16>
    %26 = arith.extf %25 : vector<128x128xbf16> to vector<128x128xf32>
    %27 = vector.shape_cast %26 : vector<128x128xf32> to vector<2x64x128xf32>
    %cst = arith.constant dense<0.000000e+00> : vector<2x128xf32>
    %28 = vector.multi_reduction <add>, %27, %cst [1] : vector<2x64x128xf32> to vector<2x128xf32>
    %c0_5 = arith.constant 0 : index
    %c0_6 = arith.constant 0 : index
    %29 = vector.load %arg2[%c0_5, %c0_6] : memref<128x128xf32, #tpu.memory_space<vmem>>, vector<128x128xf32>
    %cst_7 = arith.constant dense<0.000000e+00> : vector<2x128xf32>
    %30 = tpu.matmul %28, %29, %cst_7 {dimension_numbers = #tpu.dot_dimension_numbers<[1], [0], [0], [1], [0, 0, 1, 1], [], []>} : vector<2x128xf32>, vector<128x128xf32>, vector<2x128xf32> -> vector<2x128xf32>
    %cst_8 = arith.constant 1.562500e-02 : f32
    %31 = vector.broadcast %cst_8 : f32 to vector<2x128xf32>
    %32 = arith.mulf %30, %31 : vector<2x128xf32>
    %33 = vector.shape_cast %32 : vector<2x128xf32> to vector<2x1x128xf32>
    %34 = vector.broadcast %33 : vector<2x1x128xf32> to vector<2x64x128xf32>
    %35 = arith.subf %27, %34 : vector<2x64x128xf32>
    %36 = arith.mulf %35, %35 : vector<2x64x128xf32>
    %cst_9 = arith.constant dense<0.000000e+00> : vector<2x128xf32>
    %37 = vector.multi_reduction <add>, %36, %cst_9 [1] : vector<2x64x128xf32> to vector<2x128xf32>
    %c0_10 = arith.constant 0 : index
    %c0_11 = arith.constant 0 : index
    %38 = vector.load %arg2[%c0_10, %c0_11] : memref<128x128xf32, #tpu.memory_space<vmem>>, vector<128x128xf32>
    %cst_12 = arith.constant dense<0.000000e+00> : vector<2x128xf32>
    %39 = tpu.matmul %37, %38, %cst_12 {dimension_numbers = #tpu.dot_dimension_numbers<[1], [0], [0], [1], [0, 0, 1, 1], [], []>} : vector<2x128xf32>, vector<128x128xf32>, vector<2x128xf32> -> vector<2x128xf32>
    %cst_13 = arith.constant 1.562500e-02 : f32
    %40 = vector.broadcast %cst_13 : f32 to vector<2x128xf32>
    %41 = arith.mulf %39, %40 : vector<2x128xf32>
    %cst_14 = arith.constant 9.99999997E-7 : f32
    %42 = vector.broadcast %cst_14 : f32 to vector<2x128xf32>
    %43 = arith.addf %41, %42 : vector<2x128xf32>
    %44 = math.rsqrt %43 : vector<2x128xf32>
    %c0_15 = arith.constant 0 : index
    %c0_16 = arith.constant 0 : index
    %45 = vector.load %arg4[%c0_15, %c0_16] : memref<1x128xf32, #tpu.memory_space<vmem>>, vector<1x128xf32>
    %46 = vector.broadcast %45 : vector<1x128xf32> to vector<2x128xf32>
    %47 = arith.mulf %44, %46 : vector<2x128xf32>
    %48 = vector.shape_cast %47 : vector<2x128xf32> to vector<2x1x128xf32>
    %49 = vector.broadcast %48 : vector<2x1x128xf32> to vector<2x64x128xf32>
    %50 = arith.mulf %35, %49 : vector<2x64x128xf32>
    %c0_17 = arith.constant 0 : index
    %c0_18 = arith.constant 0 : index
    %51 = vector.load %arg5[%c0_17, %c0_18] : memref<1x128xf32, #tpu.memory_space<vmem>>, vector<1x128xf32>
    %52 = vector.shape_cast %51 : vector<1x128xf32> to vector<1x1x128xf32>
    %53 = vector.broadcast %52 : vector<1x1x128xf32> to vector<2x64x128xf32>
    %54 = arith.addf %50, %53 : vector<2x64x128xf32>
    %55 = vector.shape_cast %54 : vector<2x64x128xf32> to vector<128x128xf32>
    %56 = arith.negf %55 : vector<128x128xf32>
    %57 = math.exp %56 : vector<128x128xf32>
    %cst_19 = arith.constant 1.000000e+00 : f32
    %58 = vector.broadcast %cst_19 : f32 to vector<128x128xf32>
    %59 = arith.addf %58, %57 : vector<128x128xf32>
    %60 = arith.divf %58, %59 : vector<128x128xf32>
    %61 = arith.mulf %55, %60 : vector<128x128xf32>
    %62 = arith.truncf %61 : vector<128x128xf32> to vector<128x128xbf16>
    %c1_i32_20 = arith.constant 1 : i32
    %63 = tpu.dynamic_rotate %61 by %c1_i32_20 dim 0 : vector<128x128xf32>, i32 -> vector<128x128xf32>
    %64 = vector.broadcast %20 : vector<128x1xf32> to vector<128x128xf32>
    %65 = arith.mulf %63, %64 : vector<128x128xf32>
    %66 = arith.truncf %65 : vector<128x128xf32> to vector<128x128xbf16>
    %c127_i32 = arith.constant 127 : i32
    %67 = tpu.dynamic_rotate %61 by %c127_i32 dim 0 : vector<128x128xf32>, i32 -> vector<128x128xf32>
    %68 = vector.broadcast %24 : vector<128x1xf32> to vector<128x128xf32>
    %69 = arith.mulf %67, %68 : vector<128x128xf32>
    %70 = arith.truncf %69 : vector<128x128xf32> to vector<128x128xbf16>
    %71 = vector.shape_cast %66 : vector<128x128xbf16> to vector<2x8x8x128xbf16>
    %c0_21 = arith.constant 0 : index
    %c1 = arith.constant 1 : index
    %c0_22 = arith.constant 0 : index
    %c0_23 = arith.constant 0 : index
    %72 = vector.load %arg15[%c0_21, %c1, %c0_22, %c0_23] : memref<2x10x8x384xbf16, #tpu.memory_space<vmem>>, vector<2x8x8x128xbf16>
    tpu.vector_store %arg15[%c0_21, %c1, %c0_22, %c0_23], %71 {strides = array<i32>} : memref<2x10x8x384xbf16, #tpu.memory_space<vmem>>, vector<2x8x8x128xbf16>,
    %73 = vector.shape_cast %62 : vector<128x128xbf16> to vector<2x8x8x128xbf16>
    %c0_24 = arith.constant 0 : index
    %c1_25 = arith.constant 1 : index
    %c0_26 = arith.constant 0 : index
    %c128 = arith.constant 128 : index
    %74 = vector.load %arg15[%c0_24, %c1_25, %c0_26, %c128] : memref<2x10x8x384xbf16, #tpu.memory_space<vmem>>, vector<2x8x8x128xbf16>
    tpu.vector_store %arg15[%c0_24, %c1_25, %c0_26, %c128], %73 {strides = array<i32>} : memref<2x10x8x384xbf16, #tpu.memory_space<vmem>>, vector<2x8x8x128xbf16>,
    %75 = vector.shape_cast %70 : vector<128x128xbf16> to vector<2x8x8x128xbf16>
    %c0_27 = arith.constant 0 : index
    %c1_28 = arith.constant 1 : index
    %c0_29 = arith.constant 0 : index
    %c256 = arith.constant 256 : index
    %76 = vector.load %arg15[%c0_27, %c1_28, %c0_29, %c256] : memref<2x10x8x384xbf16, #tpu.memory_space<vmem>>, vector<2x8x8x128xbf16>
    tpu.vector_store %arg15[%c0_27, %c1_28, %c0_29, %c256], %75 {strides = array<i32>} : memref<2x10x8x384xbf16, #tpu.memory_space<vmem>>, vector<2x8x8x128xbf16>,
    %cst_30 = arith.constant 0.000000e+00 : bf16
    %77 = vector.broadcast %cst_30 : bf16 to vector<2x1x8x384xbf16>
    %c0_31 = arith.constant 0 : index
    %c0_32 = arith.constant 0 : index
    %c0_33 = arith.constant 0 : index
    %c0_34 = arith.constant 0 : index
    %78 = vector.load %arg15[%c0_31, %c0_32, %c0_33, %c0_34] : memref<2x10x8x384xbf16, #tpu.memory_space<vmem>>, vector<2x1x8x384xbf16>
    tpu.vector_store %arg15[%c0_31, %c0_32, %c0_33, %c0_34], %77 {strides = array<i32>} : memref<2x10x8x384xbf16, #tpu.memory_space<vmem>>, vector<2x1x8x384xbf16>,
    %c0_35 = arith.constant 0 : index
    %c9 = arith.constant 9 : index
    %c0_36 = arith.constant 0 : index
    %c0_37 = arith.constant 0 : index
    %79 = vector.load %arg15[%c0_35, %c9, %c0_36, %c0_37] : memref<2x10x8x384xbf16, #tpu.memory_space<vmem>>, vector<2x1x8x384xbf16>
    tpu.vector_store %arg15[%c0_35, %c9, %c0_36, %c0_37], %77 {strides = array<i32>} : memref<2x10x8x384xbf16, #tpu.memory_space<vmem>>, vector<2x1x8x384xbf16>,
    %c0_38 = arith.constant 0 : index
    %c0_39 = arith.constant 0 : index
    %c0_40 = arith.constant 0 : index
    %c0_41 = arith.constant 0 : index
    %80 = vector.load %arg15[%c0_38, %c0_39, %c0_40, %c0_41] : memref<2x10x8x384xbf16, #tpu.memory_space<vmem>>, vector<2x8x8x384xbf16>
    %81 = vector.shape_cast %80 : vector<2x8x8x384xbf16> to vector<128x384xbf16>
    %c0_42 = arith.constant 0 : index
    %c0_43 = arith.constant 0 : index
    %c0_44 = arith.constant 0 : index
    %82 = vector.load %arg8[%c0_42, %c0_43, %c0_44] : memref<3x384x128xbf16, #tpu.memory_space<vmem>>, vector<1x384x128xbf16>
    %83 = vector.shape_cast %82 : vector<1x384x128xbf16> to vector<384x128xbf16>
    %cst_45 = arith.constant dense<0.000000e+00> : vector<128x128xf32>
    %84 = tpu.matmul %81, %83, %cst_45 {dimension_numbers = #tpu.dot_dimension_numbers<[1], [0], [0], [1], [0, 0, 1, 1], [], []>} : vector<128x384xbf16>, vector<384x128xbf16>, vector<128x128xf32> -> vector<128x128xf32>
    %c0_46 = arith.constant 0 : index
    %c1_47 = arith.constant 1 : index
    %c0_48 = arith.constant 0 : index
    %c0_49 = arith.constant 0 : index
    %85 = vector.load %arg15[%c0_46, %c1_47, %c0_48, %c0_49] : memref<2x10x8x384xbf16, #tpu.memory_space<vmem>>, vector<2x8x8x384xbf16>
    %86 = vector.shape_cast %85 : vector<2x8x8x384xbf16> to vector<128x384xbf16>
    %c1_50 = arith.constant 1 : index
    %c0_51 = arith.constant 0 : index
    %c0_52 = arith.constant 0 : index
    %87 = vector.load %arg8[%c1_50, %c0_51, %c0_52] : memref<3x384x128xbf16, #tpu.memory_space<vmem>>, vector<1x384x128xbf16>
    %88 = vector.shape_cast %87 : vector<1x384x128xbf16> to vector<384x128xbf16>
    %cst_53 = arith.constant dense<0.000000e+00> : vector<128x128xf32>
    %89 = tpu.matmul %86, %88, %cst_53 {dimension_numbers = #tpu.dot_dimension_numbers<[1], [0], [0], [1], [0, 0, 1, 1], [], []>} : vector<128x384xbf16>, vector<384x128xbf16>, vector<128x128xf32> -> vector<128x128xf32>
    %90 = arith.addf %84, %89 : vector<128x128xf32>
    %c0_54 = arith.constant 0 : index
    %c2 = arith.constant 2 : index
    %c0_55 = arith.constant 0 : index
    %c0_56 = arith.constant 0 : index
    %91 = vector.load %arg15[%c0_54, %c2, %c0_55, %c0_56] : memref<2x10x8x384xbf16, #tpu.memory_space<vmem>>, vector<2x8x8x384xbf16>
    %92 = vector.shape_cast %91 : vector<2x8x8x384xbf16> to vector<128x384xbf16>
    %c2_57 = arith.constant 2 : index
    %c0_58 = arith.constant 0 : index
    %c0_59 = arith.constant 0 : index
    %93 = vector.load %arg8[%c2_57, %c0_58, %c0_59] : memref<3x384x128xbf16, #tpu.memory_space<vmem>>, vector<1x384x128xbf16>
    %94 = vector.shape_cast %93 : vector<1x384x128xbf16> to vector<384x128xbf16>
    %cst_60 = arith.constant dense<0.000000e+00> : vector<128x128xf32>
    %95 = tpu.matmul %92, %94, %cst_60 {dimension_numbers = #tpu.dot_dimension_numbers<[1], [0], [0], [1], [0, 0, 1, 1], [], []>} : vector<128x384xbf16>, vector<384x128xbf16>, vector<128x128xf32> -> vector<128x128xf32>
    %96 = arith.addf %90, %95 : vector<128x128xf32>
    %c0_61 = arith.constant 0 : index
    %c0_62 = arith.constant 0 : index
    %97 = vector.load %arg9[%c0_61, %c0_62] : memref<1x128xf32, #tpu.memory_space<vmem>>, vector<1x128xf32>
    %98 = vector.broadcast %97 : vector<1x128xf32> to vector<128x128xf32>
    %99 = arith.addf %96, %98 : vector<128x128xf32>
    %100 = vector.shape_cast %99 : vector<128x128xf32> to vector<2x64x128xf32>
    %cst_63 = arith.constant dense<0.000000e+00> : vector<2x128xf32>
    %101 = vector.multi_reduction <add>, %100, %cst_63 [1] : vector<2x64x128xf32> to vector<2x128xf32>
    %c0_64 = arith.constant 0 : index
    %c0_65 = arith.constant 0 : index
    %102 = vector.load %arg3[%c0_64, %c0_65] : memref<128x128xf32, #tpu.memory_space<vmem>>, vector<128x128xf32>
    %cst_66 = arith.constant dense<0.000000e+00> : vector<2x128xf32>
    %103 = tpu.matmul %101, %102, %cst_66 {dimension_numbers = #tpu.dot_dimension_numbers<[1], [0], [0], [1], [0, 0, 1, 1], [], []>} : vector<2x128xf32>, vector<128x128xf32>, vector<2x128xf32> -> vector<2x128xf32>
    %cst_67 = arith.constant 7.812500e-03 : f32
    %104 = vector.broadcast %cst_67 : f32 to vector<2x128xf32>
    %105 = arith.mulf %103, %104 : vector<2x128xf32>
    %106 = vector.shape_cast %105 : vector<2x128xf32> to vector<2x1x128xf32>
    %107 = vector.broadcast %106 : vector<2x1x128xf32> to vector<2x64x128xf32>
    %108 = arith.subf %100, %107 : vector<2x64x128xf32>
    %109 = arith.mulf %108, %108 : vector<2x64x128xf32>
    %cst_68 = arith.constant dense<0.000000e+00> : vector<2x128xf32>
    %110 = vector.multi_reduction <add>, %109, %cst_68 [1] : vector<2x64x128xf32> to vector<2x128xf32>
    %c0_69 = arith.constant 0 : index
    %c0_70 = arith.constant 0 : index
    %111 = vector.load %arg3[%c0_69, %c0_70] : memref<128x128xf32, #tpu.memory_space<vmem>>, vector<128x128xf32>
    %cst_71 = arith.constant dense<0.000000e+00> : vector<2x128xf32>
    %112 = tpu.matmul %110, %111, %cst_71 {dimension_numbers = #tpu.dot_dimension_numbers<[1], [0], [0], [1], [0, 0, 1, 1], [], []>} : vector<2x128xf32>, vector<128x128xf32>, vector<2x128xf32> -> vector<2x128xf32>
    %cst_72 = arith.constant 7.812500e-03 : f32
    %113 = vector.broadcast %cst_72 : f32 to vector<2x128xf32>
    %114 = arith.mulf %112, %113 : vector<2x128xf32>
    %cst_73 = arith.constant 9.99999997E-7 : f32
    %115 = vector.broadcast %cst_73 : f32 to vector<2x128xf32>
    %116 = arith.addf %114, %115 : vector<2x128xf32>
    %117 = math.rsqrt %116 : vector<2x128xf32>
    %c0_74 = arith.constant 0 : index
    %c0_75 = arith.constant 0 : index
    %118 = vector.load %arg6[%c0_74, %c0_75] : memref<1x128xf32, #tpu.memory_space<vmem>>, vector<1x128xf32>
    %119 = vector.broadcast %118 : vector<1x128xf32> to vector<2x128xf32>
    %120 = arith.mulf %117, %119 : vector<2x128xf32>
    %121 = vector.shape_cast %120 : vector<2x128xf32> to vector<2x1x128xf32>
    %122 = vector.broadcast %121 : vector<2x1x128xf32> to vector<2x64x128xf32>
    %123 = arith.mulf %108, %122 : vector<2x64x128xf32>
    %c0_76 = arith.constant 0 : index
    %c0_77 = arith.constant 0 : index
    %124 = vector.load %arg7[%c0_76, %c0_77] : memref<1x128xf32, #tpu.memory_space<vmem>>, vector<1x128xf32>
    %125 = vector.shape_cast %124 : vector<1x128xf32> to vector<1x1x128xf32>
    %126 = vector.broadcast %125 : vector<1x1x128xf32> to vector<2x64x128xf32>
    %127 = arith.addf %123, %126 : vector<2x64x128xf32>
    %128 = vector.shape_cast %127 : vector<2x64x128xf32> to vector<128x128xf32>
    %129 = arith.negf %128 : vector<128x128xf32>
    %130 = math.exp %129 : vector<128x128xf32>
    %cst_78 = arith.constant 1.000000e+00 : f32
    %131 = vector.broadcast %cst_78 : f32 to vector<128x128xf32>
    %132 = arith.addf %131, %130 : vector<128x128xf32>
    %133 = arith.divf %131, %132 : vector<128x128xf32>
    %134 = arith.mulf %128, %133 : vector<128x128xf32>
    %135 = arith.truncf %134 : vector<128x128xf32> to vector<128x128xbf16>
    %c1_i32_79 = arith.constant 1 : i32
    %136 = tpu.dynamic_rotate %134 by %c1_i32_79 dim 0 : vector<128x128xf32>, i32 -> vector<128x128xf32>
    %137 = vector.broadcast %20 : vector<128x1xf32> to vector<128x128xf32>
    %138 = arith.mulf %136, %137 : vector<128x128xf32>
    %139 = arith.truncf %138 : vector<128x128xf32> to vector<128x128xbf16>
    %c127_i32_80 = arith.constant 127 : i32
    %140 = tpu.dynamic_rotate %134 by %c127_i32_80 dim 0 : vector<128x128xf32>, i32 -> vector<128x128xf32>
    %141 = vector.broadcast %24 : vector<128x1xf32> to vector<128x128xf32>
    %142 = arith.mulf %140, %141 : vector<128x128xf32>
    %143 = arith.truncf %142 : vector<128x128xf32> to vector<128x128xbf16>
    %144 = vector.shape_cast %139 : vector<128x128xbf16> to vector<2x8x8x128xbf16>
    %c0_81 = arith.constant 0 : index
    %c1_82 = arith.constant 1 : index
    %c0_83 = arith.constant 0 : index
    %c0_84 = arith.constant 0 : index
    %145 = vector.load %arg16[%c0_81, %c1_82, %c0_83, %c0_84] : memref<2x10x8x384xbf16, #tpu.memory_space<vmem>>, vector<2x8x8x128xbf16>
    tpu.vector_store %arg16[%c0_81, %c1_82, %c0_83, %c0_84], %144 {strides = array<i32>} : memref<2x10x8x384xbf16, #tpu.memory_space<vmem>>, vector<2x8x8x128xbf16>,
    %146 = vector.shape_cast %135 : vector<128x128xbf16> to vector<2x8x8x128xbf16>
    %c0_85 = arith.constant 0 : index
    %c1_86 = arith.constant 1 : index
    %c0_87 = arith.constant 0 : index
    %c128_88 = arith.constant 128 : index
    %147 = vector.load %arg16[%c0_85, %c1_86, %c0_87, %c128_88] : memref<2x10x8x384xbf16, #tpu.memory_space<vmem>>, vector<2x8x8x128xbf16>
    tpu.vector_store %arg16[%c0_85, %c1_86, %c0_87, %c128_88], %146 {strides = array<i32>} : memref<2x10x8x384xbf16, #tpu.memory_space<vmem>>, vector<2x8x8x128xbf16>,
    %148 = vector.shape_cast %143 : vector<128x128xbf16> to vector<2x8x8x128xbf16>
    %c0_89 = arith.constant 0 : index
    %c1_90 = arith.constant 1 : index
    %c0_91 = arith.constant 0 : index
    %c256_92 = arith.constant 256 : index
    %149 = vector.load %arg16[%c0_89, %c1_90, %c0_91, %c256_92] : memref<2x10x8x384xbf16, #tpu.memory_space<vmem>>, vector<2x8x8x128xbf16>
    tpu.vector_store %arg16[%c0_89, %c1_90, %c0_91, %c256_92], %148 {strides = array<i32>} : memref<2x10x8x384xbf16, #tpu.memory_space<vmem>>, vector<2x8x8x128xbf16>,
    %cst_93 = arith.constant 0.000000e+00 : bf16
    %150 = vector.broadcast %cst_93 : bf16 to vector<2x1x8x384xbf16>
    %c0_94 = arith.constant 0 : index
    %c0_95 = arith.constant 0 : index
    %c0_96 = arith.constant 0 : index
    %c0_97 = arith.constant 0 : index
    %151 = vector.load %arg16[%c0_94, %c0_95, %c0_96, %c0_97] : memref<2x10x8x384xbf16, #tpu.memory_space<vmem>>, vector<2x1x8x384xbf16>
    tpu.vector_store %arg16[%c0_94, %c0_95, %c0_96, %c0_97], %150 {strides = array<i32>} : memref<2x10x8x384xbf16, #tpu.memory_space<vmem>>, vector<2x1x8x384xbf16>,
    %c0_98 = arith.constant 0 : index
    %c9_99 = arith.constant 9 : index
    %c0_100 = arith.constant 0 : index
    %c0_101 = arith.constant 0 : index
    %152 = vector.load %arg16[%c0_98, %c9_99, %c0_100, %c0_101] : memref<2x10x8x384xbf16, #tpu.memory_space<vmem>>, vector<2x1x8x384xbf16>
    tpu.vector_store %arg16[%c0_98, %c9_99, %c0_100, %c0_101], %150 {strides = array<i32>} : memref<2x10x8x384xbf16, #tpu.memory_space<vmem>>, vector<2x1x8x384xbf16>,
    %c0_102 = arith.constant 0 : index
    %c0_103 = arith.constant 0 : index
    %c0_104 = arith.constant 0 : index
    %c0_105 = arith.constant 0 : index
    %153 = vector.load %arg16[%c0_102, %c0_103, %c0_104, %c0_105] : memref<2x10x8x384xbf16, #tpu.memory_space<vmem>>, vector<2x8x8x384xbf16>
    %154 = vector.shape_cast %153 : vector<2x8x8x384xbf16> to vector<128x384xbf16>
    %c0_106 = arith.constant 0 : index
    %c0_107 = arith.constant 0 : index
    %c0_108 = arith.constant 0 : index
    %155 = vector.load %arg10[%c0_106, %c0_107, %c0_108] : memref<3x384x128xbf16, #tpu.memory_space<vmem>>, vector<1x384x128xbf16>
    %156 = vector.shape_cast %155 : vector<1x384x128xbf16> to vector<384x128xbf16>
    %cst_109 = arith.constant dense<0.000000e+00> : vector<128x128xf32>
    %157 = tpu.matmul %154, %156, %cst_109 {dimension_numbers = #tpu.dot_dimension_numbers<[1], [0], [0], [1], [0, 0, 1, 1], [], []>} : vector<128x384xbf16>, vector<384x128xbf16>, vector<128x128xf32> -> vector<128x128xf32>
    %c0_110 = arith.constant 0 : index
    %c1_111 = arith.constant 1 : index
    %c0_112 = arith.constant 0 : index
    %c0_113 = arith.constant 0 : index
    %158 = vector.load %arg16[%c0_110, %c1_111, %c0_112, %c0_113] : memref<2x10x8x384xbf16, #tpu.memory_space<vmem>>, vector<2x8x8x384xbf16>
    %159 = vector.shape_cast %158 : vector<2x8x8x384xbf16> to vector<128x384xbf16>
    %c1_114 = arith.constant 1 : index
    %c0_115 = arith.constant 0 : index
    %c0_116 = arith.constant 0 : index
    %160 = vector.load %arg10[%c1_114, %c0_115, %c0_116] : memref<3x384x128xbf16, #tpu.memory_space<vmem>>, vector<1x384x128xbf16>
    %161 = vector.shape_cast %160 : vector<1x384x128xbf16> to vector<384x128xbf16>
    %cst_117 = arith.constant dense<0.000000e+00> : vector<128x128xf32>
    %162 = tpu.matmul %159, %161, %cst_117 {dimension_numbers = #tpu.dot_dimension_numbers<[1], [0], [0], [1], [0, 0, 1, 1], [], []>} : vector<128x384xbf16>, vector<384x128xbf16>, vector<128x128xf32> -> vector<128x128xf32>
    %163 = arith.addf %157, %162 : vector<128x128xf32>
    %c0_118 = arith.constant 0 : index
    %c2_119 = arith.constant 2 : index
    %c0_120 = arith.constant 0 : index
    %c0_121 = arith.constant 0 : index
    %164 = vector.load %arg16[%c0_118, %c2_119, %c0_120, %c0_121] : memref<2x10x8x384xbf16, #tpu.memory_space<vmem>>, vector<2x8x8x384xbf16>
    %165 = vector.shape_cast %164 : vector<2x8x8x384xbf16> to vector<128x384xbf16>
    %c2_122 = arith.constant 2 : index
    %c0_123 = arith.constant 0 : index
    %c0_124 = arith.constant 0 : index
    %166 = vector.load %arg10[%c2_122, %c0_123, %c0_124] : memref<3x384x128xbf16, #tpu.memory_space<vmem>>, vector<1x384x128xbf16>
    %167 = vector.shape_cast %166 : vector<1x384x128xbf16> to vector<384x128xbf16>
    %cst_125 = arith.constant dense<0.000000e+00> : vector<128x128xf32>
    %168 = tpu.matmul %165, %167, %cst_125 {dimension_numbers = #tpu.dot_dimension_numbers<[1], [0], [0], [1], [0, 0, 1, 1], [], []>} : vector<128x384xbf16>, vector<384x128xbf16>, vector<128x128xf32> -> vector<128x128xf32>
    %169 = arith.addf %163, %168 : vector<128x128xf32>
    %c0_126 = arith.constant 0 : index
    %c0_127 = arith.constant 0 : index
    %170 = vector.load %arg11[%c0_126, %c0_127] : memref<1x128xf32, #tpu.memory_space<vmem>>, vector<1x128xf32>
    %171 = vector.broadcast %170 : vector<1x128xf32> to vector<128x128xf32>
    %172 = arith.addf %169, %171 : vector<128x128xf32>
    %c0_128 = arith.constant 0 : index
    %c0_129 = arith.constant 0 : index
    %173 = vector.load %arg1[%c0_128, %c0_129] : memref<128x128xbf16, #tpu.memory_space<vmem>>, vector<128x128xbf16>
    %c0_130 = arith.constant 0 : index
    %c0_131 = arith.constant 0 : index
    %174 = vector.load %arg12[%c0_130, %c0_131] : memref<128x128xbf16, #tpu.memory_space<vmem>>, vector<128x128xbf16>
    %cst_132 = arith.constant dense<0.000000e+00> : vector<128x128xf32>
    %175 = tpu.matmul %173, %174, %cst_132 {dimension_numbers = #tpu.dot_dimension_numbers<[1], [0], [0], [1], [0, 0, 1, 1], [], []>} : vector<128x128xbf16>, vector<128x128xbf16>, vector<128x128xf32> -> vector<128x128xf32>
    %c0_133 = arith.constant 0 : index
    %c0_134 = arith.constant 0 : index
    %176 = vector.load %arg13[%c0_133, %c0_134] : memref<1x128xf32, #tpu.memory_space<vmem>>, vector<1x128xf32>
    %177 = vector.broadcast %176 : vector<1x128xf32> to vector<128x128xf32>
    %178 = arith.addf %175, %177 : vector<128x128xf32>
    %179 = arith.addf %178, %172 : vector<128x128xf32>
    %180 = arith.truncf %179 : vector<128x128xf32> to vector<128x128xbf16>
    %c0_135 = arith.constant 0 : index
    %c0_136 = arith.constant 0 : index
    %181 = vector.load %arg14[%c0_135, %c0_136] : memref<128x128xbf16, #tpu.memory_space<vmem>>, vector<128x128xbf16>
    tpu.vector_store %arg14[%c0_135, %c0_136], %180 {strides = array<i32>} : memref<128x128xbf16, #tpu.memory_space<vmem>>, vector<128x128xbf16>,
    return
  }
  func.func @transform_0(%arg0: i32) -> (i32, i32) {
    %c0_i32 = arith.constant 0 : i32
    %c0_i32_0 = arith.constant 0 : i32
    return %arg0, %c0_i32 : i32, i32
  }
  func.func @transform_1(%arg0: i32) -> (i32, i32) {
    %c0_i32 = arith.constant 0 : i32
    %c0_i32_0 = arith.constant 0 : i32
    %c0_i32_1 = arith.constant 0 : i32
    return %c0_i32, %c0_i32_0 : i32, i32
  }
  func.func @transform_2(%arg0: i32) -> (i32, i32) {
    %c0_i32 = arith.constant 0 : i32
    %c0_i32_0 = arith.constant 0 : i32
    %c0_i32_1 = arith.constant 0 : i32
    return %c0_i32, %c0_i32_0 : i32, i32
  }
  func.func @transform_3(%arg0: i32) -> (i32, i32) {
    %c0_i32 = arith.constant 0 : i32
    %c0_i32_0 = arith.constant 0 : i32
    %c0_i32_1 = arith.constant 0 : i32
    return %c0_i32, %c0_i32_0 : i32, i32
  }
  func.func @transform_4(%arg0: i32) -> (i32, i32) {
    %c0_i32 = arith.constant 0 : i32
    %c0_i32_0 = arith.constant 0 : i32
    %c0_i32_1 = arith.constant 0 : i32
    return %c0_i32, %c0_i32_0 : i32, i32
  }
  func.func @transform_5(%arg0: i32) -> (i32, i32) {
    %c0_i32 = arith.constant 0 : i32
    %c0_i32_0 = arith.constant 0 : i32
    %c0_i32_1 = arith.constant 0 : i32
    return %c0_i32, %c0_i32_0 : i32, i32
  }
  func.func @transform_6(%arg0: i32) -> (i32, i32) {
    %c0_i32 = arith.constant 0 : i32
    %c0_i32_0 = arith.constant 0 : i32
    %c0_i32_1 = arith.constant 0 : i32
    return %c0_i32, %c0_i32_0 : i32, i32
  }
  func.func @transform_7(%arg0: i32) -> (i32, i32, i32) {
    %c0_i32 = arith.constant 0 : i32
    %c0_i32_0 = arith.constant 0 : i32
    %c0_i32_1 = arith.constant 0 : i32
    %c0_i32_2 = arith.constant 0 : i32
    return %c0_i32, %c0_i32_0, %c0_i32_1 : i32, i32, i32
  }
  func.func @transform_8(%arg0: i32) -> (i32, i32) {
    %c0_i32 = arith.constant 0 : i32
    %c0_i32_0 = arith.constant 0 : i32
    %c0_i32_1 = arith.constant 0 : i32
    return %c0_i32, %c0_i32_0 : i32, i32
  }
  func.func @transform_9(%arg0: i32) -> (i32, i32, i32) {
    %c0_i32 = arith.constant 0 : i32
    %c0_i32_0 = arith.constant 0 : i32
    %c0_i32_1 = arith.constant 0 : i32
    %c0_i32_2 = arith.constant 0 : i32
    return %c0_i32, %c0_i32_0, %c0_i32_1 : i32, i32, i32
  }
  func.func @transform_10(%arg0: i32) -> (i32, i32) {
    %c0_i32 = arith.constant 0 : i32
    %c0_i32_0 = arith.constant 0 : i32
    %c0_i32_1 = arith.constant 0 : i32
    return %c0_i32, %c0_i32_0 : i32, i32
  }
  func.func @transform_11(%arg0: i32) -> (i32, i32) {
    %c0_i32 = arith.constant 0 : i32
    %c0_i32_0 = arith.constant 0 : i32
    %c0_i32_1 = arith.constant 0 : i32
    return %c0_i32, %c0_i32_0 : i32, i32
  }
  func.func @transform_12(%arg0: i32) -> (i32, i32) {
    %c0_i32 = arith.constant 0 : i32
    %c0_i32_0 = arith.constant 0 : i32
    %c0_i32_1 = arith.constant 0 : i32
    return %c0_i32, %c0_i32_0 : i32, i32
  }
  func.func @transform_13(%arg0: i32) -> (i32, i32) {
    %c0_i32 = arith.constant 0 : i32
    %c0_i32_0 = arith.constant 0 : i32
    return %arg0, %c0_i32 : i32, i32
  }
}

module attributes {stable_mosaic.version = 11 : i64} {
  func.func @resnet_block_kernel(%arg0: i32, %arg1: memref<128x128xbf16, #tpu.memory_space<vmem>>, %arg2: memref<128x128xf32, #tpu.memory_space<vmem>>, %arg3: memref<128x128xf32, #tpu.memory_space<vmem>>, %arg4: memref<1x128xf32, #tpu.memory_space<vmem>>, %arg5: memref<1x128xf32, #tpu.memory_space<vmem>>, %arg6: memref<1x128xf32, #tpu.memory_space<vmem>>, %arg7: memref<1x128xf32, #tpu.memory_space<vmem>>, %arg8: memref<3x384x128xbf16, #tpu.memory_space<vmem>>, %arg9: memref<1x128xf32, #tpu.memory_space<vmem>>, %arg10: memref<3x384x128xbf16, #tpu.memory_space<vmem>>, %arg11: memref<1x128xf32, #tpu.memory_space<vmem>>, %arg12: memref<128x128xbf16, #tpu.memory_space<vmem>>, %arg13: memref<1x128xf32, #tpu.memory_space<vmem>>, %arg14: memref<128x128xbf16, #tpu.memory_space<vmem>>, %arg15: memref<2x10x8x384xbf16, #tpu.memory_space<vmem>>, %arg16: memref<2x10x8x384xbf16, #tpu.memory_space<vmem>>) attributes {dimension_semantics = [#tpu.dimension_semantics<parallel>], iteration_bounds = array<i64: 2>, scalar_prefetch = 0 : i64, scratch_operands = 2 : i64, tpu.core_type = #tpu.core_type<tc>, window_params = [{transform_indices = @transform_0, window_bounds = array<i64: 128, 128>}, {pipeline_mode = #tpu.pipeline_mode<synchronous>, transform_indices = @transform_1, window_bounds = array<i64: 128, 128>}, {pipeline_mode = #tpu.pipeline_mode<synchronous>, transform_indices = @transform_2, window_bounds = array<i64: 128, 128>}, {pipeline_mode = #tpu.pipeline_mode<synchronous>, transform_indices = @transform_3, window_bounds = array<i64: 1, 128>}, {pipeline_mode = #tpu.pipeline_mode<synchronous>, transform_indices = @transform_4, window_bounds = array<i64: 1, 128>}, {pipeline_mode = #tpu.pipeline_mode<synchronous>, transform_indices = @transform_5, window_bounds = array<i64: 1, 128>}, {pipeline_mode = #tpu.pipeline_mode<synchronous>, transform_indices = @transform_6, window_bounds = array<i64: 1, 128>}, {pipeline_mode = #tpu.pipeline_mode<synchronous>, transform_indices = @transform_7, window_bounds = array<i64: 3, 384, 128>}, {pipeline_mode = #tpu.pipeline_mode<synchronous>, transform_indices = @transform_8, window_bounds = array<i64: 1, 128>}, {pipeline_mode = #tpu.pipeline_mode<synchronous>, transform_indices = @transform_9, window_bounds = array<i64: 3, 384, 128>}, {pipeline_mode = #tpu.pipeline_mode<synchronous>, transform_indices = @transform_10, window_bounds = array<i64: 1, 128>}, {pipeline_mode = #tpu.pipeline_mode<synchronous>, transform_indices = @transform_11, window_bounds = array<i64: 128, 128>}, {pipeline_mode = #tpu.pipeline_mode<synchronous>, transform_indices = @transform_12, window_bounds = array<i64: 1, 128>}, {transform_indices = @transform_13, window_bounds = array<i64: 128, 128>}]} {
    %0 = tpu.iota {dimensions = array<i32: 0>} : vector<128x1xi32>
    %c8_i32 = arith.constant 8 : i32
    %c0_i32 = arith.constant 0 : i32
    %1 = arith.cmpi eq, %c8_i32, %c0_i32 : i32
    %c1_i32 = arith.constant 1 : i32
    %2 = arith.select %1, %c1_i32, %c8_i32 : i32
    %3 = vector.broadcast %2 : i32 to vector<128x1xi32>
    %4 = arith.remsi %0, %3 : vector<128x1xi32>
    %c0_i32_0 = arith.constant 0 : i32
    %5 = vector.broadcast %c0_i32_0 : i32 to vector<128x1xi32>
    %6 = arith.cmpi ne, %4, %5 : vector<128x1xi32>
    %c0_i32_1 = arith.constant 0 : i32
    %7 = vector.broadcast %c0_i32_1 : i32 to vector<128x1xi32>
    %8 = arith.cmpi slt, %4, %7 : vector<128x1xi32>
    %c0_i32_2 = arith.constant 0 : i32
    %9 = arith.cmpi slt, %2, %c0_i32_2 : i32
    %10 = vector.broadcast %9 : i1 to vector<128x1xi1>
    %11 = vector.broadcast %10 : vector<128x1xi1> to vector<128x1xi1>
    %12 = arith.xori %8, %11 : vector<128x1xi1>
    %13 = arith.andi %12, %6 : vector<128x1xi1>
    %14 = vector.broadcast %2 : i32 to vector<128x1xi32>
    %15 = arith.addi %4, %14 : vector<128x1xi32>
    %16 = arith.select %13, %15, %4 : vector<128x1xi1>, vector<128x1xi32>
    %c0_i32_3 = arith.constant 0 : i32
    %17 = vector.broadcast %c0_i32_3 : i32 to vector<128x1xi32>
    %18 = arith.cmpi sgt, %16, %17 : vector<128x1xi32>
    %19 = arith.extui %18 : vector<128x1xi1> to vector<128x1xi32>
    %20 = arith.sitofp %19 : vector<128x1xi32> to vector<128x1xf32>
    %c7_i32 = arith.constant 7 : i32
    %21 = vector.broadcast %c7_i32 : i32 to vector<128x1xi32>
    %22 = arith.cmpi slt, %16, %21 : vector<128x1xi32>
    %23 = arith.extui %22 : vector<128x1xi1> to vector<128x1xi32>
    %24 = arith.sitofp %23 : vector<128x1xi32> to vector<128x1xf32>
    %c0 = arith.constant 0 : index
    %c0_4 = arith.constant 0 : index
    %25 = vector.load %arg1[%c0, %c0_4] : memref<128x128xbf16, #tpu.memory_space<vmem>>, vector<128x128xbf16>
    %26 = arith.extf %25 : vector<128x128xbf16> to vector<128x128xf32>
    %27 = vector.shape_cast %26 : vector<128x128xf32> to vector<2x64x128xf32>
    %cst = arith.constant dense<0.000000e+00> : vector<2x128xf32>
    %28 = vector.multi_reduction <add>, %27, %cst [1] : vector<2x64x128xf32> to vector<2x128xf32>
    %c0_5 = arith.constant 0 : index
    %c0_6 = arith.constant 0 : index
    %29 = vector.load %arg2[%c0_5, %c0_6] : memref<128x128xf32, #tpu.memory_space<vmem>>, vector<128x128xf32>
    %cst_7 = arith.constant dense<0.000000e+00> : vector<2x128xf32>
    %30 = tpu.matmul %28, %29, %cst_7 {dimension_numbers = #tpu.dot_dimension_numbers<[1], [0], [0], [1], [0, 0, 1, 1], [], []>} : vector<2x128xf32>, vector<128x128xf32>, vector<2x128xf32> -> vector<2x128xf32>
    %cst_8 = arith.constant 1.562500e-02 : f32
    %31 = vector.broadcast %cst_8 : f32 to vector<2x128xf32>
    %32 = arith.mulf %30, %31 : vector<2x128xf32>
    %33 = vector.shape_cast %32 : vector<2x128xf32> to vector<2x1x128xf32>
    %34 = vector.broadcast %33 : vector<2x1x128xf32> to vector<2x64x128xf32>
    %35 = arith.subf %27, %34 : vector<2x64x128xf32>
    %36 = arith.mulf %35, %35 : vector<2x64x128xf32>
    %cst_9 = arith.constant dense<0.000000e+00> : vector<2x128xf32>
    %37 = vector.multi_reduction <add>, %36, %cst_9 [1] : vector<2x64x128xf32> to vector<2x128xf32>
    %c0_10 = arith.constant 0 : index
    %c0_11 = arith.constant 0 : index
    %38 = vector.load %arg2[%c0_10, %c0_11] : memref<128x128xf32, #tpu.memory_space<vmem>>, vector<128x128xf32>
    %cst_12 = arith.constant dense<0.000000e+00> : vector<2x128xf32>
    %39 = tpu.matmul %37, %38, %cst_12 {dimension_numbers = #tpu.dot_dimension_numbers<[1], [0], [0], [1], [0, 0, 1, 1], [], []>} : vector<2x128xf32>, vector<128x128xf32>, vector<2x128xf32> -> vector<2x128xf32>
    %cst_13 = arith.constant 1.562500e-02 : f32
    %40 = vector.broadcast %cst_13 : f32 to vector<2x128xf32>
    %41 = arith.mulf %39, %40 : vector<2x128xf32>
    %cst_14 = arith.constant 9.99999997E-7 : f32
    %42 = vector.broadcast %cst_14 : f32 to vector<2x128xf32>
    %43 = arith.addf %41, %42 : vector<2x128xf32>
    %44 = math.rsqrt %43 : vector<2x128xf32>
    %c0_15 = arith.constant 0 : index
    %c0_16 = arith.constant 0 : index
    %45 = vector.load %arg4[%c0_15, %c0_16] : memref<1x128xf32, #tpu.memory_space<vmem>>, vector<1x128xf32>
    %46 = vector.broadcast %45 : vector<1x128xf32> to vector<2x128xf32>
    %47 = arith.mulf %44, %46 : vector<2x128xf32>
    %48 = vector.shape_cast %47 : vector<2x128xf32> to vector<2x1x128xf32>
    %49 = vector.broadcast %48 : vector<2x1x128xf32> to vector<2x64x128xf32>
    %50 = arith.mulf %35, %49 : vector<2x64x128xf32>
    %c0_17 = arith.constant 0 : index
    %c0_18 = arith.constant 0 : index
    %51 = vector.load %arg5[%c0_17, %c0_18] : memref<1x128xf32, #tpu.memory_space<vmem>>, vector<1x128xf32>
    %52 = vector.shape_cast %51 : vector<1x128xf32> to vector<1x1x128xf32>
    %53 = vector.broadcast %52 : vector<1x1x128xf32> to vector<2x64x128xf32>
    %54 = arith.addf %50, %53 : vector<2x64x128xf32>
    %55 = vector.shape_cast %54 : vector<2x64x128xf32> to vector<128x128xf32>
    %56 = arith.negf %55 : vector<128x128xf32>
    %57 = math.exp %56 : vector<128x128xf32>
    %cst_19 = arith.constant 1.000000e+00 : f32
    %58 = vector.broadcast %cst_19 : f32 to vector<128x128xf32>
    %59 = arith.addf %58, %57 : vector<128x128xf32>
    %60 = arith.divf %58, %59 : vector<128x128xf32>
    %61 = arith.mulf %55, %60 : vector<128x128xf32>
    %62 = arith.truncf %61 : vector<128x128xf32> to vector<128x128xbf16>
    %c1_i32_20 = arith.constant 1 : i32
    %63 = tpu.dynamic_rotate %61 by %c1_i32_20 dim 0 : vector<128x128xf32>, i32 -> vector<128x128xf32>
    %64 = vector.broadcast %20 : vector<128x1xf32> to vector<128x128xf32>
    %65 = arith.mulf %63, %64 : vector<128x128xf32>
    %66 = arith.truncf %65 : vector<128x128xf32> to vector<128x128xbf16>
    %c127_i32 = arith.constant 127 : i32
    %67 = tpu.dynamic_rotate %61 by %c127_i32 dim 0 : vector<128x128xf32>, i32 -> vector<128x128xf32>
    %68 = vector.broadcast %24 : vector<128x1xf32> to vector<128x128xf32>
    %69 = arith.mulf %67, %68 : vector<128x128xf32>
    %70 = arith.truncf %69 : vector<128x128xf32> to vector<128x128xbf16>
    %71 = vector.shape_cast %66 : vector<128x128xbf16> to vector<2x8x8x128xbf16>
    %c0_21 = arith.constant 0 : index
    %c1 = arith.constant 1 : index
    %c0_22 = arith.constant 0 : index
    %c0_23 = arith.constant 0 : index
    %72 = vector.load %arg15[%c0_21, %c1, %c0_22, %c0_23] : memref<2x10x8x384xbf16, #tpu.memory_space<vmem>>, vector<2x8x8x128xbf16>
    tpu.vector_store %arg15[%c0_21, %c1, %c0_22, %c0_23], %71 {strides = array<i32>} : memref<2x10x8x384xbf16, #tpu.memory_space<vmem>>, vector<2x8x8x128xbf16>,
    %73 = vector.shape_cast %62 : vector<128x128xbf16> to vector<2x8x8x128xbf16>
    %c0_24 = arith.constant 0 : index
    %c1_25 = arith.constant 1 : index
    %c0_26 = arith.constant 0 : index
    %c128 = arith.constant 128 : index
    %74 = vector.load %arg15[%c0_24, %c1_25, %c0_26, %c128] : memref<2x10x8x384xbf16, #tpu.memory_space<vmem>>, vector<2x8x8x128xbf16>
    tpu.vector_store %arg15[%c0_24, %c1_25, %c0_26, %c128], %73 {strides = array<i32>} : memref<2x10x8x384xbf16, #tpu.memory_space<vmem>>, vector<2x8x8x128xbf16>,
    %75 = vector.shape_cast %70 : vector<128x128xbf16> to vector<2x8x8x128xbf16>
    %c0_27 = arith.constant 0 : index
    %c1_28 = arith.constant 1 : index
    %c0_29 = arith.constant 0 : index
    %c256 = arith.constant 256 : index
    %76 = vector.load %arg15[%c0_27, %c1_28, %c0_29, %c256] : memref<2x10x8x384xbf16, #tpu.memory_space<vmem>>, vector<2x8x8x128xbf16>
    tpu.vector_store %arg15[%c0_27, %c1_28, %c0_29, %c256], %75 {strides = array<i32>} : memref<2x10x8x384xbf16, #tpu.memory_space<vmem>>, vector<2x8x8x128xbf16>,
    %cst_30 = arith.constant 0.000000e+00 : bf16
    %77 = vector.broadcast %cst_30 : bf16 to vector<2x1x8x384xbf16>
    %c0_31 = arith.constant 0 : index
    %c0_32 = arith.constant 0 : index
    %c0_33 = arith.constant 0 : index
    %c0_34 = arith.constant 0 : index
    %78 = vector.load %arg15[%c0_31, %c0_32, %c0_33, %c0_34] : memref<2x10x8x384xbf16, #tpu.memory_space<vmem>>, vector<2x1x8x384xbf16>
    tpu.vector_store %arg15[%c0_31, %c0_32, %c0_33, %c0_34], %77 {strides = array<i32>} : memref<2x10x8x384xbf16, #tpu.memory_space<vmem>>, vector<2x1x8x384xbf16>,
    %c0_35 = arith.constant 0 : index
    %c9 = arith.constant 9 : index
    %c0_36 = arith.constant 0 : index
    %c0_37 = arith.constant 0 : index
    %79 = vector.load %arg15[%c0_35, %c9, %c0_36, %c0_37] : memref<2x10x8x384xbf16, #tpu.memory_space<vmem>>, vector<2x1x8x384xbf16>
    tpu.vector_store %arg15[%c0_35, %c9, %c0_36, %c0_37], %77 {strides = array<i32>} : memref<2x10x8x384xbf16, #tpu.memory_space<vmem>>, vector<2x1x8x384xbf16>,
    %c0_38 = arith.constant 0 : index
    %c0_39 = arith.constant 0 : index
    %c0_40 = arith.constant 0 : index
    %c0_41 = arith.constant 0 : index
    %80 = vector.load %arg15[%c0_38, %c0_39, %c0_40, %c0_41] : memref<2x10x8x384xbf16, #tpu.memory_space<vmem>>, vector<2x8x8x384xbf16>
    %81 = vector.shape_cast %80 : vector<2x8x8x384xbf16> to vector<128x384xbf16>
    %c0_42 = arith.constant 0 : index
    %c0_43 = arith.constant 0 : index
    %c0_44 = arith.constant 0 : index
    %82 = vector.load %arg8[%c0_42, %c0_43, %c0_44] : memref<3x384x128xbf16, #tpu.memory_space<vmem>>, vector<1x384x128xbf16>
    %83 = vector.shape_cast %82 : vector<1x384x128xbf16> to vector<384x128xbf16>
    %cst_45 = arith.constant dense<0.000000e+00> : vector<128x128xf32>
    %84 = tpu.matmul %81, %83, %cst_45 {dimension_numbers = #tpu.dot_dimension_numbers<[1], [0], [0], [1], [0, 0, 1, 1], [], []>} : vector<128x384xbf16>, vector<384x128xbf16>, vector<128x128xf32> -> vector<128x128xf32>
    %c0_46 = arith.constant 0 : index
    %c1_47 = arith.constant 1 : index
    %c0_48 = arith.constant 0 : index
    %c0_49 = arith.constant 0 : index
    %85 = vector.load %arg15[%c0_46, %c1_47, %c0_48, %c0_49] : memref<2x10x8x384xbf16, #tpu.memory_space<vmem>>, vector<2x8x8x384xbf16>
    %86 = vector.shape_cast %85 : vector<2x8x8x384xbf16> to vector<128x384xbf16>
    %c1_50 = arith.constant 1 : index
    %c0_51 = arith.constant 0 : index
    %c0_52 = arith.constant 0 : index
    %87 = vector.load %arg8[%c1_50, %c0_51, %c0_52] : memref<3x384x128xbf16, #tpu.memory_space<vmem>>, vector<1x384x128xbf16>
    %88 = vector.shape_cast %87 : vector<1x384x128xbf16> to vector<384x128xbf16>
    %cst_53 = arith.constant dense<0.000000e+00> : vector<128x128xf32>
    %89 = tpu.matmul %86, %88, %cst_53 {dimension_numbers = #tpu.dot_dimension_numbers<[1], [0], [0], [1], [0, 0, 1, 1], [], []>} : vector<128x384xbf16>, vector<384x128xbf16>, vector<128x128xf32> -> vector<128x128xf32>
    %90 = arith.addf %84, %89 : vector<128x128xf32>
    %c0_54 = arith.constant 0 : index
    %c2 = arith.constant 2 : index
    %c0_55 = arith.constant 0 : index
    %c0_56 = arith.constant 0 : index
    %91 = vector.load %arg15[%c0_54, %c2, %c0_55, %c0_56] : memref<2x10x8x384xbf16, #tpu.memory_space<vmem>>, vector<2x8x8x384xbf16>
    %92 = vector.shape_cast %91 : vector<2x8x8x384xbf16> to vector<128x384xbf16>
    %c2_57 = arith.constant 2 : index
    %c0_58 = arith.constant 0 : index
    %c0_59 = arith.constant 0 : index
    %93 = vector.load %arg8[%c2_57, %c0_58, %c0_59] : memref<3x384x128xbf16, #tpu.memory_space<vmem>>, vector<1x384x128xbf16>
    %94 = vector.shape_cast %93 : vector<1x384x128xbf16> to vector<384x128xbf16>
    %cst_60 = arith.constant dense<0.000000e+00> : vector<128x128xf32>
    %95 = tpu.matmul %92, %94, %cst_60 {dimension_numbers = #tpu.dot_dimension_numbers<[1], [0], [0], [1], [0, 0, 1, 1], [], []>} : vector<128x384xbf16>, vector<384x128xbf16>, vector<128x128xf32> -> vector<128x128xf32>
    %96 = arith.addf %90, %95 : vector<128x128xf32>
    %c0_61 = arith.constant 0 : index
    %c0_62 = arith.constant 0 : index
    %97 = vector.load %arg9[%c0_61, %c0_62] : memref<1x128xf32, #tpu.memory_space<vmem>>, vector<1x128xf32>
    %98 = vector.broadcast %97 : vector<1x128xf32> to vector<128x128xf32>
    %99 = arith.addf %96, %98 : vector<128x128xf32>
    %100 = vector.shape_cast %99 : vector<128x128xf32> to vector<2x64x128xf32>
    %cst_63 = arith.constant dense<0.000000e+00> : vector<2x128xf32>
    %101 = vector.multi_reduction <add>, %100, %cst_63 [1] : vector<2x64x128xf32> to vector<2x128xf32>
    %c0_64 = arith.constant 0 : index
    %c0_65 = arith.constant 0 : index
    %102 = vector.load %arg3[%c0_64, %c0_65] : memref<128x128xf32, #tpu.memory_space<vmem>>, vector<128x128xf32>
    %cst_66 = arith.constant dense<0.000000e+00> : vector<2x128xf32>
    %103 = tpu.matmul %101, %102, %cst_66 {dimension_numbers = #tpu.dot_dimension_numbers<[1], [0], [0], [1], [0, 0, 1, 1], [], []>} : vector<2x128xf32>, vector<128x128xf32>, vector<2x128xf32> -> vector<2x128xf32>
    %cst_67 = arith.constant 7.812500e-03 : f32
    %104 = vector.broadcast %cst_67 : f32 to vector<2x128xf32>
    %105 = arith.mulf %103, %104 : vector<2x128xf32>
    %106 = vector.shape_cast %105 : vector<2x128xf32> to vector<2x1x128xf32>
    %107 = vector.broadcast %106 : vector<2x1x128xf32> to vector<2x64x128xf32>
    %108 = arith.subf %100, %107 : vector<2x64x128xf32>
    %109 = arith.mulf %108, %108 : vector<2x64x128xf32>
    %cst_68 = arith.constant dense<0.000000e+00> : vector<2x128xf32>
    %110 = vector.multi_reduction <add>, %109, %cst_68 [1] : vector<2x64x128xf32> to vector<2x128xf32>
    %c0_69 = arith.constant 0 : index
    %c0_70 = arith.constant 0 : index
    %111 = vector.load %arg3[%c0_69, %c0_70] : memref<128x128xf32, #tpu.memory_space<vmem>>, vector<128x128xf32>
    %cst_71 = arith.constant dense<0.000000e+00> : vector<2x128xf32>
    %112 = tpu.matmul %110, %111, %cst_71 {dimension_numbers = #tpu.dot_dimension_numbers<[1], [0], [0], [1], [0, 0, 1, 1], [], []>} : vector<2x128xf32>, vector<128x128xf32>, vector<2x128xf32> -> vector<2x128xf32>
    %cst_72 = arith.constant 7.812500e-03 : f32
    %113 = vector.broadcast %cst_72 : f32 to vector<2x128xf32>
    %114 = arith.mulf %112, %113 : vector<2x128xf32>
    %cst_73 = arith.constant 9.99999997E-7 : f32
    %115 = vector.broadcast %cst_73 : f32 to vector<2x128xf32>
    %116 = arith.addf %114, %115 : vector<2x128xf32>
    %117 = math.rsqrt %116 : vector<2x128xf32>
    %c0_74 = arith.constant 0 : index
    %c0_75 = arith.constant 0 : index
    %118 = vector.load %arg6[%c0_74, %c0_75] : memref<1x128xf32, #tpu.memory_space<vmem>>, vector<1x128xf32>
    %119 = vector.broadcast %118 : vector<1x128xf32> to vector<2x128xf32>
    %120 = arith.mulf %117, %119 : vector<2x128xf32>
    %121 = vector.shape_cast %120 : vector<2x128xf32> to vector<2x1x128xf32>
    %122 = vector.broadcast %121 : vector<2x1x128xf32> to vector<2x64x128xf32>
    %123 = arith.mulf %108, %122 : vector<2x64x128xf32>
    %c0_76 = arith.constant 0 : index
    %c0_77 = arith.constant 0 : index
    %124 = vector.load %arg7[%c0_76, %c0_77] : memref<1x128xf32, #tpu.memory_space<vmem>>, vector<1x128xf32>
    %125 = vector.shape_cast %124 : vector<1x128xf32> to vector<1x1x128xf32>
    %126 = vector.broadcast %125 : vector<1x1x128xf32> to vector<2x64x128xf32>
    %127 = arith.addf %123, %126 : vector<2x64x128xf32>
    %128 = vector.shape_cast %127 : vector<2x64x128xf32> to vector<128x128xf32>
    %129 = arith.negf %128 : vector<128x128xf32>
    %130 = math.exp %129 : vector<128x128xf32>
    %cst_78 = arith.constant 1.000000e+00 : f32
    %131 = vector.broadcast %cst_78 : f32 to vector<128x128xf32>
    %132 = arith.addf %131, %130 : vector<128x128xf32>
    %133 = arith.divf %131, %132 : vector<128x128xf32>
    %134 = arith.mulf %128, %133 : vector<128x128xf32>
    %135 = arith.truncf %134 : vector<128x128xf32> to vector<128x128xbf16>
    %c1_i32_79 = arith.constant 1 : i32
    %136 = tpu.dynamic_rotate %134 by %c1_i32_79 dim 0 : vector<128x128xf32>, i32 -> vector<128x128xf32>
    %137 = vector.broadcast %20 : vector<128x1xf32> to vector<128x128xf32>
    %138 = arith.mulf %136, %137 : vector<128x128xf32>
    %139 = arith.truncf %138 : vector<128x128xf32> to vector<128x128xbf16>
    %c127_i32_80 = arith.constant 127 : i32
    %140 = tpu.dynamic_rotate %134 by %c127_i32_80 dim 0 : vector<128x128xf32>, i32 -> vector<128x128xf32>
    %141 = vector.broadcast %24 : vector<128x1xf32> to vector<128x128xf32>
    %142 = arith.mulf %140, %141 : vector<128x128xf32>
    %143 = arith.truncf %142 : vector<128x128xf32> to vector<128x128xbf16>
    %144 = vector.shape_cast %139 : vector<128x128xbf16> to vector<2x8x8x128xbf16>
    %c0_81 = arith.constant 0 : index
    %c1_82 = arith.constant 1 : index
    %c0_83 = arith.constant 0 : index
    %c0_84 = arith.constant 0 : index
    %145 = vector.load %arg16[%c0_81, %c1_82, %c0_83, %c0_84] : memref<2x10x8x384xbf16, #tpu.memory_space<vmem>>, vector<2x8x8x128xbf16>
    tpu.vector_store %arg16[%c0_81, %c1_82, %c0_83, %c0_84], %144 {strides = array<i32>} : memref<2x10x8x384xbf16, #tpu.memory_space<vmem>>, vector<2x8x8x128xbf16>,
    %146 = vector.shape_cast %135 : vector<128x128xbf16> to vector<2x8x8x128xbf16>
    %c0_85 = arith.constant 0 : index
    %c1_86 = arith.constant 1 : index
    %c0_87 = arith.constant 0 : index
    %c128_88 = arith.constant 128 : index
    %147 = vector.load %arg16[%c0_85, %c1_86, %c0_87, %c128_88] : memref<2x10x8x384xbf16, #tpu.memory_space<vmem>>, vector<2x8x8x128xbf16>
    tpu.vector_store %arg16[%c0_85, %c1_86, %c0_87, %c128_88], %146 {strides = array<i32>} : memref<2x10x8x384xbf16, #tpu.memory_space<vmem>>, vector<2x8x8x128xbf16>,
    %148 = vector.shape_cast %143 : vector<128x128xbf16> to vector<2x8x8x128xbf16>
    %c0_89 = arith.constant 0 : index
    %c1_90 = arith.constant 1 : index
    %c0_91 = arith.constant 0 : index
    %c256_92 = arith.constant 256 : index
    %149 = vector.load %arg16[%c0_89, %c1_90, %c0_91, %c256_92] : memref<2x10x8x384xbf16, #tpu.memory_space<vmem>>, vector<2x8x8x128xbf16>
    tpu.vector_store %arg16[%c0_89, %c1_90, %c0_91, %c256_92], %148 {strides = array<i32>} : memref<2x10x8x384xbf16, #tpu.memory_space<vmem>>, vector<2x8x8x128xbf16>,
    %cst_93 = arith.constant 0.000000e+00 : bf16
    %150 = vector.broadcast %cst_93 : bf16 to vector<2x1x8x384xbf16>
    %c0_94 = arith.constant 0 : index
    %c0_95 = arith.constant 0 : index
    %c0_96 = arith.constant 0 : index
    %c0_97 = arith.constant 0 : index
    %151 = vector.load %arg16[%c0_94, %c0_95, %c0_96, %c0_97] : memref<2x10x8x384xbf16, #tpu.memory_space<vmem>>, vector<2x1x8x384xbf16>
    tpu.vector_store %arg16[%c0_94, %c0_95, %c0_96, %c0_97], %150 {strides = array<i32>} : memref<2x10x8x384xbf16, #tpu.memory_space<vmem>>, vector<2x1x8x384xbf16>,
    %c0_98 = arith.constant 0 : index
    %c9_99 = arith.constant 9 : index
    %c0_100 = arith.constant 0 : index
    %c0_101 = arith.constant 0 : index
    %152 = vector.load %arg16[%c0_98, %c9_99, %c0_100, %c0_101] : memref<2x10x8x384xbf16, #tpu.memory_space<vmem>>, vector<2x1x8x384xbf16>
    tpu.vector_store %arg16[%c0_98, %c9_99, %c0_100, %c0_101], %150 {strides = array<i32>} : memref<2x10x8x384xbf16, #tpu.memory_space<vmem>>, vector<2x1x8x384xbf16>,
    %c0_102 = arith.constant 0 : index
    %c0_103 = arith.constant 0 : index
    %c0_104 = arith.constant 0 : index
    %c0_105 = arith.constant 0 : index
    %153 = vector.load %arg16[%c0_102, %c0_103, %c0_104, %c0_105] : memref<2x10x8x384xbf16, #tpu.memory_space<vmem>>, vector<2x8x8x384xbf16>
    %154 = vector.shape_cast %153 : vector<2x8x8x384xbf16> to vector<128x384xbf16>
    %c0_106 = arith.constant 0 : index
    %c0_107 = arith.constant 0 : index
    %c0_108 = arith.constant 0 : index
    %155 = vector.load %arg10[%c0_106, %c0_107, %c0_108] : memref<3x384x128xbf16, #tpu.memory_space<vmem>>, vector<1x384x128xbf16>
    %156 = vector.shape_cast %155 : vector<1x384x128xbf16> to vector<384x128xbf16>
    %cst_109 = arith.constant dense<0.000000e+00> : vector<128x128xf32>
    %157 = tpu.matmul %154, %156, %cst_109 {dimension_numbers = #tpu.dot_dimension_numbers<[1], [0], [0], [1], [0, 0, 1, 1], [], []>} : vector<128x384xbf16>, vector<384x128xbf16>, vector<128x128xf32> -> vector<128x128xf32>
    %c0_110 = arith.constant 0 : index
    %c1_111 = arith.constant 1 : index
    %c0_112 = arith.constant 0 : index
    %c0_113 = arith.constant 0 : index
    %158 = vector.load %arg16[%c0_110, %c1_111, %c0_112, %c0_113] : memref<2x10x8x384xbf16, #tpu.memory_space<vmem>>, vector<2x8x8x384xbf16>
    %159 = vector.shape_cast %158 : vector<2x8x8x384xbf16> to vector<128x384xbf16>
    %c1_114 = arith.constant 1 : index
    %c0_115 = arith.constant 0 : index
    %c0_116 = arith.constant 0 : index
    %160 = vector.load %arg10[%c1_114, %c0_115, %c0_116] : memref<3x384x128xbf16, #tpu.memory_space<vmem>>, vector<1x384x128xbf16>
    %161 = vector.shape_cast %160 : vector<1x384x128xbf16> to vector<384x128xbf16>
    %cst_117 = arith.constant dense<0.000000e+00> : vector<128x128xf32>
    %162 = tpu.matmul %159, %161, %cst_117 {dimension_numbers = #tpu.dot_dimension_numbers<[1], [0], [0], [1], [0, 0, 1, 1], [], []>} : vector<128x384xbf16>, vector<384x128xbf16>, vector<128x128xf32> -> vector<128x128xf32>
    %163 = arith.addf %157, %162 : vector<128x128xf32>
    %c0_118 = arith.constant 0 : index
    %c2_119 = arith.constant 2 : index
    %c0_120 = arith.constant 0 : index
    %c0_121 = arith.constant 0 : index
    %164 = vector.load %arg16[%c0_118, %c2_119, %c0_120, %c0_121] : memref<2x10x8x384xbf16, #tpu.memory_space<vmem>>, vector<2x8x8x384xbf16>
    %165 = vector.shape_cast %164 : vector<2x8x8x384xbf16> to vector<128x384xbf16>
    %c2_122 = arith.constant 2 : index
    %c0_123 = arith.constant 0 : index
    %c0_124 = arith.constant 0 : index
    %166 = vector.load %arg10[%c2_122, %c0_123, %c0_124] : memref<3x384x128xbf16, #tpu.memory_space<vmem>>, vector<1x384x128xbf16>
    %167 = vector.shape_cast %166 : vector<1x384x128xbf16> to vector<384x128xbf16>
    %cst_125 = arith.constant dense<0.000000e+00> : vector<128x128xf32>
    %168 = tpu.matmul %165, %167, %cst_125 {dimension_numbers = #tpu.dot_dimension_numbers<[1], [0], [0], [1], [0, 0, 1, 1], [], []>} : vector<128x384xbf16>, vector<384x128xbf16>, vector<128x128xf32> -> vector<128x128xf32>
    %169 = arith.addf %163, %168 : vector<128x128xf32>
    %c0_126 = arith.constant 0 : index
    %c0_127 = arith.constant 0 : index
    %170 = vector.load %arg11[%c0_126, %c0_127] : memref<1x128xf32, #tpu.memory_space<vmem>>, vector<1x128xf32>
    %171 = vector.broadcast %170 : vector<1x128xf32> to vector<128x128xf32>
    %172 = arith.addf %169, %171 : vector<128x128xf32>
    %c0_128 = arith.constant 0 : index
    %c0_129 = arith.constant 0 : index
    %173 = vector.load %arg1[%c0_128, %c0_129] : memref<128x128xbf16, #tpu.memory_space<vmem>>, vector<128x128xbf16>
    %c0_130 = arith.constant 0 : index
    %c0_131 = arith.constant 0 : index
    %174 = vector.load %arg12[%c0_130, %c0_131] : memref<128x128xbf16, #tpu.memory_space<vmem>>, vector<128x128xbf16>
    %cst_132 = arith.constant dense<0.000000e+00> : vector<128x128xf32>
    %175 = tpu.matmul %173, %174, %cst_132 {dimension_numbers = #tpu.dot_dimension_numbers<[1], [0], [0], [1], [0, 0, 1, 1], [], []>} : vector<128x128xbf16>, vector<128x128xbf16>, vector<128x128xf32> -> vector<128x128xf32>
    %c0_133 = arith.constant 0 : index
    %c0_134 = arith.constant 0 : index
    %176 = vector.load %arg13[%c0_133, %c0_134] : memref<1x128xf32, #tpu.memory_space<vmem>>, vector<1x128xf32>
    %177 = vector.broadcast %176 : vector<1x128xf32> to vector<128x128xf32>
    %178 = arith.addf %175, %177 : vector<128x128xf32>
    %179 = arith.addf %178, %172 : vector<128x128xf32>
    %180 = arith.truncf %179 : vector<128x128xf32> to vector<128x128xbf16>
    %c0_135 = arith.constant 0 : index
    %c0_136 = arith.constant 0 : index
    %181 = vector.load %arg14[%c0_135, %c0_136] : memref<128x128xbf16, #tpu.memory_space<vmem>>, vector<128x128xbf16>
    tpu.vector_store %arg14[%c0_135, %c0_136], %180 {strides = array<i32>} : memref<128x128xbf16, #tpu.memory_space<vmem>>, vector<128x128xbf16>,
    return
  }
  func.func @transform_0(%arg0: i32) -> (i32, i32) {
    %c0_i32 = arith.constant 0 : i32
    %c0_i32_0 = arith.constant 0 : i32
    return %arg0, %c0_i32 : i32, i32
  }
  func.func @transform_1(%arg0: i32) -> (i32, i32) {
    %c0_i32 = arith.constant 0 : i32
    %c0_i32_0 = arith.constant 0 : i32
    %c0_i32_1 = arith.constant 0 : i32
    return %c0_i32, %c0_i32_0 : i32, i32
  }
  func.func @transform_2(%arg0: i32) -> (i32, i32) {
    %c0_i32 = arith.constant 0 : i32
    %c0_i32_0 = arith.constant 0 : i32
    %c0_i32_1 = arith.constant 0 : i32
    return %c0_i32, %c0_i32_0 : i32, i32
  }
  func.func @transform_3(%arg0: i32) -> (i32, i32) {
    %c0_i32 = arith.constant 0 : i32
    %c0_i32_0 = arith.constant 0 : i32
    %c0_i32_1 = arith.constant 0 : i32
    return %c0_i32, %c0_i32_0 : i32, i32
  }
  func.func @transform_4(%arg0: i32) -> (i32, i32) {
    %c0_i32 = arith.constant 0 : i32
    %c0_i32_0 = arith.constant 0 : i32
    %c0_i32_1 = arith.constant 0 : i32
    return %c0_i32, %c0_i32_0 : i32, i32
  }
  func.func @transform_5(%arg0: i32) -> (i32, i32) {
    %c0_i32 = arith.constant 0 : i32
    %c0_i32_0 = arith.constant 0 : i32
    %c0_i32_1 = arith.constant 0 : i32
    return %c0_i32, %c0_i32_0 : i32, i32
  }
  func.func @transform_6(%arg0: i32) -> (i32, i32) {
    %c0_i32 = arith.constant 0 : i32
    %c0_i32_0 = arith.constant 0 : i32
    %c0_i32_1 = arith.constant 0 : i32
    return %c0_i32, %c0_i32_0 : i32, i32
  }
  func.func @transform_7(%arg0: i32) -> (i32, i32, i32) {
    %c0_i32 = arith.constant 0 : i32
    %c0_i32_0 = arith.constant 0 : i32
    %c0_i32_1 = arith.constant 0 : i32
    %c0_i32_2 = arith.constant 0 : i32
    return %c0_i32, %c0_i32_0, %c0_i32_1 : i32, i32, i32
  }
  func.func @transform_8(%arg0: i32) -> (i32, i32) {
    %c0_i32 = arith.constant 0 : i32
    %c0_i32_0 = arith.constant 0 : i32
    %c0_i32_1 = arith.constant 0 : i32
    return %c0_i32, %c0_i32_0 : i32, i32
  }
  func.func @transform_9(%arg0: i32) -> (i32, i32, i32) {
    %c0_i32 = arith.constant 0 : i32
    %c0_i32_0 = arith.constant 0 : i32
    %c0_i32_1 = arith.constant 0 : i32
    %c0_i32_2 = arith.constant 0 : i32
    return %c0_i32, %c0_i32_0, %c0_i32_1 : i32, i32, i32
  }
  func.func @transform_10(%arg0: i32) -> (i32, i32) {
    %c0_i32 = arith.constant 0 : i32
    %c0_i32_0 = arith.constant 0 : i32
    %c0_i32_1 = arith.constant 0 : i32
    return %c0_i32, %c0_i32_0 : i32, i32
  }
  func.func @transform_11(%arg0: i32) -> (i32, i32) {
    %c0_i32 = arith.constant 0 : i32
    %c0_i32_0 = arith.constant 0 : i32
    %c0_i32_1 = arith.constant 0 : i32
    return %c0_i32, %c0_i32_0 : i32, i32
  }
  func.func @transform_12(%arg0: i32) -> (i32, i32) {
    %c0_i32 = arith.constant 0 : i32
    %c0_i32_0 = arith.constant 0 : i32
    %c0_i32_1 = arith.constant 0 : i32
    return %c0_i32, %c0_i32_0 : i32, i32
  }
  func.func @transform_13(%arg0: i32) -> (i32, i32) {
    %c0_i32 = arith.constant 0 : i32
    %c0_i32_0 = arith.constant 0 : i32
    return %arg0, %c0_i32 : i32, i32
  }
}

</mosaic_0001>

<bundles_post_ra>
// kernel: tpu_custom_call.1
= control target key start
LH: loop header
LB: loop body
LE: loop exit
PB: predicated region body
PF: predicated region fallthrough
CT: control target
= control target key end

     0   :  { %s11847_s0 = inlined_call_operand.hbm [shape: bf16[256,128], index: 0, kind: input, shape index: {}]   ;;  %s11848_s1 = inlined_call_operand.hbm [shape: f32[128,128], index: 1, kind: input, shape index: {}]   ;;  %s11849_s2 = inlined_call_operand.hbm [shape: f32[128,128], index: 2, kind: input, shape index: {}]   ;;  %s11850_s3 = inlined_call_operand.hbm [shape: f32[1,128], index: 3, kind: input, shape index: {}]   ;;  %s11851_s4 = inlined_call_operand.hbm [shape: f32[1,128], index: 4, kind: input, shape index: {}]   ;;  %s11852_s5 = inlined_call_operand.hbm [shape: f32[1,128], index: 5, kind: input, shape index: {}]   ;;  %s11853_s6 = inlined_call_operand.hbm [shape: f32[1,128], index: 6, kind: input, shape index: {}]   ;;  %s11854_s7 = inlined_call_operand.hbm [shape: bf16[3,384,128], index: 7, kind: input, shape index: {}]   ;;  %s11855_s8 = inlined_call_operand.hbm [shape: f32[1,128], index: 8, kind: input, shape index: {}]   ;;  %s11856_s9 = inlined_call_operand.hbm [shape: bf16[3,384,128], index: 9, kind: input, shape index: {}]   ;;  %s11857_s10 = inlined_call_operand.hbm [shape: f32[1,128], index: 10, kind: input, shape index: {}]   ;;  %s11858_s11 = inlined_call_operand.hbm [shape: bf16[128,128], index: 11, kind: input, shape index: {}]   ;;  %s11859_s12 = inlined_call_operand.hbm [shape: f32[1,128], index: 12, kind: input, shape index: {}]   ;;  %s11860_s13 = inlined_call_operand.hbm [shape: bf16[256,128], index: 13, kind: output, shape index: {}]  }
   0x1   :  { %11904 = sst [smem:[#allocation56_spill]] %s11847_s0 }
   0x2   :  { %11905 = sst [smem:[#allocation57_spill]] %s11848_s1 }
   0x3   :  { %11906 = sst [smem:[#allocation58_spill]] %s11849_s2 }
   0x4   :  { %11907 = sst [smem:[#allocation59_spill]] %s11860_s13 }
   0x5   :  { %18 = vsyncpa [#allocation5], 0 }
   0x6   :  { %20 = vsyncpa [#allocation5 + $0x1], 0 }
   0x7   :  { %21 = vsyncpa [#allocation8], 0 }
   0x8   :  { %22 = vsyncpa [#allocation11], 0 }
   0x9   :  { %23 = vsyncpa [#allocation14], 0 }
   0xa   :  { %24 = vsyncpa [#allocation17], 0 }
   0xb   :  { %25 = vsyncpa [#allocation20], 0 }
   0xc   :  { %26 = vsyncpa [#allocation23], 0 }
   0xd   :  { %27 = vsyncpa [#allocation6], 0 }
   0xe   :  { %29 = vsyncpa [#allocation6 + $0x1], 0  ;;  %s9577_s25 = smov 0   ;;  %s9579_s26 = smov 0  }
   0xf   :  { %s9581_s27 = smov 0   ;;  %s9583_s28 = smov 0  }
  0x10 LB: > { %11908 = sst [smem:[#allocation34_spill]] %s9468_s25  ;;  %s9482_s29 = smov [#allocation7]   ;;  %s9480_s28 = sphi %s9583_s28, %s12040_s28   ;;  %s9476_s27 = sphi %s9581_s27, %s12039_s27   ;;  %s9472_s26 = sphi %s9579_s26, %s12038_s26   ;;  %s9468_s25 = sphi %s9577_s25, %s12037_s25  }
  0x11   : > { %s356_s30 = sshll.u32 %s9482_s29, 4  ;;  %s9598_s14 = sadd.s32 4294967295, %s9480_s28   ;;  %s9603_s30 = int_to_ptr.vmem [resolvable:$true] %s356_s30 }
  0x12   : > { %11909 = sst [smem:[#allocation35_spill]] %s9598_s14  ;;  %p6498_p0 = scmp.ge.s32.totalorder %s9480_s28, 1 }
  0x13   : > { %p11867_p1 = scmp.eq.s32.totalorder %s9598_s14, 0  ;;  %p344_p2 = scmp.lt.s32.totalorder %s9480_s28, 3 }
  0x14   : > { %s9483_s16 = smov [#allocation10]   ;;  %s9484_s19 = smov [#allocation13]  }
  0x15   : > { %p9605_p3 = pnand %p6498_p0, %p344_p2  ;;  %s383_s17 = sshll.u32 %s9483_s16, 4  ;;  %s9618_s17 = int_to_ptr.vmem [resolvable:$true] %s383_s17 }
  0x16   : > { %s405_s20 = sshll.u32 %s9484_s19, 4  ;;  %s11913_s1 = sld [smem:[#allocation57_spill]]  ;;  %s9620_s20 = int_to_ptr.vmem [resolvable:$true] %s405_s20 }
  0x17   : > { %s11910_s15 = scalar_select %p9605_p3, 1, 0 }
  0x18   : > { %p8522_p5 = pneg %p9605_p3 }
  0x19   : > { %11911 = sst [smem:[#allocation36_spill]] %s11910_s15 }
  0x1a   : > { %p9614_p6 = pnand %p8522_p5, %p11867_p1 }
  0x1c   : > { %s9024_s23 = scalar_lea.hbm %s11913_s1, 2048  ;;  %p9630_p8 = pneg %p9614_p6 }
  0x1d   : > { %p9025_p7 = scmp.ne.s32.totalorder %s11913_s1, %s9024_s23  ;;  %p9031_p11 = scmp.lt.u32.totalorder %s9024_s23, %s11913_s1 }
  0x1f   : > { %p9027_p9 = pnand %p9630_p8, %p9025_p7 }
  0x21   : > { %p9028_p10 = pneg %p9027_p9 }
  0x23   : > { %p9033_p12 = pnand %p9031_p11, %p9028_p10 }
  0x25   : > { %9036 = shalt.err (!%p9033_p12)
}
  0x26   : > { %s9037_s21 = scalar_lea.vmem %s9603_s30, 2048  ;;  %p9045_p5 = scmp.lt.s32.totalorder %s9603_s30, %s9603_s30 }
  0x27   : > { %p9038_p13 = scmp.ne.s32.totalorder %s9603_s30, %s9037_s21  ;;  %p9046_p4 = scmp.lt.s32.totalorder %s9037_s21, %s9037_s21 }
  0x29   : > { %p9040_p0 = pnand %p9038_p13, %p9630_p8  ;;  %p9047_p7 = por %p9046_p4, %p9045_p5 }
  0x2b   : > { %p9041_p2 = pneg %p9040_p0 }
  0x2d   : > { %p9048_p9 = pnand %p9047_p7, %p9041_p2 }
  0x2f   : > { %9051 = shalt.err (!%p9048_p9)
}
  0x30   : > { %s11869_s22 = smov 128   ;;  %s11870_s13 = smov 8  }
  0x31   : > { %8525 = dma.hbm_to_vmem [thread:$0]  (!%p9614_p6), %s11913_s1, 2048, %s9603_s30, [#allocation8], %s11869_s22, %s11869_s22, %s11870_s13  }
  0x32   : > { %s9052_s21 = scalar_lea.hbm %s11850_s3, 16 }
  0x33   : > { %p9053_p4 = scmp.ne.s32.totalorder %s11850_s3, %s9052_s21  ;;  %p9059_p12 = scmp.lt.u32.totalorder %s9052_s21, %s11850_s3 }
  0x35   : > { %p9055_p10 = pnand %p9053_p4, %p9630_p8 }
  0x37   : > { %p9056_p11 = pneg %p9055_p10 }
  0x39   : > { %p9061_p13 = pnand %p9059_p12, %p9056_p11 }
  0x3b   : > { %9064 = shalt.err (!%p9061_p13)
}
  0x3c   : > { %s9065_s30 = scalar_lea.vmem %s9618_s17, 16  ;;  %s9072_s0 = scalar_lea.vmem %s9618_s17, 32 }
  0x3d   : > { %p9066_p0 = scmp.ne.s32.totalorder %s9618_s17, %s9065_s30  ;;  %p9073_p7 = scmp.lt.s32.totalorder %s9618_s17, %s9618_s17 }
  0x3e   : > { %p9074_p9 = scmp.lt.s32.totalorder %s9072_s0, %s9065_s30 }
  0x3f   : > { %p9068_p2 = pnand %p9066_p0, %p9630_p8 }
  0x40   : > { %p9075_p4 = por %p9074_p9, %p9073_p7 }
  0x41   : > { %p9069_p5 = pneg %p9068_p2 }
  0x43   : > { %p9076_p10 = pnand %p9075_p4, %p9069_p5 }
  0x45   : > { %9079 = shalt.err (!%p9076_p10)
}
  0x46   : > { %8531 = dma.hbm_to_vmem [thread:$0]  (!%p9614_p6), %s11850_s3, 16, %s9618_s17, [#allocation11]  }
  0x47   : > { %s9080_s24 = scalar_lea.hbm %s11852_s5, 16 }
  0x48   : > { %p9081_p11 = scmp.ne.s32.totalorder %s11852_s5, %s9080_s24  ;;  %p9087_p0 = scmp.lt.u32.totalorder %s9080_s24, %s11852_s5 }
  0x4a   : > { %p9083_p12 = pnand %p9081_p11, %p9630_p8 }
  0x4c   : > { %p9084_p13 = pneg %p9083_p12 }
  0x4e   : > { %p9089_p2 = pnand %p9087_p0, %p9084_p13 }
  0x50   : > { %9092 = shalt.err (!%p9089_p2)
}
  0x51   : > { %s9093_s17 = scalar_lea.vmem %s9620_s20, 16  ;;  %s9100_s0 = scalar_lea.vmem %s9620_s20, 32 }
  0x52   : > { %p9094_p5 = scmp.ne.s32.totalorder %s9620_s20, %s9093_s17  ;;  %p9101_p4 = scmp.lt.s32.totalorder %s9620_s20, %s9620_s20 }
  0x53   : > { %p9102_p10 = scmp.lt.s32.totalorder %s9100_s0, %s9093_s17 }
  0x54   : > { %p9096_p7 = pnand %p9094_p5, %p9630_p8 }
  0x55   : > { %p9103_p11 = por %p9102_p10, %p9101_p4 }
  0x56   : > { %p9097_p9 = pneg %p9096_p7 }
  0x58   : > { %p9104_p12 = pnand %p9103_p11, %p9097_p9 }
  0x5a   : > { %9107 = shalt.err (!%p9104_p12)
}
  0x5b   : > { %8537 = dma.hbm_to_vmem [thread:$0]  (!%p9614_p6), %s11852_s5, 16, %s9620_s20, [#allocation14]  }
  0x5c   : > { %s9487_s15 = smov [#allocation16]   ;;  %s9108_s19 = scalar_lea.hbm %s11854_s7, 9216 }
  0x5d   : > { %s426_s23 = sshll.u32 %s9487_s15, 4  ;;  %p9109_p13 = scmp.ne.s32.totalorder %s11854_s7, %s9108_s19  ;;  %s427_s23 = int_to_ptr.vmem [resolvable:$true] %s426_s23 }
  0x5e   : > { %p9115_p5 = scmp.lt.u32.totalorder %s9108_s19, %s11854_s7 }
  0x5f   : > { %p9111_p0 = pnand %p9109_p13, %p9630_p8 }
  0x61   : > { %p9112_p2 = pneg %p9111_p0 }
  0x63   : > { %p9117_p7 = pnand %p9115_p5, %p9112_p2 }
  0x65   : > { %9120 = shalt.err (!%p9117_p7)
}
  0x66   : > { %s9121_s20 = scalar_lea.vmem %s427_s23, 9216  ;;  %p9129_p11 = scmp.lt.s32.totalorder %s427_s23, %s427_s23 }
  0x67   : > { %p9122_p9 = scmp.ne.s32.totalorder %s427_s23, %s9121_s20  ;;  %p9130_p12 = scmp.lt.s32.totalorder %s9121_s20, %s9121_s20 }
  0x69   : > { %p9124_p4 = pnand %p9122_p9, %p9630_p8  ;;  %p9131_p1 = por %p9130_p12, %p9129_p11 }
  0x6b   : > { %p9125_p10 = pneg %p9124_p4 }
  0x6d   : > { %p9132_p3 = pnand %p9131_p1, %p9125_p10 }
  0x6f   : > { %9135 = shalt.err (!%p9132_p3)
}
  0x70   : > { %s11871_s25 = smov 64   ;;  %s11872_s14 = smov 4  }
  0x71   : > { %8543 = dma.hbm_to_vmem [thread:$0]  (!%p9614_p6), %s11854_s7, 9216, %s427_s23, [#allocation17], %s11871_s25, %s11871_s25, %s11872_s14  }
  0x72   : > { %s9490_s29 = smov [#allocation19]   ;;  %s9491_s21 = smov [#allocation22]  }
  0x73   : > { %s450_s19 = sshll.u32 %s9490_s29, 4  ;;  %s474_s30 = sshll.u32 %s9491_s21, 4  ;;  %s451_s19 = int_to_ptr.vmem [resolvable:$true] %s450_s19  ;;  %s9723_s30 = int_to_ptr.vmem [resolvable:$true] %s474_s30 }
  0x74   : > { %s9136_s20 = scalar_lea.hbm %s11856_s9, 9216 }
  0x75   : > { %p9137_p1 = scmp.ne.s32.totalorder %s11856_s9, %s9136_s20  ;;  %p9143_p0 = scmp.lt.u32.totalorder %s9136_s20, %s11856_s9 }
  0x77   : > { %p9139_p3 = pnand %p9137_p1, %p9630_p8 }
  0x79   : > { %p9140_p13 = pneg %p9139_p3 }
  0x7b   : > { %p9145_p2 = pnand %p9143_p0, %p9140_p13 }
  0x7d   : > { %9148 = shalt.err (!%p9145_p2)
}
  0x7e   : > { %s9149_s24 = scalar_lea.vmem %s451_s19, 9216  ;;  %p9157_p4 = scmp.lt.s32.totalorder %s451_s19, %s451_s19 }
  0x7f   : > { %p9150_p5 = scmp.ne.s32.totalorder %s451_s19, %s9149_s24  ;;  %p9158_p10 = scmp.lt.s32.totalorder %s9149_s24, %s9149_s24 }
  0x81   : > { %p9152_p7 = pnand %p9150_p5, %p9630_p8  ;;  %p9159_p11 = por %p9158_p10, %p9157_p4 }
  0x83   : > { %p9153_p9 = pneg %p9152_p7 }
  0x85   : > { %p9160_p12 = pnand %p9159_p11, %p9153_p9 }
  0x87   : > { %9163 = shalt.err (!%p9160_p12)
}
  0x88   : > { %8549 = dma.hbm_to_vmem [thread:$0]  (!%p9614_p6), %s11856_s9, 9216, %s451_s19, [#allocation20], %s11871_s25, %s11871_s25, %s11872_s14  }
  0x89   : > { %s9164_s17 = scalar_lea.hbm %s11858_s11, 1024 }
  0x8a   : > { %p9165_p1 = scmp.ne.s32.totalorder %s11858_s11, %s9164_s17  ;;  %p9171_p0 = scmp.lt.u32.totalorder %s9164_s17, %s11858_s11 }
  0x8c   : > { %p9167_p3 = pnand %p9165_p1, %p9630_p8 }
  0x8e   : > { %p9168_p13 = pneg %p9167_p3 }
  0x90   : > { %p9173_p2 = pnand %p9171_p0, %p9168_p13 }
  0x92   : > { %9176 = shalt.err (!%p9173_p2)
}
  0x93   : > { %s9177_s19 = scalar_lea.vmem %s9723_s30, 1024  ;;  %p9185_p4 = scmp.lt.s32.totalorder %s9723_s30, %s9723_s30 }
  0x94   : > { %p9178_p5 = scmp.ne.s32.totalorder %s9723_s30, %s9177_s19  ;;  %p9186_p10 = scmp.lt.s32.totalorder %s9177_s19, %s9177_s19 }
  0x96   : > { %p9180_p7 = pnand %p9178_p5, %p9630_p8  ;;  %p9187_p11 = por %p9186_p10, %p9185_p4 }
  0x98   : > { %p9181_p9 = pneg %p9180_p7 }
  0x9a   : > { %p9188_p12 = pnand %p9187_p11, %p9181_p9 }
  0x9c   : > { %9191 = shalt.err (!%p9188_p12)
}
  0x9d   : > { %8555 = dma.hbm_to_vmem [thread:$0]  (!%p9614_p6), %s11858_s11, 1024, %s9723_s30, [#allocation23], %s11871_s25, %s11871_s25, %s11872_s14  }
  0x9e   : > { %s9492_s13 = smov [#allocation9]   ;;  %s9493_s21 = smov [#allocation12]  }
  0x9f   : > { %s369_s29 = sshll.u32 %s9492_s13, 4  ;;  %s394_s17 = sshll.u32 %s9493_s21, 4  ;;  %s370_s29 = int_to_ptr.vmem [resolvable:$true] %s369_s29  ;;  %s9772_s17 = int_to_ptr.vmem [resolvable:$true] %s394_s17 }
  0xa0   : > { %s11915_s2 = sld [smem:[#allocation58_spill]] }
  0xa6   : > { %s9192_s15 = scalar_lea.hbm %s11915_s2, 2048 }
  0xa7   : > { %p9193_p1 = scmp.ne.s32.totalorder %s11915_s2, %s9192_s15  ;;  %p9199_p0 = scmp.lt.u32.totalorder %s9192_s15, %s11915_s2 }
  0xa9   : > { %p9195_p3 = pnand %p9193_p1, %p9630_p8 }
  0xab   : > { %p9196_p13 = pneg %p9195_p3 }
  0xad   : > { %p9201_p2 = pnand %p9199_p0, %p9196_p13 }
  0xaf   : > { %9204 = shalt.err (!%p9201_p2)
}
  0xb0   : > { %s9205_s22 = scalar_lea.vmem %s370_s29, 2048  ;;  %p9213_p4 = scmp.lt.s32.totalorder %s370_s29, %s370_s29 }
  0xb1   : > { %p9206_p5 = scmp.ne.s32.totalorder %s370_s29, %s9205_s22  ;;  %p9214_p10 = scmp.lt.s32.totalorder %s9205_s22, %s9205_s22 }
  0xb3   : > { %p9208_p7 = pnand %p9206_p5, %p9630_p8  ;;  %p9215_p11 = por %p9214_p10, %p9213_p4 }
  0xb5   : > { %p9209_p9 = pneg %p9208_p7 }
  0xb7   : > { %p9216_p12 = pnand %p9215_p11, %p9209_p9 }
  0xb9   : > { %9219 = shalt.err (!%p9216_p12)
}
  0xba   : > { %s11916_s13 = smov 8   ;;  %s11917_s21 = smov 128  }
  0xbb   : > { %8528 = dma.hbm_to_vmem [thread:$0]  (!%p9614_p6), %s11915_s2, 2048, %s370_s29, [#allocation8], %s11917_s21, %s11917_s21, %s11916_s13  }
  0xbc   : > { %s9220_s19 = scalar_lea.hbm %s11851_s4, 16 }
  0xbd   : > { %p9221_p1 = scmp.ne.s32.totalorder %s11851_s4, %s9220_s19  ;;  %p9227_p0 = scmp.lt.u32.totalorder %s9220_s19, %s11851_s4 }
  0xbf   : > { %p9223_p3 = pnand %p9221_p1, %p9630_p8 }
  0xc1   : > { %p9224_p13 = pneg %p9223_p3 }
  0xc3   : > { %p9229_p2 = pnand %p9227_p0, %p9224_p13 }
  0xc5   : > { %9232 = shalt.err (!%p9229_p2)
}
  0xc6   : > { %s9233_s29 = scalar_lea.vmem %s9772_s17, 16  ;;  %s9240_s13 = scalar_lea.vmem %s9772_s17, 32 }
  0xc7   : > { %p9234_p5 = scmp.ne.s32.totalorder %s9772_s17, %s9233_s29  ;;  %p9241_p4 = scmp.lt.s32.totalorder %s9772_s17, %s9772_s17 }
  0xc8   : > { %p9242_p10 = scmp.lt.s32.totalorder %s9240_s13, %s9233_s29 }
  0xc9   : > { %p9236_p7 = pnand %p9234_p5, %p9630_p8 }
  0xca   : > { %p9243_p11 = por %p9242_p10, %p9241_p4 }
  0xcb   : > { %p9237_p9 = pneg %p9236_p7 }
  0xcd   : > { %p9244_p12 = pnand %p9243_p11, %p9237_p9 }
  0xcf   : > { %9247 = shalt.err (!%p9244_p12)
}
  0xd0   : > { %8534 = dma.hbm_to_vmem [thread:$0]  (!%p9614_p6), %s11851_s4, 16, %s9772_s17, [#allocation11]  }
  0xd1   : > { %s9494_s0 = smov [#allocation15]   ;;  %s9495_s15 = smov [#allocation18]  }
  0xd2   : > { %s416_s20 = sshll.u32 %s9494_s0, 4  ;;  %s440_s23 = sshll.u32 %s9495_s15, 4  ;;  %s417_s20 = int_to_ptr.vmem [resolvable:$true] %s416_s20  ;;  %s9819_s23 = int_to_ptr.vmem [resolvable:$true] %s440_s23 }
  0xd3   : > { %s9248_s30 = scalar_lea.hbm %s11853_s6, 16 }
  0xd4   : > { %p9249_p1 = scmp.ne.s32.totalorder %s11853_s6, %s9248_s30  ;;  %p9255_p0 = scmp.lt.u32.totalorder %s9248_s30, %s11853_s6 }
  0xd6   : > { %p9251_p3 = pnand %p9249_p1, %p9630_p8 }
  0xd8   : > { %p9252_p13 = pneg %p9251_p3 }
  0xda   : > { %p9257_p2 = pnand %p9255_p0, %p9252_p13 }
  0xdc   : > { %9260 = shalt.err (!%p9257_p2)
}
  0xdd   : > { %s9261_s25 = scalar_lea.vmem %s417_s20, 16  ;;  %s9268_s21 = scalar_lea.vmem %s417_s20, 32 }
  0xde   : > { %p9262_p5 = scmp.ne.s32.totalorder %s417_s20, %s9261_s25  ;;  %p9269_p4 = scmp.lt.s32.totalorder %s417_s20, %s417_s20 }
  0xdf   : > { %p9270_p10 = scmp.lt.s32.totalorder %s9268_s21, %s9261_s25 }
  0xe0   : > { %p9264_p7 = pnand %p9262_p5, %p9630_p8 }
  0xe1   : > { %p9271_p11 = por %p9270_p10, %p9269_p4 }
  0xe2   : > { %p9265_p9 = pneg %p9264_p7 }
  0xe4   : > { %p9272_p12 = pnand %p9271_p11, %p9265_p9 }
  0xe6   : > { %9275 = shalt.err (!%p9272_p12)
}
  0xe7   : > { %8540 = dma.hbm_to_vmem [thread:$0]  (!%p9614_p6), %s11853_s6, 16, %s417_s20, [#allocation14]  }
  0xe8   : > { %s9276_s30 = scalar_lea.hbm %s11855_s8, 16 }
  0xe9   : > { %p9277_p1 = scmp.ne.s32.totalorder %s11855_s8, %s9276_s30  ;;  %p9283_p0 = scmp.lt.u32.totalorder %s9276_s30, %s11855_s8 }
  0xeb   : > { %p9279_p3 = pnand %p9277_p1, %p9630_p8 }
  0xed   : > { %p9280_p13 = pneg %p9279_p3 }
  0xef   : > { %p9285_p2 = pnand %p9283_p0, %p9280_p13 }
  0xf1   : > { %9288 = shalt.err (!%p9285_p2)
}
  0xf2   : > { %s9289_s20 = scalar_lea.vmem %s9819_s23, 16  ;;  %s9296_s25 = scalar_lea.vmem %s9819_s23, 32 }
  0xf3   : > { %p9290_p5 = scmp.ne.s32.totalorder %s9819_s23, %s9289_s20  ;;  %p9297_p4 = scmp.lt.s32.totalorder %s9819_s23, %s9819_s23 }
  0xf4   : > { %p9298_p10 = scmp.lt.s32.totalorder %s9296_s25, %s9289_s20 }
  0xf5   : > { %p9292_p7 = pnand %p9290_p5, %p9630_p8 }
  0xf6   : > { %p9299_p11 = por %p9298_p10, %p9297_p4 }
  0xf7   : > { %p9293_p9 = pneg %p9292_p7 }
  0xf9   : > { %p9300_p12 = pnand %p9299_p11, %p9293_p9 }
  0xfb   : > { %9303 = shalt.err (!%p9300_p12)
}
  0xfc   : > { %8546 = dma.hbm_to_vmem [thread:$0]  (!%p9614_p6), %s11855_s8, 16, %s9819_s23, [#allocation17]  }
  0xfd   : > { %s9496_s15 = smov [#allocation21]   ;;  %s9497_s24 = smov [#allocation24]  }
  0xfe   : > { %s464_s19 = sshll.u32 %s9496_s15, 4  ;;  %s488_s30 = sshll.u32 %s9497_s24, 4  ;;  %s465_s19 = int_to_ptr.vmem [resolvable:$true] %s464_s19  ;;  %s9863_s30 = int_to_ptr.vmem [resolvable:$true] %s488_s30 }
  0xff   : > { %s9304_s13 = scalar_lea.hbm %s11857_s10, 16 }
 0x100   : > { %p9305_p1 = scmp.ne.s32.totalorder %s11857_s10, %s9304_s13  ;;  %p9311_p0 = scmp.lt.u32.totalorder %s9304_s13, %s11857_s10 }
 0x102   : > { %p9307_p3 = pnand %p9305_p1, %p9630_p8 }
 0x104   : > { %p9308_p13 = pneg %p9307_p3 }
 0x106   : > { %p9313_p2 = pnand %p9311_p0, %p9308_p13 }
 0x108   : > { %9316 = shalt.err (!%p9313_p2)
}
 0x109   : > { %s9317_s21 = scalar_lea.vmem %s465_s19, 16  ;;  %s9324_s0 = scalar_lea.vmem %s465_s19, 32 }
 0x10a   : > { %p9318_p5 = scmp.ne.s32.totalorder %s465_s19, %s9317_s21  ;;  %p9325_p4 = scmp.lt.s32.totalorder %s465_s19, %s465_s19 }
 0x10b   : > { %p9326_p10 = scmp.lt.s32.totalorder %s9324_s0, %s9317_s21 }
 0x10c   : > { %p9320_p7 = pnand %p9318_p5, %p9630_p8 }
 0x10d   : > { %p9327_p11 = por %p9326_p10, %p9325_p4 }
 0x10e   : > { %p9321_p9 = pneg %p9320_p7 }
 0x110   : > { %p9328_p12 = pnand %p9327_p11, %p9321_p9 }
 0x112   : > { %9331 = shalt.err (!%p9328_p12)
}
 0x113   : > { %8552 = dma.hbm_to_vmem [thread:$0]  (!%p9614_p6), %s11857_s10, 16, %s465_s19, [#allocation20]  }
 0x114   : > { %s9332_s13 = scalar_lea.hbm %s11859_s12, 16 }
 0x115   : > { %p9333_p1 = scmp.ne.s32.totalorder %s11859_s12, %s9332_s13  ;;  %p9339_p0 = scmp.lt.u32.totalorder %s9332_s13, %s11859_s12 }
 0x117   : > { %p9335_p3 = pnand %p9333_p1, %p9630_p8 }
 0x119   : > { %p9336_p13 = pneg %p9335_p3 }
 0x11b   : > { %p9341_p2 = pnand %p9339_p0, %p9336_p13 }
 0x11d   : > { %9344 = shalt.err (!%p9341_p2)
}
 0x11e   : > { %s9345_s19 = scalar_lea.vmem %s9863_s30, 16  ;;  %s9352_s21 = scalar_lea.vmem %s9863_s30, 32 }
 0x11f   : > { %p9346_p5 = scmp.ne.s32.totalorder %s9863_s30, %s9345_s19  ;;  %p9353_p4 = scmp.lt.s32.totalorder %s9863_s30, %s9863_s30 }
 0x120   : > { %p9354_p10 = scmp.lt.s32.totalorder %s9352_s21, %s9345_s19 }
 0x121   : > { %p9348_p7 = pnand %p9346_p5, %p9630_p8 }
 0x122   : > { %p9355_p11 = por %p9354_p10, %p9353_p4 }
 0x123   : > { %p9349_p9 = pneg %p9348_p7 }
 0x125   : > { %p9356_p12 = pnand %p9355_p11, %p9349_p9 }
 0x127   : > { %9359 = shalt.err (!%p9356_p12)
}
 0x128   : > { %s11918_s16 = sld [smem:[#allocation34_spill]]  ;;  %s11919_s24 = sld [smem:[#allocation35_spill]] }
 0x129   : > { %8558 = dma.hbm_to_vmem [thread:$0]  (!%p9614_p6), %s11859_s12, 16, %s9863_s30, [#allocation23]  }
 0x12a   : > { %s6497_s18 = sadd.s32 4294967294, %s9480_s28   ;;  %s9909_s22 = sadd.s32 1, %s9480_s28  }
 0x12b   : > { %s39_s29 = ssub.s32 %s9480_s28, %s9909_s22  ;;  %s42_s13 = sadd.s32 1, %s9476_s27 }
 0x12c   : > { %p40_p8 = scmp.eq.s32.totalorder %s39_s29, 0  ;;  %p49_p1 = scmp.ne.s32.totalorder %s9476_s27, %s9472_s26 }
 0x12d   : > { %p50_p3 = scmp.eq.s32.totalorder %s9480_s28, 0  ;;  %p337_p7 = scmp.eq.s32.totalorder %s6497_s18, 1 }
 0x12e   : > { %p55_p13 = scmp.ne.s32.totalorder %s9472_s26, %s11918_s16  ;;  %p11921_p2 = scmp.eq.s32.totalorder %s11919_s24, 0 }
 0x12f   : > { %s9920_s17 = scalar_select %p40_p8, %s9476_s27, %s42_s13  }
 0x130   : > { %p9922_p0 = por %p50_p3, %p49_p1  ;;  %p9928_p6 = por %p11921_p2, %p55_p13 }
 0x131   : > { %p331_p5 = scmp.eq.s32.totalorder %s11919_s24, 1  ;;  %p8579_p9 = scmp.lt.s32.totalorder %s9480_s28, 2 }
 0x132   : > { %s499_s25 = sand.u32 1, %s9476_s27   ;;  %p9939_p10 = por %p337_p7, %p55_p13 }
 0x133   : > { %p9935_p4 = por %p331_p5, %p49_p1  ;;  %s6512_s21 = sshll.u32 %s499_s25, 6 }
 0x134   : > { %s11924_s19 = scalar_select %p9939_p10, 1, 0 }
 0x135   : > { %s11923_s23 = scalar_select %p9935_p4, 1, 0 }
 0x136   : > { %s7022_s0 = sshll.u32 %s9480_s28, 10  ;;  %s11925_s29 = sld [smem:[#allocation56_spill]] }
 0x137   : > { %s503_s24 = scalar_lea.vmem [#allocation4], %s6512_s21  ;;  %p9953_p11 = pnand %p8579_p9, %p9922_p0 }
 0x138   : > { %s510_s18 = sshll.u32 %s503_s24, 4  ;;  %s9957_s1 = scalar_lea.sflag [#allocation5], %s499_s25  ;;  %s9949_s18 = int_to_ptr.vmem [resolvable:$true] %s510_s18 }
 0x139   : > { %p9362_p8 = pneg %p9953_p11 }
 0x13c   : > { %s9947_s13 = scalar_lea.hbm %s11925_s29, %s7022_s0  ;;  %s9365_s20 = scalar_lea.hbm %s11925_s29, 2048 }
 0x13d   : > { %s9360_s15 = scalar_lea.hbm %s9947_s13, 1024  ;;  %p9366_p13 = scmp.lt.u32.totalorder %s9947_s13, %s11925_s29 }
 0x13e   : > { %p9361_p12 = scmp.ne.s32.totalorder %s9947_s13, %s9360_s15  ;;  %p9367_p0 = scmp.lt.u32.totalorder %s9365_s20, %s9360_s15 }
 0x13f   : > { %p9369_p5 = scmp.lt.u32.totalorder %s9360_s15, %s9947_s13 }
 0x140   : > { %p9363_p1 = pnand %p9362_p8, %p9361_p12  ;;  %p9368_p2 = por %p9367_p0, %p9366_p13 }
 0x142   : > { %p9364_p3 = pneg %p9363_p1  ;;  %p9370_p7 = por %p9369_p5, %p9368_p2 }
 0x144   : > { %p9371_p9 = pnand %p9370_p7, %p9364_p3 }
 0x146   : > { %9374 = shalt.err (!%p9371_p9)
}
 0x147   : > { %s9375_s25 = scalar_lea.vmem %s9949_s18, 1024  ;;  %s9498_s21 = smov [#allocation4]  }
 0x148   : > { %p9376_p12 = scmp.ne.s32.totalorder %s9949_s18, %s9375_s25  ;;  %s9380_s0 = sshll.u32 %s9498_s21, 4  ;;  %s9381_s0 = int_to_ptr.vmem [resolvable:$false] %s9380_s0 }
 0x149   : > { %s9382_s16 = scalar_lea.vmem %s9381_s0, 2048  ;;  %p9383_p4 = scmp.lt.s32.totalorder %s9949_s18, %s9381_s0 }
 0x14a   : > { %p9378_p1 = pnand %p9376_p12, %p9362_p8  ;;  %p9384_p13 = scmp.lt.s32.totalorder %s9382_s16, %s9375_s25 }
 0x14c   : > { %p9379_p10 = pneg %p9378_p1  ;;  %p9385_p0 = por %p9384_p13, %p9383_p4 }
 0x14e   : > { %p9386_p2 = pnand %p9385_p0, %p9379_p10 }
 0x150   : > { %9389 = shalt.err (!%p9386_p2)
}
 0x151   : > { %s11927_s15 = smov 4   ;;  %s11928_s20 = smov 64  }
 0x152   : > { %8562 = dma.hbm_to_vmem [thread:$0]  (!%p9953_p11), %s9947_s13, 1024, %s9949_s18, %s9957_s1, %s11928_s20, %s11928_s20, %s11927_s15  }
 0x153   : > { %s11929_s24 = sld [smem:[#allocation36_spill]] }
 0x159   : > { %p11930_p8 = scmp.ne.s32.totalorder %s11929_s24, 0 }
 0x15b   : > { %522 = sbr.rel (%p11930_p8) target bundleno = 2339 (0x923), region = 72 }
 0x162   : > { %s9991_s21 = sand.u32 1, %s9472_s26  }
 0x163   : > { %s6516_s25 = sshll.u32 %s9991_s21, 6  ;;  %s525_s0 = scalar_lea.sflag [#allocation5], %s9991_s21 }
 0x164   : > { %s9997_s14 = scalar_lea.vmem [#allocation4], %s6516_s25 }
 0x165   : > { %9435 = dma.done.wait (%p9928_p6), %s525_s0, 1024  }
 0x166   : > { %9437 = vsyncadd (%p9928_p6), %s525_s0, 4294966272  ;;  %s11931_s1 = sld [smem:[#allocation35_spill]] }
 0x16c   : > { %p11932_p4 = scmp.eq.s32.totalorder %s11931_s1, 0 }
 0x16e   : > { %9439 = dma.done.wait (%p11932_p4), [#allocation8], 4096   ;;  %p11933_p10 = pmov %p11932_p4 }
 0x16f   : > { %p11934_p11 = pmov %p11932_p4 }
 0x170   : > { %9441 = vsyncadd (%p11933_p10), [#allocation8], 4294963200 }
 0x171   : > { %9443 = dma.done.wait (%p11934_p11), [#allocation11], 32   ;;  %p11935_p3 = pmov %p11932_p4 }
 0x173   : > { %9445 = vsyncadd (%p11935_p3), [#allocation11], 4294967264  ;;  %p11936_p5 = pmov %p11935_p3 }
 0x174   : > { %p11937_p7 = pmov %p11935_p3 }
 0x175   : > { %9447 = dma.done.wait (%p11936_p5), [#allocation14], 32  }
 0x176   : > { %9449 = vsyncadd (%p11937_p7), [#allocation14], 4294967264  ;;  %p11938_p6 = pmov %p11935_p3 }
 0x177   : > { %p11939_p9 = pmov %p11935_p3 }
 0x178   : > { %9451 = dma.done.wait (%p11938_p6), [#allocation17], 9232  }
 0x179   : > { %9453 = vsyncadd (%p11939_p9), [#allocation17], 4294958064  ;;  %p11940_p12 = pmov %p11935_p3 }
 0x17a   : > { %p11941_p1 = pmov %p11935_p3 }
 0x17b   : > { %9455 = dma.done.wait (%p11940_p12), [#allocation20], 9232  }
 0x17c   : > { %9457 = vsyncadd (%p11941_p1), [#allocation20], 4294958064  ;;  %p11942_p13 = pmov %p11941_p1 }
 0x17d   : > { %p11943_p0 = pmov %p11941_p1 }
 0x17e   : > { %9459 = dma.done.wait (%p11942_p13), [#allocation23], 1040  }
 0x17f   : > { %9461 = vsyncadd (%p11943_p0), [#allocation23], 4294966256  ;;  %v11874_v0 = vmov 0.0|0.0   ;;  %vm9500_vm0 = vmmov 0   ;;  %v11878_v1 = vmov 0.0   ;;  %v985_v2 = vld [vmem:[#allocation7] sm:$0xff] }
 0x180   : > { %8150 = vmatprep.subr.bf16.mxu1 %v11874_v0  ;;  %7818 = vmatprep.mubr.msk.f32.mxu1 %vm9500_vm0, %v11878_v1  ;;  %v986_v3 = vld [vmem:[#allocation7 + $0x8] sm:$0xff]  ;;  %v987_v4 = vld [vmem:[#allocation7 + $0x10] sm:$0xff]  ;;  %v988_v6 = vld [vmem:[#allocation7 + $0x18] sm:$0xff]  ;;  %vm1003_vm1 = vcmask 1041409   ;;  %s11756_s30 = scalar_lea.vmem [#allocation25], %s6516_s25  ;;  %s7135_s18 = sshll.u32 %s11931_s1, 10 }
 0x181   : > { %v10030_v5 = vpack.c.bf16 %v986_v3, %v985_v2  ;;  %v10033_v7 = vpack.c.bf16 %v988_v6, %v987_v4  ;;  %v989_v8 = vld [vmem:[#allocation7 + $0x20] sm:$0xff]  ;;  %v990_v9 = vld [vmem:[#allocation7 + $0x28] sm:$0xff]  ;;  %v991_v12 = vld [vmem:[#allocation7 + $0x30] sm:$0xff]  ;;  %s6310_s13 = sshll.u32 %s11756_s30, 4  ;;  %s12032_s20 = sld [smem:[#allocation59_spill]]  ;;  %s11796_s13 = int_to_ptr.vmem [resolvable:$true] %s6310_s13 }
 0x182   : > { %v10037_v10 = vld [vmem:[%s9997_s14] sm:$0xff]   ;;  %v10040_v11 = vld [vmem:[%s9997_s14 + $0x8] sm:$0xff]   ;;  %v992_v13 = vld [vmem:[#allocation7 + $0x38] sm:$0xff]  ;;  %v10048_v17 = vpack.c.bf16 %v990_v9, %v989_v8  ;;  %s6297_s25 = scalar_lea.sflag [#allocation6], %s9991_s21  ;;  %s9390_s0 = scalar_lea.vmem %s11796_s13, 1024 }
 0x183   : > { %8152 = vmatpush3.bf16.msra.mxu1 %v10030_v5  ;;  %v7138_v14 = vunpack.c.l.bf16 %v10037_v10  ;;  %v7139_v15 = vunpack.c.h.bf16 %v10037_v10  ;;  %v10045_v16 = vld [vmem:[%s9997_s14 + $0x20] sm:$0xff]   ;;  %v10051_v18 = vld [vmem:[%s9997_s14 + $0x10] sm:$0xff]   ;;  %v10054_v19 = vld [vmem:[%s9997_s14 + $0x28] sm:$0xff]   ;;  %v7142_v21 = vunpack.c.l.bf16 %v10040_v11  ;;  %v7143_v27 = vunpack.c.h.bf16 %v10040_v11  ;;  %p9391_p2 = scmp.ne.s32.totalorder %s11796_s13, %s9390_s0  ;;  %p12033_p8 = scmp.ne.s32.totalorder %s11923_s23, 0 }
 0x184   : > { %8153 = vmatprep.subr.bf16.mxu1 %v11874_v0  ;;  %v10057_v20 = vld [vmem:[%s9997_s14 + $0x30] sm:$0xff]   ;;  %v7154_v22 = vunpack.c.l.bf16 %v10045_v16  ;;  %v7155_v23 = vunpack.c.h.bf16 %v10045_v16  ;;  %v7158_v24 = vunpack.c.l.bf16 %v10054_v19  ;;  %v993_v25 = vld [vmem:[#allocation7 + $0x40] sm:$0xff]  ;;  %v994_v26 = vld [vmem:[#allocation7 + $0x48] sm:$0xff]  ;;  %v7159_v28 = vunpack.c.h.bf16 %v10054_v19 }
 0x185   : > { %v959_v29 = vadd.f32 %v7139_v15, %v7138_v14  ;;  %v10075_v31 = vpack.c.bf16 %v992_v13, %v991_v12  ;;  %v10078_v32 = vld [vmem:[%s9997_s14 + $0x18] sm:$0xff]   ;;  %v7146_v34 = vunpack.c.l.bf16 %v10051_v18  ;;  %v7162_v35 = vunpack.c.l.bf16 %v10057_v20  ;;  %v995_v38 = vld [vmem:[#allocation7 + $0x50] sm:$0xff]  ;;  %v997_v49 = vld [vmem:[#allocation7 + $0x60] sm:$0xff]  ;;  %p9392_p4 = pnand %p9391_p2, %p12033_p8 }
 0x186   : > { %v972_v30 = vadd.f32 %v7155_v23, %v7154_v22  ;;  %v10081_v33 = vld [vmem:[%s9997_s14 + $0x38] sm:$0xff]   ;;  %v7147_v40 = vunpack.c.h.bf16 %v10051_v18  ;;  %v7163_v41 = vunpack.c.h.bf16 %v10057_v20  ;;  %v8163_v44 = vpack.c.bf16 %v994_v26, %v993_v25  ;;  %v998_v50 = vld [vmem:[#allocation7 + $0x68] sm:$0xff]  ;;  %v999_v58 = vld [vmem:[#allocation7 + $0x70] sm:$0xff] }
 0x187   : > { %8155 = vmatpush3.bf16.msra.mxu1 %v10033_v7  ;;  %v960_v36 = vadd.f32 %v7142_v21, %v959_v29  ;;  %v996_v39 = vld [vmem:[#allocation7 + $0x58] sm:$0xff]  ;;  %v7150_v45 = vunpack.c.l.bf16 %v10078_v32  ;;  %v7166_v46 = vunpack.c.l.bf16 %v10081_v33  ;;  %v7151_v51 = vunpack.c.h.bf16 %v10078_v32  ;;  %s11801_s24 = scalar_lea.hbm %s12032_s20, %s7135_s18  ;;  %p9393_p10 = pneg %p9392_p4 }
 0x188   : > { %8156 = vmatprep.subr.bf16.mxu1 %v11874_v0  ;;  %v973_v37 = vadd.f32 %v7158_v24, %v972_v30  ;;  %v7167_v52 = vunpack.c.h.bf16 %v10081_v33  ;;  %v8166_v55 = vpack.c.bf16 %v996_v39, %v995_v38  ;;  %v1000_v59 = vld [vmem:[#allocation7 + $0x78] sm:$0xff]  ;;  %v8169_v62 = vpack.c.bf16 %v998_v50, %v997_v49 }
 0x189   : > { %v961_v42 = vadd.f32 %v7143_v27, %v960_v36  ;;  %v8172_v6 = vpack.c.bf16 %v1000_v59, %v999_v58 }
 0x18a   : > { %v974_v43 = vadd.f32 %v7159_v28, %v973_v37 }
 0x18b   : > { %8158 = vmatpush3.bf16.msra.mxu1 %v10048_v17  ;;  %v962_v47 = vadd.f32 %v7146_v34, %v961_v42 }
 0x18c   : > { %8159 = vmatprep.subr.bf16.mxu1 %v11874_v0  ;;  %v975_v48 = vadd.f32 %v7162_v35, %v974_v43 }
 0x18d   : > { %v963_v53 = vadd.f32 %v7147_v40, %v962_v47 }
 0x18e   : > { %v976_v54 = vadd.f32 %v7163_v41, %v975_v48 }
 0x18f   : > { %8161 = vmatpush3.bf16.msra.mxu1 %v10075_v31  ;;  %v964_v56 = vadd.f32 %v7150_v45, %v963_v53 }
 0x190   : > { %8162 = vmatprep.subr.bf16.mxu1 %v11874_v0  ;;  %v977_v57 = vadd.f32 %v7166_v46, %v976_v54 }
 0x191   : > { %v965_v60 = vadd.f32 %v7151_v51, %v964_v56 }
 0x192   : > { %v978_v61 = vadd.f32 %v7167_v52, %v977_v57 }
 0x193   : > { %8164 = vmatpush3.bf16.msra.mxu1 %v8163_v44  ;;  %v966_v63 = vrot.slane %v965_v60, 4 }
 0x194   : > { %8165 = vmatprep.subr.bf16.mxu1 %v11874_v0  ;;  %v979_v2 = vrot.slane %v978_v61, 4 }
 0x195   : > { %v967_v3 = vadd.f32 %v966_v63, %v965_v60 }
 0x196   : > { %v980_v4 = vadd.f32 %v979_v2, %v978_v61 }
 0x197   : > { %8167 = vmatpush3.bf16.msra.mxu1 %v8166_v55  ;;  %v968_v8 = vrot.slane %v967_v3, 2 }
 0x198   : > { %8168 = vmatprep.subr.bf16.mxu1 %v11874_v0  ;;  %v981_v9 = vrot.slane %v980_v4, 2 }
 0x199   : > { %v969_v12 = vadd.f32 %v968_v8, %v967_v3 }
 0x19a   : > { %v982_v13 = vadd.f32 %v981_v9, %v980_v4 }
 0x19b   : > { %8170 = vmatpush3.bf16.msra.mxu1 %v8169_v62  ;;  %v970_v25 = vrot.slane %v969_v12, 1 }
 0x19c   : > { %8171 = vmatprep.subr.bf16.mxu1 %v11874_v0  ;;  %v983_v26 = vrot.slane %v982_v13, 1 }
 0x19d   : > { %v971_v29 = vadd.f32 %v970_v25, %v969_v12 }
 0x19e   : > { %v984_v30 = vadd.f32 %v983_v26, %v982_v13 }
 0x19f   : > { %8173 = vmatpush3.bf16.msra.mxu1 %v8172_v6 }
 0x1a0   : > { %8174 = vmatprep.subr.bf16.mxu1 %v11874_v0  ;;  %v1004_v36 = vsel %vm1003_vm1, %v984_v30, %v971_v29 }
 0x1a2   : > { %7819 = vmatmul.mubr.f32.vlgmr.msra.gmra.mrb[0].mxu1 %v1004_v36 }
 0x1a3   : > { %8176 = vmatpush3.bf16.msra.mxu1 %v10030_v5  ;;  %7853 = vmatprep.mubr.msk.f32.mxu1 %vm9500_vm0, %v11878_v1  ;;  %v622_v5 = vlaneseq }
 0x1a4   : > { %8177 = vmatprep.subr.bf16.mxu1 %v11874_v0 }
 0x1a7   : > { %8179 = vmatpush3.bf16.msra.mxu1 %v10033_v7  ;;  %v9502_v7 = vmov 1966171168  }
 0x1a8   : > { %8180 = vmatprep.subr.bf16.mxu1 %v11874_v0  ;;  %v1079_v37 = vunpack.c.l.s4 %v9502_v7 }
 0x1aa   : > { %v1080_v38 = vunpack.c.0.s8 %v1079_v37 }
 0x1ab   : > { %8182 = vmatpush3.bf16.msra.mxu1 %v10048_v17  ;;  %v10136_v17 = vshrl.u32 %v622_v5, 7 }
 0x1ac   : > { %8183 = vmatprep.subr.bf16.mxu1 %v11874_v0 }
 0x1ad   : > { %v10143_v47 = vsub.s32 0, %v10136_v17 }
 0x1af   : > { %8185 = vmatpush3.bf16.msra.mxu1 %v10075_v31  ;;  %v10139_v31 = vsub.s32 %v1080_v38, %v10136_v17  ;;  %11945 = vst [vmem:[#allocation38_spill] sm:$0xff] %v10143_v47 }
 0x1b0   : > { %8186 = vmatprep.subr.bf16.mxu1 %v11874_v0 }
 0x1b1   : > { %11944 = vst [vmem:[#allocation37_spill] sm:$0xff] %v10139_v31 }
 0x1b3   : > { %8188 = vmatpush3.bf16.msra.mxu1 %v8163_v44 }
 0x1b4   : > { %8189 = vmatprep.subr.bf16.mxu1 %v11874_v0 }
 0x1b7   : > { %8191 = vmatpush3.bf16.msra.mxu1 %v8166_v55 }
 0x1b8   : > { %8192 = vmatprep.subr.bf16.mxu1 %v11874_v0 }
 0x1bb   : > { %8194 = vmatpush3.bf16.msra.mxu1 %v8169_v62 }
 0x1bc   : > { %8195 = vmatprep.subr.bf16.mxu1 %v11874_v0 }
 0x1bf   : > { %8197 = vmatpush3.bf16.msra.mxu1 %v8172_v6 }
 0x275   : > { %v1072_v39 = vpop.f32.mrb[0].mxu1 }
 0x276   : > { %v1076_v42 = vmul.f32 0.015625, %v1072_v39  ;;  %v7820_v43 = vpop.f32.mrb[1].mxu1 }
 0x278   : > { %v1084_v44 = vrot.slane %v1076_v42, %v10139_v31 }
 0x27a   : > { %v1085_v48 = vcombine.high %v1084_v44, %v1084_v44  ;;  %v1092_v49 = vrot.slane %v1084_v44, %v10139_v31 }
 0x27c   : > { %v1099_v50 = vrot.slane %v1085_v48, %v10139_v31  ;;  %v1103_v53 = vrot.slane %v1092_v49, %v10143_v47 }
 0x27e   : > { %v1107_v54 = vrot.slane %v1099_v50, %v10143_v47  ;;  %v10151_v55 = vsub.f32 %v7138_v14, %v1103_v53  ;;  %v10155_v56 = vsub.f32 %v7139_v15, %v1103_v53  ;;  %v10167_v59 = vsub.f32 %v7142_v21, %v1103_v53 }
 0x27f   : > { %v10203_v61 = vsub.f32 %v7147_v40, %v1103_v53  ;;  %v10215_v3 = vsub.f32 %v7150_v45, %v1103_v53  ;;  %v10227_v6 = vsub.f32 %v7151_v51, %v1103_v53 }
 0x280   : > { %v10159_v57 = vsub.f32 %v7154_v22, %v1107_v54  ;;  %v10163_v58 = vsub.f32 %v7155_v23, %v1107_v54  ;;  %v10171_v14 = vsub.f32 %v7158_v24, %v1107_v54  ;;  %v1126_v10 = vmul.f32 %v10151_v55, %v10151_v55 }
 0x281   : > { %v1127_v15 = vmul.f32 %v10155_v56, %v10155_v56  ;;  %v10179_v22 = vsub.f32 %v7143_v27, %v1103_v53  ;;  %v10183_v16 = vsub.f32 %v7159_v28, %v1107_v54  ;;  %v10191_v24 = vsub.f32 %v7146_v34, %v1103_v53 }
 0x282   : > { %v1134_v21 = vmul.f32 %v10159_v57, %v10159_v57  ;;  %v1135_v23 = vmul.f32 %v10163_v58, %v10163_v58  ;;  %v10195_v60 = vsub.f32 %v7162_v35, %v1107_v54  ;;  %v1128_v11 = vmul.f32 %v10167_v59, %v10167_v59 }
 0x283   : > { %v1136_v19 = vmul.f32 %v10171_v14, %v10171_v14  ;;  %v1142_v27 = vadd.f32 %v1127_v15, %v1126_v10  ;;  %v10207_v34 = vsub.f32 %v7163_v41, %v1107_v54  ;;  %v1129_v35 = vmul.f32 %v10179_v22, %v10179_v22  ;;  %v8648_v10 = vld [vmem:[#allocation16 + $0x140] sm:$0xff]  }
 0x284   : > { %v1155_v28 = vadd.f32 %v1135_v23, %v1134_v21  ;;  %v1137_v62 = vmul.f32 %v10183_v16, %v10183_v16  ;;  %v10219_v18 = vsub.f32 %v7166_v46, %v1107_v54  ;;  %v1130_v20 = vmul.f32 %v10191_v24, %v10191_v24  ;;  %7856 = vmatprep.subr.bf16.mxu1 %v8648_v10  ;;  %v8649_v15 = vld [vmem:[#allocation16 + $0x100] sm:$0xff]   ;;  %v8651_v23 = vld [vmem:[#allocation16 + $0x148] sm:$0xff]  }
 0x285   : > { %v1143_v63 = vadd.f32 %v1142_v27, %v1128_v11  ;;  %v1138_v40 = vmul.f32 %v10195_v60, %v10195_v60  ;;  %v10231_v45 = vsub.f32 %v7167_v52, %v1107_v54  ;;  %v1131_v46 = vmul.f32 %v10203_v61, %v10203_v61  ;;  %v8650_v21 = vld [vmem:[#allocation16 + $0xc0] sm:$0xff]   ;;  %v8652_v11 = vld [vmem:[#allocation16 + $0x108] sm:$0xff]   ;;  %7256 = vmatprep.subr.bf16.mxu0 %v8649_v15 }
 0x286   : > { %v1156_v2 = vadd.f32 %v1155_v28, %v1136_v19  ;;  %v1139_v8 = vmul.f32 %v10207_v34, %v10207_v34  ;;  %v1132_v13 = vmul.f32 %v10215_v3, %v10215_v3  ;;  %v1140_v32 = vmul.f32 %v10219_v18, %v10219_v18  ;;  %v8654_v19 = vld [vmem:[#allocation16 + $0x150] sm:$0xff]   ;;  %7257 = vmatpush3.bf16.msra.mxu0 %v8650_v21  ;;  %v8653_v27 = vld [vmem:[#allocation16 + $0xc8] sm:$0xff]  }
 0x287   : > { %v1144_v41 = vadd.f32 %v1143_v63, %v1129_v35  ;;  %v1133_v33 = vmul.f32 %v10227_v6, %v10227_v6  ;;  %v1141_v52 = vmul.f32 %v10231_v45, %v10231_v45  ;;  %7258 = vmatprep.subr.bf16.mxu0 %v8652_v11  ;;  %v8655_v28 = vld [vmem:[#allocation16 + $0x110] sm:$0xff]   ;;  %v8657_v35 = vld [vmem:[#allocation16 + $0x158] sm:$0xff]  }
 0x288   : > { %v1157_v4 = vadd.f32 %v1156_v2, %v1137_v62  ;;  %v8656_v62 = vld [vmem:[#allocation16 + $0xd0] sm:$0xff]   ;;  %v8658_v63 = vld [vmem:[#allocation16 + $0x118] sm:$0xff]   ;;  %v8660_v2 = vld [vmem:[#allocation16 + $0x160] sm:$0xff]  }
 0x289   : > { %v1145_v9 = vadd.f32 %v1144_v41, %v1130_v20  ;;  %v8659_v20 = vld [vmem:[#allocation16 + $0xd8] sm:$0xff]   ;;  %v8663_v41 = vld [vmem:[#allocation16 + $0x168] sm:$0xff]  }
 0x28a   : > { %v1158_v12 = vadd.f32 %v1157_v4, %v1138_v40  ;;  %7259 = vmatpush3.bf16.msra.mxu0 %v8653_v27  ;;  %v8661_v40 = vld [vmem:[#allocation16 + $0x120] sm:$0xff]  }
 0x28b   : > { %v1146_v51 = vadd.f32 %v1145_v9, %v1131_v46  ;;  %7260 = vmatprep.subr.bf16.mxu0 %v8655_v28  ;;  %v8662_v4 = vld [vmem:[#allocation16 + $0xe0] sm:$0xff]   ;;  %v8664_v46 = vld [vmem:[#allocation16 + $0x128] sm:$0xff]  }
 0x28c   : > { %v1159_v25 = vadd.f32 %v1158_v12, %v1139_v8  ;;  %v8666_v8 = vld [vmem:[#allocation16 + $0x170] sm:$0xff]   ;;  %v8665_v9 = vld [vmem:[#allocation16 + $0xe8] sm:$0xff]  }
 0x28d   : > { %v1147_v26 = vadd.f32 %v1146_v51, %v1132_v13  ;;  %v8667_v12 = vld [vmem:[#allocation16 + $0x130] sm:$0xff]   ;;  %v8669_v13 = vld [vmem:[#allocation16 + $0x178] sm:$0xff]  }
 0x28e   : > { %v1160_v29 = vadd.f32 %v1159_v25, %v1140_v32  ;;  %7261 = vmatpush3.bf16.msra.mxu0 %v8656_v62  ;;  %v8668_v32 = vld [vmem:[#allocation16 + $0xf0] sm:$0xff]   ;;  %v8670_v51 = vld [vmem:[#allocation16 + $0x138] sm:$0xff]  }
 0x28f   : > { %v1148_v30 = vadd.f32 %v1147_v26, %v1133_v33  ;;  %7262 = vmatprep.subr.bf16.mxu0 %v8658_v63  ;;  %v8671_v25 = vld [vmem:[#allocation16 + $0xf8] sm:$0xff]   ;;  %v8673_v33 = vld [vmem:[#allocation16 + $0x40] sm:$0xff]  }
 0x290   : > { %v1161_v36 = vadd.f32 %v1160_v29, %v1141_v52  ;;  %v9503_v52 = vmov 0   ;;  %v8706_v26 = vld [vmem:[#allocation16 + $0x1c0] sm:$0xff]  }
 0x291   : > { %v1149_v5 = vrot.slane %v1148_v30, 4  ;;  %1776 = vst [vmem:[#allocation2] sm:$0xff] %v9503_v52  ;;  %1777 = vst [vmem:[#allocation2 + $0x8] sm:$0xf] %v9503_v52 }
 0x292   : > { %v1162_v7 = vrot.slane %v1161_v36, 4  ;;  %7263 = vmatpush3.bf16.msra.mxu0 %v8659_v20  ;;  %1779 = vst [vmem:[#allocation2 + $0x80] sm:$0xf] %v9503_v52  ;;  %1782 = vst [vmem:[#allocation2 + $0x74] sm:$0xf] %v9503_v52 }
 0x293   : > { %v1150_v37 = vadd.f32 %v1149_v5, %v1148_v30  ;;  %7264 = vmatprep.subr.bf16.mxu0 %v8661_v40  ;;  %1784 = vst [vmem:[#allocation2 + $0xec] sm:$0xf] %v9503_v52  ;;  %4280 = vst [vmem:[#allocation3 + $0x8] sm:$0xf] %v9503_v52 }
 0x294   : > { %v1163_v38 = vadd.f32 %v1162_v7, %v1161_v36  ;;  %4282 = vst [vmem:[#allocation3 + $0x80] sm:$0xf] %v9503_v52  ;;  %4285 = vst [vmem:[#allocation3 + $0x74] sm:$0xf] %v9503_v52  ;;  %v624_v7 = vadd.s32 8, %v10136_v17 }
 0x295   : > { %v1151_v39 = vrot.slane %v1150_v37, 2  ;;  %4287 = vst [vmem:[#allocation3 + $0xec] sm:$0xf] %v9503_v52 }
 0x296   : > { %v1164_v42 = vrot.slane %v1163_v38, 2  ;;  %7265 = vmatpush3.bf16.msra.mxu0 %v8662_v4 }
 0x297   : > { %v1152_v43 = vadd.f32 %v1151_v39, %v1150_v37  ;;  %7266 = vmatprep.subr.bf16.mxu0 %v8664_v46  ;;  %v625_v37 = vadd.s32 16, %v10136_v17  ;;  %v6562_v39 = vld [vmem:[#allocation10] ss:$0 sm:$0xff] }
 0x298   : > { %v1165_v44 = vadd.f32 %v1164_v42, %v1163_v38  ;;  %v626_v38 = vadd.s32 24, %v10136_v17  ;;  %v10250_v42 = vadd.s32 32, %v10136_v17 }
 0x299   : > { %v1153_v48 = vrot.slane %v1152_v43, 1 }
 0x29a   : > { %v1166_v49 = vrot.slane %v1165_v44, 1  ;;  %7267 = vmatpush3.bf16.msra.mxu0 %v8665_v9 }
 0x29b   : > { %v1154_v50 = vadd.f32 %v1153_v48, %v1152_v43  ;;  %7268 = vmatprep.subr.bf16.mxu0 %v8667_v12  ;;  %v643_v43 = vand.u32 7, %v10136_v17  ;;  %v650_v48 = vand.u32 7, %v624_v7 }
 0x29c   : > { %v1167_v53 = vadd.f32 %v1166_v49, %v1165_v44  ;;  %v657_v49 = vand.u32 7, %v625_v37 }
 0x29d   : > { %vm879_vm2 = vcmp.lt.s32.totalorder %v643_v43, 7  ;;  %vm880_vm3 = vcmp.lt.s32.totalorder %v650_v48, 7  ;;  %vm832_vm6 = vcmp.gt.s32.totalorder %v650_v48, 0  ;;  %vm831_vm8 = vcmp.gt.s32.totalorder %v643_v43, 0 }
 0x29e   : > { %v1170_v54 = vsel %vm1003_vm1, %v1167_v53, %v1154_v50  ;;  %7269 = vmatpush3.bf16.msra.mxu0 %v8668_v32  ;;  %v10254_v50 = vadd.s32 40, %v10136_v17  ;;  %vm881_vm4 = vcmp.lt.s32.totalorder %v657_v49, 7  ;;  %vm10309_vm10 = vcmp.gt.s32.totalorder %v657_v49, 0 }
 0x29f   : > { %7854 = vmatmul.mubr.f32.vlgmr.msra.gmra.mrb[2].mxu1 %v1170_v54  ;;  %7270 = vmatprep.subr.bf16.mxu0 %v8670_v51  ;;  %v664_v54 = vand.u32 7, %v626_v38  ;;  %v10271_v62 = vsel %vm881_vm4, 1.0, %v11878_v1  ;;  %v10305_v51 = vadd.s32 56, %v10136_v17 }
 0x2a0   : > { %7857 = vmatpush3.bf16.msra.mxu1 %v8648_v10  ;;  %v671_v10 = vand.u32 7, %v10250_v42  ;;  %v678_v21 = vand.u32 7, %v10254_v50  ;;  %11947 = vst [vmem:[#allocation40_spill] sm:$0xff] %v10271_v62  ;;  %v10463_v50 = vadd.s32 96, %v10136_v17 }
 0x2a1   : > { %7858 = vmatprep.subr.bf16.mxu1 %v8651_v23  ;;  %vm882_vm5 = vcmp.lt.s32.totalorder %v664_v54, 7  ;;  %vm10335_vm11 = vcmp.gt.s32.totalorder %v664_v54, 0  ;;  %v692_v49 = vand.u32 7, %v10305_v51 }
 0x2a2   : > { %7271 = vmatpush3.bf16.msra.mxu0 %v8671_v25  ;;  %vm883_vm7 = vcmp.lt.s32.totalorder %v671_v10, 7  ;;  %v10274_v63 = vsel %vm882_vm5, 1.0, %v11878_v1  ;;  %vm884_vm9 = vcmp.lt.s32.totalorder %v678_v21, 7  ;;  %vm835_vm14 = vcmp.gt.s32.totalorder %v671_v10, 0 }
 0x2a3   : > { %7416 = vmatprep.subr.bf16.mxu0 %v8706_v26  ;;  %11948 = vst [vmem:[#allocation41_spill] sm:$0xff] %v10274_v63  ;;  %v10287_v4 = vsel %vm883_vm7, 1.0, %v11878_v1  ;;  %v10302_v32 = vsel %vm884_vm9, 1.0, %v11878_v1  ;;  %vm886_vm13 = vcmp.lt.s32.totalorder %v692_v49, 7  ;;  %vm836_vm15 = vcmp.gt.s32.totalorder %v678_v21, 0 }
 0x2a4   : > { %7859 = vmatpush3.bf16.msra.mxu1 %v8651_v23  ;;  %v10436_v21 = vadd.s32 120, %v10136_v17  ;;  %vm1518_vm5 = vcmp.lt.s32.totalorder %v10136_v17, 7  ;;  %vm10479_vm7 = vcmp.gt.s32.totalorder %v692_v49, 0 }
 0x2a5   : > { %7860 = vmatprep.subr.bf16.mxu1 %v8654_v19 }
 0x2a6   : > { %11957 = vst [vmem:[#allocation42_spill] sm:$0xff] %v10436_v21  ;;  %v11877_v10 = vand.u32 7, %v10436_v21 }
 0x2a8   : > { %7861 = vmatpush3.bf16.msra.mxu1 %v8654_v19  ;;  %v10261_v19 = vsel %vm879_vm2, 1.0, %v11878_v1 }
 0x2a9   : > { %7862 = vmatprep.subr.bf16.mxu1 %v8657_v35 }
 0x2ac   : > { %7863 = vmatpush3.bf16.msra.mxu1 %v8657_v35  ;;  %v10268_v35 = vsel %vm880_vm3, 1.0, %v11878_v1 }
 0x2ad   : > { %7864 = vmatprep.subr.bf16.mxu1 %v8660_v2  ;;  %11946 = vst [vmem:[#allocation39_spill] sm:$0xff] %v10268_v35 }
 0x2b0   : > { %7865 = vmatpush3.bf16.msra.mxu1 %v8660_v2  ;;  %v10279_v2 = vadd.s32 48, %v10136_v17 }
 0x2b1   : > { %7866 = vmatprep.subr.bf16.mxu1 %v8663_v41 }
 0x2b4   : > { %7867 = vmatpush3.bf16.msra.mxu1 %v8663_v41  ;;  %v10284_v41 = vsel %vm832_vm6, 1.0, %v11878_v1 }
 0x2b5   : > { %7868 = vmatprep.subr.bf16.mxu1 %v8666_v8 }
 0x2b8   : > { %7869 = vmatpush3.bf16.msra.mxu1 %v8666_v8 }
 0x2b9   : > { %7870 = vmatprep.subr.bf16.mxu1 %v8669_v13 }
 0x2bc   : > { %7871 = vmatpush3.bf16.msra.mxu1 %v8669_v13  ;;  %v10295_v13 = vld [vmem:[#allocation12] ss:$0 sm:$0xff] }
 0x2bd   : > { %7336 = vmatprep.subr.bf16.mxu1 %v8673_v33 }
 0x372   : > { %v1238_v29 = vpop.f32.mrb[2].mxu1 }
 0x373   : > { %v1242_v30 = vmul.f32 0.015625, %v1238_v29  ;;  %v7855_v36 = vpop.f32.mrb[3].mxu1 }
 0x374   : > { %v10424_v36 = vsel %vm835_vm14, 1.0, %v11878_v1 }
 0x375   : > { %v1243_v5 = vadd.f32 1e-06, %v1242_v30 }
 0x377   : > { %8890 = vrsqrt.f32 %v1243_v5 }
 0x381   : > { %v8891_v44 = vpop.eup %8890 }
 0x382   : > { %v1252_v53 = vmul.f32 %v8891_v44, %v6562_v39 }
 0x384   : > { %v1260_v15 = vrot.slane %v1252_v53, %v10139_v31 }
 0x386   : > { %v1261_v23 = vcombine.high %v1260_v15, %v1260_v15  ;;  %v1268_v11 = vrot.slane %v1260_v15, %v10139_v31  ;;  %v10367_v15 = vadd.s32 64, %v10136_v17 }
 0x388   : > { %v1275_v27 = vrot.slane %v1261_v23, %v10139_v31  ;;  %v1279_v28 = vrot.slane %v1268_v11, %v10143_v47  ;;  %v10374_v11 = vadd.s32 72, %v10136_v17 }
 0x38a   : > { %v1286_v20 = vmul.f32 %v1279_v28, %v10151_v55  ;;  %v1287_v40 = vmul.f32 %v1279_v28, %v10155_v56  ;;  %v10290_v46 = vrot.slane %v1275_v27, %v10143_v47  ;;  %v1288_v8 = vmul.f32 %v1279_v28, %v10167_v59 }
 0x38b   : > { %v1289_v9 = vmul.f32 %v1279_v28, %v10179_v22  ;;  %v1290_v12 = vmul.f32 %v1279_v28, %v10191_v24  ;;  %v1291_v55 = vmul.f32 %v1279_v28, %v10203_v61  ;;  %v10299_v56 = vsel %vm831_vm8, 1.0, %v11878_v1 }
 0x38c   : > { %v1292_v25 = vmul.f32 %v1279_v28, %v10215_v3  ;;  %v1293_v59 = vmul.f32 %v1279_v28, %v10227_v6  ;;  %v685_v24 = vand.u32 7, %v10279_v2  ;;  %v10321_v52 = vadd.f32 %v10295_v13, %v1286_v20 }
 0x38d   : > { %v10315_v61 = vadd.f32 %v10295_v13, %v1289_v9  ;;  %v10318_v33 = vadd.f32 %v10295_v13, %v1290_v12  ;;  %v10324_v26 = vadd.f32 %v10295_v13, %v1287_v40  ;;  %v1294_v3 = vmul.f32 %v10290_v46, %v10159_v57 }
 0x38e   : > { %v1295_v6 = vmul.f32 %v10290_v46, %v10163_v58  ;;  %v10331_v29 = vadd.f32 %v10295_v13, %v1288_v8  ;;  %v1301_v30 = vmul.f32 %v10290_v46, %v10231_v45  ;;  %v6564_v37 = vmul.f32 -1.442695, %v10321_v52 }
 0x38f   : > { %v6567_v5 = vmul.f32 -1.442695, %v10315_v61  ;;  %v6568_v7 = vmul.f32 -1.442695, %v10318_v33  ;;  %v10343_v57 = vadd.f32 %v10295_v13, %v1291_v55  ;;  %v1296_v58 = vmul.f32 %v10290_v46, %v10171_v14 }
 0x390   : > { %v6565_v38 = vmul.f32 -1.442695, %v10324_v26  ;;  %v10349_v45 = vadd.f32 %v10295_v13, %v1301_v30  ;;  %v10352_v39 = vadd.f32 %v10295_v13, %v1292_v25  ;;  %v1297_v43 = vmul.f32 %v10290_v46, %v10183_v16 }
 0x391   : > { %8892 = vpow2.f32 %v6567_v5  ;;  %v6566_v44 = vmul.f32 -1.442695, %v10331_v29  ;;  %v10358_v48 = vadd.f32 %v10295_v13, %v1293_v59  ;;  %v10363_v53 = vadd.f32 %v10295_v13, %v1294_v3 }
 0x392   : > { %8894 = vpow2.f32 %v6568_v7  ;;  %v6579_v14 = vmul.f32 -1.442695, %v10349_v45  ;;  %v6569_v54 = vmul.f32 -1.442695, %v10343_v57  ;;  %v10370_v16 = vadd.f32 %v10295_v13, %v1295_v6 }
 0x393   : > { %8896 = vpow2.f32 %v6564_v37  ;;  %v6570_v23 = vmul.f32 -1.442695, %v10352_v39  ;;  %v10377_v27 = vadd.f32 %v10295_v13, %v1296_v58  ;;  %v6571_v28 = vmul.f32 -1.442695, %v10358_v48 }
 0x394   : > { %8898 = vpow2.f32 %v6565_v38  ;;  %v10381_v20 = vadd.s32 80, %v10136_v17  ;;  %v10384_v40 = vadd.f32 %v10295_v13, %v1297_v43  ;;  %v10389_v8 = vsel %vm10309_vm10, 1.0, %v11878_v1 }
 0x395   : > { %8900 = vpow2.f32 %v6566_v44  ;;  %vm885_vm12 = vcmp.lt.s32.totalorder %v685_v24, 7  ;;  %v6572_v9 = vmul.f32 -1.442695, %v10363_v53  ;;  %v699_v12 = vand.u32 7, %v10367_v15 }
 0x396   : > { %8902 = vpow2.f32 %v6579_v14  ;;  %v6573_v55 = vmul.f32 -1.442695, %v10370_v16  ;;  %v706_v25 = vand.u32 7, %v10374_v11  ;;  %v6574_v59 = vmul.f32 -1.442695, %v10377_v27 }
 0x397   : > { %8904 = vpow2.f32 %v6569_v54  ;;  %v10405_v22 = vsel %vm10335_vm11, 1.0, %v11878_v1  ;;  %v11876_v3 = vand.u32 7, %v10381_v20  ;;  %v6575_v6 = vmul.f32 -1.442695, %v10384_v40 }
 0x398   : > { %8906 = vpow2.f32 %v6570_v23  ;;  %v10410_v30 = vsel %vm885_vm12, 1.0, %v11878_v1  ;;  %v10413_v5 = vsel %vm886_vm13, 1.0, %v11878_v1  ;;  %vm10419_vm2 = vcmp.lt.s32.totalorder %v699_v12, 7 }
 0x399   : > { %8908 = vpow2.f32 %v6571_v28  ;;  %v10427_v7 = vadd.s32 88, %v10136_v17  ;;  %vm10431_vm3 = vcmp.lt.s32.totalorder %v706_v25, 7  ;;  %v10439_v44 = vsel %vm836_vm15, 1.0, %v11878_v1 }
 0x39a   : > { %8910 = vpow2.f32 %v6572_v9  ;;  %vm889_vm4 = vcmp.lt.s32.totalorder %v11876_v3, 7  ;;  %v1298_v54 = vmul.f32 %v10290_v46, %v10195_v60  ;;  %v10448_v28 = vsel %vm10419_vm2, 1.0, %v11878_v1 }
 0x39b   : > { %v8893_v42 = vpop.eup %8892  ;;  %8912 = vpow2.f32 %v6573_v55  ;;  %v10457_v60 = vsel %vm889_vm4, 1.0, %v11878_v1  ;;  %v1300_v0 = vmul.f32 %v10290_v46, %v10219_v18  ;;  %vm10473_vm6 = vcmp.gt.s32.totalorder %v685_v24, 0 }
 0x39c   : > { %v8895_v37 = vpop.eup %8894  ;;  %v1376_v58 = vadd.f32 1.0, %v8893_v42  ;;  %8914 = vpow2.f32 %v6574_v59  ;;  %v10453_v59 = vsel %vm10431_vm3, 1.0, %v11878_v1  ;;  %11958 = vst [vmem:[#allocation43_spill] sm:$0xff] %v10457_v60  ;;  %vm10485_vm8 = vcmp.lt.s32.totalorder %v11877_v10, 7 }
 0x39d   : > { %v8897_v38 = vpop.eup %8896  ;;  %v1377_v43 = vadd.f32 1.0, %v8895_v37  ;;  %8916 = vpow2.f32 %v6575_v6  ;;  %vm10491_vm9 = vcmp.gt.s32.totalorder %v699_v12, 0  ;;  %vm1461_vm10 = vcmp.lt.s32.totalorder %v10136_v17, 1 }
 0x39e   : > { %v8899_v14 = vpop.eup %8898  ;;  %8918 = vrcp.f32 %v1376_v58  ;;  %v1373_v23 = vadd.f32 1.0, %v8897_v38  ;;  %v1299_v38 = vmul.f32 %v10290_v46, %v10207_v34  ;;  %vm10501_vm11 = vcmp.gt.s32.totalorder %v706_v25, 0 }
 0x39f   : > { %v8901_v9 = vpop.eup %8900  ;;  %8920 = vrcp.f32 %v1377_v43  ;;  %v1374_v55 = vadd.f32 1.0, %v8899_v14  ;;  %v10513_v11 = vsel %vm10473_vm6, 1.0, %v11878_v1  ;;  %v10539_v18 = vsel %vm10501_vm11, 1.0, %v11878_v1 }
 0x3a0   : > { %v8903_v42 = vpop.eup %8902  ;;  %v1375_v37 = vadd.f32 1.0, %v8901_v9  ;;  %8922 = vrcp.f32 %v1373_v23  ;;  %v10468_v9 = vadd.f32 %v10295_v13, %v1298_v54  ;;  %v10497_v49 = vadd.f32 %v10295_v13, %v1299_v38  ;;  %11973 = vst [vmem:[#allocation48_spill] sm:$0xff] %v10539_v18 }
 0x3a1   : > { %v8905_v58 = vpop.eup %8904  ;;  %8924 = vrcp.f32 %v1374_v55  ;;  %v1388_v43 = vadd.f32 1.0, %v8903_v42 }
 0x3a2   : > { %v8907_v14 = vpop.eup %8906  ;;  %8926 = vrcp.f32 %v1375_v37  ;;  %v1378_v23 = vadd.f32 1.0, %v8905_v58  ;;  %11967 = vst [vmem:[#allocation44_spill] sm:$0xff] %v10497_v49  ;;  %v6576_v12 = vmul.f32 -1.442695, %v10468_v9  ;;  %v10507_v37 = vadd.f32 %v10295_v13, %v1300_v0 }
 0x3a3   : > { %v8909_v6 = vpop.eup %8908  ;;  %8928 = vrcp.f32 %v1388_v43  ;;  %v1379_v3 = vadd.f32 1.0, %v8907_v14  ;;  %v10518_v43 = vsel %vm10479_vm7, 1.0, %v11878_v1  ;;  %v10523_v0 = vsel %vm10485_vm8, 1.0, %v11878_v1 }
 0x3a4   : > { %v8911_v46 = vpop.eup %8910  ;;  %8930 = vrcp.f32 %v1378_v23  ;;  %v1380_v54 = vadd.f32 1.0, %v8909_v6  ;;  %11970 = vst [vmem:[#allocation45_spill] sm:$0xff] %v10507_v37  ;;  %11971 = vst [vmem:[#allocation46_spill] sm:$0xff] %v10523_v0  ;;  %v10528_v13 = vsel %vm10491_vm9, 1.0, %v11878_v1  ;;  %v10534_v34 = vmul.f32 -1.442695, %v10497_v49 }
 0x3a5   : > { %v8913_v51 = vpop.eup %8912  ;;  %8932 = vrcp.f32 %v1379_v3  ;;  %v1381_v24 = vadd.f32 1.0, %v8911_v46  ;;  %11972 = vst [vmem:[#allocation47_spill] sm:$0xff] %v10528_v13  ;;  %v10547_v2 = vmul.f32 -1.442695, %v10507_v37 }
 0x3a6   : > { %v8915_v42 = vpop.eup %8914  ;;  %8934 = vrcp.f32 %v1380_v54  ;;  %v1382_v15 = vadd.f32 1.0, %v8913_v51 }
 0x3a7   : > { %v8917_v58 = vpop.eup %8916  ;;  %8936 = vrcp.f32 %v1381_v24  ;;  %v1383_v3 = vadd.f32 1.0, %v8915_v42 }
 0x3a8   : > { %v8919_v25 = vpop.eup %8918  ;;  %8938 = vrcp.f32 %v1382_v15  ;;  %v10544_v55 = vadd.f32 1.0, %v8917_v58 }
 0x3a9   : > { %v8921_v14 = vpop.eup %8920  ;;  %v10531_v23 = vmul.f32 %v8919_v25, %v10315_v61  ;;  %8940 = vrcp.f32 %v1383_v3 }
 0x3aa   : > { %v8923_v46 = vpop.eup %8922  ;;  %v10542_v54 = vmul.f32 %v8921_v14, %v10318_v33  ;;  %8942 = vpow2.f32 %v6576_v12 }
 0x3ab   : > { %v8925_v61 = vpop.eup %8924  ;;  %v10550_v51 = vmul.f32 %v8923_v46, %v10321_v52  ;;  %v1505_v24 = vrot.slane %v10531_v23, 1  ;;  %v7042_v42 = vpack.c.bf16 %v10531_v23, %v10531_v23  ;;  %8944 = vrcp.f32 %v10544_v55 }
 0x3ac   : > { %v8927_v15 = vpop.eup %8926  ;;  %v1422_v33 = vmul.f32 %v8925_v61, %v10324_v26  ;;  %v1506_v12 = vrot.slane %v10542_v54, 1  ;;  %v7043_v3 = vpack.c.bf16 %v10542_v54, %v10542_v54 }
 0x3ad   : > { %v8929_v25 = vpop.eup %8928  ;;  %v1423_v52 = vmul.f32 %v8927_v15, %v10331_v29  ;;  %v1445_v46 = vrot.slane %v10550_v51, 7  ;;  %v7039_v10 = vpack.c.bf16 %v10550_v51, %v10550_v51  ;;  %1691 = vst [vmem:[#allocation2 + $0x34] sm:$0xf] %v7042_v42  ;;  %v11974_v31 = vrot.slane %v10550_v51, 1 }
 0x3ae   : > { %v8931_v38 = vpop.eup %8930  ;;  %v1503_v26 = vrot.slane %v1422_v33, 1  ;;  %v1530_v61 = vsel %vm1518_vm5, %v1505_v24, %v1506_v12  ;;  %v10569_v1 = vmul.f32 %v8929_v25, %v10349_v45  ;;  %v1446_v58 = vrot.slane %v1422_v33, 7  ;;  %1692 = vst [vmem:[#allocation2 + $0x40] sm:$0xf] %v7043_v3 }
 0x3af   : > { %v8933_v6 = vpop.eup %8932  ;;  %v1504_v29 = vrot.slane %v1423_v52, 1  ;;  %v1538_v15 = vmul.f32 %v10274_v63, %v1530_v61  ;;  %v7040_v14 = vpack.c.bf16 %v1422_v33, %v1422_v33  ;;  %1688 = vst [vmem:[#allocation2 + $0x10] sm:$0xf] %v7039_v10  ;;  %v10573_v47 = vmul.f32 %v8931_v38, %v10343_v57 }
 0x3b0   : > { %v8935_v42 = vpop.eup %8934  ;;  %v1533_v37 = vsel %vm1518_vm5, %v11974_v31, %v1503_v26  ;;  %v1476_v3 = vsel %vm1461_vm10, %v1445_v46, %v1446_v58  ;;  %v10583_v25 = vmul.f32 %v8933_v6, %v10352_v39  ;;  %v11975_v21 = vrot.slane %v10569_v1, 7 }
 0x3b1   : > { %v8937_v61 = vpop.eup %8936  ;;  %v1532_v10 = vsel %vm1518_vm5, %v1503_v26, %v1504_v29  ;;  %v1535_v57 = vmul.f32 %v10261_v19, %v1533_v37  ;;  %v1531_v38 = vsel %vm1518_vm5, %v1504_v29, %v1505_v24  ;;  %v7058_v33 = vpack.c.bf16 %v1538_v15, %v1538_v15  ;;  %1689 = vst [vmem:[#allocation2 + $0x1c] sm:$0xf] %v7040_v14 }
 0x3b2   : > { %v8939_v31 = vpop.eup %8938  ;;  %v1536_v45 = vmul.f32 %v10268_v35, %v1532_v10  ;;  %v1537_v63 = vmul.f32 %v10271_v62, %v1531_v38  ;;  %v1477_v39 = vsel %vm1461_vm10, %v11975_v21, %v1445_v46  ;;  %v1479_v6 = vmul.f32 %v10284_v41, %v1476_v3 }
 0x3b3   : > { %v8941_v26 = vpop.eup %8940  ;;  %v7055_v49 = vpack.c.bf16 %v1535_v57, %v1535_v57  ;;  %1763 = vst [vmem:[#allocation2 + $0x38] sm:$0xf] %v7058_v33  ;;  %v1478_v37 = vmul.f32 %v10299_v56, %v1477_v39  ;;  %v1507_v24 = vrot.slane %v10573_v47, 1  ;;  %v1508_v14 = vrot.slane %v10583_v25, 1 }
 0x3b4   : > { %v8943_v29 = vpop.eup %8942  ;;  %v7056_v15 = vpack.c.bf16 %v1536_v45, %v1536_v45  ;;  %v7057_v10 = vpack.c.bf16 %v1537_v63, %v1537_v63  ;;  %v7024_v38 = vpack.c.bf16 %v1479_v6, %v1479_v6  ;;  %v1447_v62 = vrot.slane %v1423_v52, 7 }
 0x3b5   : > { %1760 = vst [vmem:[#allocation2 + $0x14] sm:$0xf] %v7055_v49  ;;  %v7023_v35 = vpack.c.bf16 %v1478_v37, %v1478_v37  ;;  %v1528_v21 = vsel %vm1518_vm5, %v1507_v24, %v1508_v14  ;;  %v1529_v46 = vsel %vm1518_vm5, %v1506_v12, %v1507_v24  ;;  %v7041_v3 = vpack.c.bf16 %v1423_v52, %v1423_v52 }
 0x3b6   : > { %1761 = vst [vmem:[#allocation2 + $0x20] sm:$0xf] %v7056_v15  ;;  %1762 = vst [vmem:[#allocation2 + $0x2c] sm:$0xf] %v7057_v10  ;;  %v1539_v57 = vmul.f32 %v10287_v4, %v1529_v46  ;;  %v1540_v33 = vmul.f32 %v10302_v32, %v1528_v21  ;;  %v11976_v63 = vrot.slane %v10531_v23, 7  ;;  %v1475_v45 = vsel %vm1461_vm10, %v1446_v58, %v1447_v62 }
 0x3b7   : > { %1617 = vst [vmem:[#allocation2 + $0x18] sm:$0xf] %v7024_v38  ;;  %1616 = vst [vmem:[#allocation2 + $0xc] sm:$0xf] %v7023_v35  ;;  %v1480_v39 = vmul.f32 %v10389_v8, %v1475_v45  ;;  %v10615_v52 = vmul.f32 %v8935_v42, %v10358_v48  ;;  %v10618_v6 = vmul.f32 %v8937_v61, %v10363_v53  ;;  %v11977_v35 = vand.u32 7, %v10381_v20  ;;  %v8675_v38 = vld [vmem:[#allocation16] sm:$0xff]  }
 0x3b8   : > { %v1474_v49 = vsel %vm1461_vm10, %v1447_v62, %v11976_v63  ;;  %1690 = vst [vmem:[#allocation2 + $0x28] sm:$0xf] %v7041_v3  ;;  %v7059_v37 = vpack.c.bf16 %v1539_v57, %v1539_v57  ;;  %v7060_v24 = vpack.c.bf16 %v1540_v33, %v1540_v33  ;;  %v10621_v15 = vmul.f32 %v8939_v31, %v10370_v16  ;;  %v8680_v33 = vld [vmem:[#allocation16 + $0x48] sm:$0xff]   ;;  %v8688_v62 = vld [vmem:[#allocation16 + $0x58] sm:$0xff]  }
 0x3b9   : > { %v1481_v12 = vmul.f32 %v10405_v22, %v1474_v49  ;;  %v10624_v10 = vmul.f32 %v8941_v26, %v10377_v27  ;;  %vm10628_vm12 = vcmp.gt.s32.totalorder %v11977_v35, 0  ;;  %v7025_v58 = vpack.c.bf16 %v1480_v39, %v1480_v39 }
 0x3ba   : > { %v1509_v42 = vrot.slane %v10615_v52, 1  ;;  %v1510_v53 = vrot.slane %v10618_v6, 1  ;;  %1764 = vst [vmem:[#allocation2 + $0x44] sm:$0xf] %v7059_v37  ;;  %1765 = vst [vmem:[#allocation2 + $0x50] sm:$0xf] %v7060_v24  ;;  %v11981_v31 = vmov %v11976_v63  ;;  %v7044_v57 = vpack.c.bf16 %v10573_v47, %v10573_v47 }
 0x3bb   : > { %v7026_v48 = vpack.c.bf16 %v1481_v12, %v1481_v12  ;;  %v1511_v16 = vrot.slane %v10621_v15, 1  ;;  %v1512_v61 = vrot.slane %v10624_v10, 1  ;;  %v1450_v27 = vrot.slane %v10573_v47, 7  ;;  %1618 = vst [vmem:[#allocation2 + $0x24] sm:$0xf] %v7025_v58 }
 0x3bc   : > { %v11980_v20 = vrot.slane %v10542_v54, 7  ;;  %v1526_v21 = vsel %vm1518_vm5, %v1509_v42, %v1510_v53  ;;  %v1527_v46 = vsel %vm1518_vm5, %v1508_v14, %v1509_v42  ;;  %1693 = vst [vmem:[#allocation2 + $0x4c] sm:$0xf] %v7044_v57  ;;  %v8707_v57 = vld [vmem:[#allocation16 + $0x180] sm:$0xff]  }
 0x3bd   : > { %1619 = vst [vmem:[#allocation2 + $0x30] sm:$0xf] %v7026_v48  ;;  %v1541_v23 = vmul.f32 %v10410_v30, %v1527_v46  ;;  %v1542_v63 = vmul.f32 %v10413_v5, %v1526_v21  ;;  %v1524_v49 = vsel %vm1518_vm5, %v1511_v16, %v1512_v61  ;;  %v1525_v45 = vsel %vm1518_vm5, %v1510_v53, %v1511_v16  ;;  %v8672_v39 = vld [vmem:[#allocation2 + $0x14] ss:$12 sps:$4 sm:$0xff]   ;;  %v8674_v35 = vld [vmem:[#allocation2 + $0x2c] ss:$12 sps:$4 sm:$0xff]  }
 0x3be   : > { %v1473_v26 = vsel %vm1461_vm10, %v11981_v31, %v11980_v20  ;;  %v1543_v14 = vmul.f32 %v10448_v28, %v1525_v45  ;;  %v1544_v12 = vmul.f32 %v10453_v59, %v1524_v49  ;;  %v11982_v47 = vmov %v11980_v20  ;;  %v10664_v58 = vld [vmem:[#allocation2 + $0xc] sm:$0xff]  ;;  %v10666_v48 = vld [vmem:[#allocation2 + $0x18] sm:$0xff]  ;;  %7872 = vmatprep.mubr.bf16.mxu1 %v8672_v39 }
 0x3bf   : > { %v1482_v3 = vmul.f32 %v10424_v36, %v1473_v26  ;;  %v1472_v37 = vsel %vm1461_vm10, %v11982_v47, %v1450_v27  ;;  %v7061_v42 = vpack.c.bf16 %v1541_v23, %v1541_v23  ;;  %v7062_v20 = vpack.c.bf16 %v1542_v63, %v1542_v63  ;;  %7873 = vmatmul.mubr.bf16.vlgmr.msra.gmra.mrb[4].mxu1 %v8674_v35  ;;  %v8681_v23 = vld [vmem:[#allocation16 + $0x8] sm:$0xff]  }
 0x3c0   : > { %v1483_v53 = vmul.f32 %v10439_v44, %v1472_v37  ;;  %v1385_v16 = vadd.f32 1.0, %v8943_v29  ;;  %v6628_v31 = vcombine.low %v10664_v58, %v10666_v48  ;;  %v6629_v54 = vcombine.high %v10664_v58, %v10666_v48  ;;  %v8682_v29 = vld [vmem:[#allocation16 + $0x50] sm:$0xff]   ;;  %v8710_v39 = vld [vmem:[#allocation16 + $0x1c8] sm:$0xff]   ;;  %7337 = vmatpush3.bf16.msra.mxu1 %v8675_v38 }
 0x3c1   : > { %v7027_v24 = vpack.c.bf16 %v1482_v3, %v1482_v3  ;;  %v7063_v26 = vpack.c.bf16 %v1543_v14, %v1543_v14  ;;  %v7064_v21 = vpack.c.bf16 %v1544_v12, %v1544_v12  ;;  %v11983_v46 = vand.u32 7, %v10427_v7  ;;  %1766 = vst [vmem:[#allocation2 + $0x5c] sm:$0xf] %v7061_v42  ;;  %1767 = vst [vmem:[#allocation2 + $0x68] sm:$0xf] %v7062_v20  ;;  %v8712_v20 = vld [vmem:[#allocation16 + $0x188] sm:$0xff]  }
 0x3c2   : > { %v7028_v63 = vpack.c.bf16 %v1483_v53, %v1483_v53  ;;  %v1451_v49 = vrot.slane %v10583_v25, 7  ;;  %v1452_v45 = vrot.slane %v10615_v52, 7  ;;  %2250 = vmatprep.mubr.bf16.mxu0 %v6629_v54  ;;  %v8678_v14 = vld [vmem:[#allocation2 + $0x44] ss:$12 sps:$4 sm:$0xff]   ;;  %8946 = vrcp.f32 %v1385_v16  ;;  %7338 = vmatprep.subr.bf16.mxu1 %v8680_v33  ;;  %v8684_v54 = vld [vmem:[#allocation16 + $0x10] sm:$0xff]  }
 0x3c3   : > { %1620 = vst [vmem:[#allocation2 + $0x3c] sm:$0xf] %v7027_v24  ;;  %vm10675_vm13 = vcmp.lt.s32.totalorder %v11983_v46, 7  ;;  %1768 = vst [vmem:[#allocation2 + $0x8c] sm:$0xf] %v7063_v26  ;;  %v7045_v12 = vpack.c.bf16 %v10583_v25, %v10583_v25  ;;  %v7046_v47 = vpack.c.bf16 %v10615_v52, %v10615_v52  ;;  %v11986_v37 = vmov %v11983_v46  ;;  %2251 = vmatmul.mubr.bf16.vlgmr.msra.gmra.mrb[0].mxu0 %v6628_v31  ;;  %v10692_v24 = vld [vmem:[#allocation2 + $0x24] sm:$0xff] }
 0x3c4   : > { %1769 = vst [vmem:[#allocation2 + $0x98] sm:$0xf] %v7064_v21  ;;  %vm10688_vm14 = vcmp.gt.s32.totalorder %v11986_v37, 0  ;;  %v10694_v38 = vld [vmem:[#allocation2 + $0x30] sm:$0xff]  ;;  %1621 = vst [vmem:[#allocation2 + $0x48] sm:$0xf] %v7028_v63  ;;  %8948 = vpow2.f32 %v10534_v34  ;;  %v1470_v25 = vsel %vm1461_vm10, %v1451_v49, %v1452_v45  ;;  %v1471_v52 = vsel %vm1461_vm10, %v1450_v27, %v1451_v49  ;;  %7876 = vmatprep.mubr.bf16.mxu1 %v8678_v14 }
 0x3c5   : > { %v1517_v7 = vrot.slane %v10569_v1, 1  ;;  %v6632_v35 = vcombine.high %v10692_v24, %v10694_v38  ;;  %8950 = vpow2.f32 %v10547_v2  ;;  %v1484_v42 = vmul.f32 %v10513_v11, %v1471_v52  ;;  %1694 = vst [vmem:[#allocation2 + $0x58] sm:$0xf] %v7045_v12  ;;  %1695 = vst [vmem:[#allocation2 + $0x64] sm:$0xf] %v7046_v47  ;;  %7417 = vmatpush3.bf16.msra.mxu0 %v8707_v57  ;;  %v8714_v31 = vld [vmem:[#allocation16 + $0x1d0] sm:$0xff]  }
 0x3c6   : > { %v11989_v34 = vmov 0.0   ;;  %v1485_v27 = vmul.f32 %v10518_v43, %v1470_v25  ;;  %v11991_v53 = vrot.slane %v10550_v51, 1  ;;  %v1453_v16 = vrot.slane %v10618_v6, 7  ;;  %7418 = vmatprep.subr.bf16.mxu0 %v8710_v39  ;;  %7339 = vmatpush3.bf16.msra.mxu1 %v8681_v23  ;;  %v8716_v12 = vld [vmem:[#allocation16 + $0x190] sm:$0xff]  }
 0x3c7   : > { %v10709_v33 = vsel %vm10628_vm12, 1.0, %v11989_v34  ;;  %2258 = vmatprep.mubr.bf16.mxu0 %v6632_v35  ;;  %v7029_v26 = vpack.c.bf16 %v1484_v42, %v1484_v42  ;;  %v1454_v46 = vrot.slane %v10621_v15, 7  ;;  %v7047_v51 = vpack.c.bf16 %v10618_v6, %v10618_v6  ;;  %7340 = vmatprep.subr.bf16.mxu1 %v8682_v29 }
 0x3c8   : > { %11990 = vst [vmem:[#allocation49_spill] sm:$0xff] %v10709_v33  ;;  %v1534_v2 = vsel %vm1518_vm5, %v1517_v7, %v11991_v53  ;;  %v7030_v63 = vpack.c.bf16 %v1485_v27, %v1485_v27  ;;  %v1469_v49 = vsel %vm1461_vm10, %v1452_v45, %v1453_v16  ;;  %v7048_v23 = vpack.c.bf16 %v10621_v15, %v10621_v15  ;;  %v8683_v47 = vld [vmem:[#allocation2 + $0x5c] ss:$12 sps:$4 sm:$0xff]   ;;  %v8717_v53 = vld [vmem:[#allocation16 + $0x1d8] sm:$0xff]  }
 0x3c9   : > { %v1550_v21 = vmul.f32 %v10523_v0, %v1534_v2  ;;  %v11992_v39 = vand.u32 7, %v10463_v50  ;;  %1622 = vst [vmem:[#allocation2 + $0x54] sm:$0xf] %v7029_v26  ;;  %v1468_v29 = vsel %vm1461_vm10, %v1453_v16, %v1454_v46  ;;  %v1486_v37 = vmul.f32 %v10528_v13, %v1469_v49  ;;  %1696 = vst [vmem:[#allocation2 + $0x88] sm:$0xf] %v7047_v51  ;;  %v8945_v2 = vpop.eup %8944 }
 0x3ca   : > { %v10723_v57 = vld [vmem:[#allocation2 + $0x3c] sm:$0xff]  ;;  %v7049_v45 = vpack.c.bf16 %v10624_v10, %v10624_v10  ;;  %7419 = vmatpush3.bf16.msra.mxu0 %v8712_v20  ;;  %1623 = vst [vmem:[#allocation2 + $0x60] sm:$0xf] %v7030_v63  ;;  %v1487_v25 = vmul.f32 %v10539_v18, %v1468_v29  ;;  %1697 = vst [vmem:[#allocation2 + $0x94] sm:$0xf] %v7048_v23  ;;  %7877 = vmatmul.mubr.bf16.gmra.mrb[8].mxu1 %v8683_v47  ;;  %v1455_v27 = vrot.slane %v10624_v10, 7 }
 0x3cb   : > { %vm10731_vm15 = vcmp.gt.s32.totalorder %v11992_v39, 0  ;;  %v7070_v6 = vpack.c.bf16 %v1550_v21, %v1550_v21  ;;  %v8685_v15 = vld [vmem:[#allocation2 + $0x8c] ss:$12 sps:$4 sm:$0xff]   ;;  %7420 = vmatprep.subr.bf16.mxu0 %v8714_v31  ;;  %v6631_v52 = vcombine.low %v10692_v24, %v10694_v38  ;;  %v7031_v42 = vpack.c.bf16 %v1486_v37, %v1486_v37  ;;  %7341 = vmatpush3.bf16.msra.mxu1 %v8684_v54  ;;  %v8689_v31 = vld [vmem:[#allocation16 + $0x18] sm:$0xff]  }
 0x3cc   : > { %v10743_v35 = vld [vmem:[#allocation2 + $0x48] sm:$0xff]  ;;  %1698 = vst [vmem:[#allocation2 + $0xa0] sm:$0xf] %v7049_v45  ;;  %v7054_v20 = vpack.c.bf16 %v10569_v1, %v10569_v1  ;;  %7880 = vmatprep.mubr.bf16.mxu1 %v8685_v15  ;;  %v10753_v26 = vsel %vm10675_vm13, 1.0, %v11989_v34  ;;  %v7032_v21 = vpack.c.bf16 %v1487_v25, %v1487_v25  ;;  %v8947_v51 = vpop.eup %8946  ;;  %7342 = vmatprep.subr.bf16.mxu1 %v8688_v62  ;;  %v10757_v23 = vadd.s32 104, %v10136_v17 }
 0x3cd   : > { %1775 = vst [vmem:[#allocation2 + $0xe0] sm:$0xf] %v7070_v6  ;;  %v6635_v16 = vcombine.high %v10723_v57, %v10743_v35  ;;  %11995 = vst [vmem:[#allocation50_spill] sm:$0xff] %v10753_v26  ;;  %2259 = vmatmul.mubr.bf16.gmra.mrb[4].mxu0 %v6631_v52  ;;  %v8690_v63 = vld [vmem:[#allocation16 + $0x60] sm:$0xff]   ;;  %v1432_v49 = vmul.f32 %v8945_v2, %v10384_v40  ;;  %v10760_v54 = vadd.s32 112, %v10136_v17  ;;  %v10770_v40 = vsel %vm10688_vm14, 1.0, %v11989_v34 }
 0x3ce   : > { %1624 = vst [vmem:[#allocation2 + $0x84] sm:$0xf] %v7031_v42  ;;  %v1467_v39 = vsel %vm1461_vm10, %v1454_v46, %v1455_v27  ;;  %1703 = vst [vmem:[#allocation2 + $0xdc] sm:$0xf] %v7054_v20  ;;  %v8949_v3 = vpop.eup %8948  ;;  %v10765_v47 = vmul.f32 %v8947_v51, %v10468_v9  ;;  %v10776_v6 = vsel %vm10731_vm15, 1.0, %v11989_v34  ;;  %7421 = vmatpush3.bf16.msra.mxu0 %v8716_v12  ;;  %v8719_v46 = vld [vmem:[#allocation16 + $0x198] sm:$0xff]  }
 0x3cf   : > { %2266 = vmatprep.mubr.bf16.mxu0 %v6635_v16  ;;  %1625 = vst [vmem:[#allocation2 + $0x90] sm:$0xf] %v7032_v21  ;;  %11996 = vst [vmem:[#allocation51_spill] sm:$0xff] %v10770_v40  ;;  %v1488_v62 = vmul.f32 %v10709_v33, %v1467_v39  ;;  %v8951_v29 = vpop.eup %8950  ;;  %v1513_v37 = vrot.slane %v1432_v49, 1  ;;  %v1386_v45 = vadd.f32 1.0, %v8949_v3  ;;  %v1456_v9 = vrot.slane %v1432_v49, 7  ;;  %7422 = vmatprep.subr.bf16.mxu0 %v8717_v53 }
 0x3d0   : > { %11997 = vst [vmem:[#allocation52_spill] sm:$0xff] %v10776_v6  ;;  %v7050_v15 = vpack.c.bf16 %v1432_v49, %v1432_v49  ;;  %v8721_v25 = vld [vmem:[#allocation16 + $0x1e0] sm:$0xff]   ;;  %7343 = vmatpush3.bf16.msra.mxu1 %v8689_v31  ;;  %v1514_v55 = vrot.slane %v10765_v47, 1  ;;  %v1387_v42 = vadd.f32 1.0, %v8951_v29  ;;  %v1457_v2 = vrot.slane %v10765_v47, 7  ;;  %v10784_v12 = vld [vmem:[#allocation2 + $0x54] sm:$0xff] }
 0x3d1   : > { %v8692_v52 = vld [vmem:[#allocation16 + $0x20] sm:$0xff]   ;;  %v7033_v20 = vpack.c.bf16 %v1488_v62, %v1488_v62  ;;  %7344 = vmatprep.subr.bf16.mxu1 %v8690_v63  ;;  %v1523_v14 = vsel %vm1518_vm5, %v1512_v61, %v1513_v37  ;;  %8952 = vrcp.f32 %v1386_v45  ;;  %v10786_v16 = vld [vmem:[#allocation2 + $0x60] sm:$0xff]  ;;  %v8696_v53 = vld [vmem:[#allocation16 + $0x68] sm:$0xff]   ;;  %v1466_v31 = vsel %vm1461_vm10, %v1455_v27, %v1456_v9 }
 0x3d2   : > { %1699 = vst [vmem:[#allocation2 + $0xac] sm:$0xf] %v7050_v15  ;;  %v7051_v21 = vpack.c.bf16 %v10765_v47, %v10765_v47  ;;  %v1522_v10 = vsel %vm1518_vm5, %v1513_v37, %v1514_v55  ;;  %v1545_v61 = vmul.f32 %v10457_v60, %v1523_v14  ;;  %v734_v51 = vand.u32 7, %v10757_v23  ;;  %7423 = vmatpush3.bf16.msra.mxu0 %v8719_v46  ;;  %v8723_v63 = vld [vmem:[#allocation16 + $0x1a0] sm:$0xff]   ;;  %v8724_v62 = vld [vmem:[#allocation16 + $0x1e8] sm:$0xff]  }
 0x3d3   : > { %8954 = vrcp.f32 %v1387_v42  ;;  %1626 = vst [vmem:[#allocation2 + $0x9c] sm:$0xf] %v7033_v20  ;;  %v1546_v49 = vmul.f32 %v10753_v26, %v1522_v10  ;;  %v6634_v27 = vcombine.low %v10723_v57, %v10743_v35  ;;  %v1489_v39 = vmul.f32 %v10770_v40, %v1466_v31  ;;  %7424 = vmatprep.subr.bf16.mxu0 %v8721_v25  ;;  %v8697_v29 = vld [vmem:[#allocation16 + $0x28] sm:$0xff]   ;;  %v8698_v42 = vld [vmem:[#allocation16 + $0x70] sm:$0xff]  }
 0x3d4   : > { %v1465_v3 = vsel %vm1461_vm10, %v1456_v9, %v1457_v2  ;;  %1700 = vst [vmem:[#allocation2 + $0xb8] sm:$0xf] %v7051_v21  ;;  %v7065_v23 = vpack.c.bf16 %v1545_v61, %v1545_v61  ;;  %7345 = vmatpush3.bf16.msra.mxu1 %v8692_v52  ;;  %v6638_v46 = vcombine.high %v10784_v12, %v10786_v16  ;;  %v741_v37 = vand.u32 7, %v10760_v54  ;;  %v8726_v25 = vld [vmem:[#allocation16 + $0x1a8] sm:$0xff]   ;;  %v8728_v52 = vld [vmem:[#allocation16 + $0x1f0] sm:$0xff]   ;;  %v8703_v21 = vld [vmem:[#allocation16 + $0x78] sm:$0xff]  }
 0x3d5   : > { %v1490_v45 = vmul.f32 %v10776_v6, %v1465_v3  ;;  %v7066_v15 = vpack.c.bf16 %v1546_v49, %v1546_v49  ;;  %2267 = vmatmul.mubr.bf16.gmra.mrb[8].mxu0 %v6634_v27  ;;  %7346 = vmatprep.subr.bf16.mxu1 %v8696_v53  ;;  %v7034_v20 = vpack.c.bf16 %v1489_v39, %v1489_v39  ;;  %v11998_v14 = vand.u32 7, %v10463_v50  ;;  %v8700_v54 = vld [vmem:[#allocation16 + $0x30] sm:$0xff]   ;;  %v10812_v53 = vld [vmem:[#allocation2 + $0x84] sm:$0xff] }
 0x3d6   : > { %1770 = vst [vmem:[#allocation2 + $0xa4] sm:$0xf] %v7065_v23  ;;  %2274 = vmatprep.mubr.bf16.mxu0 %v6638_v46  ;;  %7425 = vmatpush3.bf16.msra.mxu0 %v8723_v63  ;;  %vm892_vm3 = vcmp.lt.s32.totalorder %v734_v51, 7  ;;  %vm893_vm4 = vcmp.lt.s32.totalorder %v741_v37, 7  ;;  %v10814_v31 = vld [vmem:[#allocation2 + $0x90] sm:$0xff]  ;;  %vm844_vm6 = vcmp.gt.s32.totalorder %v734_v51, 0  ;;  %v6637_v39 = vcombine.low %v10784_v12, %v10786_v16 }
 0x3d7   : > { %v7035_v9 = vpack.c.bf16 %v1490_v45, %v1490_v45  ;;  %1771 = vst [vmem:[#allocation2 + $0xb0] sm:$0xf] %v7066_v15  ;;  %1627 = vst [vmem:[#allocation2 + $0xa8] sm:$0xf] %v7034_v20  ;;  %7426 = vmatprep.subr.bf16.mxu0 %v8724_v62  ;;  %vm891_vm2 = vcmp.lt.s32.totalorder %v11998_v14, 7  ;;  %vm10816_vm7 = vcmp.gt.s32.totalorder %v741_v37, 0  ;;  %v6641_v46 = vcombine.high %v10812_v53, %v10814_v31 }
 0x3d8   : > { %7347 = vmatpush3.bf16.msra.mxu1 %v8697_v29  ;;  %v8729_v61 = vld [vmem:[#allocation16 + $0x1b0] sm:$0xff]   ;;  %v10821_v63 = vsel %vm891_vm2, 1.0, %v11989_v34  ;;  %v10824_v49 = vsel %vm892_vm3, 1.0, %v11989_v34  ;;  %v10827_v27 = vsel %vm893_vm4, 1.0, %v11989_v34  ;;  %v8732_v51 = vld [vmem:[#allocation16 + $0x1f8] sm:$0xff]   ;;  %v10835_v29 = vsel %vm844_vm6, 1.0, %v11989_v34 }
 0x3d9   : > { %1628 = vst [vmem:[#allocation2 + $0xb4] sm:$0xf] %v7035_v9  ;;  %7348 = vmatprep.subr.bf16.mxu1 %v8698_v42  ;;  %12001 = vst [vmem:[#allocation53_spill] sm:$0xff] %v10821_v63  ;;  %v12004_v62 = vld [vmem:[#allocation44_spill] sm:$0xff]  ;;  %v12006_v37 = vld [vmem:[#allocation42_spill] sm:$0xff]  ;;  %v10843_v9 = vsel %vm10816_vm7, 1.0, %v11989_v34 }
 0x3da   : > { %7427 = vmatpush3.bf16.msra.mxu0 %v8726_v25  ;;  %12002 = vst [vmem:[#allocation54_spill] sm:$0xff] %v10824_v49  ;;  %12003 = vst [vmem:[#allocation55_spill] sm:$0xff] %v10827_v27  ;;  %v12007_v45 = vand.u32 7, %v12006_v37  ;;  %v12008_v15 = vld [vmem:[#allocation45_spill] sm:$0xff]  ;;  %v8704_v20 = vld [vmem:[#allocation16 + $0x38] sm:$0xff]  }
 0x3db   : > { %v8953_v50 = vpop.eup %8952  ;;  %7428 = vmatprep.subr.bf16.mxu0 %v8728_v52  ;;  %12005 = vst [vmem:[#allocation44_spill] sm:$0xff] %v10835_v29  ;;  %12009 = vst [vmem:[#allocation42_spill] sm:$0xff] %v10843_v9  ;;  %v10845_v14 = vld [vmem:[#allocation16 + $0x80] sm:$0xff]  }
 0x3dc   : > { %v1434_v23 = vmul.f32 %v8953_v50, %v12004_v62  ;;  %7349 = vmatpush3.bf16.msra.mxu1 %v8700_v54  ;;  %vm846_vm8 = vcmp.gt.s32.totalorder %v12007_v45, 0 }
 0x3dd   : > { %v8955_v3 = vpop.eup %8954  ;;  %2275 = vmatmul.mubr.bf16.gmra.mrb[12].mxu0 %v6637_v39  ;;  %7350 = vmatprep.subr.bf16.mxu1 %v8703_v21  ;;  %v10848_v37 = vsel %vm846_vm8, 1.0, %v11989_v34  ;;  %v8734_v21 = vld [vmem:[#allocation16 + $0x1b8] sm:$0xff]   ;;  %v6640_v39 = vcombine.low %v10812_v53, %v10814_v31 }
 0x3de   : > { %v1435_v42 = vmul.f32 %v8955_v3, %v12008_v15  ;;  %v8691_v25 = vld [vmem:[#allocation2 + $0xa4] ss:$12 sps:$4 sm:$0xff]   ;;  %v1515_v52 = vrot.slane %v1434_v23, 1  ;;  %2282 = vmatprep.mubr.bf16.mxu0 %v6641_v46  ;;  %v7052_v54 = vpack.c.bf16 %v1434_v23, %v1434_v23  ;;  %7429 = vmatpush3.bf16.msra.mxu0 %v8729_v61  ;;  %v1458_v62 = vrot.slane %v1434_v23, 7  ;;  %12010 = vst [vmem:[#allocation45_spill] sm:$0xff] %v10848_v37  ;;  %v10856_v3 = vld [vmem:[#allocation2 + $0x9c] sm:$0xff] }
 0x3df   : > { %7430 = vmatprep.subr.bf16.mxu0 %v8732_v51  ;;  %7881 = vmatmul.mubr.bf16.gmra.mrb[12].mxu1 %v8691_v25  ;;  %v10858_v46 = vld [vmem:[#allocation2 + $0xa8] sm:$0xff] }
 0x3e0   : > { %v1516_v50 = vrot.slane %v1435_v42, 1  ;;  %v1521_v10 = vsel %vm1518_vm5, %v1514_v55, %v1515_v52  ;;  %1701 = vst [vmem:[#allocation2 + $0xc4] sm:$0xf] %v7052_v54  ;;  %v1459_v61 = vrot.slane %v1435_v42, 7  ;;  %v7053_v23 = vpack.c.bf16 %v1435_v42, %v1435_v42  ;;  %7351 = vmatpush3.bf16.msra.mxu1 %v8704_v20 }
 0x3e1   : > { %v1547_v45 = vmul.f32 %v10821_v63, %v1521_v10  ;;  %v1464_v15 = vsel %vm1461_vm10, %v1457_v2, %v1458_v62  ;;  %7888 = vmatprep.subr.bf16.mxu1 %v10845_v14  ;;  %v12011_v54 = vrot.slane %v10569_v1, 7  ;;  %v6644_v47 = vcombine.high %v10856_v3, %v10858_v46  ;;  %v3503_v63 = vld [vmem:[#allocation9 + $0x60] sm:$0xff] }
 0x3e2   : > { %v1520_v51 = vsel %vm1518_vm5, %v1515_v52, %v1516_v50  ;;  %v1519_v55 = vsel %vm1518_vm5, %v1516_v50, %v1517_v7  ;;  %v1491_v52 = vmul.f32 %v10835_v29, %v1464_v15  ;;  %1702 = vst [vmem:[#allocation2 + $0xd0] sm:$0xf] %v7053_v23  ;;  %v1463_v2 = vsel %vm1461_vm10, %v1458_v62, %v1459_v61 }
 0x3e3   : > { %v1548_v25 = vmul.f32 %v10824_v49, %v1520_v51  ;;  %v1549_v42 = vmul.f32 %v10827_v27, %v1519_v55  ;;  %v1462_v10 = vsel %vm1461_vm10, %v1459_v61, %v12011_v54  ;;  %v7067_v7 = vpack.c.bf16 %v1547_v45, %v1547_v45  ;;  %7431 = vmatpush3.bf16.msra.mxu0 %v8734_v21  ;;  %v10888_v21 = vld [vmem:[#allocation2 + $0xb4] sm:$0xff] }
 0x3e4   : > { %v1493_v20 = vmul.f32 %v10848_v37, %v1462_v10  ;;  %v7036_v55 = vpack.c.bf16 %v1491_v52, %v1491_v52  ;;  %v1492_v15 = vmul.f32 %v10843_v9, %v1463_v2  ;;  %v12012_v1 = vmov 0.0|0.0  }
 0x3e5   : > { %v7068_v50 = vpack.c.bf16 %v1548_v25, %v1548_v25  ;;  %v7069_v51 = vpack.c.bf16 %v1549_v42, %v1549_v42  ;;  %8198 = vmatprep.subr.bf16.mxu0 %v12012_v1  ;;  %1772 = vst [vmem:[#allocation2 + $0xbc] sm:$0xf] %v7067_v7  ;;  %2283 = vmatmul.mubr.bf16.gmra.mrb[16].mxu0 %v6640_v39  ;;  %v10892_v39 = vld [vmem:[#allocation2] sm:$0xff] }
 0x3e6   : > { %v7038_v23 = vpack.c.bf16 %v1493_v20, %v1493_v20  ;;  %2290 = vmatprep.mubr.bf16.mxu0 %v6644_v47  ;;  %1629 = vst [vmem:[#allocation2 + $0xc0] sm:$0xf] %v7036_v55  ;;  %v7037_v45 = vpack.c.bf16 %v1492_v15, %v1492_v15  ;;  %v6643_v62 = vcombine.low %v10856_v3, %v10858_v46  ;;  %v2879_v55 = vld [vmem:[#allocation2 + $0x18] sm:$0xff] }
 0x3e7   : > { %1773 = vst [vmem:[#allocation2 + $0xc8] sm:$0xf] %v7068_v50  ;;  %1774 = vst [vmem:[#allocation2 + $0xd4] sm:$0xf] %v7069_v51  ;;  %v6677_v52 = vcombine.high %v10892_v39, %v10664_v58  ;;  %v6676_v20 = vcombine.low %v10892_v39, %v10664_v58  ;;  %v8711_v50 = vld [vmem:[#allocation16 + $0x88] sm:$0xff]   ;;  %v6680_v51 = vcombine.high %v10666_v48, %v10692_v24  ;;  %v8718_v15 = vld [vmem:[#allocation16 + $0x90] sm:$0xff]  }
 0x3e8   : > { %1631 = vst [vmem:[#allocation2 + $0xd8] sm:$0xf] %v7038_v23  ;;  %1630 = vst [vmem:[#allocation2 + $0xcc] sm:$0xf] %v7037_v45  ;;  %v6725_v45 = vcombine.high %v2879_v55, %v10692_v24  ;;  %v6679_v58 = vcombine.low %v10666_v48, %v10692_v24  ;;  %v8735_v48 = vld [vmem:[#allocation16 + $0xa8] sm:$0xff]  }
 0x3ed   : > { %2291 = vmatmul.mubr.bf16.gmra.mrb[20].mxu0 %v6643_v62  ;;  %v10890_v42 = vld [vmem:[#allocation2 + $0xc0] sm:$0xff] }
 0x3ee   : > { %v8693_v61 = vld [vmem:[#allocation2 + $0xbc] ss:$12 sps:$4 sm:$0xff]   ;;  %v8699_v25 = vld [vmem:[#allocation2 + $0xd4] ss:$12 sps:$4 sm:$0xff]   ;;  %v6647_v54 = vcombine.high %v10888_v21, %v10890_v42  ;;  %v6646_v47 = vcombine.low %v10888_v21, %v10890_v42 }
 0x3ef   : > { %7884 = vmatprep.mubr.bf16.mxu1 %v8693_v61  ;;  %v10898_v10 = vld [vmem:[#allocation2 + $0xd8] sm:$0xff]  ;;  %v10900_v7 = vld [vmem:[#allocation2 + $0xcc] sm:$0xff]  ;;  %v8725_v62 = vld [vmem:[#allocation16 + $0x98] sm:$0xff]  }
 0x3f0   : > { %7885 = vmatmul.mubr.bf16.gmra.mrb[16].mxu1 %v8699_v25  ;;  %2298 = vmatprep.mubr.bf16.mxu0 %v6647_v54  ;;  %v6650_v2 = vcombine.high %v10900_v7, %v10898_v10  ;;  %v6649_v23 = vcombine.low %v10900_v7, %v10898_v10  ;;  %v8733_v61 = vld [vmem:[#allocation16 + $0xa0] sm:$0xff]   ;;  %v6724_v25 = vcombine.low %v2879_v55, %v10692_v24 }
 0x3f1   : > { %2716 = vmatprep.mubr.bf16.mxu1 %v6677_v52  ;;  %v6682_v52 = vcombine.low %v10694_v38, %v10723_v57  ;;  %v6686_v54 = vcombine.high %v10743_v35, %v10784_v12  ;;  %v6685_v24 = vcombine.low %v10743_v35, %v10784_v12  ;;  %v6692_v35 = vcombine.high %v10814_v31, %v10856_v3 }
 0x3f2   : > { %v6733_v12 = vcombine.low %v10786_v16, %v10892_v39  ;;  %v6695_v55 = vcombine.high %v10858_v46, %v10888_v21 }
 0x3f5   : > { %2299 = vmatmul.mubr.bf16.gmra.mrb[24].mxu0 %v6646_v47  ;;  %v8736_v47 = vld [vmem:[#allocation16 + $0xb0] sm:$0xff]  }
 0x3f6   : > { %2306 = vmatprep.mubr.bf16.mxu0 %v6650_v2  ;;  %v8737_v2 = vld [vmem:[#allocation16 + $0xb8] sm:$0xff]  }
 0x3f8   : > { %2717 = vmatmul.mubr.bf16.vlgmr.msra.gmra.mrb[20].mxu1 %v6676_v20  ;;  %v6734_v20 = vcombine.high %v10786_v16, %v10892_v39  ;;  %v6697_v16 = vcombine.low %v10890_v42, %v10900_v7 }
 0x3f9   : > { %7889 = vmatpush3.bf16.msra.mxu1 %v10845_v14  ;;  %2724 = vmatprep.mubr.bf16.mxu1 %v6680_v51  ;;  %v6683_v14 = vcombine.high %v10694_v38, %v10723_v57  ;;  %v6689_v38 = vcombine.high %v10892_v39, %v10812_v53  ;;  %v8739_v57 = vld [vmem:[#allocation16 + $0x200] sm:$0xff]   ;;  %v6691_v51 = vcombine.low %v10814_v31, %v10856_v3 }
 0x3fa   : > { %7890 = vmatprep.subr.bf16.mxu1 %v8711_v50  ;;  %v8738_v31 = vld [vmem:[#allocation2 + $0x8] ss:$12 sps:$4 sm:$0xff]   ;;  %v6746_v3 = vcombine.high %v10898_v10, %v10892_v39 }
 0x3fd   : > { %7891 = vmatpush3.bf16.msra.mxu1 %v8711_v50  ;;  %2307 = vmatmul.mubr.bf16.gmra.mrb[28].mxu0 %v6649_v23  ;;  %v6688_v50 = vcombine.low %v10892_v39, %v10812_v53  ;;  %v6694_v53 = vcombine.low %v10858_v46, %v10888_v21  ;;  %v8740_v23 = vld [vmem:[#allocation2 + $0x20] ss:$12 sps:$4 sm:$0xff]   ;;  %v8742_v46 = vld [vmem:[#allocation16 + $0x208] sm:$0xff]   ;;  %v8741_v21 = vld [vmem:[#allocation2 + $0x38] ss:$12 sps:$4 sm:$0xff]  }
 0x3fe   : > { %7892 = vmatprep.subr.bf16.mxu1 %v8718_v15  ;;  %3264 = vmatprep.mubr.bf16.mxu0 %v6725_v45  ;;  %v8743_v45 = vld [vmem:[#allocation16 + $0x210] sm:$0xff]  }
 0x400   : > { %2725 = vmatmul.mubr.bf16.gmra.mrb[24].mxu1 %v6679_v58  ;;  %v8746_v58 = vld [vmem:[#allocation16 + $0x218] sm:$0xff]  }
 0x401   : > { %2732 = vmatprep.mubr.bf16.mxu1 %v6683_v14  ;;  %7893 = vmatpush3.bf16.msra.mxu1 %v8718_v15  ;;  %v6698_v15 = vcombine.high %v10890_v42, %v10900_v7  ;;  %v6745_v42 = vcombine.low %v10898_v10, %v10892_v39  ;;  %v8744_v7 = vld [vmem:[#allocation2 + $0x50] ss:$12 sps:$4 sm:$0xff]   ;;  %v8752_v10 = vld [vmem:[#allocation2 + $0xc8] ss:$12 sps:$4 sm:$0xff]  }
 0x402   : > { %7894 = vmatprep.subr.bf16.mxu1 %v8725_v62  ;;  %v8751_v39 = vld [vmem:[#allocation16 + $0x230] sm:$0xff]  }
 0x405   : > { %7895 = vmatpush3.bf16.msra.mxu1 %v8725_v62  ;;  %3265 = vmatmul.mubr.bf16.vlgmr.msra.gmra.mrb[32].mxu0 %v6724_v25  ;;  %v8745_v62 = vld [vmem:[#allocation2 + $0x80] ss:$12 sps:$4 sm:$0xff]   ;;  %v8750_v25 = vld [vmem:[#allocation16 + $0x228] sm:$0xff]  }
 0x406   : > { %7896 = vmatprep.subr.bf16.mxu1 %v8733_v61  ;;  %3272 = vmatprep.mubr.bf16.mxu0 %v6683_v14  ;;  %v8747_v14 = vld [vmem:[#allocation16 + $0x220] sm:$0xff]  }
 0x408   : > { %2733 = vmatmul.mubr.bf16.gmra.mrb[28].mxu1 %v6682_v52 }
 0x409   : > { %2740 = vmatprep.mubr.bf16.mxu1 %v6686_v54  ;;  %7897 = vmatpush3.bf16.msra.mxu1 %v8733_v61  ;;  %v8748_v61 = vld [vmem:[#allocation2 + $0x98] ss:$12 sps:$4 sm:$0xff]  }
 0x40a   : > { %7898 = vmatprep.subr.bf16.mxu1 %v8735_v48 }
 0x40d   : > { %7899 = vmatpush3.bf16.msra.mxu1 %v8735_v48  ;;  %3273 = vmatmul.mubr.bf16.gmra.mrb[36].mxu0 %v6682_v52  ;;  %v8749_v52 = vld [vmem:[#allocation2 + $0xb0] ss:$12 sps:$4 sm:$0xff]   ;;  %v8754_v48 = vld [vmem:[#allocation16 + $0x238] sm:$0xff]  }
 0x40e   : > { %3280 = vmatprep.mubr.bf16.mxu0 %v6686_v54  ;;  %7900 = vmatprep.subr.bf16.mxu1 %v8736_v47  ;;  %v8753_v54 = vld [vmem:[#allocation2 + $0x20] ss:$12 sps:$4 sm:$0xff]  }
 0x410   : > { %2741 = vmatmul.mubr.bf16.gmra.mrb[32].mxu1 %v6685_v24 }
 0x411   : > { %2748 = vmatprep.mubr.bf16.mxu1 %v6689_v38  ;;  %7901 = vmatpush3.bf16.msra.mxu1 %v8736_v47  ;;  %v8755_v47 = vld [vmem:[#allocation2 + $0x38] ss:$12 sps:$4 sm:$0xff]  }
 0x412   : > { %7902 = vmatprep.subr.bf16.mxu1 %v8737_v2  ;;  %v8758_v38 = vld [vmem:[#allocation2 + $0x98] ss:$12 sps:$4 sm:$0xff]  }
 0x415   : > { %3281 = vmatmul.mubr.bf16.gmra.mrb[40].mxu0 %v6685_v24  ;;  %7903 = vmatpush3.bf16.msra.mxu1 %v8737_v2  ;;  %v8756_v24 = vld [vmem:[#allocation2 + $0x50] ss:$12 sps:$4 sm:$0xff]   ;;  %v8757_v2 = vld [vmem:[#allocation2 + $0x68] ss:$12 sps:$4 sm:$0xff]  }
 0x416   : > { %3288 = vmatprep.mubr.bf16.mxu0 %v6734_v20  ;;  %7920 = vmatprep.subr.bf16.mxu1 %v8739_v57  ;;  %v8760_v20 = vld [vmem:[#allocation2 + $0xc8] ss:$12 sps:$4 sm:$0xff]  }
 0x418   : > { %2749 = vmatmul.mubr.bf16.gmra.mrb[36].mxu1 %v6688_v50  ;;  %v8761_v50 = vld [vmem:[#allocation2 + $0xe0] ss:$12 sps:$4 sm:$0xff]  }
 0x419   : > { %2756 = vmatprep.mubr.bf16.mxu1 %v6692_v35 }
 0x41d   : > { %3289 = vmatmul.mubr.bf16.gmra.mrb[44].mxu0 %v6733_v12  ;;  %v3492_v12 = vld [vmem:[#allocation9 + $0x8] sm:$0xff] }
 0x41e   : > { %3296 = vmatprep.mubr.bf16.mxu0 %v6692_v35  ;;  %v3491_v35 = vld [vmem:[#allocation9] sm:$0xff] }
 0x420   : > { %2757 = vmatmul.mubr.bf16.gmra.mrb[40].mxu1 %v6691_v51 }
 0x421   : > { %2764 = vmatprep.mubr.bf16.mxu1 %v6695_v55 }
 0x425   : > { %3297 = vmatmul.mubr.bf16.gmra.mrb[48].mxu0 %v6691_v51  ;;  %v10951_v51 = vpack.c.bf16 %v3492_v12, %v3491_v35 }
 0x426   : > { %3304 = vmatprep.mubr.bf16.mxu0 %v6695_v55  ;;  %v3493_v55 = vld [vmem:[#allocation9 + $0x10] sm:$0xff] }
 0x427   : > { %8200 = vmatpush3.bf16.msra.mxu0 %v10951_v51 }
 0x428   : > { %2765 = vmatmul.mubr.bf16.gmra.mrb[44].mxu1 %v6694_v53  ;;  %8201 = vmatprep.subr.bf16.mxu0 %v12012_v1 }
 0x429   : > { %2772 = vmatprep.mubr.bf16.mxu1 %v6698_v15 }
 0x42d   : > { %3305 = vmatmul.mubr.bf16.gmra.mrb[52].mxu0 %v6694_v53  ;;  %v3494_v53 = vld [vmem:[#allocation9 + $0x18] sm:$0xff] }
 0x42e   : > { %3312 = vmatprep.mubr.bf16.mxu0 %v6698_v15  ;;  %v10955_v15 = vpack.c.bf16 %v3494_v53, %v3493_v55 }
 0x430   : > { %2773 = vmatmul.mubr.bf16.gmra.mrb[48].mxu1 %v6697_v16  ;;  %8203 = vmatpush3.bf16.msra.mxu0 %v10955_v15 }
 0x431   : > { %7904 = vmatprep.mubr.bf16.mxu1 %v8738_v31  ;;  %8204 = vmatprep.subr.bf16.mxu0 %v12012_v1 }
 0x435   : > { %3313 = vmatmul.mubr.bf16.gmra.mrb[56].mxu0 %v6697_v16 }
 0x436   : > { %3320 = vmatprep.mubr.bf16.mxu0 %v6746_v3 }
 0x438   : > { %7905 = vmatmul.mubr.bf16.vlgmr.msra.gmra.mrb[4].mxu1 %v8740_v23 }
 0x439   : > { %7921 = vmatpush3.bf16.msra.mxu1 %v8739_v57  ;;  %7908 = vmatprep.mubr.bf16.mxu1 %v8741_v21  ;;  %v8759_v57 = vld [vmem:[#allocation2 + $0xb0] ss:$12 sps:$4 sm:$0xff]  }
 0x43a   : > { %7922 = vmatprep.subr.bf16.mxu1 %v8742_v46 }
 0x43d   : > { %7923 = vmatpush3.bf16.msra.mxu1 %v8742_v46  ;;  %3321 = vmatmul.mubr.bf16.gmra.mrb[60].mxu0 %v6745_v42 }
 0x43e   : > { %7924 = vmatprep.subr.bf16.mxu1 %v8743_v45  ;;  %7984 = vmatprep.mubr.msk.f32.mxu0 %vm9500_vm0, %v11989_v34 }
 0x440   : > { %7909 = vmatmul.mubr.bf16.gmra.mrb[8].mxu1 %v8744_v7 }
 0x441   : > { %7925 = vmatpush3.bf16.msra.mxu1 %v8743_v45  ;;  %7912 = vmatprep.mubr.bf16.mxu1 %v8745_v62 }
 0x442   : > { %7926 = vmatprep.subr.bf16.mxu1 %v8746_v58 }
 0x445   : > { %7927 = vmatpush3.bf16.msra.mxu1 %v8746_v58 }
 0x446   : > { %7928 = vmatprep.subr.bf16.mxu1 %v8747_v14 }
 0x448   : > { %7913 = vmatmul.mubr.bf16.gmra.mrb[12].mxu1 %v8748_v61 }
 0x449   : > { %7929 = vmatpush3.bf16.msra.mxu1 %v8747_v14  ;;  %7916 = vmatprep.mubr.bf16.mxu1 %v8749_v52 }
 0x44a   : > { %7930 = vmatprep.subr.bf16.mxu1 %v8750_v25 }
 0x44d   : > { %7931 = vmatpush3.bf16.msra.mxu1 %v8750_v25 }
 0x44e   : > { %7932 = vmatprep.subr.bf16.mxu1 %v8751_v39 }
 0x450   : > { %7917 = vmatmul.mubr.bf16.gmra.mrb[16].mxu1 %v8752_v10 }
 0x451   : > { %7933 = vmatpush3.bf16.msra.mxu1 %v8751_v39  ;;  %7936 = vmatprep.mubr.bf16.mxu1 %v8753_v54 }
 0x452   : > { %7934 = vmatprep.subr.bf16.mxu1 %v8754_v48 }
 0x455   : > { %7935 = vmatpush3.bf16.msra.mxu1 %v8754_v48 }
 0x458   : > { %7937 = vmatmul.mubr.bf16.vlgmr.msra.gmra.mrb[4].mxu1 %v8755_v47 }
 0x459   : > { %7940 = vmatprep.mubr.bf16.mxu1 %v8756_v24 }
 0x460   : > { %7941 = vmatmul.mubr.bf16.gmra.mrb[8].mxu1 %v8757_v2 }
 0x461   : > { %7944 = vmatprep.mubr.bf16.mxu1 %v8758_v38 }
 0x468   : > { %7945 = vmatmul.mubr.bf16.gmra.mrb[12].mxu1 %v8759_v57 }
 0x469   : > { %7948 = vmatprep.mubr.bf16.mxu1 %v8760_v20  ;;  %v3495_v20 = vld [vmem:[#allocation9 + $0x20] sm:$0xff] }
 0x470   : > { %7949 = vmatmul.mubr.bf16.gmra.mrb[16].mxu1 %v8761_v50  ;;  %v3496_v50 = vld [vmem:[#allocation9 + $0x28] sm:$0xff] }
 0x471   : > { %v10971_v35 = vpack.c.bf16 %v3496_v50, %v3495_v20 }
 0x473   : > { %8206 = vmatpush3.bf16.msra.mxu0 %v10971_v35 }
 0x474   : > { %8207 = vmatprep.subr.bf16.mxu0 %v12012_v1 }
 0x496   : > { %v7272_v16 = vpop.f32.mrb[0].mxu0 }
 0x497   : > { %v7273_v31 = vpop.f32.mrb[1].mxu0 }
 0x498   : > { %v7274_v3 = vadd.f32 %v7273_v31, %v7272_v16  ;;  %v7275_v23 = vpop.f32.mrb[2].mxu0 }
 0x499   : > { %v7276_v46 = vpop.f32.mrb[3].mxu0 }
 0x49a   : > { %v7277_v21 = vadd.f32 %v7276_v46, %v7275_v23 }
 0x4a0   : > { %v7278_v45 = vpop.f32.mrb[4].mxu0 }
 0x4a1   : > { %v7279_v42 = vpop.f32.mrb[5].mxu0 }
 0x4a2   : > { %v10959_v7 = vadd.f32 %v7279_v42, %v7278_v45  ;;  %v7281_v58 = vpop.f32.mrb[6].mxu0 }
 0x4a3   : > { %v7282_v62 = vpop.f32.mrb[7].mxu0 }
 0x4a4   : > { %v10961_v14 = vadd.f32 %v7282_v62, %v7281_v58 }
 0x4a8   : > { %v7284_v61 = vpop.f32.mrb[8].mxu0 }
 0x4a9   : > { %v7285_v25 = vpop.f32.mrb[9].mxu0 }
 0x4aa   : > { %v10963_v52 = vadd.f32 %v7285_v25, %v7284_v61  ;;  %v7287_v39 = vpop.f32.mrb[10].mxu0  ;;  %v3497_v25 = vld [vmem:[#allocation9 + $0x30] sm:$0xff] }
 0x4ab   : > { %v7288_v10 = vpop.f32.mrb[11].mxu0 }
 0x4ac   : > { %v10965_v48 = vadd.f32 %v7288_v10, %v7287_v39  ;;  %v3498_v39 = vld [vmem:[#allocation9 + $0x38] sm:$0xff]  ;;  %v3499_v10 = vld [vmem:[#allocation9 + $0x40] sm:$0xff] }
 0x4b0   : > { %v7290_v54 = vpop.f32.mrb[12].mxu0 }
 0x4b1   : > { %v7291_v47 = vpop.f32.mrb[13].mxu0 }
 0x4b2   : > { %v10967_v24 = vadd.f32 %v7291_v47, %v7290_v54  ;;  %v7293_v2 = vpop.f32.mrb[14].mxu0  ;;  %v10983_v54 = vpack.c.bf16 %v3498_v39, %v3497_v25  ;;  %v3500_v47 = vld [vmem:[#allocation9 + $0x48] sm:$0xff] }
 0x4b3   : > { %v7294_v38 = vpop.f32.mrb[15].mxu0 }
 0x4b4   : > { %v10969_v57 = vadd.f32 %v7294_v38, %v7293_v2  ;;  %8209 = vmatpush3.bf16.msra.mxu0 %v10983_v54  ;;  %v10986_v38 = vpack.c.bf16 %v3500_v47, %v3499_v10 }
 0x4b5   : > { %8210 = vmatprep.subr.bf16.mxu0 %v12012_v1 }
 0x4b8   : > { %v7296_v12 = vpop.f32.mrb[16].mxu0  ;;  %8212 = vmatpush3.bf16.msra.mxu0 %v10986_v38 }
 0x4b9   : > { %v7297_v55 = vpop.f32.mrb[17].mxu0  ;;  %8213 = vmatprep.subr.bf16.mxu0 %v12012_v1 }
 0x4ba   : > { %v10975_v53 = vadd.f32 %v7297_v55, %v7296_v12  ;;  %v7299_v16 = vpop.f32.mrb[18].mxu0 }
 0x4bb   : > { %v7300_v31 = vpop.f32.mrb[19].mxu0 }
 0x4bc   : > { %v10977_v23 = vadd.f32 %v7300_v31, %v7299_v16 }
 0x4c0   : > { %v7302_v46 = vpop.f32.mrb[20].mxu0 }
 0x4c1   : > { %v7303_v45 = vpop.f32.mrb[21].mxu0 }
 0x4c2   : > { %v10979_v42 = vadd.f32 %v7303_v45, %v7302_v46  ;;  %v7305_v58 = vpop.f32.mrb[22].mxu0 }
 0x4c3   : > { %v7306_v62 = vpop.f32.mrb[23].mxu0 }
 0x4c4   : > { %v10981_v61 = vadd.f32 %v7306_v62, %v7305_v58 }
 0x4c8   : > { %v7308_v2 = vpop.f32.mrb[24].mxu0 }
 0x4c9   : > { %v7309_v20 = vpop.f32.mrb[25].mxu0 }
 0x4ca   : > { %v10989_v50 = vadd.f32 %v7309_v20, %v7308_v2  ;;  %v7311_v12 = vpop.f32.mrb[26].mxu0 }
 0x4cb   : > { %v7352_v55 = vpop.f32.mrb[20].mxu1  ;;  %v7312_v16 = vpop.f32.mrb[27].mxu0 }
 0x4cc   : > { %v7353_v31 = vpop.f32.mrb[21].mxu1  ;;  %v10991_v46 = vadd.f32 %v7312_v16, %v7311_v12 }
 0x4cd   : > { %v7354_v45 = vadd.f32 %v7353_v31, %v7352_v55  ;;  %v7355_v58 = vpop.f32.mrb[22].mxu1  ;;  %v3501_v55 = vld [vmem:[#allocation9 + $0x50] sm:$0xff]  ;;  %v3502_v31 = vld [vmem:[#allocation9 + $0x58] sm:$0xff] }
 0x4ce   : > { %v7356_v62 = vpop.f32.mrb[23].mxu1  ;;  %v10999_v40 = vpack.c.bf16 %v3502_v31, %v3501_v55 }
 0x4cf   : > { %v8265_v25 = vadd.f32 %v7354_v45, %v7274_v3  ;;  %v7357_v39 = vadd.f32 %v7356_v62, %v7355_v58  ;;  %v3504_v3 = vld [vmem:[#allocation9 + $0x68] sm:$0xff] }
 0x4d0   : > { %v7314_v10 = vpop.f32.mrb[28].mxu0  ;;  %8215 = vmatpush3.bf16.msra.mxu0 %v10999_v40  ;;  %v11003_v58 = vpack.c.bf16 %v3504_v3, %v3503_v63 }
 0x4d1   : > { %v8271_v47 = vadd.f32 %v7357_v39, %v7277_v21  ;;  %v7315_v9 = vpop.f32.mrb[29].mxu0  ;;  %8216 = vmatprep.subr.bf16.mxu0 %v12012_v1 }
 0x4d2   : > { %v10995_v2 = vadd.f32 %v7315_v9, %v7314_v10  ;;  %v7317_v20 = vpop.f32.mrb[30].mxu0 }
 0x4d3   : > { %v7358_v37 = vpop.f32.mrb[24].mxu1  ;;  %v7318_v29 = vpop.f32.mrb[31].mxu0 }
 0x4d4   : > { %v7359_v27 = vpop.f32.mrb[25].mxu1  ;;  %v10997_v12 = vadd.f32 %v7318_v29, %v7317_v20  ;;  %8218 = vmatpush3.bf16.msra.mxu0 %v11003_v58 }
 0x4d5   : > { %v7360_v16 = vadd.f32 %v7359_v27, %v7358_v37  ;;  %v7361_v49 = vpop.f32.mrb[26].mxu1  ;;  %v3505_v27 = vld [vmem:[#allocation9 + $0x70] sm:$0xff]  ;;  %v3506_v37 = vld [vmem:[#allocation9 + $0x78] sm:$0xff]  ;;  %8219 = vmatprep.subr.bf16.mxu0 %v12012_v1 }
 0x4d6   : > { %v7362_v6 = vpop.f32.mrb[27].mxu1 }
 0x4d7   : > { %v8262_v21 = vadd.f32 %v7360_v16, %v10959_v7  ;;  %v7363_v45 = vadd.f32 %v7362_v6, %v7361_v49  ;;  %v11010_v6 = vpack.c.bf16 %v3506_v37, %v3505_v27 }
 0x4d8   : > { %v7432_v9 = vpop.f32.mrb[32].mxu0 }
 0x4d9   : > { %v8268_v29 = vadd.f32 %v7363_v45, %v10961_v14  ;;  %v7433_v62 = vpop.f32.mrb[33].mxu0  ;;  %8221 = vmatpush3.bf16.msra.mxu0 %v11010_v6 }
 0x4da   : > { %v7434_v39 = vadd.f32 %v7433_v62, %v7432_v9  ;;  %v7435_v10 = vpop.f32.mrb[34].mxu0  ;;  %8222 = vmatprep.subr.bf16.mxu0 %v12012_v1 }
 0x4db   : > { %v7364_v20 = vpop.f32.mrb[28].mxu1  ;;  %v7436_v55 = vpop.f32.mrb[35].mxu0 }
 0x4dc   : > { %v7365_v31 = vpop.f32.mrb[29].mxu1  ;;  %v7437_v26 = vadd.f32 %v7436_v55, %v7435_v10  ;;  %v11007_v7 = vadd.f32 %v8265_v25, %v7434_v39 }
 0x4dd   : > { %v7366_v63 = vadd.f32 %v7365_v31, %v7364_v20  ;;  %v7367_v49 = vpop.f32.mrb[30].mxu1 }
 0x4de   : > { %v7368_v14 = vpop.f32.mrb[31].mxu1  ;;  %v11013_v16 = vadd.f32 %v8271_v47, %v7437_v26 }
 0x4df   : > { %v8277_v3 = vadd.f32 %v7366_v63, %v10963_v52  ;;  %v7369_v45 = vadd.f32 %v7368_v14, %v7367_v49 }
 0x4e0   : > { %v7438_v9 = vpop.f32.mrb[36].mxu0 }
 0x4e1   : > { %v8283_v25 = vadd.f32 %v7369_v45, %v10965_v48  ;;  %v7439_v62 = vpop.f32.mrb[37].mxu0 }
 0x4e2   : > { %v7440_v27 = vadd.f32 %v7439_v62, %v7438_v9  ;;  %v7441_v37 = vpop.f32.mrb[38].mxu0 }
 0x4e3   : > { %v7370_v39 = vpop.f32.mrb[32].mxu1  ;;  %v7442_v10 = vpop.f32.mrb[39].mxu0 }
 0x4e4   : > { %v7371_v20 = vpop.f32.mrb[33].mxu1  ;;  %v7443_v55 = vadd.f32 %v7442_v10, %v7441_v37  ;;  %v11019_v31 = vadd.f32 %v8262_v21, %v7440_v27 }
 0x4e5   : > { %v7372_v26 = vadd.f32 %v7371_v20, %v7370_v39  ;;  %v7373_v47 = vpop.f32.mrb[34].mxu1 }
 0x4e6   : > { %v7374_v52 = vpop.f32.mrb[35].mxu1  ;;  %v11021_v63 = vadd.f32 %v8268_v29, %v7443_v55 }
 0x4e7   : > { %v8274_v49 = vadd.f32 %v7372_v26, %v10967_v24  ;;  %v7375_v14 = vadd.f32 %v7374_v52, %v7373_v47 }
 0x4e8   : > { %v7444_v48 = vpop.f32.mrb[40].mxu0 }
 0x4e9   : > { %v8280_v45 = vadd.f32 %v7375_v14, %v10969_v57  ;;  %v7445_v60 = vpop.f32.mrb[41].mxu0 }
 0x4ea   : > { %v7446_v9 = vadd.f32 %v7445_v60, %v7444_v48  ;;  %v7447_v62 = vpop.f32.mrb[42].mxu0 }
 0x4eb   : > { %v7376_v33 = vpop.f32.mrb[36].mxu1  ;;  %v7448_v18 = vpop.f32.mrb[43].mxu0 }
 0x4ec   : > { %v7377_v13 = vpop.f32.mrb[37].mxu1  ;;  %v7449_v37 = vadd.f32 %v7448_v18, %v7447_v62  ;;  %v11025_v21 = vadd.f32 %v8277_v3, %v7446_v9 }
 0x4ed   : > { %v7378_v27 = vadd.f32 %v7377_v13, %v7376_v33  ;;  %v7379_v39 = vpop.f32.mrb[38].mxu1 }
 0x4ee   : > { %v7380_v10 = vpop.f32.mrb[39].mxu1  ;;  %v11027_v29 = vadd.f32 %v8283_v25, %v7449_v37 }
 0x4ef   : > { %v8289_v24 = vadd.f32 %v7378_v27, %v10975_v53  ;;  %v7381_v20 = vadd.f32 %v7380_v10, %v7379_v39 }
 0x4f0   : > { %v7450_v55 = vpop.f32.mrb[44].mxu0 }
 0x4f1   : > { %v8295_v57 = vadd.f32 %v7381_v20, %v10977_v23  ;;  %v7451_v26 = vpop.f32.mrb[45].mxu0 }
 0x4f2   : > { %v7452_v60 = vadd.f32 %v7451_v26, %v7450_v55  ;;  %v7453_v47 = vpop.f32.mrb[46].mxu0 }
 0x4f3   : > { %v7382_v52 = vpop.f32.mrb[40].mxu1  ;;  %v7454_v14 = vpop.f32.mrb[47].mxu0 }
 0x4f4   : > { %v7383_v48 = vpop.f32.mrb[41].mxu1  ;;  %v7455_v18 = vadd.f32 %v7454_v14, %v7453_v47  ;;  %v11031_v3 = vadd.f32 %v8274_v49, %v7452_v60 }
 0x4f5   : > { %v7384_v13 = vadd.f32 %v7383_v48, %v7382_v52  ;;  %v7385_v33 = vpop.f32.mrb[42].mxu1 }
 0x4f6   : > { %v7386_v9 = vpop.f32.mrb[43].mxu1  ;;  %v11033_v25 = vadd.f32 %v8280_v45, %v7455_v18 }
 0x4f7   : > { %v8286_v53 = vadd.f32 %v7384_v13, %v10979_v42  ;;  %v7387_v62 = vadd.f32 %v7386_v9, %v7385_v33 }
 0x4f8   : > { %v7456_v37 = vpop.f32.mrb[48].mxu0 }
 0x4f9   : > { %v8292_v23 = vadd.f32 %v7387_v62, %v10981_v61  ;;  %v7457_v27 = vpop.f32.mrb[49].mxu0 }
 0x4fa   : > { %v7458_v39 = vadd.f32 %v7457_v27, %v7456_v37  ;;  %v7459_v10 = vpop.f32.mrb[50].mxu0 }
 0x4fb   : > { %v7388_v20 = vpop.f32.mrb[44].mxu1  ;;  %v7460_v55 = vpop.f32.mrb[51].mxu0 }
 0x4fc   : > { %v7389_v26 = vpop.f32.mrb[45].mxu1  ;;  %v7461_v47 = vadd.f32 %v7460_v55, %v7459_v10  ;;  %v11037_v49 = vadd.f32 %v8289_v24, %v7458_v39 }
 0x4fd   : > { %v7390_v60 = vadd.f32 %v7389_v26, %v7388_v20  ;;  %v7391_v52 = vpop.f32.mrb[46].mxu1 }
 0x4fe   : > { %v7392_v14 = vpop.f32.mrb[47].mxu1  ;;  %v11039_v45 = vadd.f32 %v8295_v57, %v7461_v47 }
 0x4ff   : > { %v8301_v42 = vadd.f32 %v7390_v60, %v10989_v50  ;;  %v7393_v48 = vadd.f32 %v7392_v14, %v7391_v52 }
 0x500   : > { %v7462_v18 = vpop.f32.mrb[52].mxu0 }
 0x501   : > { %v8307_v61 = vadd.f32 %v7393_v48, %v10991_v46  ;;  %v7463_v13 = vpop.f32.mrb[53].mxu0 }
 0x502   : > { %v7464_v33 = vadd.f32 %v7463_v13, %v7462_v18  ;;  %v7465_v9 = vpop.f32.mrb[54].mxu0 }
 0x503   : > { %v7394_v62 = vpop.f32.mrb[48].mxu1  ;;  %v7466_v37 = vpop.f32.mrb[55].mxu0 }
 0x504   : > { %v7395_v27 = vpop.f32.mrb[49].mxu1  ;;  %v7467_v10 = vadd.f32 %v7466_v37, %v7465_v9  ;;  %v8287_v24 = vadd.f32 %v8286_v53, %v7464_v33 }
 0x505   : > { %v7396_v39 = vadd.f32 %v7395_v27, %v7394_v62  ;;  %v7397_v20 = vpop.f32.mrb[50].mxu1 }
 0x506   : > { %v7398_v55 = vpop.f32.mrb[51].mxu1  ;;  %v8293_v26 = vadd.f32 %v8292_v23, %v7467_v10 }
 0x507   : > { %v8298_v57 = vadd.f32 %v7396_v39, %v10995_v2  ;;  %v7399_v47 = vadd.f32 %v7398_v55, %v7397_v20 }
 0x508   : > { %v7468_v50 = vpop.f32.mrb[56].mxu0 }
 0x509   : > { %v8304_v60 = vadd.f32 %v7399_v47, %v10997_v12  ;;  %v7469_v52 = vpop.f32.mrb[57].mxu0  ;;  %v6772_v47 = vld [vmem:[#allocation18] ss:$0 sm:$0xff] }
 0x50a   : > { %v7470_v46 = vadd.f32 %v7469_v52, %v7468_v50  ;;  %v7471_v14 = vpop.f32.mrb[58].mxu0 }
 0x50b   : > { %v7472_v48 = vpop.f32.mrb[59].mxu0 }
 0x50c   : > { %v7473_v18 = vadd.f32 %v7472_v48, %v7471_v14  ;;  %v8302_v13 = vadd.f32 %v8301_v42, %v7470_v46 }
 0x50e   : > { %v11045_v0 = vadd.f32 %v8307_v61, %v7473_v18 }
 0x510   : > { %v7474_v9 = vpop.f32.mrb[60].mxu0 }
 0x511   : > { %v7475_v53 = vpop.f32.mrb[61].mxu0 }
 0x512   : > { %v7476_v33 = vadd.f32 %v7475_v53, %v7474_v9  ;;  %v7477_v62 = vpop.f32.mrb[62].mxu0 }
 0x513   : > { %v7478_v37 = vpop.f32.mrb[63].mxu0 }
 0x514   : > { %v7479_v23 = vadd.f32 %v7478_v37, %v7477_v62  ;;  %v8299_v27 = vadd.f32 %v8298_v57, %v7476_v33 }
 0x516   : > { %v8305_v2 = vadd.f32 %v8304_v60, %v7479_v23 }
 0x52b   : > { %v7938_v10 = vpop.f32.mrb[4].mxu1 }
 0x52c   : > { %v8264_v39 = vadd.f32 %v11019_v31, %v7938_v10  ;;  %v3363_v12 = vpop.f32.mrb[5].mxu1 }
 0x52d   : > { %v8267_v20 = vadd.f32 %v11007_v7, %v3363_v12  ;;  %v7939_v55 = vpop.f32.mrb[6].mxu1 }
 0x52e   : > { %v8270_v42 = vadd.f32 %v11021_v63, %v7939_v55  ;;  %v3366_v61 = vpop.f32.mrb[7].mxu1  ;;  %v11055_v14 = vadd.f32 %v8264_v39, %v6772_v47 }
 0x52f   : > { %v8273_v50 = vadd.f32 %v11013_v16, %v3366_v61  ;;  %v11051_v52 = vadd.f32 %v8267_v20, %v6772_v47 }
 0x530   : > { %v11060_v48 = vadd.f32 %v8270_v42, %v6772_v47 }
 0x531   : > { %v11053_v46 = vadd.f32 %v8273_v50, %v6772_v47 }
 0x533   : > { %v3465_v57 = vadd.f32 %v11053_v46, %v11051_v52  ;;  %v7942_v31 = vpop.f32.mrb[8].mxu1 }
 0x534   : > { %v8276_v60 = vadd.f32 %v11031_v3, %v7942_v31  ;;  %v3379_v7 = vpop.f32.mrb[9].mxu1 }
 0x535   : > { %v3466_v63 = vadd.f32 %v3465_v57, %v11055_v14  ;;  %v8279_v18 = vadd.f32 %v11025_v21, %v3379_v7  ;;  %v7943_v16 = vpop.f32.mrb[10].mxu1 }
 0x536   : > { %v8282_v9 = vadd.f32 %v11033_v25, %v7943_v16  ;;  %v3382_v53 = vpop.f32.mrb[11].mxu1  ;;  %v11073_v21 = vadd.f32 %v8276_v60, %v6772_v47 }
 0x537   : > { %v11065_v33 = vadd.f32 %v8279_v18, %v6772_v47  ;;  %v3467_v62 = vadd.f32 %v3466_v63, %v11060_v48  ;;  %v8285_v37 = vadd.f32 %v11027_v29, %v3382_v53 }
 0x538   : > { %v11078_v57 = vadd.f32 %v8282_v9, %v6772_v47 }
 0x539   : > { %v3468_v23 = vadd.f32 %v3467_v62, %v11065_v33  ;;  %v11070_v3 = vadd.f32 %v8285_v37, %v6772_v47 }
 0x53b   : > { %v3469_v10 = vadd.f32 %v3468_v23, %v11070_v3  ;;  %v7946_v39 = vpop.f32.mrb[12].mxu1 }
 0x53c   : > { %v8288_v12 = vadd.f32 %v8287_v24, %v7946_v39  ;;  %v3395_v20 = vpop.f32.mrb[13].mxu1 }
 0x53d   : > { %v8291_v25 = vadd.f32 %v11037_v49, %v3395_v20  ;;  %v7947_v55 = vpop.f32.mrb[14].mxu1  ;;  %v3470_v50 = vadd.f32 %v3469_v10, %v11073_v21 }
 0x53e   : > { %v8294_v42 = vadd.f32 %v8293_v26, %v7947_v55  ;;  %v3398_v61 = vpop.f32.mrb[15].mxu1  ;;  %v11085_v63 = vadd.f32 %v8288_v12, %v6772_v47 }
 0x53f   : > { %v8297_v29 = vadd.f32 %v11039_v45, %v3398_v61  ;;  %v11080_v31 = vadd.f32 %v8291_v25, %v6772_v47  ;;  %v3471_v24 = vadd.f32 %v3470_v50, %v11078_v57 }
 0x540   : > { %v11089_v16 = vadd.f32 %v8294_v42, %v6772_v47 }
 0x541   : > { %v11082_v7 = vadd.f32 %v8297_v29, %v6772_v47  ;;  %v3472_v23 = vrot.slane %v3471_v24, 4 }
 0x543   : > { %v3478_v49 = vadd.f32 %v11082_v7, %v11080_v31  ;;  %v7950_v60 = vpop.f32.mrb[16].mxu1  ;;  %v3473_v55 = vadd.f32 %v3472_v23, %v3471_v24 }
 0x544   : > { %v8300_v26 = vadd.f32 %v8299_v27, %v7950_v60  ;;  %v3411_v18 = vpop.f32.mrb[17].mxu1 }
 0x545   : > { %v3479_v45 = vadd.f32 %v3478_v49, %v11085_v63  ;;  %v8303_v9 = vadd.f32 %v8302_v13, %v3411_v18  ;;  %v7951_v53 = vpop.f32.mrb[18].mxu1 }
 0x546   : > { %v8306_v62 = vadd.f32 %v8305_v2, %v7951_v53  ;;  %v3414_v37 = vpop.f32.mrb[19].mxu1  ;;  %v11096_v27 = vadd.f32 %v8300_v26, %v6772_v47  ;;  %v3474_v2 = vrot.slane %v3473_v55, 2 }
 0x547   : > { %v3461_v10 = vadd.f32 %v8303_v9, %v6772_v47  ;;  %v3480_v39 = vadd.f32 %v3479_v45, %v11089_v16  ;;  %v8309_v12 = vadd.f32 %v11045_v0, %v3414_v37  ;;  %v12014_v37 = vld [vmem:[#allocation38_spill] sm:$0xff] }
 0x548   : > { %v11099_v61 = vadd.f32 %v8306_v62, %v6772_v47  ;;  %v3475_v60 = vadd.f32 %v3474_v2, %v3473_v55 }
 0x549   : > { %v3481_v20 = vadd.f32 %v3480_v39, %v3461_v10  ;;  %v11094_v25 = vadd.f32 %v8309_v12, %v6772_v47 }
 0x54a   : > { %v3476_v0 = vrot.slane %v3475_v60, 1 }
 0x54b   : > { %v3482_v42 = vadd.f32 %v3481_v20, %v11094_v25 }
 0x54c   : > { %v3477_v53 = vadd.f32 %v3476_v0, %v3475_v60 }
 0x54d   : > { %v3483_v13 = vadd.f32 %v3482_v42, %v11096_v27 }
 0x54f   : > { %v3484_v50 = vadd.f32 %v3483_v13, %v11099_v61 }
 0x551   : > { %v3485_v29 = vrot.slane %v3484_v50, 4 }
 0x553   : > { %v3486_v49 = vadd.f32 %v3485_v29, %v3484_v50 }
 0x555   : > { %v3487_v18 = vrot.slane %v3486_v49, 2 }
 0x557   : > { %v3488_v45 = vadd.f32 %v3487_v18, %v3486_v49 }
 0x559   : > { %v3489_v9 = vrot.slane %v3488_v45, 1 }
 0x55b   : > { %v3490_v24 = vadd.f32 %v3489_v9, %v3488_v45 }
 0x55d   : > { %v3509_v26 = vsel %vm1003_vm1, %v3490_v24, %v3477_v53 }
 0x55e   : > { %7985 = vmatmul.mubr.f32.vlgmr.msra.gmra.mrb[64].mxu0 %v3509_v26 }
 0x55f   : > { %8224 = vmatpush3.bf16.msra.mxu0 %v10951_v51  ;;  %8019 = vmatprep.mubr.msk.f32.mxu0 %vm9500_vm0, %v11989_v34 }
 0x560   : > { %8225 = vmatprep.subr.bf16.mxu0 %v12012_v1 }
 0x563   : > { %8227 = vmatpush3.bf16.msra.mxu0 %v10955_v15 }
 0x564   : > { %8228 = vmatprep.subr.bf16.mxu0 %v12012_v1 }
 0x567   : > { %8230 = vmatpush3.bf16.msra.mxu0 %v10971_v35  ;;  %v12013_v35 = vld [vmem:[#allocation37_spill] sm:$0xff] }
 0x568   : > { %8231 = vmatprep.subr.bf16.mxu0 %v12012_v1 }
 0x56b   : > { %8233 = vmatpush3.bf16.msra.mxu0 %v10983_v54 }
 0x56c   : > { %8234 = vmatprep.subr.bf16.mxu0 %v12012_v1 }
 0x56f   : > { %8236 = vmatpush3.bf16.msra.mxu0 %v10986_v38 }
 0x570   : > { %8237 = vmatprep.subr.bf16.mxu0 %v12012_v1 }
 0x573   : > { %8239 = vmatpush3.bf16.msra.mxu0 %v10999_v40 }
 0x574   : > { %8240 = vmatprep.subr.bf16.mxu0 %v12012_v1 }
 0x577   : > { %8242 = vmatpush3.bf16.msra.mxu0 %v11003_v58 }
 0x578   : > { %8243 = vmatprep.subr.bf16.mxu0 %v12012_v1 }
 0x57b   : > { %8245 = vmatpush3.bf16.msra.mxu0 %v11010_v6 }
 0x631   : > { %v3577_v34 = vpop.f32.mrb[64].mxu0 }
 0x632   : > { %v3581_v51 = vmul.f32 0.0078125, %v3577_v34  ;;  %v7986_v15 = vpop.f32.mrb[65].mxu0 }
 0x634   : > { %v3589_v54 = vrot.slane %v3581_v51, %v12013_v35 }
 0x636   : > { %v3590_v47 = vcombine.high %v3589_v54, %v3589_v54  ;;  %v3597_v38 = vrot.slane %v3589_v54, %v12013_v35 }
 0x638   : > { %v3604_v62 = vrot.slane %v3590_v47, %v12013_v35  ;;  %v3608_v40 = vrot.slane %v3597_v38, %v12014_v37 }
 0x63a   : > { %v3612_v23 = vrot.slane %v3604_v62, %v12014_v37  ;;  %v11127_v58 = vsub.f32 %v11051_v52, %v3608_v40  ;;  %v11130_v1 = vsub.f32 %v11053_v46, %v3608_v40  ;;  %v11139_v12 = vsub.f32 %v11055_v14, %v3608_v40 }
 0x63b   : > { %v11149_v46 = vsub.f32 %v11060_v48, %v3608_v40  ;;  %v11168_v50 = vsub.f32 %v11070_v3, %v3608_v40  ;;  %v11178_v18 = vsub.f32 %v11073_v21, %v3608_v40  ;;  %v11188_v53 = vsub.f32 %v11078_v57, %v3608_v40 }
 0x63c   : > { %v11133_v6 = vsub.f32 %v11080_v31, %v3612_v23  ;;  %v11136_v39 = vsub.f32 %v11082_v7, %v3612_v23  ;;  %v11142_v20 = vsub.f32 %v11085_v63, %v3612_v23  ;;  %v3631_v55 = vmul.f32 %v11127_v58, %v11127_v58 }
 0x63d   : > { %v3632_v52 = vmul.f32 %v11130_v1, %v11130_v1  ;;  %v11152_v31 = vsub.f32 %v11089_v16, %v3612_v23  ;;  %v11159_v63 = vsub.f32 %v11065_v33, %v3608_v40  ;;  %v11161_v42 = vsub.f32 %v3461_v10, %v3612_v23 }
 0x63e   : > { %v3639_v7 = vmul.f32 %v11133_v6, %v11133_v6  ;;  %v3640_v14 = vmul.f32 %v11136_v39, %v11136_v39  ;;  %v3633_v13 = vmul.f32 %v11139_v12, %v11139_v12  ;;  %v3641_v48 = vmul.f32 %v11142_v20, %v11142_v20 }
 0x63f   : > { %v3647_v2 = vadd.f32 %v3632_v52, %v3631_v55  ;;  %v11171_v29 = vsub.f32 %v11094_v25, %v3612_v23  ;;  %v3634_v33 = vmul.f32 %v11149_v46, %v11149_v46  ;;  %v3642_v10 = vmul.f32 %v11152_v31, %v11152_v31 }
 0x640   : > { %v3660_v16 = vadd.f32 %v3640_v14, %v3639_v7  ;;  %v11181_v0 = vsub.f32 %v11096_v27, %v3612_v23  ;;  %v3635_v3 = vmul.f32 %v11159_v63, %v11159_v63  ;;  %v3643_v25 = vmul.f32 %v11161_v42, %v11161_v42 }
 0x641   : > { %v3648_v49 = vadd.f32 %v3647_v2, %v3633_v13  ;;  %v11191_v24 = vsub.f32 %v11099_v61, %v3612_v23  ;;  %v3636_v21 = vmul.f32 %v11168_v50, %v11168_v50  ;;  %v3644_v27 = vmul.f32 %v11171_v29, %v11171_v29 }
 0x642   : > { %v3661_v60 = vadd.f32 %v3660_v16, %v3641_v48  ;;  %v3637_v51 = vmul.f32 %v11178_v18, %v11178_v18  ;;  %v3645_v15 = vmul.f32 %v11181_v0, %v11181_v0  ;;  %v3638_v61 = vmul.f32 %v11188_v53, %v11188_v53 }
 0x643   : > { %v3649_v45 = vadd.f32 %v3648_v49, %v3634_v33  ;;  %v3646_v47 = vmul.f32 %v11191_v24, %v11191_v24 }
 0x644   : > { %v3662_v9 = vadd.f32 %v3661_v60, %v3642_v10 }
 0x645   : > { %v3650_v26 = vadd.f32 %v3649_v45, %v3635_v3  ;;  %v8763_v45 = vld [vmem:[#allocation19 + $0x100] sm:$0xff]  }
 0x646   : > { %v3663_v34 = vadd.f32 %v3662_v9, %v3643_v25  ;;  %v8762_v25 = vld [vmem:[#allocation19 + $0x140] sm:$0xff]   ;;  %7530 = vmatprep.subr.bf16.mxu1 %v8763_v45 }
 0x647   : > { %v3651_v54 = vadd.f32 %v3650_v26, %v3636_v21  ;;  %v8764_v9 = vld [vmem:[#allocation19 + $0xc0] sm:$0xff]   ;;  %v8765_v21 = vld [vmem:[#allocation19 + $0x148] sm:$0xff]   ;;  %8022 = vmatprep.subr.bf16.mxu0 %v8762_v25 }
 0x648   : > { %v3664_v57 = vadd.f32 %v3663_v34, %v3644_v27  ;;  %v8766_v27 = vld [vmem:[#allocation19 + $0x108] sm:$0xff]   ;;  %7531 = vmatpush3.bf16.msra.mxu1 %v8764_v9  ;;  %v8768_v34 = vld [vmem:[#allocation19 + $0x150] sm:$0xff]  }
 0x649   : > { %v3652_v38 = vadd.f32 %v3651_v54, %v3637_v51  ;;  %v8767_v26 = vld [vmem:[#allocation19 + $0xc8] sm:$0xff]   ;;  %7532 = vmatprep.subr.bf16.mxu1 %v8766_v27  ;;  %v8769_v51 = vld [vmem:[#allocation19 + $0x110] sm:$0xff]   ;;  %v8771_v54 = vld [vmem:[#allocation19 + $0x158] sm:$0xff]  }
 0x64a   : > { %v3665_v62 = vadd.f32 %v3664_v57, %v3645_v15  ;;  %v8770_v15 = vld [vmem:[#allocation19 + $0xd0] sm:$0xff]   ;;  %v8772_v57 = vld [vmem:[#allocation19 + $0x118] sm:$0xff]  }
 0x64b   : > { %v3653_v40 = vadd.f32 %v3652_v38, %v3638_v61  ;;  %v8773_v61 = vld [vmem:[#allocation19 + $0xd8] sm:$0xff]   ;;  %v8775_v38 = vld [vmem:[#allocation19 + $0x120] sm:$0xff]  }
 0x64c   : > { %v3666_v23 = vadd.f32 %v3665_v62, %v3646_v47  ;;  %7533 = vmatpush3.bf16.msra.mxu1 %v8767_v26  ;;  %v8774_v47 = vld [vmem:[#allocation19 + $0x160] sm:$0xff]  }
 0x64d   : > { %v3654_v55 = vrot.slane %v3653_v40, 4  ;;  %7534 = vmatprep.subr.bf16.mxu1 %v8769_v51  ;;  %v8776_v62 = vld [vmem:[#allocation19 + $0xe0] sm:$0xff]  }
 0x64e   : > { %v3667_v52 = vrot.slane %v3666_v23, 4 }
 0x64f   : > { %v3655_v7 = vadd.f32 %v3654_v55, %v3653_v40  ;;  %v8777_v40 = vld [vmem:[#allocation19 + $0x168] sm:$0xff]  }
 0x650   : > { %v3668_v14 = vadd.f32 %v3667_v52, %v3666_v23  ;;  %7535 = vmatpush3.bf16.msra.mxu1 %v8770_v15  ;;  %v8778_v23 = vld [vmem:[#allocation19 + $0x128] sm:$0xff]   ;;  %v8780_v52 = vld [vmem:[#allocation19 + $0x170] sm:$0xff]  }
 0x651   : > { %v3656_v13 = vrot.slane %v3655_v7, 2  ;;  %7536 = vmatprep.subr.bf16.mxu1 %v8772_v57  ;;  %v8779_v55 = vld [vmem:[#allocation19 + $0xe8] sm:$0xff]  }
 0x652   : > { %v3669_v48 = vrot.slane %v3668_v14, 2 }
 0x653   : > { %v3657_v2 = vadd.f32 %v3656_v13, %v3655_v7  ;;  %v8781_v7 = vld [vmem:[#allocation19 + $0x130] sm:$0xff]   ;;  %v8783_v13 = vld [vmem:[#allocation19 + $0x178] sm:$0xff]  }
 0x654   : > { %v3670_v16 = vadd.f32 %v3669_v48, %v3668_v14  ;;  %7537 = vmatpush3.bf16.msra.mxu1 %v8773_v61  ;;  %v8782_v14 = vld [vmem:[#allocation19 + $0xf0] sm:$0xff]   ;;  %v8784_v48 = vld [vmem:[#allocation19 + $0x138] sm:$0xff]  }
 0x655   : > { %v3658_v33 = vrot.slane %v3657_v2, 1  ;;  %7538 = vmatprep.subr.bf16.mxu1 %v8775_v38 }
 0x656   : > { %v3671_v10 = vrot.slane %v3670_v16, 1 }
 0x657   : > { %v3659_v49 = vadd.f32 %v3658_v33, %v3657_v2  ;;  %v8785_v2 = vld [vmem:[#allocation19 + $0xf8] sm:$0xff]   ;;  %v8820_v33 = vld [vmem:[#allocation19 + $0x1c0] sm:$0xff]  }
 0x658   : > { %v3672_v60 = vadd.f32 %v3671_v10, %v3670_v16  ;;  %7539 = vmatpush3.bf16.msra.mxu1 %v8776_v62  ;;  %v8787_v16 = vld [vmem:[#allocation19 + $0x40] sm:$0xff]  }
 0x659   : > { %7540 = vmatprep.subr.bf16.mxu1 %v8778_v23 }
 0x65a   : > { %v3675_v3 = vsel %vm1003_vm1, %v3672_v60, %v3659_v49 }
 0x65b   : > { %8020 = vmatmul.mubr.f32.vlgmr.msra.gmra.mrb[66].mxu0 %v3675_v3 }
 0x65c   : > { %8023 = vmatpush3.bf16.msra.mxu0 %v8762_v25  ;;  %7541 = vmatpush3.bf16.msra.mxu1 %v8779_v55  ;;  %v6773_v25 = vld [vmem:[#allocation13] ss:$0 sm:$0xff] }
 0x65d   : > { %8024 = vmatprep.subr.bf16.mxu0 %v8765_v21  ;;  %7542 = vmatprep.subr.bf16.mxu1 %v8781_v7 }
 0x660   : > { %8025 = vmatpush3.bf16.msra.mxu0 %v8765_v21  ;;  %7543 = vmatpush3.bf16.msra.mxu1 %v8782_v14 }
 0x661   : > { %8026 = vmatprep.subr.bf16.mxu0 %v8768_v34  ;;  %7544 = vmatprep.subr.bf16.mxu1 %v8784_v48 }
 0x664   : > { %8027 = vmatpush3.bf16.msra.mxu0 %v8768_v34  ;;  %7545 = vmatpush3.bf16.msra.mxu1 %v8785_v2 }
 0x665   : > { %8028 = vmatprep.subr.bf16.mxu0 %v8771_v54  ;;  %7690 = vmatprep.subr.bf16.mxu1 %v8820_v33 }
 0x668   : > { %8029 = vmatpush3.bf16.msra.mxu0 %v8771_v54 }
 0x669   : > { %8030 = vmatprep.subr.bf16.mxu0 %v8774_v47 }
 0x66c   : > { %8031 = vmatpush3.bf16.msra.mxu0 %v8774_v47 }
 0x66d   : > { %8032 = vmatprep.subr.bf16.mxu0 %v8777_v40 }
 0x670   : > { %8033 = vmatpush3.bf16.msra.mxu0 %v8777_v40  ;;  %v11219_v40 = vld [vmem:[#allocation15] ss:$0 sm:$0xff] }
 0x671   : > { %8034 = vmatprep.subr.bf16.mxu0 %v8780_v52 }
 0x674   : > { %8035 = vmatpush3.bf16.msra.mxu0 %v8780_v52 }
 0x675   : > { %8036 = vmatprep.subr.bf16.mxu0 %v8783_v13 }
 0x678   : > { %8037 = vmatpush3.bf16.msra.mxu0 %v8783_v13 }
 0x679   : > { %7610 = vmatprep.subr.bf16.mxu0 %v8787_v16 }
 0x72e   : > { %v3743_v10 = vpop.f32.mrb[66].mxu0 }
 0x72f   : > { %v3747_v49 = vmul.f32 0.0078125, %v3743_v10  ;;  %v8021_v60 = vpop.f32.mrb[67].mxu0 }
 0x731   : > { %v3748_v3 = vadd.f32 1e-06, %v3747_v49 }
 0x733   : > { %8956 = vrsqrt.f32 %v3748_v3 }
 0x73d   : > { %v8957_v45 = vpop.eup %8956 }
 0x73e   : > { %v3757_v9 = vmul.f32 %v8957_v45, %v6773_v25 }
 0x740   : > { %v3765_v21 = vrot.slane %v3757_v9, %v12013_v35 }
 0x742   : > { %v3766_v27 = vcombine.high %v3765_v21, %v3765_v21  ;;  %v3773_v26 = vrot.slane %v3765_v21, %v12013_v35 }
 0x744   : > { %v3780_v34 = vrot.slane %v3766_v27, %v12013_v35  ;;  %v3784_v51 = vrot.slane %v3773_v26, %v12014_v37 }
 0x746   : > { %v11211_v15 = vrot.slane %v3780_v34, %v12014_v37  ;;  %v3791_v54 = vmul.f32 %v3784_v51, %v11127_v58  ;;  %v3792_v57 = vmul.f32 %v3784_v51, %v11130_v1  ;;  %v3793_v61 = vmul.f32 %v3784_v51, %v11139_v12 }
 0x747   : > { %v3794_v47 = vmul.f32 %v3784_v51, %v11149_v46  ;;  %v3795_v38 = vmul.f32 %v3784_v51, %v11159_v63  ;;  %v3796_v62 = vmul.f32 %v3784_v51, %v11168_v50  ;;  %v3797_v35 = vmul.f32 %v3784_v51, %v11178_v18 }
 0x748   : > { %v3798_v23 = vmul.f32 %v3784_v51, %v11188_v53  ;;  %v3799_v37 = vmul.f32 %v11211_v15, %v11133_v6  ;;  %v3806_v58 = vmul.f32 %v11211_v15, %v11191_v24  ;;  %v11234_v46 = vadd.f32 %v11219_v40, %v3791_v54 }
 0x749   : > { %v11228_v1 = vadd.f32 %v11219_v40, %v3794_v47  ;;  %v11231_v12 = vadd.f32 %v11219_v40, %v3795_v38  ;;  %v3800_v63 = vmul.f32 %v11211_v15, %v11136_v39  ;;  %v11239_v50 = vadd.f32 %v11219_v40, %v3792_v57 }
 0x74a   : > { %v11242_v6 = vadd.f32 %v11219_v40, %v3793_v61  ;;  %v11245_v18 = vadd.f32 %v11219_v40, %v3796_v62  ;;  %v6775_v55 = vmul.f32 -1.442695, %v11234_v46  ;;  %v11251_v52 = vadd.f32 %v11219_v40, %v3806_v58 }
 0x74b   : > { %v6778_v53 = vmul.f32 -1.442695, %v11228_v1  ;;  %v6779_v24 = vmul.f32 -1.442695, %v11231_v12  ;;  %v3801_v39 = vmul.f32 %v11211_v15, %v11142_v20  ;;  %v6776_v7 = vmul.f32 -1.442695, %v11239_v50 }
 0x74c   : > { %v11257_v14 = vadd.f32 %v11219_v40, %v3797_v35  ;;  %v3802_v13 = vmul.f32 %v11211_v15, %v11152_v31  ;;  %v6777_v48 = vmul.f32 -1.442695, %v11242_v6  ;;  %v11263_v2 = vadd.f32 %v11219_v40, %v3798_v23 }
 0x74d   : > { %8958 = vpow2.f32 %v6778_v53  ;;  %v6790_v16 = vmul.f32 -1.442695, %v11251_v52  ;;  %v11267_v33 = vadd.f32 %v11219_v40, %v3799_v37  ;;  %v6780_v20 = vmul.f32 -1.442695, %v11245_v18 }
 0x74e   : > { %8960 = vpow2.f32 %v6779_v24  ;;  %v11271_v10 = vadd.f32 %v11219_v40, %v3800_v63  ;;  %v6781_v31 = vmul.f32 -1.442695, %v11257_v14  ;;  %v11275_v49 = vadd.f32 %v11219_v40, %v3801_v39 }
 0x74f   : > { %8962 = vpow2.f32 %v6775_v55  ;;  %v6782_v60 = vmul.f32 -1.442695, %v11263_v2  ;;  %v11279_v3 = vadd.f32 %v11219_v40, %v3802_v13  ;;  %v6783_v25 = vmul.f32 -1.442695, %v11267_v33 }
 0x750   : > { %8964 = vpow2.f32 %v6776_v7  ;;  %v6784_v45 = vmul.f32 -1.442695, %v11271_v10  ;;  %v6785_v9 = vmul.f32 -1.442695, %v11275_v49  ;;  %v3803_v61 = vmul.f32 %v11211_v15, %v11161_v42 }
 0x751   : > { %8966 = vpow2.f32 %v6777_v48  ;;  %v6786_v21 = vmul.f32 -1.442695, %v11279_v3  ;;  %v3804_v58 = vmul.f32 %v11211_v15, %v11171_v29  ;;  %v3805_v24 = vmul.f32 %v11211_v15, %v11181_v0 }
 0x752   : > { %8968 = vpow2.f32 %v6790_v16  ;;  %v11292_v55 = vadd.f32 %v11219_v40, %v3803_v61 }
 0x753   : > { %8970 = vpow2.f32 %v6780_v20  ;;  %v11295_v20 = vadd.f32 %v11219_v40, %v3804_v58 }
 0x754   : > { %8972 = vpow2.f32 %v6781_v31  ;;  %v6787_v15 = vmul.f32 -1.442695, %v11292_v55 }
 0x755   : > { %8974 = vpow2.f32 %v6782_v60  ;;  %v11299_v60 = vadd.f32 %v11219_v40, %v3805_v24 }
 0x756   : > { %8976 = vpow2.f32 %v6783_v25 }
 0x757   : > { %v8959_v27 = vpop.eup %8958  ;;  %8978 = vpow2.f32 %v6784_v45 }
 0x758   : > { %v8961_v26 = vpop.eup %8960  ;;  %v3881_v34 = vadd.f32 1.0, %v8959_v27  ;;  %8980 = vpow2.f32 %v6785_v9 }
 0x759   : > { %v8963_v51 = vpop.eup %8962  ;;  %v3882_v54 = vadd.f32 1.0, %v8961_v26  ;;  %8982 = vpow2.f32 %v6786_v21  ;;  %v11305_v26 = vmul.f32 -1.442695, %v11295_v20 }
 0x75a   : > { %v8965_v57 = vpop.eup %8964  ;;  %8984 = vrcp.f32 %v3881_v34  ;;  %v3878_v47 = vadd.f32 1.0, %v8963_v51 }
 0x75b   : > { %v8967_v38 = vpop.eup %8966  ;;  %8986 = vrcp.f32 %v3882_v54  ;;  %v3879_v62 = vadd.f32 1.0, %v8965_v57  ;;  %v11313_v54 = vmul.f32 -1.442695, %v11299_v60 }
 0x75c   : > { %v8969_v35 = vpop.eup %8968  ;;  %v3880_v23 = vadd.f32 1.0, %v8967_v38  ;;  %8988 = vrcp.f32 %v3878_v47 }
 0x75d   : > { %v8971_v37 = vpop.eup %8970  ;;  %8990 = vrcp.f32 %v3879_v62  ;;  %v3893_v63 = vadd.f32 1.0, %v8969_v35 }
 0x75e   : > { %v8973_v53 = vpop.eup %8972  ;;  %8992 = vrcp.f32 %v3880_v23  ;;  %v3883_v42 = vadd.f32 1.0, %v8971_v37 }
 0x75f   : > { %v8975_v39 = vpop.eup %8974  ;;  %8994 = vrcp.f32 %v3893_v63  ;;  %v3884_v7 = vadd.f32 1.0, %v8973_v53 }
 0x760   : > { %v8977_v13 = vpop.eup %8976  ;;  %8996 = vrcp.f32 %v3883_v42  ;;  %v3885_v48 = vadd.f32 1.0, %v8975_v39 }
 0x761   : > { %v8979_v16 = vpop.eup %8978  ;;  %8998 = vrcp.f32 %v3884_v7  ;;  %v3886_v29 = vadd.f32 1.0, %v8977_v13 }
 0x762   : > { %v8981_v31 = vpop.eup %8980  ;;  %9000 = vrcp.f32 %v3885_v48  ;;  %v3887_v0 = vadd.f32 1.0, %v8979_v16  ;;  %v12015_v16 = vld [vmem:[#allocation41_spill] sm:$0xff] }
 0x763   : > { %v8983_v25 = vpop.eup %8982  ;;  %9002 = vrcp.f32 %v3886_v29  ;;  %v3888_v45 = vadd.f32 1.0, %v8981_v31 }
 0x764   : > { %v8985_v9 = vpop.eup %8984  ;;  %9004 = vrcp.f32 %v3887_v0  ;;  %v11310_v40 = vadd.f32 1.0, %v8983_v25 }
 0x765   : > { %v8987_v21 = vpop.eup %8986  ;;  %v11302_v27 = vmul.f32 %v8985_v9, %v11228_v1  ;;  %9006 = vrcp.f32 %v3888_v45 }
 0x766   : > { %v8989_v34 = vpop.eup %8988  ;;  %v11308_v51 = vmul.f32 %v8987_v21, %v11231_v12  ;;  %9008 = vpow2.f32 %v6787_v15 }
 0x767   : > { %v8991_v57 = vpop.eup %8990  ;;  %v11316_v61 = vmul.f32 %v8989_v34, %v11234_v46  ;;  %v4009_v1 = vrot.slane %v11302_v27, 1  ;;  %v3953_v47 = vrot.slane %v11302_v27, 7  ;;  %v7090_v38 = vpack.c.bf16 %v11302_v27, %v11302_v27 }
 0x768   : > { %v8993_v62 = vpop.eup %8992  ;;  %v3927_v12 = vmul.f32 %v8991_v57, %v11239_v50  ;;  %v4010_v35 = vrot.slane %v11308_v51, 1  ;;  %v3954_v23 = vrot.slane %v11308_v51, 7  ;;  %v7091_v37 = vpack.c.bf16 %v11308_v51, %v11308_v51  ;;  %v8795_v51 = vld [vmem:[#allocation19 + $0x8] sm:$0xff]  }
 0x769   : > { %v8995_v58 = vpop.eup %8994  ;;  %v3928_v46 = vmul.f32 %v8993_v62, %v11242_v6  ;;  %v4006_v63 = vrot.slane %v11316_v61, 1  ;;  %v3950_v53 = vrot.slane %v11316_v61, 7  ;;  %v7087_v24 = vpack.c.bf16 %v11316_v61, %v11316_v61  ;;  %4194 = vst [vmem:[#allocation3 + $0x34] sm:$0xf] %v7090_v38 }
 0x76a   : > { %v8997_v42 = vpop.eup %8996  ;;  %v4007_v50 = vrot.slane %v3927_v12, 1  ;;  %v4033_v39 = vsel %vm1518_vm5, %v4009_v1, %v4010_v35  ;;  %v11335_v7 = vmul.f32 %v8995_v58, %v11251_v52  ;;  %v3951_v13 = vrot.slane %v3927_v12, 7  ;;  %4195 = vst [vmem:[#allocation3 + $0x40] sm:$0xf] %v7091_v37  ;;  %v12017_v58 = vld [vmem:[#allocation40_spill] sm:$0xff] }
 0x76b   : > { %v8999_v48 = vpop.eup %8998  ;;  %v4008_v6 = vrot.slane %v3928_v46, 1  ;;  %v4041_v29 = vmul.f32 %v12015_v16, %v4033_v39  ;;  %v7088_v31 = vpack.c.bf16 %v3927_v12, %v3927_v12  ;;  %4191 = vst [vmem:[#allocation3 + $0x10] sm:$0xf] %v7087_v24  ;;  %v11339_v0 = vmul.f32 %v8997_v42, %v11245_v18  ;;  %v12016_v12 = vld [vmem:[#allocation39_spill] sm:$0xff] }
 0x76c   : > { %v9001_v15 = vpop.eup %9000  ;;  %v4036_v25 = vsel %vm1518_vm5, %v4006_v63, %v4007_v50  ;;  %v3965_v52 = vrot.slane %v11335_v7, 7  ;;  %v3980_v45 = vsel %vm1461_vm10, %v3950_v53, %v3951_v13  ;;  %v11349_v9 = vmul.f32 %v8999_v48, %v11257_v14 }
 0x76d   : > { %v9003_v21 = vpop.eup %9002  ;;  %v4035_v34 = vsel %vm1518_vm5, %v4007_v50, %v4008_v6  ;;  %v4038_v18 = vmul.f32 %v10261_v19, %v4036_v25  ;;  %v4034_v57 = vsel %vm1518_vm5, %v4008_v6, %v4009_v1  ;;  %v7106_v38 = vpack.c.bf16 %v4041_v29, %v4041_v29  ;;  %4192 = vst [vmem:[#allocation3 + $0x1c] sm:$0xf] %v7088_v31 }
 0x76e   : > { %v9005_v62 = vpop.eup %9004  ;;  %v4039_v37 = vmul.f32 %v12016_v12, %v4035_v34  ;;  %v4040_v24 = vmul.f32 %v12017_v58, %v4034_v57  ;;  %v3981_v14 = vsel %vm1461_vm10, %v3965_v52, %v3950_v53  ;;  %v3983_v42 = vmul.f32 %v10284_v41, %v3980_v45 }
 0x76f   : > { %v9007_v50 = vpop.eup %9006  ;;  %v7103_v39 = vpack.c.bf16 %v4038_v18, %v4038_v18  ;;  %4266 = vst [vmem:[#allocation3 + $0x38] sm:$0xf] %v7106_v38  ;;  %v3982_v19 = vmul.f32 %v10299_v56, %v3981_v14  ;;  %v4011_v1 = vrot.slane %v11339_v0, 1  ;;  %v4012_v48 = vrot.slane %v11349_v9, 1 }
 0x770   : > { %v9009_v6 = vpop.eup %9008  ;;  %v7104_v16 = vpack.c.bf16 %v4039_v37, %v4039_v37  ;;  %v7105_v29 = vpack.c.bf16 %v4040_v24, %v4040_v24  ;;  %v7072_v31 = vpack.c.bf16 %v3983_v42, %v3983_v42  ;;  %v3952_v25 = vrot.slane %v3928_v46, 7 }
 0x771   : > { %4263 = vst [vmem:[#allocation3 + $0x14] sm:$0xf] %v7103_v39  ;;  %v7071_v34 = vpack.c.bf16 %v3982_v19, %v3982_v19  ;;  %v4031_v53 = vsel %vm1518_vm5, %v4011_v1, %v4012_v48  ;;  %v4032_v41 = vsel %vm1518_vm5, %v4010_v35, %v4011_v1  ;;  %v7089_v45 = vpack.c.bf16 %v3928_v46, %v3928_v46  ;;  %v8794_v39 = vld [vmem:[#allocation19 + $0x48] sm:$0xff]  }
 0x772   : > { %4264 = vst [vmem:[#allocation3 + $0x20] sm:$0xf] %v7104_v16  ;;  %4265 = vst [vmem:[#allocation3 + $0x2c] sm:$0xf] %v7105_v29  ;;  %v4042_v56 = vmul.f32 %v10287_v4, %v4032_v41  ;;  %v4043_v18 = vmul.f32 %v10302_v32, %v4031_v53  ;;  %v3978_v57 = vsel %vm1461_vm10, %v3952_v25, %v3953_v47  ;;  %v3890_v41 = vadd.f32 1.0, %v9009_v6 }
 0x773   : > { %4120 = vst [vmem:[#allocation3 + $0x18] sm:$0xf] %v7072_v31  ;;  %v3979_v38 = vsel %vm1461_vm10, %v3951_v13, %v3952_v25  ;;  %4119 = vst [vmem:[#allocation3 + $0xc] sm:$0xf] %v7071_v34  ;;  %v3985_v35 = vmul.f32 %v10405_v22, %v3978_v57  ;;  %v11381_v46 = vmul.f32 %v9001_v15, %v11263_v2  ;;  %v3955_v15 = vrot.slane %v11339_v0, 7 }
 0x774   : > { %v3984_v12 = vmul.f32 %v10389_v8, %v3979_v38  ;;  %4193 = vst [vmem:[#allocation3 + $0x28] sm:$0xf] %v7089_v45  ;;  %v11384_v4 = vmul.f32 %v9003_v21, %v11267_v33  ;;  %v7107_v32 = vpack.c.bf16 %v4042_v56, %v4042_v56  ;;  %v7108_v37 = vpack.c.bf16 %v4043_v18, %v4043_v18  ;;  %v8821_v56 = vld [vmem:[#allocation19 + $0x180] sm:$0xff]   ;;  %v8796_v18 = vld [vmem:[#allocation19 + $0x50] sm:$0xff]   ;;  %v8824_v38 = vld [vmem:[#allocation19 + $0x1c8] sm:$0xff]  }
 0x775   : > { %v11387_v58 = vmul.f32 %v9005_v62, %v11271_v10  ;;  %v11390_v24 = vmul.f32 %v9007_v50, %v11275_v49  ;;  %v7074_v14 = vpack.c.bf16 %v3985_v35, %v3985_v35  ;;  %v4013_v8 = vrot.slane %v11381_v46, 1  ;;  %v8789_v49 = vld [vmem:[#allocation19] sm:$0xff]  }
 0x776   : > { %v7073_v13 = vpack.c.bf16 %v3984_v12, %v3984_v12  ;;  %v4014_v22 = vrot.slane %v11384_v4, 1  ;;  %4267 = vst [vmem:[#allocation3 + $0x44] sm:$0xf] %v7107_v32  ;;  %4268 = vst [vmem:[#allocation3 + $0x50] sm:$0xf] %v7108_v37  ;;  %v3977_v10 = vsel %vm1461_vm10, %v3953_v47, %v3954_v23  ;;  %v7092_v50 = vpack.c.bf16 %v11339_v0, %v11339_v0 }
 0x777   : > { %v4015_v2 = vrot.slane %v11387_v58, 1  ;;  %v4016_v33 = vrot.slane %v11390_v24, 1  ;;  %4122 = vst [vmem:[#allocation3 + $0x30] sm:$0xf] %v7074_v14  ;;  %v4030_v62 = vsel %vm1518_vm5, %v4012_v48, %v4013_v8  ;;  %v3986_v42 = vmul.f32 %v10424_v36, %v3977_v10  ;;  %v8828_v10 = vld [vmem:[#allocation19 + $0x1d0] sm:$0xff]  }
 0x778   : > { %4121 = vst [vmem:[#allocation3 + $0x24] sm:$0xf] %v7073_v13  ;;  %v4029_v21 = vsel %vm1518_vm5, %v4013_v8, %v4014_v22  ;;  %v4044_v27 = vmul.f32 %v10410_v30, %v4030_v62  ;;  %v3976_v30 = vsel %vm1461_vm10, %v3954_v23, %v3955_v15  ;;  %4196 = vst [vmem:[#allocation3 + $0x4c] sm:$0xf] %v7092_v50  ;;  %9010 = vrcp.f32 %v11310_v40 }
 0x779   : > { %v4045_v19 = vmul.f32 %v10413_v5, %v4029_v21  ;;  %v4027_v47 = vsel %vm1518_vm5, %v4015_v2, %v4016_v33  ;;  %v4028_v1 = vsel %vm1518_vm5, %v4014_v22, %v4015_v2  ;;  %v8786_v16 = vld [vmem:[#allocation3 + $0x14] ss:$12 sps:$4 sm:$0xff]   ;;  %v7075_v0 = vpack.c.bf16 %v3986_v42, %v3986_v42  ;;  %v8788_v5 = vld [vmem:[#allocation3 + $0x2c] ss:$12 sps:$4 sm:$0xff]  }
 0x77a   : > { %v4046_v48 = vmul.f32 %v10448_v28, %v4028_v1  ;;  %v4047_v36 = vmul.f32 %v10453_v59, %v4027_v47  ;;  %v11424_v29 = vld [vmem:[#allocation3 + $0xc] sm:$0xff]  ;;  %v11426_v31 = vld [vmem:[#allocation3 + $0x18] sm:$0xff]  ;;  %v7109_v25 = vpack.c.bf16 %v4044_v27, %v4044_v27  ;;  %v3987_v53 = vmul.f32 %v10439_v44, %v3976_v30  ;;  %8038 = vmatprep.mubr.bf16.mxu0 %v8786_v16 }
 0x77b   : > { %v7110_v34 = vpack.c.bf16 %v4045_v19, %v4045_v19  ;;  %v6839_v28 = vcombine.low %v11424_v29, %v11426_v31  ;;  %v6840_v59 = vcombine.high %v11424_v29, %v11426_v31  ;;  %4123 = vst [vmem:[#allocation3 + $0x3c] sm:$0xf] %v7075_v0  ;;  %8039 = vmatmul.mubr.bf16.vlgmr.msra.gmra.mrb[68].mxu0 %v8788_v5  ;;  %v3956_v44 = vrot.slane %v11349_v9, 7  ;;  %v12018_v21 = vld [vmem:[#allocation46_spill] sm:$0xff]  ;;  %v12019_v16 = vld [vmem:[#allocation47_spill] sm:$0xff]  ;;  %v12020_v30 = vld [vmem:[#allocation48_spill] sm:$0xff] }
 0x77c   : > { %v7111_v23 = vpack.c.bf16 %v4046_v48, %v4046_v48  ;;  %v7112_v45 = vpack.c.bf16 %v4047_v36, %v4047_v36  ;;  %4269 = vst [vmem:[#allocation3 + $0x5c] sm:$0xf] %v7109_v25  ;;  %v7076_v57 = vpack.c.bf16 %v3987_v53, %v3987_v53  ;;  %v3957_v6 = vrot.slane %v11381_v46, 7  ;;  %7611 = vmatpush3.bf16.msra.mxu0 %v8789_v49  ;;  %v8830_v27 = vld [vmem:[#allocation19 + $0x190] sm:$0xff]   ;;  %v8831_v53 = vld [vmem:[#allocation19 + $0x1d8] sm:$0xff]  }
 0x77d   : > { %4270 = vst [vmem:[#allocation3 + $0x68] sm:$0xf] %v7110_v34  ;;  %4753 = vmatprep.mubr.bf16.mxu1 %v6840_v59  ;;  %v8792_v12 = vld [vmem:[#allocation3 + $0x44] ss:$12 sps:$4 sm:$0xff]   ;;  %9012 = vrcp.f32 %v3890_v41  ;;  %v7093_v35 = vpack.c.bf16 %v11349_v9, %v11349_v9  ;;  %v7094_v32 = vpack.c.bf16 %v11381_v46, %v11381_v46  ;;  %7612 = vmatprep.subr.bf16.mxu0 %v8794_v39  ;;  %v4021_v9 = vrot.slane %v11335_v7, 1 }
 0x77e   : > { %4271 = vst [vmem:[#allocation3 + $0x8c] sm:$0xf] %v7111_v23  ;;  %4272 = vst [vmem:[#allocation3 + $0x98] sm:$0xf] %v7112_v45  ;;  %4754 = vmatmul.mubr.bf16.vlgmr.msra.gmra.mrb[52].mxu1 %v6839_v28  ;;  %v11442_v40 = vld [vmem:[#allocation3 + $0x30] sm:$0xff]  ;;  %9014 = vpow2.f32 %v11305_v26  ;;  %v3974_v13 = vsel %vm1461_vm10, %v3956_v44, %v3957_v6  ;;  %v3975_v14 = vsel %vm1461_vm10, %v3955_v15, %v3956_v44  ;;  %8042 = vmatprep.mubr.bf16.mxu0 %v8792_v12  ;;  %v8826_v26 = vld [vmem:[#allocation19 + $0x188] sm:$0xff]  }
 0x77f   : > { %v11440_v37 = vld [vmem:[#allocation3 + $0x24] sm:$0xff]  ;;  %4124 = vst [vmem:[#allocation3 + $0x48] sm:$0xf] %v7076_v57  ;;  %9016 = vpow2.f32 %v11313_v54  ;;  %v3988_v8 = vmul.f32 %v10513_v11, %v3975_v14  ;;  %4197 = vst [vmem:[#allocation3 + $0x58] sm:$0xf] %v7093_v35  ;;  %7691 = vmatpush3.bf16.msra.mxu1 %v8821_v56  ;;  %v3989_v22 = vmul.f32 %v10518_v43, %v3974_v13  ;;  %v3958_v15 = vrot.slane %v11384_v4, 7 }
 0x780   : > { %v6843_v46 = vcombine.high %v11440_v37, %v11442_v40  ;;  %4198 = vst [vmem:[#allocation3 + $0x64] sm:$0xf] %v7094_v32  ;;  %v4037_v2 = vsel %vm1518_vm5, %v4021_v9, %v4006_v63  ;;  %7692 = vmatprep.subr.bf16.mxu1 %v8824_v38  ;;  %7613 = vmatpush3.bf16.msra.mxu0 %v8795_v51  ;;  %v8798_v11 = vld [vmem:[#allocation19 + $0x10] sm:$0xff]   ;;  %v8802_v54 = vld [vmem:[#allocation19 + $0x58] sm:$0xff]   ;;  %v3959_v43 = vrot.slane %v11387_v58, 7  ;;  %v3960_v34 = vrot.slane %v11390_v24, 7 }
 0x781   : > { %v7077_v49 = vpack.c.bf16 %v3988_v8, %v3988_v8  ;;  %v4053_v62 = vmul.f32 %v12018_v21, %v4037_v2  ;;  %v7095_v61 = vpack.c.bf16 %v11384_v4, %v11384_v4  ;;  %7614 = vmatprep.subr.bf16.mxu0 %v8796_v18  ;;  %v7078_v63 = vpack.c.bf16 %v3989_v22, %v3989_v22  ;;  %v8803_v51 = vld [vmem:[#allocation19 + $0x18] sm:$0xff]   ;;  %v8804_v56 = vld [vmem:[#allocation19 + $0x60] sm:$0xff]  }
 0x782   : > { %4761 = vmatprep.mubr.bf16.mxu1 %v6843_v46  ;;  %v11466_v42 = vld [vmem:[#allocation3 + $0x3c] sm:$0xff]  ;;  %v3973_v50 = vsel %vm1461_vm10, %v3957_v6, %v3958_v15  ;;  %v7096_v39 = vpack.c.bf16 %v11387_v58, %v11387_v58  ;;  %v3972_v1 = vsel %vm1461_vm10, %v3958_v15, %v3959_v43  ;;  %v7097_v4 = vpack.c.bf16 %v11390_v24, %v11390_v24  ;;  %v9011_v28 = vpop.eup %9010  ;;  %v8833_v35 = vld [vmem:[#allocation19 + $0x198] sm:$0xff]  }
 0x783   : > { %4125 = vst [vmem:[#allocation3 + $0x54] sm:$0xf] %v7077_v49  ;;  %v7118_v47 = vpack.c.bf16 %v4053_v62, %v4053_v62  ;;  %v3990_v48 = vmul.f32 %v12019_v16, %v3973_v50  ;;  %4199 = vst [vmem:[#allocation3 + $0x88] sm:$0xf] %v7095_v61  ;;  %7693 = vmatpush3.bf16.msra.mxu1 %v8826_v26  ;;  %v3991_v0 = vmul.f32 %v12020_v30, %v3972_v1  ;;  %v12021_v38 = vld [vmem:[#allocation49_spill] sm:$0xff] }
 0x784   : > { %v8797_v19 = vld [vmem:[#allocation3 + $0x5c] ss:$12 sps:$4 sm:$0xff]   ;;  %4126 = vst [vmem:[#allocation3 + $0x60] sm:$0xf] %v7078_v63  ;;  %4200 = vst [vmem:[#allocation3 + $0x94] sm:$0xf] %v7096_v39  ;;  %7694 = vmatprep.subr.bf16.mxu1 %v8828_v10  ;;  %v6842_v58 = vcombine.low %v11440_v37, %v11442_v40  ;;  %v7102_v41 = vpack.c.bf16 %v11335_v7, %v11335_v7  ;;  %7615 = vmatpush3.bf16.msra.mxu0 %v8798_v11 }
 0x785   : > { %v8799_v36 = vld [vmem:[#allocation3 + $0x8c] ss:$12 sps:$4 sm:$0xff]   ;;  %8043 = vmatmul.mubr.bf16.gmra.mrb[72].mxu0 %v8797_v19  ;;  %4278 = vst [vmem:[#allocation3 + $0xe0] sm:$0xf] %v7118_v47  ;;  %v7079_v25 = vpack.c.bf16 %v3990_v48, %v3990_v48  ;;  %4201 = vst [vmem:[#allocation3 + $0xa0] sm:$0xf] %v7097_v4  ;;  %v7080_v23 = vpack.c.bf16 %v3991_v0, %v3991_v0  ;;  %7616 = vmatprep.subr.bf16.mxu0 %v8802_v54 }
 0x786   : > { %v11480_v5 = vld [vmem:[#allocation3 + $0x48] sm:$0xff]  ;;  %8046 = vmatprep.mubr.bf16.mxu0 %v8799_v36  ;;  %4762 = vmatmul.mubr.bf16.gmra.mrb[56].mxu1 %v6842_v58  ;;  %v3937_v18 = vmul.f32 %v9011_v28, %v11279_v3  ;;  %v3971_v57 = vsel %vm1461_vm10, %v3959_v43, %v3960_v34  ;;  %4206 = vst [vmem:[#allocation3 + $0xdc] sm:$0xf] %v7102_v41  ;;  %v8835_v8 = vld [vmem:[#allocation19 + $0x1e0] sm:$0xff]  }
 0x787   : > { %v6846_v59 = vcombine.high %v11466_v42, %v11480_v5  ;;  %v9013_v45 = vpop.eup %9012  ;;  %4127 = vst [vmem:[#allocation3 + $0x84] sm:$0xf] %v7079_v25  ;;  %4128 = vst [vmem:[#allocation3 + $0x90] sm:$0xf] %v7080_v23  ;;  %v3992_v12 = vmul.f32 %v12021_v38, %v3971_v57  ;;  %7695 = vmatpush3.bf16.msra.mxu1 %v8830_v27  ;;  %v8806_v22 = vld [vmem:[#allocation19 + $0x20] sm:$0xff]   ;;  %v8810_v49 = vld [vmem:[#allocation19 + $0x68] sm:$0xff]   ;;  %v6845_v39 = vcombine.low %v11466_v42, %v11480_v5 }
 0x788   : > { %v9015_v44 = vpop.eup %9014  ;;  %v11491_v6 = vmul.f32 %v9013_v45, %v11292_v55  ;;  %v4017_v13 = vrot.slane %v3937_v18, 1  ;;  %v3961_v46 = vrot.slane %v3937_v18, 7  ;;  %v7098_v3 = vpack.c.bf16 %v3937_v18, %v3937_v18  ;;  %7696 = vmatprep.subr.bf16.mxu1 %v8831_v53  ;;  %7617 = vmatpush3.bf16.msra.mxu0 %v8803_v51  ;;  %v12022_v43 = vld [vmem:[#allocation43_spill] sm:$0xff]  ;;  %v8837_v61 = vld [vmem:[#allocation19 + $0x1a0] sm:$0xff]   ;;  %v12023_v63 = vld [vmem:[#allocation50_spill] sm:$0xff] }
 0x789   : > { %4769 = vmatprep.mubr.bf16.mxu1 %v6846_v59  ;;  %v9017_v32 = vpop.eup %9016  ;;  %v3891_v14 = vadd.f32 1.0, %v9015_v44  ;;  %v7081_v15 = vpack.c.bf16 %v3992_v12, %v3992_v12  ;;  %7618 = vmatprep.subr.bf16.mxu0 %v8804_v56  ;;  %v12024_v27 = vld [vmem:[#allocation51_spill] sm:$0xff]  ;;  %v8838_v1 = vld [vmem:[#allocation19 + $0x1e8] sm:$0xff]   ;;  %v12025_v36 = vld [vmem:[#allocation52_spill] sm:$0xff] }
 0x78a   : > { %v4018_v26 = vrot.slane %v11491_v6, 1  ;;  %v3892_v2 = vadd.f32 1.0, %v9017_v32  ;;  %v3962_v55 = vrot.slane %v11491_v6, 7  ;;  %v4026_v10 = vsel %vm1518_vm5, %v4016_v33, %v4017_v13  ;;  %v11500_v11 = vld [vmem:[#allocation3 + $0x54] sm:$0xff]  ;;  %4202 = vst [vmem:[#allocation3 + $0xac] sm:$0xf] %v7098_v3 }
 0x78b   : > { %9018 = vrcp.f32 %v3891_v14  ;;  %v11502_v54 = vld [vmem:[#allocation3 + $0x60] sm:$0xff]  ;;  %v3970_v21 = vsel %vm1461_vm10, %v3960_v34, %v3961_v46  ;;  %v7099_v62 = vpack.c.bf16 %v11491_v6, %v11491_v6  ;;  %v4048_v33 = vmul.f32 %v12022_v43, %v4026_v10  ;;  %4129 = vst [vmem:[#allocation3 + $0x9c] sm:$0xf] %v7081_v15  ;;  %7697 = vmatpush3.bf16.msra.mxu1 %v8833_v35  ;;  %v8812_v58 = vld [vmem:[#allocation19 + $0x70] sm:$0xff]   ;;  %v8817_v23 = vld [vmem:[#allocation19 + $0x78] sm:$0xff]  }
 0x78c   : > { %v4025_v24 = vsel %vm1518_vm5, %v4017_v13, %v4018_v26  ;;  %9020 = vrcp.f32 %v3892_v2  ;;  %v3993_v19 = vmul.f32 %v12024_v27, %v3970_v21  ;;  %v3969_v47 = vsel %vm1461_vm10, %v3961_v46, %v3962_v55  ;;  %7698 = vmatprep.subr.bf16.mxu1 %v8835_v8  ;;  %7619 = vmatpush3.bf16.msra.mxu0 %v8806_v22  ;;  %v8811_v4 = vld [vmem:[#allocation19 + $0x28] sm:$0xff]   ;;  %v8842_v41 = vld [vmem:[#allocation19 + $0x1f0] sm:$0xff]   ;;  %v8844_v57 = vld [vmem:[#allocation19 + $0x1f8] sm:$0xff]  }
 0x78d   : > { %v4049_v50 = vmul.f32 %v12023_v63, %v4025_v24  ;;  %4203 = vst [vmem:[#allocation3 + $0xb8] sm:$0xf] %v7099_v62  ;;  %v7113_v16 = vpack.c.bf16 %v4048_v33, %v4048_v33  ;;  %v6849_v48 = vcombine.high %v11500_v11, %v11502_v54  ;;  %v3994_v30 = vmul.f32 %v12025_v36, %v3969_v47  ;;  %v8840_v53 = vld [vmem:[#allocation19 + $0x1a8] sm:$0xff]   ;;  %v8814_v28 = vld [vmem:[#allocation19 + $0x30] sm:$0xff]   ;;  %v8818_v32 = vld [vmem:[#allocation19 + $0x38] sm:$0xff]  }
 0x78e   : > { %4770 = vmatmul.mubr.bf16.gmra.mrb[60].mxu1 %v6845_v39  ;;  %7620 = vmatprep.subr.bf16.mxu0 %v8810_v49  ;;  %v7082_v25 = vpack.c.bf16 %v3993_v19, %v3993_v19  ;;  %v11524_v59 = vld [vmem:[#allocation3 + $0x84] sm:$0xff]  ;;  %v11526_v51 = vld [vmem:[#allocation3 + $0x90] sm:$0xff]  ;;  %v6848_v18 = vcombine.low %v11500_v11, %v11502_v54  ;;  %v11534_v46 = vld [vmem:[#allocation19 + $0x80] sm:$0xff]  }
 0x78f   : > { %v7114_v0 = vpack.c.bf16 %v4049_v50, %v4049_v50  ;;  %4273 = vst [vmem:[#allocation3 + $0xa4] sm:$0xf] %v7113_v16  ;;  %4777 = vmatprep.mubr.bf16.mxu1 %v6849_v48  ;;  %v7083_v34 = vpack.c.bf16 %v3994_v30, %v3994_v30  ;;  %7699 = vmatpush3.bf16.msra.mxu1 %v8837_v61  ;;  %v8843_v45 = vld [vmem:[#allocation19 + $0x1b0] sm:$0xff]   ;;  %v11536_v2 = vld [vmem:[#allocation22] sm:$0xff]  }
 0x790   : > { %4130 = vst [vmem:[#allocation3 + $0xa8] sm:$0xf] %v7082_v25  ;;  %7700 = vmatprep.subr.bf16.mxu1 %v8838_v1  ;;  %7621 = vmatpush3.bf16.msra.mxu0 %v8811_v4  ;;  %v6852_v12 = vcombine.high %v11524_v59, %v11526_v51  ;;  %v6851_v15 = vcombine.low %v11524_v59, %v11526_v51  ;;  %v12026_v43 = vld [vmem:[#allocation53_spill] sm:$0xff]  ;;  %v12027_v63 = vld [vmem:[#allocation54_spill] sm:$0xff]  ;;  %v12028_v39 = vld [vmem:[#allocation55_spill] sm:$0xff] }
 0x791   : > { %4274 = vst [vmem:[#allocation3 + $0xb0] sm:$0xf] %v7114_v0  ;;  %4131 = vst [vmem:[#allocation3 + $0xb4] sm:$0xf] %v7083_v34  ;;  %7622 = vmatprep.subr.bf16.mxu0 %v8812_v58  ;;  %v12029_v19 = vld [vmem:[#allocation44_spill] sm:$0xff]  ;;  %v12030_v16 = vld [vmem:[#allocation45_spill] sm:$0xff] }
 0x792   : > { %v11544_v10 = vld [vmem:[#allocation3 + $0x9c] sm:$0xff]  ;;  %v12031_v0 = vld [vmem:[#allocation42_spill] sm:$0xff] }
 0x793   : > { %7701 = vmatpush3.bf16.msra.mxu1 %v8840_v53 }
 0x794   : > { %7702 = vmatprep.subr.bf16.mxu1 %v8842_v41  ;;  %7623 = vmatpush3.bf16.msra.mxu0 %v8814_v28  ;;  %v11580_v28 = vld [vmem:[#allocation2] sm:$0xff] }
 0x795   : > { %v9019_v56 = vpop.eup %9018  ;;  %7624 = vmatprep.subr.bf16.mxu0 %v8817_v23  ;;  %v6888_v23 = vcombine.high %v11580_v28, %v11424_v29 }
 0x796   : > { %v9021_v44 = vpop.eup %9020  ;;  %v3939_v38 = vmul.f32 %v9019_v56, %v11295_v20  ;;  %4778 = vmatmul.mubr.bf16.gmra.mrb[64].mxu1 %v6848_v18  ;;  %v8846_v20 = vld [vmem:[#allocation19 + $0x1b8] sm:$0xff]  }
 0x797   : > { %v3940_v35 = vmul.f32 %v9021_v44, %v11299_v60  ;;  %4785 = vmatprep.mubr.bf16.mxu1 %v6852_v12  ;;  %7703 = vmatpush3.bf16.msra.mxu1 %v8843_v45  ;;  %v11546_v49 = vld [vmem:[#allocation3 + $0xa8] sm:$0xff] }
 0x798   : > { %v8805_v13 = vld [vmem:[#allocation3 + $0xa4] ss:$12 sps:$4 sm:$0xff]   ;;  %v4019_v14 = vrot.slane %v3939_v38, 1  ;;  %v7100_v3 = vpack.c.bf16 %v3939_v38, %v3939_v38  ;;  %v3963_v22 = vrot.slane %v3939_v38, 7  ;;  %7704 = vmatprep.subr.bf16.mxu1 %v8844_v57  ;;  %7625 = vmatpush3.bf16.msra.mxu0 %v8818_v32  ;;  %v6855_v6 = vcombine.high %v11544_v10, %v11546_v49  ;;  %v11576_v25 = vld [vmem:[#allocation3 + $0xb4] sm:$0xff] }
 0x799   : > { %v4020_v8 = vrot.slane %v3940_v35, 1  ;;  %8047 = vmatmul.mubr.bf16.gmra.mrb[76].mxu0 %v8805_v13  ;;  %v3964_v21 = vrot.slane %v3940_v35, 7  ;;  %v7101_v62 = vpack.c.bf16 %v3940_v35, %v3940_v35  ;;  %8054 = vmatprep.subr.bf16.mxu0 %v11534_v46  ;;  %v6854_v17 = vcombine.low %v11544_v10, %v11546_v49  ;;  %v8825_v12 = vld [vmem:[#allocation19 + $0x88] sm:$0xff]   ;;  %v8832_v32 = vld [vmem:[#allocation19 + $0x90] sm:$0xff]  }
 0x79a   : > { %v4024_v60 = vsel %vm1518_vm5, %v4018_v26, %v4019_v14  ;;  %4204 = vst [vmem:[#allocation3 + $0xc4] sm:$0xf] %v7100_v3  ;;  %v3968_v61 = vsel %vm1461_vm10, %v3962_v55, %v3963_v22  ;;  %v6887_v38 = vcombine.low %v11580_v28, %v11424_v29  ;;  %v6891_v35 = vcombine.high %v11426_v31, %v11440_v37  ;;  %v8839_v29 = vld [vmem:[#allocation19 + $0x98] sm:$0xff]  }
 0x79b   : > { %v4023_v24 = vsel %vm1518_vm5, %v4019_v14, %v4020_v8  ;;  %v4050_v33 = vmul.f32 %v12026_v43, %v4024_v60  ;;  %v4022_v26 = vsel %vm1518_vm5, %v4020_v8, %v4021_v9  ;;  %v3995_v47 = vmul.f32 %v12029_v19, %v3968_v61  ;;  %4205 = vst [vmem:[#allocation3 + $0xd0] sm:$0xf] %v7101_v62  ;;  %v11605_v8 = vld [vmem:[#allocation22 + $0x8] sm:$0xff]   ;;  %v11625_v62 = vld [vmem:[#allocation22 + $0x20] sm:$0xff]  }
 0x79c   : > { %v4051_v50 = vmul.f32 %v12027_v63, %v4023_v24  ;;  %v4052_v27 = vmul.f32 %v12028_v39, %v4022_v26  ;;  %v3966_v1 = vsel %vm1461_vm10, %v3964_v21, %v3965_v52  ;;  %v3967_v55 = vsel %vm1461_vm10, %v3963_v22, %v3964_v21  ;;  %7705 = vmatpush3.bf16.msra.mxu1 %v8846_v20  ;;  %v11613_v20 = vld [vmem:[#allocation22 + $0x10] sm:$0xff]   ;;  %v8851_v24 = vld [vmem:[#allocation19 + $0x200] sm:$0xff]   ;;  %v8850_v39 = vld [vmem:[#allocation3 + $0x8] ss:$12 sps:$4 sm:$0xff]  }
 0x79d   : > { %v7115_v9 = vpack.c.bf16 %v4050_v33, %v4050_v33  ;;  %v3997_v48 = vmul.f32 %v12030_v16, %v3966_v1  ;;  %v7084_v30 = vpack.c.bf16 %v3995_v47, %v3995_v47  ;;  %v3996_v58 = vmul.f32 %v12031_v0, %v3967_v55  ;;  %8246 = vmatprep.subr.bf16.mxu1 %v11536_v2  ;;  %v8848_v60 = vld [vmem:[#allocation19 + $0xb0] sm:$0xff]   ;;  %v8855_v19 = vld [vmem:[#allocation19 + $0x208] sm:$0xff]   ;;  %v8860_v16 = vld [vmem:[#allocation19 + $0x218] sm:$0xff]  }
 0x79e   : > { %v7116_v4 = vpack.c.bf16 %v4051_v50, %v4051_v50  ;;  %v7117_v36 = vpack.c.bf16 %v4052_v27, %v4052_v27  ;;  %4786 = vmatmul.mubr.bf16.gmra.mrb[68].mxu1 %v6851_v15  ;;  %v6890_v14 = vcombine.low %v11426_v31, %v11440_v37  ;;  %v6894_v3 = vcombine.high %v11442_v40, %v11466_v42  ;;  %v8847_v31 = vld [vmem:[#allocation19 + $0xa8] sm:$0xff]   ;;  %v8849_v15 = vld [vmem:[#allocation19 + $0xb8] sm:$0xff]   ;;  %v8856_v1 = vld [vmem:[#allocation19 + $0x210] sm:$0xff]  }
 0x79f   : > { %4275 = vst [vmem:[#allocation3 + $0xbc] sm:$0xf] %v7115_v9  ;;  %v7086_v7 = vpack.c.bf16 %v3997_v48, %v3997_v48  ;;  %4793 = vmatprep.mubr.bf16.mxu1 %v6855_v6  ;;  %4132 = vst [vmem:[#allocation3 + $0xc0] sm:$0xf] %v7084_v30  ;;  %v7085_v52 = vpack.c.bf16 %v3996_v58, %v3996_v58  ;;  %v6893_v22 = vcombine.low %v11442_v40, %v11466_v42  ;;  %v11617_v40 = vld [vmem:[#allocation22 + $0x18] sm:$0xff]   ;;  %v11639_v26 = vld [vmem:[#allocation22 + $0x30] sm:$0xff]  }
 0x7a0   : > { %4276 = vst [vmem:[#allocation3 + $0xc8] sm:$0xf] %v7116_v4  ;;  %4277 = vst [vmem:[#allocation3 + $0xd4] sm:$0xf] %v7117_v36  ;;  %v6897_v37 = vcombine.high %v11480_v5, %v11500_v11  ;;  %v6896_v42 = vcombine.low %v11480_v5, %v11500_v11  ;;  %v6900_v21 = vcombine.high %v11580_v28, %v11524_v59  ;;  %v11631_v11 = vld [vmem:[#allocation22 + $0x28] sm:$0xff]   ;;  %v8881_v9 = vld [vmem:[%s9997_s14 + $0x20] sm:$0xff]  }
 0x7a1   : > { %4134 = vst [vmem:[#allocation3 + $0xd8] sm:$0xf] %v7086_v7  ;;  %4133 = vst [vmem:[#allocation3 + $0xcc] sm:$0xf] %v7085_v52  ;;  %v6945_v5 = vcombine.high %v11502_v54, %v11580_v28  ;;  %v6899_v43 = vcombine.low %v11580_v28, %v11524_v59  ;;  %v6903_v33 = vcombine.high %v11526_v51, %v11544_v10  ;;  %v11645_v59 = vld [vmem:[#allocation22 + $0x38] sm:$0xff]   ;;  %v8884_v30 = vld [vmem:[%s9997_s14 + $0x30] sm:$0xff]  }
 0x7a2   : > { %v6944_v61 = vcombine.low %v11502_v54, %v11580_v28  ;;  %v6902_v63 = vcombine.low %v11526_v51, %v11544_v10  ;;  %v6906_v50 = vcombine.high %v11546_v49, %v11576_v25  ;;  %v6905_v54 = vcombine.low %v11546_v49, %v11576_v25  ;;  %v8853_v49 = vld [vmem:[#allocation3 + $0x20] ss:$12 sps:$4 sm:$0xff]   ;;  %v8854_v47 = vld [vmem:[#allocation3 + $0x38] ss:$12 sps:$4 sm:$0xff]   ;;  %v8858_v55 = vld [vmem:[#allocation3 + $0x50] ss:$12 sps:$4 sm:$0xff]  }
 0x7a3   : > { %v8859_v48 = vld [vmem:[#allocation3 + $0x80] ss:$12 sps:$4 sm:$0xff]   ;;  %v8882_v4 = vld [vmem:[%s9997_s14 + $0x28] sm:$0xff]  }
 0x7a4   : > { %v8861_v36 = vld [vmem:[#allocation19 + $0x220] sm:$0xff]   ;;  %v8865_v58 = vld [vmem:[#allocation19 + $0x228] sm:$0xff]  }
 0x7a5   : > { %v8863_v0 = vld [vmem:[#allocation3 + $0x98] ss:$12 sps:$4 sm:$0xff]   ;;  %v8885_v52 = vld [vmem:[%s9997_s14 + $0x38] sm:$0xff]  }
 0x7a6   : > { %4794 = vmatmul.mubr.bf16.gmra.mrb[72].mxu1 %v6854_v17  ;;  %v11578_v41 = vld [vmem:[#allocation3 + $0xc0] sm:$0xff]  ;;  %v8864_v7 = vld [vmem:[#allocation3 + $0xb0] ss:$12 sps:$4 sm:$0xff]  }
 0x7a7   : > { %v8807_v34 = vld [vmem:[#allocation3 + $0xbc] ss:$12 sps:$4 sm:$0xff]   ;;  %v8813_v53 = vld [vmem:[#allocation3 + $0xd4] ss:$12 sps:$4 sm:$0xff]   ;;  %v6858_v45 = vcombine.high %v11576_v25, %v11578_v41  ;;  %v6857_v57 = vcombine.low %v11576_v25, %v11578_v41 }
 0x7a8   : > { %8050 = vmatprep.mubr.bf16.mxu0 %v8807_v34  ;;  %v11586_v56 = vld [vmem:[#allocation3 + $0xd8] sm:$0xff]  ;;  %v11588_v18 = vld [vmem:[#allocation3 + $0xcc] sm:$0xff]  ;;  %v8868_v25 = vld [vmem:[#allocation3 + $0xc8] ss:$12 sps:$4 sm:$0xff]  }
 0x7a9   : > { %8051 = vmatmul.mubr.bf16.gmra.mrb[80].mxu0 %v8813_v53  ;;  %4801 = vmatprep.mubr.bf16.mxu1 %v6858_v45  ;;  %v6861_v44 = vcombine.high %v11588_v18, %v11586_v56  ;;  %v6860_v13 = vcombine.low %v11588_v18, %v11586_v56  ;;  %v6909_v51 = vcombine.high %v11578_v41, %v11588_v18  ;;  %v8866_v17 = vld [vmem:[#allocation19 + $0x230] sm:$0xff]   ;;  %v8870_v34 = vld [vmem:[#allocation19 + $0x238] sm:$0xff]  }
 0x7aa   : > { %5219 = vmatprep.mubr.bf16.mxu0 %v6888_v23  ;;  %v6908_v10 = vcombine.low %v11578_v41, %v11588_v18  ;;  %v6957_v27 = vcombine.high %v11586_v56, %v11580_v28  ;;  %v6956_v6 = vcombine.low %v11586_v56, %v11580_v28  ;;  %v8869_v53 = vld [vmem:[#allocation3 + $0x20] ss:$12 sps:$4 sm:$0xff]   ;;  %v8872_v41 = vld [vmem:[#allocation3 + $0x38] ss:$12 sps:$4 sm:$0xff]   ;;  %v8873_v28 = vld [vmem:[#allocation3 + $0x50] ss:$12 sps:$4 sm:$0xff]  }
 0x7ab   : > { %v8875_v23 = vld [vmem:[#allocation3 + $0x68] ss:$12 sps:$4 sm:$0xff]   ;;  %v8876_v45 = vld [vmem:[#allocation3 + $0x98] ss:$12 sps:$4 sm:$0xff]  }
 0x7ac   : > { %v8879_v56 = vld [vmem:[#allocation3 + $0xc8] ss:$12 sps:$4 sm:$0xff]  }
 0x7ad   : > { %v8886_v18 = vld [vmem:[%s9997_s14] sm:$0xff]  }
 0x7ae   : > { %4802 = vmatmul.mubr.bf16.gmra.mrb[76].mxu1 %v6857_v57  ;;  %v8883_v57 = vld [vmem:[#allocation3 + $0xe0] ss:$12 sps:$4 sm:$0xff]  }
 0x7af   : > { %4809 = vmatprep.mubr.bf16.mxu1 %v6861_v44  ;;  %v8887_v44 = vld [vmem:[%s9997_s14 + $0x8] sm:$0xff]  }
 0x7b1   : > { %5220 = vmatmul.mubr.bf16.vlgmr.msra.gmra.mrb[84].mxu0 %v6887_v38  ;;  %v8888_v38 = vld [vmem:[%s9997_s14 + $0x10] sm:$0xff]  }
 0x7b2   : > { %8055 = vmatpush3.bf16.msra.mxu0 %v11534_v46  ;;  %5227 = vmatprep.mubr.bf16.mxu0 %v6891_v35  ;;  %v8845_v46 = vld [vmem:[#allocation19 + $0xa0] sm:$0xff]  }
 0x7b3   : > { %8056 = vmatprep.subr.bf16.mxu0 %v8825_v12 }
 0x7b6   : > { %8057 = vmatpush3.bf16.msra.mxu0 %v8825_v12  ;;  %4810 = vmatmul.mubr.bf16.gmra.mrb[80].mxu1 %v6860_v13  ;;  %v8889_v12 = vld [vmem:[%s9997_s14 + $0x18] sm:$0xff]   ;;  %s9504_s14 = smov [#allocation25]  }
 0x7b7   : > { %8058 = vmatprep.subr.bf16.mxu0 %v8832_v32  ;;  %5767 = vmatprep.mubr.bf16.mxu1 %v6891_v35  ;;  %s9394_s1 = sshll.u32 %s9504_s14, 4  ;;  %s9395_s1 = int_to_ptr.vmem [resolvable:$false] %s9394_s1 }
 0x7b8   : > { %s9396_s2 = scalar_lea.vmem %s9395_s1, 2048  ;;  %p9397_p11 = scmp.lt.s32.totalorder %s11796_s13, %s9395_s1 }
 0x7b9   : > { %5228 = vmatmul.mubr.bf16.gmra.mrb[88].mxu0 %v6890_v14  ;;  %p9398_p3 = scmp.lt.s32.totalorder %s9396_s2, %s9390_s0 }
 0x7ba   : > { %5235 = vmatprep.mubr.bf16.mxu0 %v6894_v3  ;;  %8059 = vmatpush3.bf16.msra.mxu0 %v8832_v32 }
 0x7bb   : > { %8060 = vmatprep.subr.bf16.mxu0 %v8839_v29  ;;  %p9399_p5 = por %p9398_p3, %p9397_p11 }
 0x7bd   : > { %p9400_p7 = pnand %p9399_p5, %p9393_p10 }
 0x7be   : > { %8061 = vmatpush3.bf16.msra.mxu0 %v8839_v29  ;;  %5768 = vmatmul.mubr.bf16.vlgmr.msra.gmra.mrb[84].mxu1 %v6890_v14 }
 0x7bf   : > { %8062 = vmatprep.subr.bf16.mxu0 %v8845_v46  ;;  %5775 = vmatprep.mubr.bf16.mxu1 %v6894_v3 }
 0x7c0   : > { %8254 = vmatpush3.bf16.msra.mxu1 %v11536_v2 }
 0x7c1   : > { %5236 = vmatmul.mubr.bf16.gmra.mrb[92].mxu0 %v6893_v22  ;;  %8247 = vmatprep.subr.bf16.mxu1 %v11605_v8 }
 0x7c2   : > { %5243 = vmatprep.mubr.bf16.mxu0 %v6897_v37  ;;  %8063 = vmatpush3.bf16.msra.mxu0 %v8845_v46 }
 0x7c3   : > { %8064 = vmatprep.subr.bf16.mxu0 %v8847_v31 }
 0x7c4   : > { %8255 = vmatpush3.bf16.msra.mxu1 %v11605_v8 }
 0x7c5   : > { %8248 = vmatprep.subr.bf16.mxu1 %v11613_v20 }
 0x7c6   : > { %8065 = vmatpush3.bf16.msra.mxu0 %v8847_v31  ;;  %5776 = vmatmul.mubr.bf16.gmra.mrb[88].mxu1 %v6893_v22 }
 0x7c7   : > { %5783 = vmatprep.mubr.bf16.mxu1 %v6897_v37  ;;  %8066 = vmatprep.subr.bf16.mxu0 %v8848_v60 }
 0x7c8   : > { %8256 = vmatpush3.bf16.msra.mxu1 %v11613_v20 }
 0x7c9   : > { %5244 = vmatmul.mubr.bf16.gmra.mrb[96].mxu0 %v6896_v42  ;;  %8249 = vmatprep.subr.bf16.mxu1 %v11617_v40 }
 0x7ca   : > { %5251 = vmatprep.mubr.bf16.mxu0 %v6900_v21  ;;  %8067 = vmatpush3.bf16.msra.mxu0 %v8848_v60 }
 0x7cb   : > { %8068 = vmatprep.subr.bf16.mxu0 %v8849_v15 }
 0x7cc   : > { %8257 = vmatpush3.bf16.msra.mxu1 %v11617_v40 }
 0x7cd   : > { %8250 = vmatprep.subr.bf16.mxu1 %v11625_v62 }
 0x7ce   : > { %5784 = vmatmul.mubr.bf16.gmra.mrb[92].mxu1 %v6896_v42  ;;  %8069 = vmatpush3.bf16.msra.mxu0 %v8849_v15 }
 0x7cf   : > { %5791 = vmatprep.mubr.bf16.mxu1 %v6945_v5  ;;  %8086 = vmatprep.subr.bf16.mxu0 %v8851_v24 }
 0x7d0   : > { %8258 = vmatpush3.bf16.msra.mxu1 %v11625_v62 }
 0x7d1   : > { %5252 = vmatmul.mubr.bf16.gmra.mrb[100].mxu0 %v6899_v43  ;;  %8251 = vmatprep.subr.bf16.mxu1 %v11631_v11 }
 0x7d2   : > { %5259 = vmatprep.mubr.bf16.mxu0 %v6903_v33 }
 0x7d4   : > { %8259 = vmatpush3.bf16.msra.mxu1 %v11631_v11 }
 0x7d5   : > { %8252 = vmatprep.subr.bf16.mxu1 %v11639_v26 }
 0x7d6   : > { %5792 = vmatmul.mubr.bf16.gmra.mrb[96].mxu1 %v6944_v61 }
 0x7d7   : > { %5799 = vmatprep.mubr.bf16.mxu1 %v6903_v33 }
 0x7d8   : > { %8260 = vmatpush3.bf16.msra.mxu1 %v11639_v26 }
 0x7d9   : > { %5260 = vmatmul.mubr.bf16.gmra.mrb[104].mxu0 %v6902_v63  ;;  %8253 = vmatprep.subr.bf16.mxu1 %v11645_v59 }
 0x7da   : > { %5267 = vmatprep.mubr.bf16.mxu0 %v6906_v50 }
 0x7dc   : > { %8261 = vmatpush3.bf16.msra.mxu1 %v11645_v59 }
 0x7de   : > { %5800 = vmatmul.mubr.bf16.gmra.mrb[100].mxu1 %v6902_v63 }
 0x7df   : > { %5807 = vmatprep.mubr.bf16.mxu1 %v6906_v50 }
 0x7e1   : > { %5268 = vmatmul.mubr.bf16.gmra.mrb[108].mxu0 %v6905_v54 }
 0x7e2   : > { %5275 = vmatprep.mubr.bf16.mxu0 %v6909_v51 }
 0x7e6   : > { %5808 = vmatmul.mubr.bf16.gmra.mrb[104].mxu1 %v6905_v54 }
 0x7e7   : > { %5815 = vmatprep.mubr.bf16.mxu1 %v6909_v51 }
 0x7e9   : > { %5276 = vmatmul.mubr.bf16.gmra.mrb[112].mxu0 %v6908_v10 }
 0x7ea   : > { %8070 = vmatprep.mubr.bf16.mxu0 %v8850_v39 }
 0x7ee   : > { %5816 = vmatmul.mubr.bf16.gmra.mrb[108].mxu1 %v6908_v10 }
 0x7ef   : > { %5823 = vmatprep.mubr.bf16.mxu1 %v6957_v27 }
 0x7f1   : > { %8071 = vmatmul.mubr.bf16.vlgmr.msra.gmra.mrb[68].mxu0 %v8853_v49 }
 0x7f2   : > { %8087 = vmatpush3.bf16.msra.mxu0 %v8851_v24  ;;  %8074 = vmatprep.mubr.bf16.mxu0 %v8854_v47 }
 0x7f3   : > { %8088 = vmatprep.subr.bf16.mxu0 %v8855_v19 }
 0x7f6   : > { %8089 = vmatpush3.bf16.msra.mxu0 %v8855_v19  ;;  %5824 = vmatmul.mubr.bf16.gmra.mrb[112].mxu1 %v6956_v6 }
 0x7f7   : > { %8090 = vmatprep.subr.bf16.mxu0 %v8856_v1  ;;  %8142 = vmatprep.mubr.bf16.mxu1 %v8881_v9 }
 0x7f9   : > { %8075 = vmatmul.mubr.bf16.gmra.mrb[72].mxu0 %v8858_v55 }
 0x7fa   : > { %8091 = vmatpush3.bf16.msra.mxu0 %v8856_v1  ;;  %8078 = vmatprep.mubr.bf16.mxu0 %v8859_v48 }
 0x7fb   : > { %8092 = vmatprep.subr.bf16.mxu0 %v8860_v16 }
 0x7fe   : > { %8093 = vmatpush3.bf16.msra.mxu0 %v8860_v16  ;;  %8143 = vmatmul.mubr.bf16.vlgmr.msra.gmra.mrb[116].mxu1 %v8882_v4 }
 0x7ff   : > { %8094 = vmatprep.subr.bf16.mxu0 %v8861_v36  ;;  %8146 = vmatprep.mubr.bf16.mxu1 %v8884_v30 }
 0x801   : > { %8079 = vmatmul.mubr.bf16.gmra.mrb[76].mxu0 %v8863_v0 }
 0x802   : > { %8095 = vmatpush3.bf16.msra.mxu0 %v8861_v36  ;;  %8082 = vmatprep.mubr.bf16.mxu0 %v8864_v7 }
 0x803   : > { %8096 = vmatprep.subr.bf16.mxu0 %v8865_v58 }
 0x806   : > { %8097 = vmatpush3.bf16.msra.mxu0 %v8865_v58  ;;  %8147 = vmatmul.mubr.bf16.gmra.mrb[120].mxu1 %v8885_v52 }
 0x807   : > { %8098 = vmatprep.subr.bf16.mxu0 %v8866_v17 }
 0x809   : > { %8083 = vmatmul.mubr.bf16.gmra.mrb[80].mxu0 %v8868_v25 }
 0x80a   : > { %8099 = vmatpush3.bf16.msra.mxu0 %v8866_v17  ;;  %8102 = vmatprep.mubr.bf16.mxu0 %v8869_v53 }
 0x80b   : > { %8100 = vmatprep.subr.bf16.mxu0 %v8870_v34 }
 0x80e   : > { %8101 = vmatpush3.bf16.msra.mxu0 %v8870_v34 }
 0x80f   : > { %8118 = vmatprep.subr.bf16.mxu0 %v11536_v2 }
 0x811   : > { %8103 = vmatmul.mubr.bf16.vlgmr.msra.gmra.mrb[68].mxu0 %v8872_v41 }
 0x812   : > { %8119 = vmatpush3.bf16.msra.mxu0 %v11536_v2  ;;  %8106 = vmatprep.mubr.bf16.mxu0 %v8873_v28  ;;  %v8878_v2 = vld [vmem:[#allocation3 + $0xb0] ss:$12 sps:$4 sm:$0xff]  }
 0x813   : > { %8120 = vmatprep.subr.bf16.mxu0 %v11605_v8 }
 0x816   : > { %8121 = vmatpush3.bf16.msra.mxu0 %v11605_v8 }
 0x817   : > { %8122 = vmatprep.subr.bf16.mxu0 %v11613_v20 }
 0x819   : > { %8107 = vmatmul.mubr.bf16.gmra.mrb[72].mxu0 %v8875_v23 }
 0x81a   : > { %8123 = vmatpush3.bf16.msra.mxu0 %v11613_v20  ;;  %8110 = vmatprep.mubr.bf16.mxu0 %v8876_v45 }
 0x81b   : > { %8124 = vmatprep.subr.bf16.mxu0 %v11617_v40 }
 0x81e   : > { %8125 = vmatpush3.bf16.msra.mxu0 %v11617_v40 }
 0x81f   : > { %8126 = vmatprep.subr.bf16.mxu0 %v11625_v62 }
 0x821   : > { %8111 = vmatmul.mubr.bf16.gmra.mrb[76].mxu0 %v8878_v2 }
 0x822   : > { %8127 = vmatpush3.bf16.msra.mxu0 %v11625_v62  ;;  %8114 = vmatprep.mubr.bf16.mxu0 %v8879_v56 }
 0x823   : > { %8128 = vmatprep.subr.bf16.mxu0 %v11631_v11 }
 0x826   : > { %8129 = vmatpush3.bf16.msra.mxu0 %v11631_v11 }
 0x827   : > { %8130 = vmatprep.subr.bf16.mxu0 %v11639_v26 }
 0x829   : > { %8115 = vmatmul.mubr.bf16.gmra.mrb[80].mxu0 %v8883_v57 }
 0x82a   : > { %8131 = vmatpush3.bf16.msra.mxu0 %v11639_v26  ;;  %8134 = vmatprep.mubr.bf16.mxu0 %v8886_v18 }
 0x82b   : > { %8132 = vmatprep.subr.bf16.mxu0 %v11645_v59 }
 0x82e   : > { %8133 = vmatpush3.bf16.msra.mxu0 %v11645_v59 }
 0x831   : > { %8135 = vmatmul.mubr.bf16.vlgmr.msra.gmra.mrb[68].mxu0 %v8887_v44 }
 0x832   : > { %8138 = vmatprep.mubr.bf16.mxu0 %v8888_v38 }
 0x839   : > { %8139 = vmatmul.mubr.bf16.gmra.mrb[72].mxu0 %v8889_v12 }
 0x851   : > { %v7546_v35 = vpop.f32.mrb[52].mxu1 }
 0x852   : > { %v7547_v32 = vpop.f32.mrb[53].mxu1 }
 0x853   : > { %v7548_v13 = vadd.f32 %v7547_v32, %v7546_v35  ;;  %v7549_v14 = vpop.f32.mrb[54].mxu1 }
 0x854   : > { %v7550_v29 = vpop.f32.mrb[55].mxu1 }
 0x855   : > { %v7551_v3 = vadd.f32 %v7550_v29, %v7549_v14 }
 0x859   : > { %v7552_v46 = vpop.f32.mrb[56].mxu1 }
 0x85a   : > { %v7553_v8 = vpop.f32.mrb[57].mxu1 }
 0x85b   : > { %v7554_v22 = vadd.f32 %v7553_v8, %v7552_v46  ;;  %v7555_v31 = vpop.f32.mrb[58].mxu1 }
 0x85c   : > { %v7556_v37 = vpop.f32.mrb[59].mxu1 }
 0x85d   : > { %v7557_v20 = vadd.f32 %v7556_v37, %v7555_v31 }
 0x861   : > { %v7558_v60 = vpop.f32.mrb[60].mxu1 }
 0x862   : > { %v7559_v40 = vpop.f32.mrb[61].mxu1 }
 0x863   : > { %v11688_v42 = vadd.f32 %v7559_v40, %v7558_v60  ;;  %v7561_v15 = vpop.f32.mrb[62].mxu1 }
 0x864   : > { %v7562_v21 = vpop.f32.mrb[63].mxu1 }
 0x865   : > { %v11690_v62 = vadd.f32 %v7562_v21, %v7561_v15 }
 0x869   : > { %v7564_v24 = vpop.f32.mrb[64].mxu1 }
 0x86a   : > { %v7565_v5 = vpop.f32.mrb[65].mxu1 }
 0x86b   : > { %v11692_v11 = vadd.f32 %v7565_v5, %v7564_v24  ;;  %v7567_v43 = vpop.f32.mrb[66].mxu1 }
 0x86c   : > { %v7568_v33 = vpop.f32.mrb[67].mxu1 }
 0x86d   : > { %v11694_v26 = vadd.f32 %v7568_v33, %v7567_v43 }
 0x871   : > { %v7570_v61 = vpop.f32.mrb[68].mxu1 }
 0x872   : > { %v7571_v59 = vpop.f32.mrb[69].mxu1 }
 0x873   : > { %v11696_v63 = vadd.f32 %v7571_v59, %v7570_v61  ;;  %v7573_v50 = vpop.f32.mrb[70].mxu1 }
 0x874   : > { %v7574_v54 = vpop.f32.mrb[71].mxu1 }
 0x875   : > { %v11698_v51 = vadd.f32 %v7574_v54, %v7573_v50 }
 0x879   : > { %v7576_v10 = vpop.f32.mrb[72].mxu1 }
 0x87a   : > { %v7577_v39 = vpop.f32.mrb[73].mxu1 }
 0x87b   : > { %v11700_v27 = vadd.f32 %v7577_v39, %v7576_v10  ;;  %v7579_v49 = vpop.f32.mrb[74].mxu1 }
 0x87c   : > { %v7580_v19 = vpop.f32.mrb[75].mxu1 }
 0x87d   : > { %v11702_v47 = vadd.f32 %v7580_v19, %v7579_v49 }
 0x881   : > { %v7582_v1 = vpop.f32.mrb[76].mxu1 }
 0x882   : > { %v7583_v9 = vpop.f32.mrb[77].mxu1 }
 0x883   : > { %v11704_v6 = vadd.f32 %v7583_v9, %v7582_v1  ;;  %v7585_v55 = vpop.f32.mrb[78].mxu1 }
 0x884   : > { %v7626_v16 = vpop.f32.mrb[84].mxu0  ;;  %v7586_v48 = vpop.f32.mrb[79].mxu1 }
 0x885   : > { %v7627_v4 = vpop.f32.mrb[85].mxu0  ;;  %v11706_v36 = vadd.f32 %v7586_v48, %v7585_v55 }
 0x886   : > { %v7628_v30 = vadd.f32 %v7627_v4, %v7626_v16  ;;  %v7629_v0 = vpop.f32.mrb[86].mxu0 }
 0x887   : > { %v7630_v58 = vpop.f32.mrb[87].mxu0 }
 0x888   : > { %v8315_v7 = vadd.f32 %v7628_v30, %v7548_v13  ;;  %v7631_v52 = vadd.f32 %v7630_v58, %v7629_v0 }
 0x889   : > { %v7588_v17 = vpop.f32.mrb[80].mxu1 }
 0x88a   : > { %v8325_v25 = vadd.f32 %v7631_v52, %v7551_v3  ;;  %v7589_v34 = vpop.f32.mrb[81].mxu1 }
 0x88b   : > { %v11708_v53 = vadd.f32 %v7589_v34, %v7588_v17  ;;  %v7591_v41 = vpop.f32.mrb[82].mxu1 }
 0x88c   : > { %v7632_v28 = vpop.f32.mrb[88].mxu0  ;;  %v7592_v23 = vpop.f32.mrb[83].mxu1 }
 0x88d   : > { %v7633_v45 = vpop.f32.mrb[89].mxu0  ;;  %v11710_v2 = vadd.f32 %v7592_v23, %v7591_v41 }
 0x88e   : > { %v7634_v56 = vadd.f32 %v7633_v45, %v7632_v28  ;;  %v7635_v18 = vpop.f32.mrb[90].mxu0 }
 0x88f   : > { %v7636_v57 = vpop.f32.mrb[91].mxu0 }
 0x890   : > { %v8310_v44 = vadd.f32 %v7634_v56, %v7554_v22  ;;  %v7637_v38 = vadd.f32 %v7636_v57, %v7635_v18 }
 0x891   : > { %v7706_v12 = vpop.f32.mrb[84].mxu1 }
 0x892   : > { %v8320_v35 = vadd.f32 %v7637_v38, %v7557_v20  ;;  %v7707_v32 = vpop.f32.mrb[85].mxu1 }
 0x893   : > { %v7708_v13 = vadd.f32 %v7707_v32, %v7706_v12  ;;  %v7709_v14 = vpop.f32.mrb[86].mxu1 }
 0x894   : > { %v7638_v29 = vpop.f32.mrb[92].mxu0  ;;  %v7710_v3 = vpop.f32.mrb[87].mxu1 }
 0x895   : > { %v7639_v46 = vpop.f32.mrb[93].mxu0  ;;  %v11712_v8 = vadd.f32 %v8315_v7, %v7708_v13  ;;  %v7711_v31 = vadd.f32 %v7710_v3, %v7709_v14 }
 0x896   : > { %v7640_v37 = vadd.f32 %v7639_v46, %v7638_v29  ;;  %v7641_v60 = vpop.f32.mrb[94].mxu0 }
 0x897   : > { %v7642_v40 = vpop.f32.mrb[95].mxu0  ;;  %v11714_v15 = vadd.f32 %v8325_v25, %v7711_v31 }
 0x898   : > { %v8335_v21 = vadd.f32 %v7640_v37, %v11688_v42  ;;  %v7643_v22 = vadd.f32 %v7642_v40, %v7641_v60 }
 0x899   : > { %v7712_v24 = vpop.f32.mrb[88].mxu1 }
 0x89a   : > { %v8345_v20 = vadd.f32 %v7643_v22, %v11690_v62  ;;  %v7713_v5 = vpop.f32.mrb[89].mxu1 }
 0x89b   : > { %v7714_v43 = vadd.f32 %v7713_v5, %v7712_v24  ;;  %v7715_v33 = vpop.f32.mrb[90].mxu1 }
 0x89c   : > { %v7644_v61 = vpop.f32.mrb[96].mxu0  ;;  %v7716_v59 = vpop.f32.mrb[91].mxu1 }
 0x89d   : > { %v7645_v50 = vpop.f32.mrb[97].mxu0  ;;  %v11718_v54 = vadd.f32 %v8310_v44, %v7714_v43  ;;  %v7717_v10 = vadd.f32 %v7716_v59, %v7715_v33 }
 0x89e   : > { %v7646_v39 = vadd.f32 %v7645_v50, %v7644_v61  ;;  %v7647_v49 = vpop.f32.mrb[98].mxu0 }
 0x89f   : > { %v7648_v19 = vpop.f32.mrb[99].mxu0  ;;  %v11720_v1 = vadd.f32 %v8320_v35, %v7717_v10 }
 0x8a0   : > { %v8330_v42 = vadd.f32 %v7646_v39, %v11692_v11  ;;  %v7649_v9 = vadd.f32 %v7648_v19, %v7647_v49 }
 0x8a1   : > { %v7718_v55 = vpop.f32.mrb[92].mxu1 }
 0x8a2   : > { %v8340_v62 = vadd.f32 %v7649_v9, %v11694_v26  ;;  %v7719_v16 = vpop.f32.mrb[93].mxu1 }
 0x8a3   : > { %v7720_v48 = vadd.f32 %v7719_v16, %v7718_v55  ;;  %v7721_v4 = vpop.f32.mrb[94].mxu1 }
 0x8a4   : > { %v7650_v30 = vpop.f32.mrb[100].mxu0  ;;  %v7722_v0 = vpop.f32.mrb[95].mxu1 }
 0x8a5   : > { %v7651_v58 = vpop.f32.mrb[101].mxu0  ;;  %v11724_v7 = vadd.f32 %v8335_v21, %v7720_v48  ;;  %v7723_v52 = vadd.f32 %v7722_v0, %v7721_v4 }
 0x8a6   : > { %v7652_v17 = vadd.f32 %v7651_v58, %v7650_v30  ;;  %v7653_v25 = vpop.f32.mrb[102].mxu0 }
 0x8a7   : > { %v7654_v34 = vpop.f32.mrb[103].mxu0  ;;  %v11726_v41 = vadd.f32 %v8345_v20, %v7723_v52 }
 0x8a8   : > { %v8356_v11 = vadd.f32 %v7652_v17, %v11696_v63  ;;  %v7655_v28 = vadd.f32 %v7654_v34, %v7653_v25 }
 0x8a9   : > { %v7724_v23 = vpop.f32.mrb[96].mxu1 }
 0x8aa   : > { %v8368_v26 = vadd.f32 %v7655_v28, %v11698_v51  ;;  %v7725_v45 = vpop.f32.mrb[97].mxu1 }
 0x8ab   : > { %v7726_v56 = vadd.f32 %v7725_v45, %v7724_v23  ;;  %v7727_v18 = vpop.f32.mrb[98].mxu1 }
 0x8ac   : > { %v7656_v57 = vpop.f32.mrb[104].mxu0  ;;  %v7728_v44 = vpop.f32.mrb[99].mxu1 }
 0x8ad   : > { %v7657_v38 = vpop.f32.mrb[105].mxu0  ;;  %v11730_v12 = vadd.f32 %v8330_v42, %v7726_v56  ;;  %v7729_v35 = vadd.f32 %v7728_v44, %v7727_v18 }
 0x8ae   : > { %v7658_v32 = vadd.f32 %v7657_v38, %v7656_v57  ;;  %v7659_v13 = vpop.f32.mrb[106].mxu0 }
 0x8af   : > { %v7660_v14 = vpop.f32.mrb[107].mxu0  ;;  %v11732_v29 = vadd.f32 %v8340_v62, %v7729_v35 }
 0x8b0   : > { %v8350_v63 = vadd.f32 %v7658_v32, %v11700_v27  ;;  %v7661_v3 = vadd.f32 %v7660_v14, %v7659_v13 }
 0x8b1   : > { %v7730_v46 = vpop.f32.mrb[100].mxu1 }
 0x8b2   : > { %v8362_v51 = vadd.f32 %v7661_v3, %v11702_v47  ;;  %v7731_v31 = vpop.f32.mrb[101].mxu1 }
 0x8b3   : > { %v7732_v37 = vadd.f32 %v7731_v31, %v7730_v46  ;;  %v7733_v60 = vpop.f32.mrb[102].mxu1 }
 0x8b4   : > { %v7662_v40 = vpop.f32.mrb[108].mxu0  ;;  %v7734_v21 = vpop.f32.mrb[103].mxu1 }
 0x8b5   : > { %v7663_v22 = vpop.f32.mrb[109].mxu0  ;;  %v7735_v24 = vadd.f32 %v7734_v21, %v7733_v60  ;;  %v8357_v20 = vadd.f32 %v8356_v11, %v7732_v37  ;;  %v11740_v60 = vld [vmem:[#allocation21] ss:$0 sm:$0xff] }
 0x8b6   : > { %v7664_v5 = vadd.f32 %v7663_v22, %v7662_v40  ;;  %v7665_v43 = vpop.f32.mrb[110].mxu0 }
 0x8b7   : > { %v7666_v33 = vpop.f32.mrb[111].mxu0  ;;  %v8369_v61 = vadd.f32 %v8368_v26, %v7735_v24 }
 0x8b8   : > { %v8380_v59 = vadd.f32 %v7664_v5, %v11704_v6  ;;  %v7667_v50 = vadd.f32 %v7666_v33, %v7665_v43 }
 0x8b9   : > { %v7736_v27 = vpop.f32.mrb[104].mxu1 }
 0x8ba   : > { %v8392_v10 = vadd.f32 %v7667_v50, %v11706_v36  ;;  %v7737_v39 = vpop.f32.mrb[105].mxu1 }
 0x8bb   : > { %v7738_v47 = vadd.f32 %v7737_v39, %v7736_v27  ;;  %v7739_v49 = vpop.f32.mrb[106].mxu1 }
 0x8bc   : > { %v7668_v19 = vpop.f32.mrb[112].mxu0  ;;  %v7740_v42 = vpop.f32.mrb[107].mxu1 }
 0x8bd   : > { %v7669_v9 = vpop.f32.mrb[113].mxu0  ;;  %v7741_v55 = vadd.f32 %v7740_v42, %v7739_v49  ;;  %v8351_v62 = vadd.f32 %v8350_v63, %v7738_v47 }
 0x8be   : > { %v7670_v16 = vadd.f32 %v7669_v9, %v7668_v19  ;;  %v7671_v48 = vpop.f32.mrb[114].mxu0 }
 0x8bf   : > { %v7672_v4 = vpop.f32.mrb[115].mxu0  ;;  %v8363_v30 = vadd.f32 %v8362_v51, %v7741_v55 }
 0x8c0   : > { %v8374_v0 = vadd.f32 %v7670_v16, %v11708_v53  ;;  %v7673_v58 = vadd.f32 %v7672_v4, %v7671_v48 }
 0x8c1   : > { %v7742_v6 = vpop.f32.mrb[108].mxu1 }
 0x8c2   : > { %v8386_v52 = vadd.f32 %v7673_v58, %v11710_v2  ;;  %v7743_v17 = vpop.f32.mrb[109].mxu1 }
 0x8c3   : > { %v7744_v36 = vadd.f32 %v7743_v17, %v7742_v6  ;;  %v7745_v25 = vpop.f32.mrb[110].mxu1 }
 0x8c4   : > { %v7746_v34 = vpop.f32.mrb[111].mxu1 }
 0x8c5   : > { %v7747_v11 = vadd.f32 %v7746_v34, %v7745_v25  ;;  %v8381_v28 = vadd.f32 %v8380_v59, %v7744_v36  ;;  %v11744_v59 = vld [vmem:[#allocation24] ss:$0 sm:$0xff]  ;;  %v8322_v34 = vadd.f32 %v11720_v1, %v11740_v60 }
 0x8c7   : > { %v8393_v23 = vadd.f32 %v8392_v10, %v7747_v11 }
 0x8c9   : > { %v7748_v26 = vpop.f32.mrb[112].mxu1 }
 0x8ca   : > { %v7749_v45 = vpop.f32.mrb[113].mxu1 }
 0x8cb   : > { %v7750_v56 = vadd.f32 %v7749_v45, %v7748_v26  ;;  %v7751_v18 = vpop.f32.mrb[114].mxu1  ;;  %v8312_v45 = vadd.f32 %v11718_v54, %v11740_v60 }
 0x8cc   : > { %v7752_v57 = vpop.f32.mrb[115].mxu1 }
 0x8cd   : > { %v7753_v44 = vadd.f32 %v7752_v57, %v7751_v18  ;;  %v8375_v38 = vadd.f32 %v8374_v0, %v7750_v56 }
 0x8cf   : > { %v8387_v35 = vadd.f32 %v8386_v52, %v7753_v44  ;;  %v8317_v44 = vadd.f32 %v11712_v8, %v11740_v60 }
 0x8d1   : > { %v8144_v53 = vpop.f32.mrb[116].mxu1 }
 0x8d2   : > { %v6169_v32 = vpop.f32.mrb[117].mxu1 }
 0x8d3   : > { %v8145_v13 = vpop.f32.mrb[118].mxu1 }
 0x8d4   : > { %v6172_v14 = vpop.f32.mrb[119].mxu1 }
 0x8d9   : > { %v8148_v2 = vpop.f32.mrb[120].mxu1 }
 0x8da   : > { %v6185_v63 = vpop.f32.mrb[121].mxu1 }
 0x8db   : > { %v8149_v3 = vpop.f32.mrb[122].mxu1 }
 0x8dc   : > { %v6188_v46 = vpop.f32.mrb[123].mxu1 }
 0x8f4   : > { %v8112_v51 = vpop.f32.mrb[76].mxu0 }
 0x8f5   : > { %v8352_v31 = vadd.f32 %v8351_v62, %v8112_v51  ;;  %v5898_v37 = vpop.f32.mrb[77].mxu0 }
 0x8f6   : > { %v8358_v40 = vadd.f32 %v8357_v20, %v5898_v37  ;;  %v8113_v21 = vpop.f32.mrb[78].mxu0 }
 0x8f7   : > { %v8353_v22 = vadd.f32 %v8352_v31, %v11740_v60  ;;  %v8364_v24 = vadd.f32 %v8363_v30, %v8113_v21  ;;  %v5901_v5 = vpop.f32.mrb[79].mxu0 }
 0x8f8   : > { %v8359_v43 = vadd.f32 %v8358_v40, %v11740_v60  ;;  %v8370_v33 = vadd.f32 %v8369_v61, %v5901_v5  ;;  %v8347_v5 = vadd.f32 %v11726_v41, %v11740_v60 }
 0x8f9   : > { %v8365_v50 = vadd.f32 %v8364_v24, %v11740_v60  ;;  %v8354_v27 = vadd.f32 %v8353_v22, %v11744_v59  ;;  %v8342_v22 = vadd.f32 %v11732_v29, %v11740_v60 }
 0x8fa   : > { %v8371_v10 = vadd.f32 %v8370_v33, %v11740_v60  ;;  %v8360_v39 = vadd.f32 %v8359_v43, %v11744_v59  ;;  %v8348_v41 = vadd.f32 %v8347_v5, %v11744_v59 }
 0x8fb   : > { %v8355_v47 = vadd.f32 %v8354_v27, %v8144_v53  ;;  %v8366_v20 = vadd.f32 %v8365_v50, %v11744_v59  ;;  %v8343_v29 = vadd.f32 %v8342_v22, %v11744_v59 }
 0x8fc   : > { %v8361_v49 = vadd.f32 %v8360_v39, %v6169_v32  ;;  %v8116_v19 = vpop.f32.mrb[80].mxu0  ;;  %v8372_v42 = vadd.f32 %v8371_v10, %v11744_v59  ;;  %v8323_v32 = vadd.f32 %v8322_v34, %v11744_v59 }
 0x8fd   : > { %v8376_v9 = vadd.f32 %v8375_v38, %v8116_v19  ;;  %v8367_v61 = vadd.f32 %v8366_v20, %v8145_v13  ;;  %v5914_v55 = vpop.f32.mrb[81].mxu0 }
 0x8fe   : > { %v8382_v62 = vadd.f32 %v8381_v28, %v5914_v55  ;;  %v8373_v16 = vadd.f32 %v8372_v42, %v6172_v14  ;;  %v8117_v48 = vpop.f32.mrb[82].mxu0 }
 0x8ff   : > { %v8377_v4 = vadd.f32 %v8376_v9, %v11740_v60  ;;  %v7196_v30 = vpack.c.bf16 %v8367_v61, %v8355_v47  ;;  %v8388_v0 = vadd.f32 %v8387_v35, %v8117_v48  ;;  %v5917_v58 = vpop.f32.mrb[83].mxu0 }
 0x900   : > { %v8383_v6 = vadd.f32 %v8382_v62, %v11740_v60  ;;  %v7191_v52 = vpack.c.bf16 %v8373_v16, %v8361_v49  ;;  %v8394_v17 = vadd.f32 %v8393_v23, %v5917_v58  ;;  %v8327_v23 = vadd.f32 %v11714_v15, %v11740_v60 }
 0x901   : > { %7219 = vst [vmem:[%s11756_s30 + $0x28] sm:$0xff] %v7196_v30   ;;  %v8389_v36 = vadd.f32 %v8388_v0, %v11740_v60  ;;  %v8378_v25 = vadd.f32 %v8377_v4, %v11744_v59 }
 0x902   : > { %7218 = vst [vmem:[%s11756_s30 + $0x20] sm:$0xff] %v7191_v52   ;;  %v8395_v11 = vadd.f32 %v8394_v17, %v11740_v60  ;;  %v8384_v28 = vadd.f32 %v8383_v6, %v11744_v59  ;;  %v8328_v54 = vadd.f32 %v8327_v23, %v11744_v59 }
 0x903   : > { %v8379_v26 = vadd.f32 %v8378_v25, %v8148_v2  ;;  %v8390_v56 = vadd.f32 %v8389_v36, %v11744_v59 }
 0x904   : > { %v8385_v18 = vadd.f32 %v8384_v28, %v6185_v63  ;;  %v8136_v57 = vpop.f32.mrb[68].mxu0  ;;  %v8396_v1 = vadd.f32 %v8395_v11, %v11744_v59 }
 0x905   : > { %v8313_v38 = vadd.f32 %v8312_v45, %v8136_v57  ;;  %v8391_v35 = vadd.f32 %v8390_v56, %v8149_v3  ;;  %v6137_v53 = vpop.f32.mrb[69].mxu0  ;;  %v8332_v3 = vadd.f32 %v11730_v12, %v11740_v60 }
 0x906   : > { %v8318_v15 = vadd.f32 %v8317_v44, %v6137_v53  ;;  %v8397_v13 = vadd.f32 %v8396_v1, %v6188_v46  ;;  %v8137_v14 = vpop.f32.mrb[70].mxu0  ;;  %v8337_v46 = vadd.f32 %v11724_v7, %v11740_v60 }
 0x907   : > { %v8314_v2 = vadd.f32 %v8313_v38, %v11744_v59  ;;  %v7206_v63 = vpack.c.bf16 %v8391_v35, %v8379_v26  ;;  %v8324_v8 = vadd.f32 %v8323_v32, %v8137_v14  ;;  %v6140_v51 = vpop.f32.mrb[71].mxu0  ;;  %v8333_v12 = vadd.f32 %v8332_v3, %v11744_v59 }
 0x908   : > { %v8319_v31 = vadd.f32 %v8318_v15, %v11744_v59  ;;  %v7201_v37 = vpack.c.bf16 %v8397_v13, %v8385_v18  ;;  %v8329_v40 = vadd.f32 %v8328_v54, %v6140_v51  ;;  %v8338_v33 = vadd.f32 %v8337_v46, %v11744_v59 }
 0x909   : > { %7221 = vst [vmem:[%s11756_s30 + $0x38] sm:$0xff] %v7206_v63   ;;  %v7176_v21 = vpack.c.bf16 %v8324_v8, %v8314_v2 }
 0x90a   : > { %7220 = vst [vmem:[%s11756_s30 + $0x30] sm:$0xff] %v7201_v37   ;;  %v7171_v24 = vpack.c.bf16 %v8329_v40, %v8319_v31 }
 0x90b   : > { %7215 = vst [vmem:[%s11756_s30 + $0x8] sm:$0xff] %v7176_v21  }
 0x90c   : > { %7172 = vst [vmem:[%s11756_s30] sm:$0xff] %v7171_v24   ;;  %v8140_v43 = vpop.f32.mrb[72].mxu0 }
 0x90d   : > { %v8334_v7 = vadd.f32 %v8333_v12, %v8140_v43  ;;  %v6153_v50 = vpop.f32.mrb[73].mxu0 }
 0x90e   : > { %v8339_v27 = vadd.f32 %v8338_v33, %v6153_v50  ;;  %v8141_v10 = vpop.f32.mrb[74].mxu0 }
 0x90f   : > { %v8344_v60 = vadd.f32 %v8343_v29, %v8141_v10  ;;  %v6156_v39 = vpop.f32.mrb[75].mxu0 }
 0x910   : > { %v8349_v47 = vadd.f32 %v8348_v41, %v6156_v39 }
 0x911   : > { %v7186_v20 = vpack.c.bf16 %v8344_v60, %v8334_v7 }
 0x912   : > { %v7181_v49 = vpack.c.bf16 %v8349_v47, %v8339_v27 }
 0x913   : > { %7217 = vst [vmem:[%s11756_s30 + $0x18] sm:$0xff] %v7186_v20  }
 0x914   : > { %7216 = vst [vmem:[%s11756_s30 + $0x10] sm:$0xff] %v7181_v49  }
 0x915   : > { %9403 = shalt.err (!%p9400_p7)
}
 0x916   : > { %s9404_s30 = scalar_lea.hbm %s11801_s24, 1024  ;;  %s9408_s15 = scalar_lea.hbm %s12032_s20, 2048 }
 0x917   : > { %p9405_p6 = scmp.ne.s32.totalorder %s11801_s24, %s9404_s30  ;;  %p9409_p1 = scmp.lt.u32.totalorder %s11801_s24, %s12032_s20 }
 0x918   : > { %p9410_p13 = scmp.lt.u32.totalorder %s9408_s15, %s9404_s30  ;;  %p9412_p2 = scmp.lt.u32.totalorder %s9404_s30, %s11801_s24 }
 0x919   : > { %p9406_p9 = pnand %p9405_p6, %p12033_p8 }
 0x91a   : > { %p9411_p0 = por %p9410_p13, %p9409_p1 }
 0x91b   : > { %p9407_p12 = pneg %p9406_p9 }
 0x91c   : > { %p9413_p4 = por %p9412_p2, %p9411_p0 }
 0x91e   : > { %p9414_p10 = pnand %p9413_p4, %p9407_p12 }
 0x920   : > { %9417 = shalt.err (!%p9414_p10)
}
 0x921   : > { %s9505_s2 = smov 64   ;;  %s9506_s0 = smov 4  }
 0x922   : > { %8520 = dma.vmem_to_hbm [thread:$0]  (%p12033_p8), %s11796_s13, 1024, %s11801_s24, %s6297_s25, %s9505_s2, %s9505_s2, %s9506_s0  }
 0x923 PF: > { %s12034_s18 = sld [smem:[#allocation34_spill]]  ;;  %p12035_p11 = scmp.ne.s32.totalorder %s11924_s19, 0 }
 0x924   : > { %p12036_p3 = scmp.ge.s32.totalorder %s9480_s28, 2 }
 0x926   : > { %p8564_p5 = pnand %p12036_p3, %p12035_p11 }
 0x929   : > { %s6325_s16 = sand.u32 1, %s12034_s18  }
 0x92a   : > { %s6326_s30 = scalar_lea.sflag [#allocation6], %s6325_s16 }
 0x92b   : > { %9463 = dma.done.wait (!%p8564_p5), %s6326_s30, 1024  }
 0x92c   : > { %9465 = vsyncadd (!%p8564_p5), %s6326_s30, 4294966272  ;;  %p32_p7 = scmp.ge.s32.totalorder %s9909_s22, 4   ;;  %s12037_s25 = smov %s9472_s26 }
 0x92d   : > { %s12038_s26 = smov %s9476_s27  ;;  %s12039_s27 = smov %s9920_s17 }
 0x92e   : > { %s12040_s28 = smov %s9909_s22  ;;  %34 = sbr.rel (!%p32_p7) target bundleno = 16 (0x10), region = 175 }
 0x935   :  { %6331 = vsyncpa [#allocation5], 1 }
 0x936   :  { %6333 = vsyncpa [#allocation5 + $0x1], 1 }
 0x937   :  { %6334 = vsyncpa [#allocation8], 1 }
 0x938   :  { %6335 = vsyncpa [#allocation11], 1 }
 0x939   :  { %6336 = vsyncpa [#allocation14], 1 }
 0x93a   :  { %6337 = vsyncpa [#allocation17], 1 }
 0x93b   :  { %6338 = vsyncpa [#allocation20], 1 }
 0x93c   :  { %6339 = vsyncpa [#allocation23], 1 }
 0x93d   :  { %6340 = vsyncpa [#allocation6], 1 }
 0x93e   :  { %6342 = vsyncpa [#allocation6 + $0x1], 1 }

// kernel: tpu_custom_call.1
= control target key start
LH: loop header
LB: loop body
LE: loop exit
PB: predicated region body
PF: predicated region fallthrough
CT: control target
= control target key end

     0   :  { %s11847_s0 = inlined_call_operand.hbm [shape: bf16[256,128], index: 0, kind: input, shape index: {}]   ;;  %s11848_s1 = inlined_call_operand.hbm [shape: f32[128,128], index: 1, kind: input, shape index: {}]   ;;  %s11849_s2 = inlined_call_operand.hbm [shape: f32[128,128], index: 2, kind: input, shape index: {}]   ;;  %s11850_s3 = inlined_call_operand.hbm [shape: f32[1,128], index: 3, kind: input, shape index: {}]   ;;  %s11851_s4 = inlined_call_operand.hbm [shape: f32[1,128], index: 4, kind: input, shape index: {}]   ;;  %s11852_s5 = inlined_call_operand.hbm [shape: f32[1,128], index: 5, kind: input, shape index: {}]   ;;  %s11853_s6 = inlined_call_operand.hbm [shape: f32[1,128], index: 6, kind: input, shape index: {}]   ;;  %s11854_s7 = inlined_call_operand.hbm [shape: bf16[3,384,128], index: 7, kind: input, shape index: {}]   ;;  %s11855_s8 = inlined_call_operand.hbm [shape: f32[1,128], index: 8, kind: input, shape index: {}]   ;;  %s11856_s9 = inlined_call_operand.hbm [shape: bf16[3,384,128], index: 9, kind: input, shape index: {}]   ;;  %s11857_s10 = inlined_call_operand.hbm [shape: f32[1,128], index: 10, kind: input, shape index: {}]   ;;  %s11858_s11 = inlined_call_operand.hbm [shape: bf16[128,128], index: 11, kind: input, shape index: {}]   ;;  %s11859_s12 = inlined_call_operand.hbm [shape: f32[1,128], index: 12, kind: input, shape index: {}]   ;;  %s11860_s13 = inlined_call_operand.hbm [shape: bf16[256,128], index: 13, kind: output, shape index: {}]  }
   0x1   :  { %11904 = sst [smem:[#allocation56_spill]] %s11847_s0 }
   0x2   :  { %11905 = sst [smem:[#allocation57_spill]] %s11848_s1 }
   0x3   :  { %11906 = sst [smem:[#allocation58_spill]] %s11849_s2 }
   0x4   :  { %11907 = sst [smem:[#allocation59_spill]] %s11860_s13 }
   0x5   :  { %18 = vsyncpa [#allocation5], 0 }
   0x6   :  { %20 = vsyncpa [#allocation5 + $0x1], 0 }
   0x7   :  { %21 = vsyncpa [#allocation8], 0 }
   0x8   :  { %22 = vsyncpa [#allocation11], 0 }
   0x9   :  { %23 = vsyncpa [#allocation14], 0 }
   0xa   :  { %24 = vsyncpa [#allocation17], 0 }
   0xb   :  { %25 = vsyncpa [#allocation20], 0 }
   0xc   :  { %26 = vsyncpa [#allocation23], 0 }
   0xd   :  { %27 = vsyncpa [#allocation6], 0 }
   0xe   :  { %29 = vsyncpa [#allocation6 + $0x1], 0  ;;  %s9577_s25 = smov 0   ;;  %s9579_s26 = smov 0  }
   0xf   :  { %s9581_s27 = smov 0   ;;  %s9583_s28 = smov 0  }
  0x10 LB: > { %11908 = sst [smem:[#allocation34_spill]] %s9468_s25  ;;  %s9482_s29 = smov [#allocation7]   ;;  %s9480_s28 = sphi %s9583_s28, %s12040_s28   ;;  %s9476_s27 = sphi %s9581_s27, %s12039_s27   ;;  %s9472_s26 = sphi %s9579_s26, %s12038_s26   ;;  %s9468_s25 = sphi %s9577_s25, %s12037_s25  }
  0x11   : > { %s356_s30 = sshll.u32 %s9482_s29, 4  ;;  %s9598_s14 = sadd.s32 4294967295, %s9480_s28   ;;  %s9603_s30 = int_to_ptr.vmem [resolvable:$true] %s356_s30 }
  0x12   : > { %11909 = sst [smem:[#allocation35_spill]] %s9598_s14  ;;  %p6498_p0 = scmp.ge.s32.totalorder %s9480_s28, 1 }
  0x13   : > { %p11867_p1 = scmp.eq.s32.totalorder %s9598_s14, 0  ;;  %p344_p2 = scmp.lt.s32.totalorder %s9480_s28, 3 }
  0x14   : > { %s9483_s16 = smov [#allocation10]   ;;  %s9484_s19 = smov [#allocation13]  }
  0x15   : > { %p9605_p3 = pnand %p6498_p0, %p344_p2  ;;  %s383_s17 = sshll.u32 %s9483_s16, 4  ;;  %s9618_s17 = int_to_ptr.vmem [resolvable:$true] %s383_s17 }
  0x16   : > { %s405_s20 = sshll.u32 %s9484_s19, 4  ;;  %s11913_s1 = sld [smem:[#allocation57_spill]]  ;;  %s9620_s20 = int_to_ptr.vmem [resolvable:$true] %s405_s20 }
  0x17   : > { %s11910_s15 = scalar_select %p9605_p3, 1, 0 }
  0x18   : > { %p8522_p5 = pneg %p9605_p3 }
  0x19   : > { %11911 = sst [smem:[#allocation36_spill]] %s11910_s15 }
  0x1a   : > { %p9614_p6 = pnand %p8522_p5, %p11867_p1 }
  0x1c   : > { %s9024_s23 = scalar_lea.hbm %s11913_s1, 2048  ;;  %p9630_p8 = pneg %p9614_p6 }
  0x1d   : > { %p9025_p7 = scmp.ne.s32.totalorder %s11913_s1, %s9024_s23  ;;  %p9031_p11 = scmp.lt.u32.totalorder %s9024_s23, %s11913_s1 }
  0x1f   : > { %p9027_p9 = pnand %p9630_p8, %p9025_p7 }
  0x21   : > { %p9028_p10 = pneg %p9027_p9 }
  0x23   : > { %p9033_p12 = pnand %p9031_p11, %p9028_p10 }
  0x25   : > { %9036 = shalt.err (!%p9033_p12)
}
  0x26   : > { %s9037_s21 = scalar_lea.vmem %s9603_s30, 2048  ;;  %p9045_p5 = scmp.lt.s32.totalorder %s9603_s30, %s9603_s30 }
  0x27   : > { %p9038_p13 = scmp.ne.s32.totalorder %s9603_s30, %s9037_s21  ;;  %p9046_p4 = scmp.lt.s32.totalorder %s9037_s21, %s9037_s21 }
  0x29   : > { %p9040_p0 = pnand %p9038_p13, %p9630_p8  ;;  %p9047_p7 = por %p9046_p4, %p9045_p5 }
  0x2b   : > { %p9041_p2 = pneg %p9040_p0 }
  0x2d   : > { %p9048_p9 = pnand %p9047_p7, %p9041_p2 }
  0x2f   : > { %9051 = shalt.err (!%p9048_p9)
}
  0x30   : > { %s11869_s22 = smov 128   ;;  %s11870_s13 = smov 8  }
  0x31   : > { %8525 = dma.hbm_to_vmem [thread:$0]  (!%p9614_p6), %s11913_s1, 2048, %s9603_s30, [#allocation8], %s11869_s22, %s11869_s22, %s11870_s13  }
  0x32   : > { %s9052_s21 = scalar_lea.hbm %s11850_s3, 16 }
  0x33   : > { %p9053_p4 = scmp.ne.s32.totalorder %s11850_s3, %s9052_s21  ;;  %p9059_p12 = scmp.lt.u32.totalorder %s9052_s21, %s11850_s3 }
  0x35   : > { %p9055_p10 = pnand %p9053_p4, %p9630_p8 }
  0x37   : > { %p9056_p11 = pneg %p9055_p10 }
  0x39   : > { %p9061_p13 = pnand %p9059_p12, %p9056_p11 }
  0x3b   : > { %9064 = shalt.err (!%p9061_p13)
}
  0x3c   : > { %s9065_s30 = scalar_lea.vmem %s9618_s17, 16  ;;  %s9072_s0 = scalar_lea.vmem %s9618_s17, 32 }
  0x3d   : > { %p9066_p0 = scmp.ne.s32.totalorder %s9618_s17, %s9065_s30  ;;  %p9073_p7 = scmp.lt.s32.totalorder %s9618_s17, %s9618_s17 }
  0x3e   : > { %p9074_p9 = scmp.lt.s32.totalorder %s9072_s0, %s9065_s30 }
  0x3f   : > { %p9068_p2 = pnand %p9066_p0, %p9630_p8 }
  0x40   : > { %p9075_p4 = por %p9074_p9, %p9073_p7 }
  0x41   : > { %p9069_p5 = pneg %p9068_p2 }
  0x43   : > { %p9076_p10 = pnand %p9075_p4, %p9069_p5 }
  0x45   : > { %9079 = shalt.err (!%p9076_p10)
}
  0x46   : > { %8531 = dma.hbm_to_vmem [thread:$0]  (!%p9614_p6), %s11850_s3, 16, %s9618_s17, [#allocation11]  }
  0x47   : > { %s9080_s24 = scalar_lea.hbm %s11852_s5, 16 }
  0x48   : > { %p9081_p11 = scmp.ne.s32.totalorder %s11852_s5, %s9080_s24  ;;  %p9087_p0 = scmp.lt.u32.totalorder %s9080_s24, %s11852_s5 }
  0x4a   : > { %p9083_p12 = pnand %p9081_p11, %p9630_p8 }
  0x4c   : > { %p9084_p13 = pneg %p9083_p12 }
  0x4e   : > { %p9089_p2 = pnand %p9087_p0, %p9084_p13 }
  0x50   : > { %9092 = shalt.err (!%p9089_p2)
}
  0x51   : > { %s9093_s17 = scalar_lea.vmem %s9620_s20, 16  ;;  %s9100_s0 = scalar_lea.vmem %s9620_s20, 32 }
  0x52   : > { %p9094_p5 = scmp.ne.s32.totalorder %s9620_s20, %s9093_s17  ;;  %p9101_p4 = scmp.lt.s32.totalorder %s9620_s20, %s9620_s20 }
  0x53   : > { %p9102_p10 = scmp.lt.s32.totalorder %s9100_s0, %s9093_s17 }
  0x54   : > { %p9096_p7 = pnand %p9094_p5, %p9630_p8 }
  0x55   : > { %p9103_p11 = por %p9102_p10, %p9101_p4 }
  0x56   : > { %p9097_p9 = pneg %p9096_p7 }
  0x58   : > { %p9104_p12 = pnand %p9103_p11, %p9097_p9 }
  0x5a   : > { %9107 = shalt.err (!%p9104_p12)
}
  0x5b   : > { %8537 = dma.hbm_to_vmem [thread:$0]  (!%p9614_p6), %s11852_s5, 16, %s9620_s20, [#allocation14]  }
  0x5c   : > { %s9487_s15 = smov [#allocation16]   ;;  %s9108_s19 = scalar_lea.hbm %s11854_s7, 9216 }
  0x5d   : > { %s426_s23 = sshll.u32 %s9487_s15, 4  ;;  %p9109_p13 = scmp.ne.s32.totalorder %s11854_s7, %s9108_s19  ;;  %s427_s23 = int_to_ptr.vmem [resolvable:$true] %s426_s23 }
  0x5e   : > { %p9115_p5 = scmp.lt.u32.totalorder %s9108_s19, %s11854_s7 }
  0x5f   : > { %p9111_p0 = pnand %p9109_p13, %p9630_p8 }
  0x61   : > { %p9112_p2 = pneg %p9111_p0 }
  0x63   : > { %p9117_p7 = pnand %p9115_p5, %p9112_p2 }
  0x65   : > { %9120 = shalt.err (!%p9117_p7)
}
  0x66   : > { %s9121_s20 = scalar_lea.vmem %s427_s23, 9216  ;;  %p9129_p11 = scmp.lt.s32.totalorder %s427_s23, %s427_s23 }
  0x67   : > { %p9122_p9 = scmp.ne.s32.totalorder %s427_s23, %s9121_s20  ;;  %p9130_p12 = scmp.lt.s32.totalorder %s9121_s20, %s9121_s20 }
  0x69   : > { %p9124_p4 = pnand %p9122_p9, %p9630_p8  ;;  %p9131_p1 = por %p9130_p12, %p9129_p11 }
  0x6b   : > { %p9125_p10 = pneg %p9124_p4 }
  0x6d   : > { %p9132_p3 = pnand %p9131_p1, %p9125_p10 }
  0x6f   : > { %9135 = shalt.err (!%p9132_p3)
}
  0x70   : > { %s11871_s25 = smov 64   ;;  %s11872_s14 = smov 4  }
  0x71   : > { %8543 = dma.hbm_to_vmem [thread:$0]  (!%p9614_p6), %s11854_s7, 9216, %s427_s23, [#allocation17], %s11871_s25, %s11871_s25, %s11872_s14  }
  0x72   : > { %s9490_s29 = smov [#allocation19]   ;;  %s9491_s21 = smov [#allocation22]  }
  0x73   : > { %s450_s19 = sshll.u32 %s9490_s29, 4  ;;  %s474_s30 = sshll.u32 %s9491_s21, 4  ;;  %s451_s19 = int_to_ptr.vmem [resolvable:$true] %s450_s19  ;;  %s9723_s30 = int_to_ptr.vmem [resolvable:$true] %s474_s30 }
  0x74   : > { %s9136_s20 = scalar_lea.hbm %s11856_s9, 9216 }
  0x75   : > { %p9137_p1 = scmp.ne.s32.totalorder %s11856_s9, %s9136_s20  ;;  %p9143_p0 = scmp.lt.u32.totalorder %s9136_s20, %s11856_s9 }
  0x77   : > { %p9139_p3 = pnand %p9137_p1, %p9630_p8 }
  0x79   : > { %p9140_p13 = pneg %p9139_p3 }
  0x7b   : > { %p9145_p2 = pnand %p9143_p0, %p9140_p13 }
  0x7d   : > { %9148 = shalt.err (!%p9145_p2)
}
  0x7e   : > { %s9149_s24 = scalar_lea.vmem %s451_s19, 9216  ;;  %p9157_p4 = scmp.lt.s32.totalorder %s451_s19, %s451_s19 }
  0x7f   : > { %p9150_p5 = scmp.ne.s32.totalorder %s451_s19, %s9149_s24  ;;  %p9158_p10 = scmp.lt.s32.totalorder %s9149_s24, %s9149_s24 }
  0x81   : > { %p9152_p7 = pnand %p9150_p5, %p9630_p8  ;;  %p9159_p11 = por %p9158_p10, %p9157_p4 }
  0x83   : > { %p9153_p9 = pneg %p9152_p7 }
  0x85   : > { %p9160_p12 = pnand %p9159_p11, %p9153_p9 }
  0x87   : > { %9163 = shalt.err (!%p9160_p12)
}
  0x88   : > { %8549 = dma.hbm_to_vmem [thread:$0]  (!%p9614_p6), %s11856_s9, 9216, %s451_s19, [#allocation20], %s11871_s25, %s11871_s25, %s11872_s14  }
  0x89   : > { %s9164_s17 = scalar_lea.hbm %s11858_s11, 1024 }
  0x8a   : > { %p9165_p1 = scmp.ne.s32.totalorder %s11858_s11, %s9164_s17  ;;  %p9171_p0 = scmp.lt.u32.totalorder %s9164_s17, %s11858_s11 }
  0x8c   : > { %p9167_p3 = pnand %p9165_p1, %p9630_p8 }
  0x8e   : > { %p9168_p13 = pneg %p9167_p3 }
  0x90   : > { %p9173_p2 = pnand %p9171_p0, %p9168_p13 }
  0x92   : > { %9176 = shalt.err (!%p9173_p2)
}
  0x93   : > { %s9177_s19 = scalar_lea.vmem %s9723_s30, 1024  ;;  %p9185_p4 = scmp.lt.s32.totalorder %s9723_s30, %s9723_s30 }
  0x94   : > { %p9178_p5 = scmp.ne.s32.totalorder %s9723_s30, %s9177_s19  ;;  %p9186_p10 = scmp.lt.s32.totalorder %s9177_s19, %s9177_s19 }
  0x96   : > { %p9180_p7 = pnand %p9178_p5, %p9630_p8  ;;  %p9187_p11 = por %p9186_p10, %p9185_p4 }
  0x98   : > { %p9181_p9 = pneg %p9180_p7 }
  0x9a   : > { %p9188_p12 = pnand %p9187_p11, %p9181_p9 }
  0x9c   : > { %9191 = shalt.err (!%p9188_p12)
}
  0x9d   : > { %8555 = dma.hbm_to_vmem [thread:$0]  (!%p9614_p6), %s11858_s11, 1024, %s9723_s30, [#allocation23], %s11871_s25, %s11871_s25, %s11872_s14  }
  0x9e   : > { %s9492_s13 = smov [#allocation9]   ;;  %s9493_s21 = smov [#allocation12]  }
  0x9f   : > { %s369_s29 = sshll.u32 %s9492_s13, 4  ;;  %s394_s17 = sshll.u32 %s9493_s21, 4  ;;  %s370_s29 = int_to_ptr.vmem [resolvable:$true] %s369_s29  ;;  %s9772_s17 = int_to_ptr.vmem [resolvable:$true] %s394_s17 }
  0xa0   : > { %s11915_s2 = sld [smem:[#allocation58_spill]] }
  0xa6   : > { %s9192_s15 = scalar_lea.hbm %s11915_s2, 2048 }
  0xa7   : > { %p9193_p1 = scmp.ne.s32.totalorder %s11915_s2, %s9192_s15  ;;  %p9199_p0 = scmp.lt.u32.totalorder %s9192_s15, %s11915_s2 }
  0xa9   : > { %p9195_p3 = pnand %p9193_p1, %p9630_p8 }
  0xab   : > { %p9196_p13 = pneg %p9195_p3 }
  0xad   : > { %p9201_p2 = pnand %p9199_p0, %p9196_p13 }
  0xaf   : > { %9204 = shalt.err (!%p9201_p2)
}
  0xb0   : > { %s9205_s22 = scalar_lea.vmem %s370_s29, 2048  ;;  %p9213_p4 = scmp.lt.s32.totalorder %s370_s29, %s370_s29 }
  0xb1   : > { %p9206_p5 = scmp.ne.s32.totalorder %s370_s29, %s9205_s22  ;;  %p9214_p10 = scmp.lt.s32.totalorder %s9205_s22, %s9205_s22 }
  0xb3   : > { %p9208_p7 = pnand %p9206_p5, %p9630_p8  ;;  %p9215_p11 = por %p9214_p10, %p9213_p4 }
  0xb5   : > { %p9209_p9 = pneg %p9208_p7 }
  0xb7   : > { %p9216_p12 = pnand %p9215_p11, %p9209_p9 }
  0xb9   : > { %9219 = shalt.err (!%p9216_p12)
}
  0xba   : > { %s11916_s13 = smov 8   ;;  %s11917_s21 = smov 128  }
  0xbb   : > { %8528 = dma.hbm_to_vmem [thread:$0]  (!%p9614_p6), %s11915_s2, 2048, %s370_s29, [#allocation8], %s11917_s21, %s11917_s21, %s11916_s13  }
  0xbc   : > { %s9220_s19 = scalar_lea.hbm %s11851_s4, 16 }
  0xbd   : > { %p9221_p1 = scmp.ne.s32.totalorder %s11851_s4, %s9220_s19  ;;  %p9227_p0 = scmp.lt.u32.totalorder %s9220_s19, %s11851_s4 }
  0xbf   : > { %p9223_p3 = pnand %p9221_p1, %p9630_p8 }
  0xc1   : > { %p9224_p13 = pneg %p9223_p3 }
  0xc3   : > { %p9229_p2 = pnand %p9227_p0, %p9224_p13 }
  0xc5   : > { %9232 = shalt.err (!%p9229_p2)
}
  0xc6   : > { %s9233_s29 = scalar_lea.vmem %s9772_s17, 16  ;;  %s9240_s13 = scalar_lea.vmem %s9772_s17, 32 }
  0xc7   : > { %p9234_p5 = scmp.ne.s32.totalorder %s9772_s17, %s9233_s29  ;;  %p9241_p4 = scmp.lt.s32.totalorder %s9772_s17, %s9772_s17 }
  0xc8   : > { %p9242_p10 = scmp.lt.s32.totalorder %s9240_s13, %s9233_s29 }
  0xc9   : > { %p9236_p7 = pnand %p9234_p5, %p9630_p8 }
  0xca   : > { %p9243_p11 = por %p9242_p10, %p9241_p4 }
  0xcb   : > { %p9237_p9 = pneg %p9236_p7 }
  0xcd   : > { %p9244_p12 = pnand %p9243_p11, %p9237_p9 }
  0xcf   : > { %9247 = shalt.err (!%p9244_p12)
}
  0xd0   : > { %8534 = dma.hbm_to_vmem [thread:$0]  (!%p9614_p6), %s11851_s4, 16, %s9772_s17, [#allocation11]  }
  0xd1   : > { %s9494_s0 = smov [#allocation15]   ;;  %s9495_s15 = smov [#allocation18]  }
  0xd2   : > { %s416_s20 = sshll.u32 %s9494_s0, 4  ;;  %s440_s23 = sshll.u32 %s9495_s15, 4  ;;  %s417_s20 = int_to_ptr.vmem [resolvable:$true] %s416_s20  ;;  %s9819_s23 = int_to_ptr.vmem [resolvable:$true] %s440_s23 }
  0xd3   : > { %s9248_s30 = scalar_lea.hbm %s11853_s6, 16 }
  0xd4   : > { %p9249_p1 = scmp.ne.s32.totalorder %s11853_s6, %s9248_s30  ;;  %p9255_p0 = scmp.lt.u32.totalorder %s9248_s30, %s11853_s6 }
  0xd6   : > { %p9251_p3 = pnand %p9249_p1, %p9630_p8 }
  0xd8   : > { %p9252_p13 = pneg %p9251_p3 }
  0xda   : > { %p9257_p2 = pnand %p9255_p0, %p9252_p13 }
  0xdc   : > { %9260 = shalt.err (!%p9257_p2)
}
  0xdd   : > { %s9261_s25 = scalar_lea.vmem %s417_s20, 16  ;;  %s9268_s21 = scalar_lea.vmem %s417_s20, 32 }
  0xde   : > { %p9262_p5 = scmp.ne.s32.totalorder %s417_s20, %s9261_s25  ;;  %p9269_p4 = scmp.lt.s32.totalorder %s417_s20, %s417_s20 }
  0xdf   : > { %p9270_p10 = scmp.lt.s32.totalorder %s9268_s21, %s9261_s25 }
  0xe0   : > { %p9264_p7 = pnand %p9262_p5, %p9630_p8 }
  0xe1   : > { %p9271_p11 = por %p9270_p10, %p9269_p4 }
  0xe2   : > { %p9265_p9 = pneg %p9264_p7 }
  0xe4   : > { %p9272_p12 = pnand %p9271_p11, %p9265_p9 }
  0xe6   : > { %9275 = shalt.err (!%p9272_p12)
}
  0xe7   : > { %8540 = dma.hbm_to_vmem [thread:$0]  (!%p9614_p6), %s11853_s6, 16, %s417_s20, [#allocation14]  }
  0xe8   : > { %s9276_s30 = scalar_lea.hbm %s11855_s8, 16 }
  0xe9   : > { %p9277_p1 = scmp.ne.s32.totalorder %s11855_s8, %s9276_s30  ;;  %p9283_p0 = scmp.lt.u32.totalorder %s9276_s30, %s11855_s8 }
  0xeb   : > { %p9279_p3 = pnand %p9277_p1, %p9630_p8 }
  0xed   : > { %p9280_p13 = pneg %p9279_p3 }
  0xef   : > { %p9285_p2 = pnand %p9283_p0, %p9280_p13 }
  0xf1   : > { %9288 = shalt.err (!%p9285_p2)
}
  0xf2   : > { %s9289_s20 = scalar_lea.vmem %s9819_s23, 16  ;;  %s9296_s25 = scalar_lea.vmem %s9819_s23, 32 }
  0xf3   : > { %p9290_p5 = scmp.ne.s32.totalorder %s9819_s23, %s9289_s20  ;;  %p9297_p4 = scmp.lt.s32.totalorder %s9819_s23, %s9819_s23 }
  0xf4   : > { %p9298_p10 = scmp.lt.s32.totalorder %s9296_s25, %s9289_s20 }
  0xf5   : > { %p9292_p7 = pnand %p9290_p5, %p9630_p8 }
  0xf6   : > { %p9299_p11 = por %p9298_p10, %p9297_p4 }
  0xf7   : > { %p9293_p9 = pneg %p9292_p7 }
  0xf9   : > { %p9300_p12 = pnand %p9299_p11, %p9293_p9 }
  0xfb   : > { %9303 = shalt.err (!%p9300_p12)
}
  0xfc   : > { %8546 = dma.hbm_to_vmem [thread:$0]  (!%p9614_p6), %s11855_s8, 16, %s9819_s23, [#allocation17]  }
  0xfd   : > { %s9496_s15 = smov [#allocation21]   ;;  %s9497_s24 = smov [#allocation24]  }
  0xfe   : > { %s464_s19 = sshll.u32 %s9496_s15, 4  ;;  %s488_s30 = sshll.u32 %s9497_s24, 4  ;;  %s465_s19 = int_to_ptr.vmem [resolvable:$true] %s464_s19  ;;  %s9863_s30 = int_to_ptr.vmem [resolvable:$true] %s488_s30 }
  0xff   : > { %s9304_s13 = scalar_lea.hbm %s11857_s10, 16 }
 0x100   : > { %p9305_p1 = scmp.ne.s32.totalorder %s11857_s10, %s9304_s13  ;;  %p9311_p0 = scmp.lt.u32.totalorder %s9304_s13, %s11857_s10 }
 0x102   : > { %p9307_p3 = pnand %p9305_p1, %p9630_p8 }
 0x104   : > { %p9308_p13 = pneg %p9307_p3 }
 0x106   : > { %p9313_p2 = pnand %p9311_p0, %p9308_p13 }
 0x108   : > { %9316 = shalt.err (!%p9313_p2)
}
 0x109   : > { %s9317_s21 = scalar_lea.vmem %s465_s19, 16  ;;  %s9324_s0 = scalar_lea.vmem %s465_s19, 32 }
 0x10a   : > { %p9318_p5 = scmp.ne.s32.totalorder %s465_s19, %s9317_s21  ;;  %p9325_p4 = scmp.lt.s32.totalorder %s465_s19, %s465_s19 }
 0x10b   : > { %p9326_p10 = scmp.lt.s32.totalorder %s9324_s0, %s9317_s21 }
 0x10c   : > { %p9320_p7 = pnand %p9318_p5, %p9630_p8 }
 0x10d   : > { %p9327_p11 = por %p9326_p10, %p9325_p4 }
 0x10e   : > { %p9321_p9 = pneg %p9320_p7 }
 0x110   : > { %p9328_p12 = pnand %p9327_p11, %p9321_p9 }
 0x112   : > { %9331 = shalt.err (!%p9328_p12)
}
 0x113   : > { %8552 = dma.hbm_to_vmem [thread:$0]  (!%p9614_p6), %s11857_s10, 16, %s465_s19, [#allocation20]  }
 0x114   : > { %s9332_s13 = scalar_lea.hbm %s11859_s12, 16 }
 0x115   : > { %p9333_p1 = scmp.ne.s32.totalorder %s11859_s12, %s9332_s13  ;;  %p9339_p0 = scmp.lt.u32.totalorder %s9332_s13, %s11859_s12 }
 0x117   : > { %p9335_p3 = pnand %p9333_p1, %p9630_p8 }
 0x119   : > { %p9336_p13 = pneg %p9335_p3 }
 0x11b   : > { %p9341_p2 = pnand %p9339_p0, %p9336_p13 }
 0x11d   : > { %9344 = shalt.err (!%p9341_p2)
}
 0x11e   : > { %s9345_s19 = scalar_lea.vmem %s9863_s30, 16  ;;  %s9352_s21 = scalar_lea.vmem %s9863_s30, 32 }
 0x11f   : > { %p9346_p5 = scmp.ne.s32.totalorder %s9863_s30, %s9345_s19  ;;  %p9353_p4 = scmp.lt.s32.totalorder %s9863_s30, %s9863_s30 }
 0x120   : > { %p9354_p10 = scmp.lt.s32.totalorder %s9352_s21, %s9345_s19 }
 0x121   : > { %p9348_p7 = pnand %p9346_p5, %p9630_p8 }
 0x122   : > { %p9355_p11 = por %p9354_p10, %p9353_p4 }
 0x123   : > { %p9349_p9 = pneg %p9348_p7 }
 0x125   : > { %p9356_p12 = pnand %p9355_p11, %p9349_p9 }
 0x127   : > { %9359 = shalt.err (!%p9356_p12)
}
 0x128   : > { %s11918_s16 = sld [smem:[#allocation34_spill]]  ;;  %s11919_s24 = sld [smem:[#allocation35_spill]] }
 0x129   : > { %8558 = dma.hbm_to_vmem [thread:$0]  (!%p9614_p6), %s11859_s12, 16, %s9863_s30, [#allocation23]  }
 0x12a   : > { %s6497_s18 = sadd.s32 4294967294, %s9480_s28   ;;  %s9909_s22 = sadd.s32 1, %s9480_s28  }
 0x12b   : > { %s39_s29 = ssub.s32 %s9480_s28, %s9909_s22  ;;  %s42_s13 = sadd.s32 1, %s9476_s27 }
 0x12c   : > { %p40_p8 = scmp.eq.s32.totalorder %s39_s29, 0  ;;  %p49_p1 = scmp.ne.s32.totalorder %s9476_s27, %s9472_s26 }
 0x12d   : > { %p50_p3 = scmp.eq.s32.totalorder %s9480_s28, 0  ;;  %p337_p7 = scmp.eq.s32.totalorder %s6497_s18, 1 }
 0x12e   : > { %p55_p13 = scmp.ne.s32.totalorder %s9472_s26, %s11918_s16  ;;  %p11921_p2 = scmp.eq.s32.totalorder %s11919_s24, 0 }
 0x12f   : > { %s9920_s17 = scalar_select %p40_p8, %s9476_s27, %s42_s13  }
 0x130   : > { %p9922_p0 = por %p50_p3, %p49_p1  ;;  %p9928_p6 = por %p11921_p2, %p55_p13 }
 0x131   : > { %p331_p5 = scmp.eq.s32.totalorder %s11919_s24, 1  ;;  %p8579_p9 = scmp.lt.s32.totalorder %s9480_s28, 2 }
 0x132   : > { %s499_s25 = sand.u32 1, %s9476_s27   ;;  %p9939_p10 = por %p337_p7, %p55_p13 }
 0x133   : > { %p9935_p4 = por %p331_p5, %p49_p1  ;;  %s6512_s21 = sshll.u32 %s499_s25, 6 }
 0x134   : > { %s11924_s19 = scalar_select %p9939_p10, 1, 0 }
 0x135   : > { %s11923_s23 = scalar_select %p9935_p4, 1, 0 }
 0x136   : > { %s7022_s0 = sshll.u32 %s9480_s28, 10  ;;  %s11925_s29 = sld [smem:[#allocation56_spill]] }
 0x137   : > { %s503_s24 = scalar_lea.vmem [#allocation4], %s6512_s21  ;;  %p9953_p11 = pnand %p8579_p9, %p9922_p0 }
 0x138   : > { %s510_s18 = sshll.u32 %s503_s24, 4  ;;  %s9957_s1 = scalar_lea.sflag [#allocation5], %s499_s25  ;;  %s9949_s18 = int_to_ptr.vmem [resolvable:$true] %s510_s18 }
 0x139   : > { %p9362_p8 = pneg %p9953_p11 }
 0x13c   : > { %s9947_s13 = scalar_lea.hbm %s11925_s29, %s7022_s0  ;;  %s9365_s20 = scalar_lea.hbm %s11925_s29, 2048 }
 0x13d   : > { %s9360_s15 = scalar_lea.hbm %s9947_s13, 1024  ;;  %p9366_p13 = scmp.lt.u32.totalorder %s9947_s13, %s11925_s29 }
 0x13e   : > { %p9361_p12 = scmp.ne.s32.totalorder %s9947_s13, %s9360_s15  ;;  %p9367_p0 = scmp.lt.u32.totalorder %s9365_s20, %s9360_s15 }
 0x13f   : > { %p9369_p5 = scmp.lt.u32.totalorder %s9360_s15, %s9947_s13 }
 0x140   : > { %p9363_p1 = pnand %p9362_p8, %p9361_p12  ;;  %p9368_p2 = por %p9367_p0, %p9366_p13 }
 0x142   : > { %p9364_p3 = pneg %p9363_p1  ;;  %p9370_p7 = por %p9369_p5, %p9368_p2 }
 0x144   : > { %p9371_p9 = pnand %p9370_p7, %p9364_p3 }
 0x146   : > { %9374 = shalt.err (!%p9371_p9)
}
 0x147   : > { %s9375_s25 = scalar_lea.vmem %s9949_s18, 1024  ;;  %s9498_s21 = smov [#allocation4]  }
 0x148   : > { %p9376_p12 = scmp.ne.s32.totalorder %s9949_s18, %s9375_s25  ;;  %s9380_s0 = sshll.u32 %s9498_s21, 4  ;;  %s9381_s0 = int_to_ptr.vmem [resolvable:$false] %s9380_s0 }
 0x149   : > { %s9382_s16 = scalar_lea.vmem %s9381_s0, 2048  ;;  %p9383_p4 = scmp.lt.s32.totalorder %s9949_s18, %s9381_s0 }
 0x14a   : > { %p9378_p1 = pnand %p9376_p12, %p9362_p8  ;;  %p9384_p13 = scmp.lt.s32.totalorder %s9382_s16, %s9375_s25 }
 0x14c   : > { %p9379_p10 = pneg %p9378_p1  ;;  %p9385_p0 = por %p9384_p13, %p9383_p4 }
 0x14e   : > { %p9386_p2 = pnand %p9385_p0, %p9379_p10 }
 0x150   : > { %9389 = shalt.err (!%p9386_p2)
}
 0x151   : > { %s11927_s15 = smov 4   ;;  %s11928_s20 = smov 64  }
 0x152   : > { %8562 = dma.hbm_to_vmem [thread:$0]  (!%p9953_p11), %s9947_s13, 1024, %s9949_s18, %s9957_s1, %s11928_s20, %s11928_s20, %s11927_s15  }
 0x153   : > { %s11929_s24 = sld [smem:[#allocation36_spill]] }
 0x159   : > { %p11930_p8 = scmp.ne.s32.totalorder %s11929_s24, 0 }
 0x15b   : > { %522 = sbr.rel (%p11930_p8) target bundleno = 2339 (0x923), region = 72 }
 0x162   : > { %s9991_s21 = sand.u32 1, %s9472_s26  }
 0x163   : > { %s6516_s25 = sshll.u32 %s9991_s21, 6  ;;  %s525_s0 = scalar_lea.sflag [#allocation5], %s9991_s21 }
 0x164   : > { %s9997_s14 = scalar_lea.vmem [#allocation4], %s6516_s25 }
 0x165   : > { %9435 = dma.done.wait (%p9928_p6), %s525_s0, 1024  }
 0x166   : > { %9437 = vsyncadd (%p9928_p6), %s525_s0, 4294966272  ;;  %s11931_s1 = sld [smem:[#allocation35_spill]] }
 0x16c   : > { %p11932_p4 = scmp.eq.s32.totalorder %s11931_s1, 0 }
 0x16e   : > { %9439 = dma.done.wait (%p11932_p4), [#allocation8], 4096   ;;  %p11933_p10 = pmov %p11932_p4 }
 0x16f   : > { %p11934_p11 = pmov %p11932_p4 }
 0x170   : > { %9441 = vsyncadd (%p11933_p10), [#allocation8], 4294963200 }
 0x171   : > { %9443 = dma.done.wait (%p11934_p11), [#allocation11], 32   ;;  %p11935_p3 = pmov %p11932_p4 }
 0x173   : > { %9445 = vsyncadd (%p11935_p3), [#allocation11], 4294967264  ;;  %p11936_p5 = pmov %p11935_p3 }
 0x174   : > { %p11937_p7 = pmov %p11935_p3 }
 0x175   : > { %9447 = dma.done.wait (%p11936_p5), [#allocation14], 32  }
 0x176   : > { %9449 = vsyncadd (%p11937_p7), [#allocation14], 4294967264  ;;  %p11938_p6 = pmov %p11935_p3 }
 0x177   : > { %p11939_p9 = pmov %p11935_p3 }
 0x178   : > { %9451 = dma.done.wait (%p11938_p6), [#allocation17], 9232  }
 0x179   : > { %9453 = vsyncadd (%p11939_p9), [#allocation17], 4294958064  ;;  %p11940_p12 = pmov %p11935_p3 }
 0x17a   : > { %p11941_p1 = pmov %p11935_p3 }
 0x17b   : > { %9455 = dma.done.wait (%p11940_p12), [#allocation20], 9232  }
 0x17c   : > { %9457 = vsyncadd (%p11941_p1), [#allocation20], 4294958064  ;;  %p11942_p13 = pmov %p11941_p1 }
 0x17d   : > { %p11943_p0 = pmov %p11941_p1 }
 0x17e   : > { %9459 = dma.done.wait (%p11942_p13), [#allocation23], 1040  }
 0x17f   : > { %9461 = vsyncadd (%p11943_p0), [#allocation23], 4294966256  ;;  %v11874_v0 = vmov 0.0|0.0   ;;  %vm9500_vm0 = vmmov 0   ;;  %v11878_v1 = vmov 0.0   ;;  %v985_v2 = vld [vmem:[#allocation7] sm:$0xff] }
 0x180   : > { %8150 = vmatprep.subr.bf16.mxu1 %v11874_v0  ;;  %7818 = vmatprep.mubr.msk.f32.mxu1 %vm9500_vm0, %v11878_v1  ;;  %v986_v3 = vld [vmem:[#allocation7 + $0x8] sm:$0xff]  ;;  %v987_v4 = vld [vmem:[#allocation7 + $0x10] sm:$0xff]  ;;  %v988_v6 = vld [vmem:[#allocation7 + $0x18] sm:$0xff]  ;;  %vm1003_vm1 = vcmask 1041409   ;;  %s11756_s30 = scalar_lea.vmem [#allocation25], %s6516_s25  ;;  %s7135_s18 = sshll.u32 %s11931_s1, 10 }
 0x181   : > { %v10030_v5 = vpack.c.bf16 %v986_v3, %v985_v2  ;;  %v10033_v7 = vpack.c.bf16 %v988_v6, %v987_v4  ;;  %v989_v8 = vld [vmem:[#allocation7 + $0x20] sm:$0xff]  ;;  %v990_v9 = vld [vmem:[#allocation7 + $0x28] sm:$0xff]  ;;  %v991_v12 = vld [vmem:[#allocation7 + $0x30] sm:$0xff]  ;;  %s6310_s13 = sshll.u32 %s11756_s30, 4  ;;  %s12032_s20 = sld [smem:[#allocation59_spill]]  ;;  %s11796_s13 = int_to_ptr.vmem [resolvable:$true] %s6310_s13 }
 0x182   : > { %v10037_v10 = vld [vmem:[%s9997_s14] sm:$0xff]   ;;  %v10040_v11 = vld [vmem:[%s9997_s14 + $0x8] sm:$0xff]   ;;  %v992_v13 = vld [vmem:[#allocation7 + $0x38] sm:$0xff]  ;;  %v10048_v17 = vpack.c.bf16 %v990_v9, %v989_v8  ;;  %s6297_s25 = scalar_lea.sflag [#allocation6], %s9991_s21  ;;  %s9390_s0 = scalar_lea.vmem %s11796_s13, 1024 }
 0x183   : > { %8152 = vmatpush3.bf16.msra.mxu1 %v10030_v5  ;;  %v7138_v14 = vunpack.c.l.bf16 %v10037_v10  ;;  %v7139_v15 = vunpack.c.h.bf16 %v10037_v10  ;;  %v10045_v16 = vld [vmem:[%s9997_s14 + $0x20] sm:$0xff]   ;;  %v10051_v18 = vld [vmem:[%s9997_s14 + $0x10] sm:$0xff]   ;;  %v10054_v19 = vld [vmem:[%s9997_s14 + $0x28] sm:$0xff]   ;;  %v7142_v21 = vunpack.c.l.bf16 %v10040_v11  ;;  %v7143_v27 = vunpack.c.h.bf16 %v10040_v11  ;;  %p9391_p2 = scmp.ne.s32.totalorder %s11796_s13, %s9390_s0  ;;  %p12033_p8 = scmp.ne.s32.totalorder %s11923_s23, 0 }
 0x184   : > { %8153 = vmatprep.subr.bf16.mxu1 %v11874_v0  ;;  %v10057_v20 = vld [vmem:[%s9997_s14 + $0x30] sm:$0xff]   ;;  %v7154_v22 = vunpack.c.l.bf16 %v10045_v16  ;;  %v7155_v23 = vunpack.c.h.bf16 %v10045_v16  ;;  %v7158_v24 = vunpack.c.l.bf16 %v10054_v19  ;;  %v993_v25 = vld [vmem:[#allocation7 + $0x40] sm:$0xff]  ;;  %v994_v26 = vld [vmem:[#allocation7 + $0x48] sm:$0xff]  ;;  %v7159_v28 = vunpack.c.h.bf16 %v10054_v19 }
 0x185   : > { %v959_v29 = vadd.f32 %v7139_v15, %v7138_v14  ;;  %v10075_v31 = vpack.c.bf16 %v992_v13, %v991_v12  ;;  %v10078_v32 = vld [vmem:[%s9997_s14 + $0x18] sm:$0xff]   ;;  %v7146_v34 = vunpack.c.l.bf16 %v10051_v18  ;;  %v7162_v35 = vunpack.c.l.bf16 %v10057_v20  ;;  %v995_v38 = vld [vmem:[#allocation7 + $0x50] sm:$0xff]  ;;  %v997_v49 = vld [vmem:[#allocation7 + $0x60] sm:$0xff]  ;;  %p9392_p4 = pnand %p9391_p2, %p12033_p8 }
 0x186   : > { %v972_v30 = vadd.f32 %v7155_v23, %v7154_v22  ;;  %v10081_v33 = vld [vmem:[%s9997_s14 + $0x38] sm:$0xff]   ;;  %v7147_v40 = vunpack.c.h.bf16 %v10051_v18  ;;  %v7163_v41 = vunpack.c.h.bf16 %v10057_v20  ;;  %v8163_v44 = vpack.c.bf16 %v994_v26, %v993_v25  ;;  %v998_v50 = vld [vmem:[#allocation7 + $0x68] sm:$0xff]  ;;  %v999_v58 = vld [vmem:[#allocation7 + $0x70] sm:$0xff] }
 0x187   : > { %8155 = vmatpush3.bf16.msra.mxu1 %v10033_v7  ;;  %v960_v36 = vadd.f32 %v7142_v21, %v959_v29  ;;  %v996_v39 = vld [vmem:[#allocation7 + $0x58] sm:$0xff]  ;;  %v7150_v45 = vunpack.c.l.bf16 %v10078_v32  ;;  %v7166_v46 = vunpack.c.l.bf16 %v10081_v33  ;;  %v7151_v51 = vunpack.c.h.bf16 %v10078_v32  ;;  %s11801_s24 = scalar_lea.hbm %s12032_s20, %s7135_s18  ;;  %p9393_p10 = pneg %p9392_p4 }
 0x188   : > { %8156 = vmatprep.subr.bf16.mxu1 %v11874_v0  ;;  %v973_v37 = vadd.f32 %v7158_v24, %v972_v30  ;;  %v7167_v52 = vunpack.c.h.bf16 %v10081_v33  ;;  %v8166_v55 = vpack.c.bf16 %v996_v39, %v995_v38  ;;  %v1000_v59 = vld [vmem:[#allocation7 + $0x78] sm:$0xff]  ;;  %v8169_v62 = vpack.c.bf16 %v998_v50, %v997_v49 }
 0x189   : > { %v961_v42 = vadd.f32 %v7143_v27, %v960_v36  ;;  %v8172_v6 = vpack.c.bf16 %v1000_v59, %v999_v58 }
 0x18a   : > { %v974_v43 = vadd.f32 %v7159_v28, %v973_v37 }
 0x18b   : > { %8158 = vmatpush3.bf16.msra.mxu1 %v10048_v17  ;;  %v962_v47 = vadd.f32 %v7146_v34, %v961_v42 }
 0x18c   : > { %8159 = vmatprep.subr.bf16.mxu1 %v11874_v0  ;;  %v975_v48 = vadd.f32 %v7162_v35, %v974_v43 }
 0x18d   : > { %v963_v53 = vadd.f32 %v7147_v40, %v962_v47 }
 0x18e   : > { %v976_v54 = vadd.f32 %v7163_v41, %v975_v48 }
 0x18f   : > { %8161 = vmatpush3.bf16.msra.mxu1 %v10075_v31  ;;  %v964_v56 = vadd.f32 %v7150_v45, %v963_v53 }
 0x190   : > { %8162 = vmatprep.subr.bf16.mxu1 %v11874_v0  ;;  %v977_v57 = vadd.f32 %v7166_v46, %v976_v54 }
 0x191   : > { %v965_v60 = vadd.f32 %v7151_v51, %v964_v56 }
 0x192   : > { %v978_v61 = vadd.f32 %v7167_v52, %v977_v57 }
 0x193   : > { %8164 = vmatpush3.bf16.msra.mxu1 %v8163_v44  ;;  %v966_v63 = vrot.slane %v965_v60, 4 }
 0x194   : > { %8165 = vmatprep.subr.bf16.mxu1 %v11874_v0  ;;  %v979_v2 = vrot.slane %v978_v61, 4 }
 0x195   : > { %v967_v3 = vadd.f32 %v966_v63, %v965_v60 }
 0x196   : > { %v980_v4 = vadd.f32 %v979_v2, %v978_v61 }
 0x197   : > { %8167 = vmatpush3.bf16.msra.mxu1 %v8166_v55  ;;  %v968_v8 = vrot.slane %v967_v3, 2 }
 0x198   : > { %8168 = vmatprep.subr.bf16.mxu1 %v11874_v0  ;;  %v981_v9 = vrot.slane %v980_v4, 2 }
 0x199   : > { %v969_v12 = vadd.f32 %v968_v8, %v967_v3 }
 0x19a   : > { %v982_v13 = vadd.f32 %v981_v9, %v980_v4 }
 0x19b   : > { %8170 = vmatpush3.bf16.msra.mxu1 %v8169_v62  ;;  %v970_v25 = vrot.slane %v969_v12, 1 }
 0x19c   : > { %8171 = vmatprep.subr.bf16.mxu1 %v11874_v0  ;;  %v983_v26 = vrot.slane %v982_v13, 1 }
 0x19d   : > { %v971_v29 = vadd.f32 %v970_v25, %v969_v12 }
 0x19e   : > { %v984_v30 = vadd.f32 %v983_v26, %v982_v13 }
 0x19f   : > { %8173 = vmatpush3.bf16.msra.mxu1 %v8172_v6 }
 0x1a0   : > { %8174 = vmatprep.subr.bf16.mxu1 %v11874_v0  ;;  %v1004_v36 = vsel %vm1003_vm1, %v984_v30, %v971_v29 }
 0x1a2   : > { %7819 = vmatmul.mubr.f32.vlgmr.msra.gmra.mrb[0].mxu1 %v1004_v36 }
 0x1a3   : > { %8176 = vmatpush3.bf16.msra.mxu1 %v10030_v5  ;;  %7853 = vmatprep.mubr.msk.f32.mxu1 %vm9500_vm0, %v11878_v1  ;;  %v622_v5 = vlaneseq }
 0x1a4   : > { %8177 = vmatprep.subr.bf16.mxu1 %v11874_v0 }
 0x1a7   : > { %8179 = vmatpush3.bf16.msra.mxu1 %v10033_v7  ;;  %v9502_v7 = vmov 1966171168  }
 0x1a8   : > { %8180 = vmatprep.subr.bf16.mxu1 %v11874_v0  ;;  %v1079_v37 = vunpack.c.l.s4 %v9502_v7 }
 0x1aa   : > { %v1080_v38 = vunpack.c.0.s8 %v1079_v37 }
 0x1ab   : > { %8182 = vmatpush3.bf16.msra.mxu1 %v10048_v17  ;;  %v10136_v17 = vshrl.u32 %v622_v5, 7 }
 0x1ac   : > { %8183 = vmatprep.subr.bf16.mxu1 %v11874_v0 }
 0x1ad   : > { %v10143_v47 = vsub.s32 0, %v10136_v17 }
 0x1af   : > { %8185 = vmatpush3.bf16.msra.mxu1 %v10075_v31  ;;  %v10139_v31 = vsub.s32 %v1080_v38, %v10136_v17  ;;  %11945 = vst [vmem:[#allocation38_spill] sm:$0xff] %v10143_v47 }
 0x1b0   : > { %8186 = vmatprep.subr.bf16.mxu1 %v11874_v0 }
 0x1b1   : > { %11944 = vst [vmem:[#allocation37_spill] sm:$0xff] %v10139_v31 }
 0x1b3   : > { %8188 = vmatpush3.bf16.msra.mxu1 %v8163_v44 }
 0x1b4   : > { %8189 = vmatprep.subr.bf16.mxu1 %v11874_v0 }
 0x1b7   : > { %8191 = vmatpush3.bf16.msra.mxu1 %v8166_v55 }
 0x1b8   : > { %8192 = vmatprep.subr.bf16.mxu1 %v11874_v0 }
 0x1bb   : > { %8194 = vmatpush3.bf16.msra.mxu1 %v8169_v62 }
 0x1bc   : > { %8195 = vmatprep.subr.bf16.mxu1 %v11874_v0 }
 0x1bf   : > { %8197 = vmatpush3.bf16.msra.mxu1 %v8172_v6 }
 0x275   : > { %v1072_v39 = vpop.f32.mrb[0].mxu1 }
 0x276   : > { %v1076_v42 = vmul.f32 0.015625, %v1072_v39  ;;  %v7820_v43 = vpop.f32.mrb[1].mxu1 }
 0x278   : > { %v1084_v44 = vrot.slane %v1076_v42, %v10139_v31 }
 0x27a   : > { %v1085_v48 = vcombine.high %v1084_v44, %v1084_v44  ;;  %v1092_v49 = vrot.slane %v1084_v44, %v10139_v31 }
 0x27c   : > { %v1099_v50 = vrot.slane %v1085_v48, %v10139_v31  ;;  %v1103_v53 = vrot.slane %v1092_v49, %v10143_v47 }
 0x27e   : > { %v1107_v54 = vrot.slane %v1099_v50, %v10143_v47  ;;  %v10151_v55 = vsub.f32 %v7138_v14, %v1103_v53  ;;  %v10155_v56 = vsub.f32 %v7139_v15, %v1103_v53  ;;  %v10167_v59 = vsub.f32 %v7142_v21, %v1103_v53 }
 0x27f   : > { %v10203_v61 = vsub.f32 %v7147_v40, %v1103_v53  ;;  %v10215_v3 = vsub.f32 %v7150_v45, %v1103_v53  ;;  %v10227_v6 = vsub.f32 %v7151_v51, %v1103_v53 }
 0x280   : > { %v10159_v57 = vsub.f32 %v7154_v22, %v1107_v54  ;;  %v10163_v58 = vsub.f32 %v7155_v23, %v1107_v54  ;;  %v10171_v14 = vsub.f32 %v7158_v24, %v1107_v54  ;;  %v1126_v10 = vmul.f32 %v10151_v55, %v10151_v55 }
 0x281   : > { %v1127_v15 = vmul.f32 %v10155_v56, %v10155_v56  ;;  %v10179_v22 = vsub.f32 %v7143_v27, %v1103_v53  ;;  %v10183_v16 = vsub.f32 %v7159_v28, %v1107_v54  ;;  %v10191_v24 = vsub.f32 %v7146_v34, %v1103_v53 }
 0x282   : > { %v1134_v21 = vmul.f32 %v10159_v57, %v10159_v57  ;;  %v1135_v23 = vmul.f32 %v10163_v58, %v10163_v58  ;;  %v10195_v60 = vsub.f32 %v7162_v35, %v1107_v54  ;;  %v1128_v11 = vmul.f32 %v10167_v59, %v10167_v59 }
 0x283   : > { %v1136_v19 = vmul.f32 %v10171_v14, %v10171_v14  ;;  %v1142_v27 = vadd.f32 %v1127_v15, %v1126_v10  ;;  %v10207_v34 = vsub.f32 %v7163_v41, %v1107_v54  ;;  %v1129_v35 = vmul.f32 %v10179_v22, %v10179_v22  ;;  %v8648_v10 = vld [vmem:[#allocation16 + $0x140] sm:$0xff]  }
 0x284   : > { %v1155_v28 = vadd.f32 %v1135_v23, %v1134_v21  ;;  %v1137_v62 = vmul.f32 %v10183_v16, %v10183_v16  ;;  %v10219_v18 = vsub.f32 %v7166_v46, %v1107_v54  ;;  %v1130_v20 = vmul.f32 %v10191_v24, %v10191_v24  ;;  %7856 = vmatprep.subr.bf16.mxu1 %v8648_v10  ;;  %v8649_v15 = vld [vmem:[#allocation16 + $0x100] sm:$0xff]   ;;  %v8651_v23 = vld [vmem:[#allocation16 + $0x148] sm:$0xff]  }
 0x285   : > { %v1143_v63 = vadd.f32 %v1142_v27, %v1128_v11  ;;  %v1138_v40 = vmul.f32 %v10195_v60, %v10195_v60  ;;  %v10231_v45 = vsub.f32 %v7167_v52, %v1107_v54  ;;  %v1131_v46 = vmul.f32 %v10203_v61, %v10203_v61  ;;  %v8650_v21 = vld [vmem:[#allocation16 + $0xc0] sm:$0xff]   ;;  %v8652_v11 = vld [vmem:[#allocation16 + $0x108] sm:$0xff]   ;;  %7256 = vmatprep.subr.bf16.mxu0 %v8649_v15 }
 0x286   : > { %v1156_v2 = vadd.f32 %v1155_v28, %v1136_v19  ;;  %v1139_v8 = vmul.f32 %v10207_v34, %v10207_v34  ;;  %v1132_v13 = vmul.f32 %v10215_v3, %v10215_v3  ;;  %v1140_v32 = vmul.f32 %v10219_v18, %v10219_v18  ;;  %v8654_v19 = vld [vmem:[#allocation16 + $0x150] sm:$0xff]   ;;  %7257 = vmatpush3.bf16.msra.mxu0 %v8650_v21  ;;  %v8653_v27 = vld [vmem:[#allocation16 + $0xc8] sm:$0xff]  }
 0x287   : > { %v1144_v41 = vadd.f32 %v1143_v63, %v1129_v35  ;;  %v1133_v33 = vmul.f32 %v10227_v6, %v10227_v6  ;;  %v1141_v52 = vmul.f32 %v10231_v45, %v10231_v45  ;;  %7258 = vmatprep.subr.bf16.mxu0 %v8652_v11  ;;  %v8655_v28 = vld [vmem:[#allocation16 + $0x110] sm:$0xff]   ;;  %v8657_v35 = vld [vmem:[#allocation16 + $0x158] sm:$0xff]  }
 0x288   : > { %v1157_v4 = vadd.f32 %v1156_v2, %v1137_v62  ;;  %v8656_v62 = vld [vmem:[#allocation16 + $0xd0] sm:$0xff]   ;;  %v8658_v63 = vld [vmem:[#allocation16 + $0x118] sm:$0xff]   ;;  %v8660_v2 = vld [vmem:[#allocation16 + $0x160] sm:$0xff]  }
 0x289   : > { %v1145_v9 = vadd.f32 %v1144_v41, %v1130_v20  ;;  %v8659_v20 = vld [vmem:[#allocation16 + $0xd8] sm:$0xff]   ;;  %v8663_v41 = vld [vmem:[#allocation16 + $0x168] sm:$0xff]  }
 0x28a   : > { %v1158_v12 = vadd.f32 %v1157_v4, %v1138_v40  ;;  %7259 = vmatpush3.bf16.msra.mxu0 %v8653_v27  ;;  %v8661_v40 = vld [vmem:[#allocation16 + $0x120] sm:$0xff]  }
 0x28b   : > { %v1146_v51 = vadd.f32 %v1145_v9, %v1131_v46  ;;  %7260 = vmatprep.subr.bf16.mxu0 %v8655_v28  ;;  %v8662_v4 = vld [vmem:[#allocation16 + $0xe0] sm:$0xff]   ;;  %v8664_v46 = vld [vmem:[#allocation16 + $0x128] sm:$0xff]  }
 0x28c   : > { %v1159_v25 = vadd.f32 %v1158_v12, %v1139_v8  ;;  %v8666_v8 = vld [vmem:[#allocation16 + $0x170] sm:$0xff]   ;;  %v8665_v9 = vld [vmem:[#allocation16 + $0xe8] sm:$0xff]  }
 0x28d   : > { %v1147_v26 = vadd.f32 %v1146_v51, %v1132_v13  ;;  %v8667_v12 = vld [vmem:[#allocation16 + $0x130] sm:$0xff]   ;;  %v8669_v13 = vld [vmem:[#allocation16 + $0x178] sm:$0xff]  }
 0x28e   : > { %v1160_v29 = vadd.f32 %v1159_v25, %v1140_v32  ;;  %7261 = vmatpush3.bf16.msra.mxu0 %v8656_v62  ;;  %v8668_v32 = vld [vmem:[#allocation16 + $0xf0] sm:$0xff]   ;;  %v8670_v51 = vld [vmem:[#allocation16 + $0x138] sm:$0xff]  }
 0x28f   : > { %v1148_v30 = vadd.f32 %v1147_v26, %v1133_v33  ;;  %7262 = vmatprep.subr.bf16.mxu0 %v8658_v63  ;;  %v8671_v25 = vld [vmem:[#allocation16 + $0xf8] sm:$0xff]   ;;  %v8673_v33 = vld [vmem:[#allocation16 + $0x40] sm:$0xff]  }
 0x290   : > { %v1161_v36 = vadd.f32 %v1160_v29, %v1141_v52  ;;  %v9503_v52 = vmov 0   ;;  %v8706_v26 = vld [vmem:[#allocation16 + $0x1c0] sm:$0xff]  }
 0x291   : > { %v1149_v5 = vrot.slane %v1148_v30, 4  ;;  %1776 = vst [vmem:[#allocation2] sm:$0xff] %v9503_v52  ;;  %1777 = vst [vmem:[#allocation2 + $0x8] sm:$0xf] %v9503_v52 }
 0x292   : > { %v1162_v7 = vrot.slane %v1161_v36, 4  ;;  %7263 = vmatpush3.bf16.msra.mxu0 %v8659_v20  ;;  %1779 = vst [vmem:[#allocation2 + $0x80] sm:$0xf] %v9503_v52  ;;  %1782 = vst [vmem:[#allocation2 + $0x74] sm:$0xf] %v9503_v52 }
 0x293   : > { %v1150_v37 = vadd.f32 %v1149_v5, %v1148_v30  ;;  %7264 = vmatprep.subr.bf16.mxu0 %v8661_v40  ;;  %1784 = vst [vmem:[#allocation2 + $0xec] sm:$0xf] %v9503_v52  ;;  %4280 = vst [vmem:[#allocation3 + $0x8] sm:$0xf] %v9503_v52 }
 0x294   : > { %v1163_v38 = vadd.f32 %v1162_v7, %v1161_v36  ;;  %4282 = vst [vmem:[#allocation3 + $0x80] sm:$0xf] %v9503_v52  ;;  %4285 = vst [vmem:[#allocation3 + $0x74] sm:$0xf] %v9503_v52  ;;  %v624_v7 = vadd.s32 8, %v10136_v17 }
 0x295   : > { %v1151_v39 = vrot.slane %v1150_v37, 2  ;;  %4287 = vst [vmem:[#allocation3 + $0xec] sm:$0xf] %v9503_v52 }
 0x296   : > { %v1164_v42 = vrot.slane %v1163_v38, 2  ;;  %7265 = vmatpush3.bf16.msra.mxu0 %v8662_v4 }
 0x297   : > { %v1152_v43 = vadd.f32 %v1151_v39, %v1150_v37  ;;  %7266 = vmatprep.subr.bf16.mxu0 %v8664_v46  ;;  %v625_v37 = vadd.s32 16, %v10136_v17  ;;  %v6562_v39 = vld [vmem:[#allocation10] ss:$0 sm:$0xff] }
 0x298   : > { %v1165_v44 = vadd.f32 %v1164_v42, %v1163_v38  ;;  %v626_v38 = vadd.s32 24, %v10136_v17  ;;  %v10250_v42 = vadd.s32 32, %v10136_v17 }
 0x299   : > { %v1153_v48 = vrot.slane %v1152_v43, 1 }
 0x29a   : > { %v1166_v49 = vrot.slane %v1165_v44, 1  ;;  %7267 = vmatpush3.bf16.msra.mxu0 %v8665_v9 }
 0x29b   : > { %v1154_v50 = vadd.f32 %v1153_v48, %v1152_v43  ;;  %7268 = vmatprep.subr.bf16.mxu0 %v8667_v12  ;;  %v643_v43 = vand.u32 7, %v10136_v17  ;;  %v650_v48 = vand.u32 7, %v624_v7 }
 0x29c   : > { %v1167_v53 = vadd.f32 %v1166_v49, %v1165_v44  ;;  %v657_v49 = vand.u32 7, %v625_v37 }
 0x29d   : > { %vm879_vm2 = vcmp.lt.s32.totalorder %v643_v43, 7  ;;  %vm880_vm3 = vcmp.lt.s32.totalorder %v650_v48, 7  ;;  %vm832_vm6 = vcmp.gt.s32.totalorder %v650_v48, 0  ;;  %vm831_vm8 = vcmp.gt.s32.totalorder %v643_v43, 0 }
 0x29e   : > { %v1170_v54 = vsel %vm1003_vm1, %v1167_v53, %v1154_v50  ;;  %7269 = vmatpush3.bf16.msra.mxu0 %v8668_v32  ;;  %v10254_v50 = vadd.s32 40, %v10136_v17  ;;  %vm881_vm4 = vcmp.lt.s32.totalorder %v657_v49, 7  ;;  %vm10309_vm10 = vcmp.gt.s32.totalorder %v657_v49, 0 }
 0x29f   : > { %7854 = vmatmul.mubr.f32.vlgmr.msra.gmra.mrb[2].mxu1 %v1170_v54  ;;  %7270 = vmatprep.subr.bf16.mxu0 %v8670_v51  ;;  %v664_v54 = vand.u32 7, %v626_v38  ;;  %v10271_v62 = vsel %vm881_vm4, 1.0, %v11878_v1  ;;  %v10305_v51 = vadd.s32 56, %v10136_v17 }
 0x2a0   : > { %7857 = vmatpush3.bf16.msra.mxu1 %v8648_v10  ;;  %v671_v10 = vand.u32 7, %v10250_v42  ;;  %v678_v21 = vand.u32 7, %v10254_v50  ;;  %11947 = vst [vmem:[#allocation40_spill] sm:$0xff] %v10271_v62  ;;  %v10463_v50 = vadd.s32 96, %v10136_v17 }
 0x2a1   : > { %7858 = vmatprep.subr.bf16.mxu1 %v8651_v23  ;;  %vm882_vm5 = vcmp.lt.s32.totalorder %v664_v54, 7  ;;  %vm10335_vm11 = vcmp.gt.s32.totalorder %v664_v54, 0  ;;  %v692_v49 = vand.u32 7, %v10305_v51 }
 0x2a2   : > { %7271 = vmatpush3.bf16.msra.mxu0 %v8671_v25  ;;  %vm883_vm7 = vcmp.lt.s32.totalorder %v671_v10, 7  ;;  %v10274_v63 = vsel %vm882_vm5, 1.0, %v11878_v1  ;;  %vm884_vm9 = vcmp.lt.s32.totalorder %v678_v21, 7  ;;  %vm835_vm14 = vcmp.gt.s32.totalorder %v671_v10, 0 }
 0x2a3   : > { %7416 = vmatprep.subr.bf16.mxu0 %v8706_v26  ;;  %11948 = vst [vmem:[#allocation41_spill] sm:$0xff] %v10274_v63  ;;  %v10287_v4 = vsel %vm883_vm7, 1.0, %v11878_v1  ;;  %v10302_v32 = vsel %vm884_vm9, 1.0, %v11878_v1  ;;  %vm886_vm13 = vcmp.lt.s32.totalorder %v692_v49, 7  ;;  %vm836_vm15 = vcmp.gt.s32.totalorder %v678_v21, 0 }
 0x2a4   : > { %7859 = vmatpush3.bf16.msra.mxu1 %v8651_v23  ;;  %v10436_v21 = vadd.s32 120, %v10136_v17  ;;  %vm1518_vm5 = vcmp.lt.s32.totalorder %v10136_v17, 7  ;;  %vm10479_vm7 = vcmp.gt.s32.totalorder %v692_v49, 0 }
 0x2a5   : > { %7860 = vmatprep.subr.bf16.mxu1 %v8654_v19 }
 0x2a6   : > { %11957 = vst [vmem:[#allocation42_spill] sm:$0xff] %v10436_v21  ;;  %v11877_v10 = vand.u32 7, %v10436_v21 }
 0x2a8   : > { %7861 = vmatpush3.bf16.msra.mxu1 %v8654_v19  ;;  %v10261_v19 = vsel %vm879_vm2, 1.0, %v11878_v1 }
 0x2a9   : > { %7862 = vmatprep.subr.bf16.mxu1 %v8657_v35 }
 0x2ac   : > { %7863 = vmatpush3.bf16.msra.mxu1 %v8657_v35  ;;  %v10268_v35 = vsel %vm880_vm3, 1.0, %v11878_v1 }
 0x2ad   : > { %7864 = vmatprep.subr.bf16.mxu1 %v8660_v2  ;;  %11946 = vst [vmem:[#allocation39_spill] sm:$0xff] %v10268_v35 }
 0x2b0   : > { %7865 = vmatpush3.bf16.msra.mxu1 %v8660_v2  ;;  %v10279_v2 = vadd.s32 48, %v10136_v17 }
 0x2b1   : > { %7866 = vmatprep.subr.bf16.mxu1 %v8663_v41 }
 0x2b4   : > { %7867 = vmatpush3.bf16.msra.mxu1 %v8663_v41  ;;  %v10284_v41 = vsel %vm832_vm6, 1.0, %v11878_v1 }
 0x2b5   : > { %7868 = vmatprep.subr.bf16.mxu1 %v8666_v8 }
 0x2b8   : > { %7869 = vmatpush3.bf16.msra.mxu1 %v8666_v8 }
 0x2b9   : > { %7870 = vmatprep.subr.bf16.mxu1 %v8669_v13 }
 0x2bc   : > { %7871 = vmatpush3.bf16.msra.mxu1 %v8669_v13  ;;  %v10295_v13 = vld [vmem:[#allocation12] ss:$0 sm:$0xff] }
 0x2bd   : > { %7336 = vmatprep.subr.bf16.mxu1 %v8673_v33 }
 0x372   : > { %v1238_v29 = vpop.f32.mrb[2].mxu1 }
 0x373   : > { %v1242_v30 = vmul.f32 0.015625, %v1238_v29  ;;  %v7855_v36 = vpop.f32.mrb[3].mxu1 }
 0x374   : > { %v10424_v36 = vsel %vm835_vm14, 1.0, %v11878_v1 }
 0x375   : > { %v1243_v5 = vadd.f32 1e-06, %v1242_v30 }
 0x377   : > { %8890 = vrsqrt.f32 %v1243_v5 }
 0x381   : > { %v8891_v44 = vpop.eup %8890 }
 0x382   : > { %v1252_v53 = vmul.f32 %v8891_v44, %v6562_v39 }
 0x384   : > { %v1260_v15 = vrot.slane %v1252_v53, %v10139_v31 }
 0x386   : > { %v1261_v23 = vcombine.high %v1260_v15, %v1260_v15  ;;  %v1268_v11 = vrot.slane %v1260_v15, %v10139_v31  ;;  %v10367_v15 = vadd.s32 64, %v10136_v17 }
 0x388   : > { %v1275_v27 = vrot.slane %v1261_v23, %v10139_v31  ;;  %v1279_v28 = vrot.slane %v1268_v11, %v10143_v47  ;;  %v10374_v11 = vadd.s32 72, %v10136_v17 }
 0x38a   : > { %v1286_v20 = vmul.f32 %v1279_v28, %v10151_v55  ;;  %v1287_v40 = vmul.f32 %v1279_v28, %v10155_v56  ;;  %v10290_v46 = vrot.slane %v1275_v27, %v10143_v47  ;;  %v1288_v8 = vmul.f32 %v1279_v28, %v10167_v59 }
 0x38b   : > { %v1289_v9 = vmul.f32 %v1279_v28, %v10179_v22  ;;  %v1290_v12 = vmul.f32 %v1279_v28, %v10191_v24  ;;  %v1291_v55 = vmul.f32 %v1279_v28, %v10203_v61  ;;  %v10299_v56 = vsel %vm831_vm8, 1.0, %v11878_v1 }
 0x38c   : > { %v1292_v25 = vmul.f32 %v1279_v28, %v10215_v3  ;;  %v1293_v59 = vmul.f32 %v1279_v28, %v10227_v6  ;;  %v685_v24 = vand.u32 7, %v10279_v2  ;;  %v10321_v52 = vadd.f32 %v10295_v13, %v1286_v20 }
 0x38d   : > { %v10315_v61 = vadd.f32 %v10295_v13, %v1289_v9  ;;  %v10318_v33 = vadd.f32 %v10295_v13, %v1290_v12  ;;  %v10324_v26 = vadd.f32 %v10295_v13, %v1287_v40  ;;  %v1294_v3 = vmul.f32 %v10290_v46, %v10159_v57 }
 0x38e   : > { %v1295_v6 = vmul.f32 %v10290_v46, %v10163_v58  ;;  %v10331_v29 = vadd.f32 %v10295_v13, %v1288_v8  ;;  %v1301_v30 = vmul.f32 %v10290_v46, %v10231_v45  ;;  %v6564_v37 = vmul.f32 -1.442695, %v10321_v52 }
 0x38f   : > { %v6567_v5 = vmul.f32 -1.442695, %v10315_v61  ;;  %v6568_v7 = vmul.f32 -1.442695, %v10318_v33  ;;  %v10343_v57 = vadd.f32 %v10295_v13, %v1291_v55  ;;  %v1296_v58 = vmul.f32 %v10290_v46, %v10171_v14 }
 0x390   : > { %v6565_v38 = vmul.f32 -1.442695, %v10324_v26  ;;  %v10349_v45 = vadd.f32 %v10295_v13, %v1301_v30  ;;  %v10352_v39 = vadd.f32 %v10295_v13, %v1292_v25  ;;  %v1297_v43 = vmul.f32 %v10290_v46, %v10183_v16 }
 0x391   : > { %8892 = vpow2.f32 %v6567_v5  ;;  %v6566_v44 = vmul.f32 -1.442695, %v10331_v29  ;;  %v10358_v48 = vadd.f32 %v10295_v13, %v1293_v59  ;;  %v10363_v53 = vadd.f32 %v10295_v13, %v1294_v3 }
 0x392   : > { %8894 = vpow2.f32 %v6568_v7  ;;  %v6579_v14 = vmul.f32 -1.442695, %v10349_v45  ;;  %v6569_v54 = vmul.f32 -1.442695, %v10343_v57  ;;  %v10370_v16 = vadd.f32 %v10295_v13, %v1295_v6 }
 0x393   : > { %8896 = vpow2.f32 %v6564_v37  ;;  %v6570_v23 = vmul.f32 -1.442695, %v10352_v39  ;;  %v10377_v27 = vadd.f32 %v10295_v13, %v1296_v58  ;;  %v6571_v28 = vmul.f32 -1.442695, %v10358_v48 }
 0x394   : > { %8898 = vpow2.f32 %v6565_v38  ;;  %v10381_v20 = vadd.s32 80, %v10136_v17  ;;  %v10384_v40 = vadd.f32 %v10295_v13, %v1297_v43  ;;  %v10389_v8 = vsel %vm10309_vm10, 1.0, %v11878_v1 }
 0x395   : > { %8900 = vpow2.f32 %v6566_v44  ;;  %vm885_vm12 = vcmp.lt.s32.totalorder %v685_v24, 7  ;;  %v6572_v9 = vmul.f32 -1.442695, %v10363_v53  ;;  %v699_v12 = vand.u32 7, %v10367_v15 }
 0x396   : > { %8902 = vpow2.f32 %v6579_v14  ;;  %v6573_v55 = vmul.f32 -1.442695, %v10370_v16  ;;  %v706_v25 = vand.u32 7, %v10374_v11  ;;  %v6574_v59 = vmul.f32 -1.442695, %v10377_v27 }
 0x397   : > { %8904 = vpow2.f32 %v6569_v54  ;;  %v10405_v22 = vsel %vm10335_vm11, 1.0, %v11878_v1  ;;  %v11876_v3 = vand.u32 7, %v10381_v20  ;;  %v6575_v6 = vmul.f32 -1.442695, %v10384_v40 }
 0x398   : > { %8906 = vpow2.f32 %v6570_v23  ;;  %v10410_v30 = vsel %vm885_vm12, 1.0, %v11878_v1  ;;  %v10413_v5 = vsel %vm886_vm13, 1.0, %v11878_v1  ;;  %vm10419_vm2 = vcmp.lt.s32.totalorder %v699_v12, 7 }
 0x399   : > { %8908 = vpow2.f32 %v6571_v28  ;;  %v10427_v7 = vadd.s32 88, %v10136_v17  ;;  %vm10431_vm3 = vcmp.lt.s32.totalorder %v706_v25, 7  ;;  %v10439_v44 = vsel %vm836_vm15, 1.0, %v11878_v1 }
 0x39a   : > { %8910 = vpow2.f32 %v6572_v9  ;;  %vm889_vm4 = vcmp.lt.s32.totalorder %v11876_v3, 7  ;;  %v1298_v54 = vmul.f32 %v10290_v46, %v10195_v60  ;;  %v10448_v28 = vsel %vm10419_vm2, 1.0, %v11878_v1 }
 0x39b   : > { %v8893_v42 = vpop.eup %8892  ;;  %8912 = vpow2.f32 %v6573_v55  ;;  %v10457_v60 = vsel %vm889_vm4, 1.0, %v11878_v1  ;;  %v1300_v0 = vmul.f32 %v10290_v46, %v10219_v18  ;;  %vm10473_vm6 = vcmp.gt.s32.totalorder %v685_v24, 0 }
 0x39c   : > { %v8895_v37 = vpop.eup %8894  ;;  %v1376_v58 = vadd.f32 1.0, %v8893_v42  ;;  %8914 = vpow2.f32 %v6574_v59  ;;  %v10453_v59 = vsel %vm10431_vm3, 1.0, %v11878_v1  ;;  %11958 = vst [vmem:[#allocation43_spill] sm:$0xff] %v10457_v60  ;;  %vm10485_vm8 = vcmp.lt.s32.totalorder %v11877_v10, 7 }
 0x39d   : > { %v8897_v38 = vpop.eup %8896  ;;  %v1377_v43 = vadd.f32 1.0, %v8895_v37  ;;  %8916 = vpow2.f32 %v6575_v6  ;;  %vm10491_vm9 = vcmp.gt.s32.totalorder %v699_v12, 0  ;;  %vm1461_vm10 = vcmp.lt.s32.totalorder %v10136_v17, 1 }
 0x39e   : > { %v8899_v14 = vpop.eup %8898  ;;  %8918 = vrcp.f32 %v1376_v58  ;;  %v1373_v23 = vadd.f32 1.0, %v8897_v38  ;;  %v1299_v38 = vmul.f32 %v10290_v46, %v10207_v34  ;;  %vm10501_vm11 = vcmp.gt.s32.totalorder %v706_v25, 0 }
 0x39f   : > { %v8901_v9 = vpop.eup %8900  ;;  %8920 = vrcp.f32 %v1377_v43  ;;  %v1374_v55 = vadd.f32 1.0, %v8899_v14  ;;  %v10513_v11 = vsel %vm10473_vm6, 1.0, %v11878_v1  ;;  %v10539_v18 = vsel %vm10501_vm11, 1.0, %v11878_v1 }
 0x3a0   : > { %v8903_v42 = vpop.eup %8902  ;;  %v1375_v37 = vadd.f32 1.0, %v8901_v9  ;;  %8922 = vrcp.f32 %v1373_v23  ;;  %v10468_v9 = vadd.f32 %v10295_v13, %v1298_v54  ;;  %v10497_v49 = vadd.f32 %v10295_v13, %v1299_v38  ;;  %11973 = vst [vmem:[#allocation48_spill] sm:$0xff] %v10539_v18 }
 0x3a1   : > { %v8905_v58 = vpop.eup %8904  ;;  %8924 = vrcp.f32 %v1374_v55  ;;  %v1388_v43 = vadd.f32 1.0, %v8903_v42 }
 0x3a2   : > { %v8907_v14 = vpop.eup %8906  ;;  %8926 = vrcp.f32 %v1375_v37  ;;  %v1378_v23 = vadd.f32 1.0, %v8905_v58  ;;  %11967 = vst [vmem:[#allocation44_spill] sm:$0xff] %v10497_v49  ;;  %v6576_v12 = vmul.f32 -1.442695, %v10468_v9  ;;  %v10507_v37 = vadd.f32 %v10295_v13, %v1300_v0 }
 0x3a3   : > { %v8909_v6 = vpop.eup %8908  ;;  %8928 = vrcp.f32 %v1388_v43  ;;  %v1379_v3 = vadd.f32 1.0, %v8907_v14  ;;  %v10518_v43 = vsel %vm10479_vm7, 1.0, %v11878_v1  ;;  %v10523_v0 = vsel %vm10485_vm8, 1.0, %v11878_v1 }
 0x3a4   : > { %v8911_v46 = vpop.eup %8910  ;;  %8930 = vrcp.f32 %v1378_v23  ;;  %v1380_v54 = vadd.f32 1.0, %v8909_v6  ;;  %11970 = vst [vmem:[#allocation45_spill] sm:$0xff] %v10507_v37  ;;  %11971 = vst [vmem:[#allocation46_spill] sm:$0xff] %v10523_v0  ;;  %v10528_v13 = vsel %vm10491_vm9, 1.0, %v11878_v1  ;;  %v10534_v34 = vmul.f32 -1.442695, %v10497_v49 }
 0x3a5   : > { %v8913_v51 = vpop.eup %8912  ;;  %8932 = vrcp.f32 %v1379_v3  ;;  %v1381_v24 = vadd.f32 1.0, %v8911_v46  ;;  %11972 = vst [vmem:[#allocation47_spill] sm:$0xff] %v10528_v13  ;;  %v10547_v2 = vmul.f32 -1.442695, %v10507_v37 }
 0x3a6   : > { %v8915_v42 = vpop.eup %8914  ;;  %8934 = vrcp.f32 %v1380_v54  ;;  %v1382_v15 = vadd.f32 1.0, %v8913_v51 }
 0x3a7   : > { %v8917_v58 = vpop.eup %8916  ;;  %8936 = vrcp.f32 %v1381_v24  ;;  %v1383_v3 = vadd.f32 1.0, %v8915_v42 }
 0x3a8   : > { %v8919_v25 = vpop.eup %8918  ;;  %8938 = vrcp.f32 %v1382_v15  ;;  %v10544_v55 = vadd.f32 1.0, %v8917_v58 }
 0x3a9   : > { %v8921_v14 = vpop.eup %8920  ;;  %v10531_v23 = vmul.f32 %v8919_v25, %v10315_v61  ;;  %8940 = vrcp.f32 %v1383_v3 }
 0x3aa   : > { %v8923_v46 = vpop.eup %8922  ;;  %v10542_v54 = vmul.f32 %v8921_v14, %v10318_v33  ;;  %8942 = vpow2.f32 %v6576_v12 }
 0x3ab   : > { %v8925_v61 = vpop.eup %8924  ;;  %v10550_v51 = vmul.f32 %v8923_v46, %v10321_v52  ;;  %v1505_v24 = vrot.slane %v10531_v23, 1  ;;  %v7042_v42 = vpack.c.bf16 %v10531_v23, %v10531_v23  ;;  %8944 = vrcp.f32 %v10544_v55 }
 0x3ac   : > { %v8927_v15 = vpop.eup %8926  ;;  %v1422_v33 = vmul.f32 %v8925_v61, %v10324_v26  ;;  %v1506_v12 = vrot.slane %v10542_v54, 1  ;;  %v7043_v3 = vpack.c.bf16 %v10542_v54, %v10542_v54 }
 0x3ad   : > { %v8929_v25 = vpop.eup %8928  ;;  %v1423_v52 = vmul.f32 %v8927_v15, %v10331_v29  ;;  %v1445_v46 = vrot.slane %v10550_v51, 7  ;;  %v7039_v10 = vpack.c.bf16 %v10550_v51, %v10550_v51  ;;  %1691 = vst [vmem:[#allocation2 + $0x34] sm:$0xf] %v7042_v42  ;;  %v11974_v31 = vrot.slane %v10550_v51, 1 }
 0x3ae   : > { %v8931_v38 = vpop.eup %8930  ;;  %v1503_v26 = vrot.slane %v1422_v33, 1  ;;  %v1530_v61 = vsel %vm1518_vm5, %v1505_v24, %v1506_v12  ;;  %v10569_v1 = vmul.f32 %v8929_v25, %v10349_v45  ;;  %v1446_v58 = vrot.slane %v1422_v33, 7  ;;  %1692 = vst [vmem:[#allocation2 + $0x40] sm:$0xf] %v7043_v3 }
 0x3af   : > { %v8933_v6 = vpop.eup %8932  ;;  %v1504_v29 = vrot.slane %v1423_v52, 1  ;;  %v1538_v15 = vmul.f32 %v10274_v63, %v1530_v61  ;;  %v7040_v14 = vpack.c.bf16 %v1422_v33, %v1422_v33  ;;  %1688 = vst [vmem:[#allocation2 + $0x10] sm:$0xf] %v7039_v10  ;;  %v10573_v47 = vmul.f32 %v8931_v38, %v10343_v57 }
 0x3b0   : > { %v8935_v42 = vpop.eup %8934  ;;  %v1533_v37 = vsel %vm1518_vm5, %v11974_v31, %v1503_v26  ;;  %v1476_v3 = vsel %vm1461_vm10, %v1445_v46, %v1446_v58  ;;  %v10583_v25 = vmul.f32 %v8933_v6, %v10352_v39  ;;  %v11975_v21 = vrot.slane %v10569_v1, 7 }
 0x3b1   : > { %v8937_v61 = vpop.eup %8936  ;;  %v1532_v10 = vsel %vm1518_vm5, %v1503_v26, %v1504_v29  ;;  %v1535_v57 = vmul.f32 %v10261_v19, %v1533_v37  ;;  %v1531_v38 = vsel %vm1518_vm5, %v1504_v29, %v1505_v24  ;;  %v7058_v33 = vpack.c.bf16 %v1538_v15, %v1538_v15  ;;  %1689 = vst [vmem:[#allocation2 + $0x1c] sm:$0xf] %v7040_v14 }
 0x3b2   : > { %v8939_v31 = vpop.eup %8938  ;;  %v1536_v45 = vmul.f32 %v10268_v35, %v1532_v10  ;;  %v1537_v63 = vmul.f32 %v10271_v62, %v1531_v38  ;;  %v1477_v39 = vsel %vm1461_vm10, %v11975_v21, %v1445_v46  ;;  %v1479_v6 = vmul.f32 %v10284_v41, %v1476_v3 }
 0x3b3   : > { %v8941_v26 = vpop.eup %8940  ;;  %v7055_v49 = vpack.c.bf16 %v1535_v57, %v1535_v57  ;;  %1763 = vst [vmem:[#allocation2 + $0x38] sm:$0xf] %v7058_v33  ;;  %v1478_v37 = vmul.f32 %v10299_v56, %v1477_v39  ;;  %v1507_v24 = vrot.slane %v10573_v47, 1  ;;  %v1508_v14 = vrot.slane %v10583_v25, 1 }
 0x3b4   : > { %v8943_v29 = vpop.eup %8942  ;;  %v7056_v15 = vpack.c.bf16 %v1536_v45, %v1536_v45  ;;  %v7057_v10 = vpack.c.bf16 %v1537_v63, %v1537_v63  ;;  %v7024_v38 = vpack.c.bf16 %v1479_v6, %v1479_v6  ;;  %v1447_v62 = vrot.slane %v1423_v52, 7 }
 0x3b5   : > { %1760 = vst [vmem:[#allocation2 + $0x14] sm:$0xf] %v7055_v49  ;;  %v7023_v35 = vpack.c.bf16 %v1478_v37, %v1478_v37  ;;  %v1528_v21 = vsel %vm1518_vm5, %v1507_v24, %v1508_v14  ;;  %v1529_v46 = vsel %vm1518_vm5, %v1506_v12, %v1507_v24  ;;  %v7041_v3 = vpack.c.bf16 %v1423_v52, %v1423_v52 }
 0x3b6   : > { %1761 = vst [vmem:[#allocation2 + $0x20] sm:$0xf] %v7056_v15  ;;  %1762 = vst [vmem:[#allocation2 + $0x2c] sm:$0xf] %v7057_v10  ;;  %v1539_v57 = vmul.f32 %v10287_v4, %v1529_v46  ;;  %v1540_v33 = vmul.f32 %v10302_v32, %v1528_v21  ;;  %v11976_v63 = vrot.slane %v10531_v23, 7  ;;  %v1475_v45 = vsel %vm1461_vm10, %v1446_v58, %v1447_v62 }
 0x3b7   : > { %1617 = vst [vmem:[#allocation2 + $0x18] sm:$0xf] %v7024_v38  ;;  %1616 = vst [vmem:[#allocation2 + $0xc] sm:$0xf] %v7023_v35  ;;  %v1480_v39 = vmul.f32 %v10389_v8, %v1475_v45  ;;  %v10615_v52 = vmul.f32 %v8935_v42, %v10358_v48  ;;  %v10618_v6 = vmul.f32 %v8937_v61, %v10363_v53  ;;  %v11977_v35 = vand.u32 7, %v10381_v20  ;;  %v8675_v38 = vld [vmem:[#allocation16] sm:$0xff]  }
 0x3b8   : > { %v1474_v49 = vsel %vm1461_vm10, %v1447_v62, %v11976_v63  ;;  %1690 = vst [vmem:[#allocation2 + $0x28] sm:$0xf] %v7041_v3  ;;  %v7059_v37 = vpack.c.bf16 %v1539_v57, %v1539_v57  ;;  %v7060_v24 = vpack.c.bf16 %v1540_v33, %v1540_v33  ;;  %v10621_v15 = vmul.f32 %v8939_v31, %v10370_v16  ;;  %v8680_v33 = vld [vmem:[#allocation16 + $0x48] sm:$0xff]   ;;  %v8688_v62 = vld [vmem:[#allocation16 + $0x58] sm:$0xff]  }
 0x3b9   : > { %v1481_v12 = vmul.f32 %v10405_v22, %v1474_v49  ;;  %v10624_v10 = vmul.f32 %v8941_v26, %v10377_v27  ;;  %vm10628_vm12 = vcmp.gt.s32.totalorder %v11977_v35, 0  ;;  %v7025_v58 = vpack.c.bf16 %v1480_v39, %v1480_v39 }
 0x3ba   : > { %v1509_v42 = vrot.slane %v10615_v52, 1  ;;  %v1510_v53 = vrot.slane %v10618_v6, 1  ;;  %1764 = vst [vmem:[#allocation2 + $0x44] sm:$0xf] %v7059_v37  ;;  %1765 = vst [vmem:[#allocation2 + $0x50] sm:$0xf] %v7060_v24  ;;  %v11981_v31 = vmov %v11976_v63  ;;  %v7044_v57 = vpack.c.bf16 %v10573_v47, %v10573_v47 }
 0x3bb   : > { %v7026_v48 = vpack.c.bf16 %v1481_v12, %v1481_v12  ;;  %v1511_v16 = vrot.slane %v10621_v15, 1  ;;  %v1512_v61 = vrot.slane %v10624_v10, 1  ;;  %v1450_v27 = vrot.slane %v10573_v47, 7  ;;  %1618 = vst [vmem:[#allocation2 + $0x24] sm:$0xf] %v7025_v58 }
 0x3bc   : > { %v11980_v20 = vrot.slane %v10542_v54, 7  ;;  %v1526_v21 = vsel %vm1518_vm5, %v1509_v42, %v1510_v53  ;;  %v1527_v46 = vsel %vm1518_vm5, %v1508_v14, %v1509_v42  ;;  %1693 = vst [vmem:[#allocation2 + $0x4c] sm:$0xf] %v7044_v57  ;;  %v8707_v57 = vld [vmem:[#allocation16 + $0x180] sm:$0xff]  }
 0x3bd   : > { %1619 = vst [vmem:[#allocation2 + $0x30] sm:$0xf] %v7026_v48  ;;  %v1541_v23 = vmul.f32 %v10410_v30, %v1527_v46  ;;  %v1542_v63 = vmul.f32 %v10413_v5, %v1526_v21  ;;  %v1524_v49 = vsel %vm1518_vm5, %v1511_v16, %v1512_v61  ;;  %v1525_v45 = vsel %vm1518_vm5, %v1510_v53, %v1511_v16  ;;  %v8672_v39 = vld [vmem:[#allocation2 + $0x14] ss:$12 sps:$4 sm:$0xff]   ;;  %v8674_v35 = vld [vmem:[#allocation2 + $0x2c] ss:$12 sps:$4 sm:$0xff]  }
 0x3be   : > { %v1473_v26 = vsel %vm1461_vm10, %v11981_v31, %v11980_v20  ;;  %v1543_v14 = vmul.f32 %v10448_v28, %v1525_v45  ;;  %v1544_v12 = vmul.f32 %v10453_v59, %v1524_v49  ;;  %v11982_v47 = vmov %v11980_v20  ;;  %v10664_v58 = vld [vmem:[#allocation2 + $0xc] sm:$0xff]  ;;  %v10666_v48 = vld [vmem:[#allocation2 + $0x18] sm:$0xff]  ;;  %7872 = vmatprep.mubr.bf16.mxu1 %v8672_v39 }
 0x3bf   : > { %v1482_v3 = vmul.f32 %v10424_v36, %v1473_v26  ;;  %v1472_v37 = vsel %vm1461_vm10, %v11982_v47, %v1450_v27  ;;  %v7061_v42 = vpack.c.bf16 %v1541_v23, %v1541_v23  ;;  %v7062_v20 = vpack.c.bf16 %v1542_v63, %v1542_v63  ;;  %7873 = vmatmul.mubr.bf16.vlgmr.msra.gmra.mrb[4].mxu1 %v8674_v35  ;;  %v8681_v23 = vld [vmem:[#allocation16 + $0x8] sm:$0xff]  }
 0x3c0   : > { %v1483_v53 = vmul.f32 %v10439_v44, %v1472_v37  ;;  %v1385_v16 = vadd.f32 1.0, %v8943_v29  ;;  %v6628_v31 = vcombine.low %v10664_v58, %v10666_v48  ;;  %v6629_v54 = vcombine.high %v10664_v58, %v10666_v48  ;;  %v8682_v29 = vld [vmem:[#allocation16 + $0x50] sm:$0xff]   ;;  %v8710_v39 = vld [vmem:[#allocation16 + $0x1c8] sm:$0xff]   ;;  %7337 = vmatpush3.bf16.msra.mxu1 %v8675_v38 }
 0x3c1   : > { %v7027_v24 = vpack.c.bf16 %v1482_v3, %v1482_v3  ;;  %v7063_v26 = vpack.c.bf16 %v1543_v14, %v1543_v14  ;;  %v7064_v21 = vpack.c.bf16 %v1544_v12, %v1544_v12  ;;  %v11983_v46 = vand.u32 7, %v10427_v7  ;;  %1766 = vst [vmem:[#allocation2 + $0x5c] sm:$0xf] %v7061_v42  ;;  %1767 = vst [vmem:[#allocation2 + $0x68] sm:$0xf] %v7062_v20  ;;  %v8712_v20 = vld [vmem:[#allocation16 + $0x188] sm:$0xff]  }
 0x3c2   : > { %v7028_v63 = vpack.c.bf16 %v1483_v53, %v1483_v53  ;;  %v1451_v49 = vrot.slane %v10583_v25, 7  ;;  %v1452_v45 = vrot.slane %v10615_v52, 7  ;;  %2250 = vmatprep.mubr.bf16.mxu0 %v6629_v54  ;;  %v8678_v14 = vld [vmem:[#allocation2 + $0x44] ss:$12 sps:$4 sm:$0xff]   ;;  %8946 = vrcp.f32 %v1385_v16  ;;  %7338 = vmatprep.subr.bf16.mxu1 %v8680_v33  ;;  %v8684_v54 = vld [vmem:[#allocation16 + $0x10] sm:$0xff]  }
 0x3c3   : > { %1620 = vst [vmem:[#allocation2 + $0x3c] sm:$0xf] %v7027_v24  ;;  %vm10675_vm13 = vcmp.lt.s32.totalorder %v11983_v46, 7  ;;  %1768 = vst [vmem:[#allocation2 + $0x8c] sm:$0xf] %v7063_v26  ;;  %v7045_v12 = vpack.c.bf16 %v10583_v25, %v10583_v25  ;;  %v7046_v47 = vpack.c.bf16 %v10615_v52, %v10615_v52  ;;  %v11986_v37 = vmov %v11983_v46  ;;  %2251 = vmatmul.mubr.bf16.vlgmr.msra.gmra.mrb[0].mxu0 %v6628_v31  ;;  %v10692_v24 = vld [vmem:[#allocation2 + $0x24] sm:$0xff] }
 0x3c4   : > { %1769 = vst [vmem:[#allocation2 + $0x98] sm:$0xf] %v7064_v21  ;;  %vm10688_vm14 = vcmp.gt.s32.totalorder %v11986_v37, 0  ;;  %v10694_v38 = vld [vmem:[#allocation2 + $0x30] sm:$0xff]  ;;  %1621 = vst [vmem:[#allocation2 + $0x48] sm:$0xf] %v7028_v63  ;;  %8948 = vpow2.f32 %v10534_v34  ;;  %v1470_v25 = vsel %vm1461_vm10, %v1451_v49, %v1452_v45  ;;  %v1471_v52 = vsel %vm1461_vm10, %v1450_v27, %v1451_v49  ;;  %7876 = vmatprep.mubr.bf16.mxu1 %v8678_v14 }
 0x3c5   : > { %v1517_v7 = vrot.slane %v10569_v1, 1  ;;  %v6632_v35 = vcombine.high %v10692_v24, %v10694_v38  ;;  %8950 = vpow2.f32 %v10547_v2  ;;  %v1484_v42 = vmul.f32 %v10513_v11, %v1471_v52  ;;  %1694 = vst [vmem:[#allocation2 + $0x58] sm:$0xf] %v7045_v12  ;;  %1695 = vst [vmem:[#allocation2 + $0x64] sm:$0xf] %v7046_v47  ;;  %7417 = vmatpush3.bf16.msra.mxu0 %v8707_v57  ;;  %v8714_v31 = vld [vmem:[#allocation16 + $0x1d0] sm:$0xff]  }
 0x3c6   : > { %v11989_v34 = vmov 0.0   ;;  %v1485_v27 = vmul.f32 %v10518_v43, %v1470_v25  ;;  %v11991_v53 = vrot.slane %v10550_v51, 1  ;;  %v1453_v16 = vrot.slane %v10618_v6, 7  ;;  %7418 = vmatprep.subr.bf16.mxu0 %v8710_v39  ;;  %7339 = vmatpush3.bf16.msra.mxu1 %v8681_v23  ;;  %v8716_v12 = vld [vmem:[#allocation16 + $0x190] sm:$0xff]  }
 0x3c7   : > { %v10709_v33 = vsel %vm10628_vm12, 1.0, %v11989_v34  ;;  %2258 = vmatprep.mubr.bf16.mxu0 %v6632_v35  ;;  %v7029_v26 = vpack.c.bf16 %v1484_v42, %v1484_v42  ;;  %v1454_v46 = vrot.slane %v10621_v15, 7  ;;  %v7047_v51 = vpack.c.bf16 %v10618_v6, %v10618_v6  ;;  %7340 = vmatprep.subr.bf16.mxu1 %v8682_v29 }
 0x3c8   : > { %11990 = vst [vmem:[#allocation49_spill] sm:$0xff] %v10709_v33  ;;  %v1534_v2 = vsel %vm1518_vm5, %v1517_v7, %v11991_v53  ;;  %v7030_v63 = vpack.c.bf16 %v1485_v27, %v1485_v27  ;;  %v1469_v49 = vsel %vm1461_vm10, %v1452_v45, %v1453_v16  ;;  %v7048_v23 = vpack.c.bf16 %v10621_v15, %v10621_v15  ;;  %v8683_v47 = vld [vmem:[#allocation2 + $0x5c] ss:$12 sps:$4 sm:$0xff]   ;;  %v8717_v53 = vld [vmem:[#allocation16 + $0x1d8] sm:$0xff]  }
 0x3c9   : > { %v1550_v21 = vmul.f32 %v10523_v0, %v1534_v2  ;;  %v11992_v39 = vand.u32 7, %v10463_v50  ;;  %1622 = vst [vmem:[#allocation2 + $0x54] sm:$0xf] %v7029_v26  ;;  %v1468_v29 = vsel %vm1461_vm10, %v1453_v16, %v1454_v46  ;;  %v1486_v37 = vmul.f32 %v10528_v13, %v1469_v49  ;;  %1696 = vst [vmem:[#allocation2 + $0x88] sm:$0xf] %v7047_v51  ;;  %v8945_v2 = vpop.eup %8944 }
 0x3ca   : > { %v10723_v57 = vld [vmem:[#allocation2 + $0x3c] sm:$0xff]  ;;  %v7049_v45 = vpack.c.bf16 %v10624_v10, %v10624_v10  ;;  %7419 = vmatpush3.bf16.msra.mxu0 %v8712_v20  ;;  %1623 = vst [vmem:[#allocation2 + $0x60] sm:$0xf] %v7030_v63  ;;  %v1487_v25 = vmul.f32 %v10539_v18, %v1468_v29  ;;  %1697 = vst [vmem:[#allocation2 + $0x94] sm:$0xf] %v7048_v23  ;;  %7877 = vmatmul.mubr.bf16.gmra.mrb[8].mxu1 %v8683_v47  ;;  %v1455_v27 = vrot.slane %v10624_v10, 7 }
 0x3cb   : > { %vm10731_vm15 = vcmp.gt.s32.totalorder %v11992_v39, 0  ;;  %v7070_v6 = vpack.c.bf16 %v1550_v21, %v1550_v21  ;;  %v8685_v15 = vld [vmem:[#allocation2 + $0x8c] ss:$12 sps:$4 sm:$0xff]   ;;  %7420 = vmatprep.subr.bf16.mxu0 %v8714_v31  ;;  %v6631_v52 = vcombine.low %v10692_v24, %v10694_v38  ;;  %v7031_v42 = vpack.c.bf16 %v1486_v37, %v1486_v37  ;;  %7341 = vmatpush3.bf16.msra.mxu1 %v8684_v54  ;;  %v8689_v31 = vld [vmem:[#allocation16 + $0x18] sm:$0xff]  }
 0x3cc   : > { %v10743_v35 = vld [vmem:[#allocation2 + $0x48] sm:$0xff]  ;;  %1698 = vst [vmem:[#allocation2 + $0xa0] sm:$0xf] %v7049_v45  ;;  %v7054_v20 = vpack.c.bf16 %v10569_v1, %v10569_v1  ;;  %7880 = vmatprep.mubr.bf16.mxu1 %v8685_v15  ;;  %v10753_v26 = vsel %vm10675_vm13, 1.0, %v11989_v34  ;;  %v7032_v21 = vpack.c.bf16 %v1487_v25, %v1487_v25  ;;  %v8947_v51 = vpop.eup %8946  ;;  %7342 = vmatprep.subr.bf16.mxu1 %v8688_v62  ;;  %v10757_v23 = vadd.s32 104, %v10136_v17 }
 0x3cd   : > { %1775 = vst [vmem:[#allocation2 + $0xe0] sm:$0xf] %v7070_v6  ;;  %v6635_v16 = vcombine.high %v10723_v57, %v10743_v35  ;;  %11995 = vst [vmem:[#allocation50_spill] sm:$0xff] %v10753_v26  ;;  %2259 = vmatmul.mubr.bf16.gmra.mrb[4].mxu0 %v6631_v52  ;;  %v8690_v63 = vld [vmem:[#allocation16 + $0x60] sm:$0xff]   ;;  %v1432_v49 = vmul.f32 %v8945_v2, %v10384_v40  ;;  %v10760_v54 = vadd.s32 112, %v10136_v17  ;;  %v10770_v40 = vsel %vm10688_vm14, 1.0, %v11989_v34 }
 0x3ce   : > { %1624 = vst [vmem:[#allocation2 + $0x84] sm:$0xf] %v7031_v42  ;;  %v1467_v39 = vsel %vm1461_vm10, %v1454_v46, %v1455_v27  ;;  %1703 = vst [vmem:[#allocation2 + $0xdc] sm:$0xf] %v7054_v20  ;;  %v8949_v3 = vpop.eup %8948  ;;  %v10765_v47 = vmul.f32 %v8947_v51, %v10468_v9  ;;  %v10776_v6 = vsel %vm10731_vm15, 1.0, %v11989_v34  ;;  %7421 = vmatpush3.bf16.msra.mxu0 %v8716_v12  ;;  %v8719_v46 = vld [vmem:[#allocation16 + $0x198] sm:$0xff]  }
 0x3cf   : > { %2266 = vmatprep.mubr.bf16.mxu0 %v6635_v16  ;;  %1625 = vst [vmem:[#allocation2 + $0x90] sm:$0xf] %v7032_v21  ;;  %11996 = vst [vmem:[#allocation51_spill] sm:$0xff] %v10770_v40  ;;  %v1488_v62 = vmul.f32 %v10709_v33, %v1467_v39  ;;  %v8951_v29 = vpop.eup %8950  ;;  %v1513_v37 = vrot.slane %v1432_v49, 1  ;;  %v1386_v45 = vadd.f32 1.0, %v8949_v3  ;;  %v1456_v9 = vrot.slane %v1432_v49, 7  ;;  %7422 = vmatprep.subr.bf16.mxu0 %v8717_v53 }
 0x3d0   : > { %11997 = vst [vmem:[#allocation52_spill] sm:$0xff] %v10776_v6  ;;  %v7050_v15 = vpack.c.bf16 %v1432_v49, %v1432_v49  ;;  %v8721_v25 = vld [vmem:[#allocation16 + $0x1e0] sm:$0xff]   ;;  %7343 = vmatpush3.bf16.msra.mxu1 %v8689_v31  ;;  %v1514_v55 = vrot.slane %v10765_v47, 1  ;;  %v1387_v42 = vadd.f32 1.0, %v8951_v29  ;;  %v1457_v2 = vrot.slane %v10765_v47, 7  ;;  %v10784_v12 = vld [vmem:[#allocation2 + $0x54] sm:$0xff] }
 0x3d1   : > { %v8692_v52 = vld [vmem:[#allocation16 + $0x20] sm:$0xff]   ;;  %v7033_v20 = vpack.c.bf16 %v1488_v62, %v1488_v62  ;;  %7344 = vmatprep.subr.bf16.mxu1 %v8690_v63  ;;  %v1523_v14 = vsel %vm1518_vm5, %v1512_v61, %v1513_v37  ;;  %8952 = vrcp.f32 %v1386_v45  ;;  %v10786_v16 = vld [vmem:[#allocation2 + $0x60] sm:$0xff]  ;;  %v8696_v53 = vld [vmem:[#allocation16 + $0x68] sm:$0xff]   ;;  %v1466_v31 = vsel %vm1461_vm10, %v1455_v27, %v1456_v9 }
 0x3d2   : > { %1699 = vst [vmem:[#allocation2 + $0xac] sm:$0xf] %v7050_v15  ;;  %v7051_v21 = vpack.c.bf16 %v10765_v47, %v10765_v47  ;;  %v1522_v10 = vsel %vm1518_vm5, %v1513_v37, %v1514_v55  ;;  %v1545_v61 = vmul.f32 %v10457_v60, %v1523_v14  ;;  %v734_v51 = vand.u32 7, %v10757_v23  ;;  %7423 = vmatpush3.bf16.msra.mxu0 %v8719_v46  ;;  %v8723_v63 = vld [vmem:[#allocation16 + $0x1a0] sm:$0xff]   ;;  %v8724_v62 = vld [vmem:[#allocation16 + $0x1e8] sm:$0xff]  }
 0x3d3   : > { %8954 = vrcp.f32 %v1387_v42  ;;  %1626 = vst [vmem:[#allocation2 + $0x9c] sm:$0xf] %v7033_v20  ;;  %v1546_v49 = vmul.f32 %v10753_v26, %v1522_v10  ;;  %v6634_v27 = vcombine.low %v10723_v57, %v10743_v35  ;;  %v1489_v39 = vmul.f32 %v10770_v40, %v1466_v31  ;;  %7424 = vmatprep.subr.bf16.mxu0 %v8721_v25  ;;  %v8697_v29 = vld [vmem:[#allocation16 + $0x28] sm:$0xff]   ;;  %v8698_v42 = vld [vmem:[#allocation16 + $0x70] sm:$0xff]  }
 0x3d4   : > { %v1465_v3 = vsel %vm1461_vm10, %v1456_v9, %v1457_v2  ;;  %1700 = vst [vmem:[#allocation2 + $0xb8] sm:$0xf] %v7051_v21  ;;  %v7065_v23 = vpack.c.bf16 %v1545_v61, %v1545_v61  ;;  %7345 = vmatpush3.bf16.msra.mxu1 %v8692_v52  ;;  %v6638_v46 = vcombine.high %v10784_v12, %v10786_v16  ;;  %v741_v37 = vand.u32 7, %v10760_v54  ;;  %v8726_v25 = vld [vmem:[#allocation16 + $0x1a8] sm:$0xff]   ;;  %v8728_v52 = vld [vmem:[#allocation16 + $0x1f0] sm:$0xff]   ;;  %v8703_v21 = vld [vmem:[#allocation16 + $0x78] sm:$0xff]  }
 0x3d5   : > { %v1490_v45 = vmul.f32 %v10776_v6, %v1465_v3  ;;  %v7066_v15 = vpack.c.bf16 %v1546_v49, %v1546_v49  ;;  %2267 = vmatmul.mubr.bf16.gmra.mrb[8].mxu0 %v6634_v27  ;;  %7346 = vmatprep.subr.bf16.mxu1 %v8696_v53  ;;  %v7034_v20 = vpack.c.bf16 %v1489_v39, %v1489_v39  ;;  %v11998_v14 = vand.u32 7, %v10463_v50  ;;  %v8700_v54 = vld [vmem:[#allocation16 + $0x30] sm:$0xff]   ;;  %v10812_v53 = vld [vmem:[#allocation2 + $0x84] sm:$0xff] }
 0x3d6   : > { %1770 = vst [vmem:[#allocation2 + $0xa4] sm:$0xf] %v7065_v23  ;;  %2274 = vmatprep.mubr.bf16.mxu0 %v6638_v46  ;;  %7425 = vmatpush3.bf16.msra.mxu0 %v8723_v63  ;;  %vm892_vm3 = vcmp.lt.s32.totalorder %v734_v51, 7  ;;  %vm893_vm4 = vcmp.lt.s32.totalorder %v741_v37, 7  ;;  %v10814_v31 = vld [vmem:[#allocation2 + $0x90] sm:$0xff]  ;;  %vm844_vm6 = vcmp.gt.s32.totalorder %v734_v51, 0  ;;  %v6637_v39 = vcombine.low %v10784_v12, %v10786_v16 }
 0x3d7   : > { %v7035_v9 = vpack.c.bf16 %v1490_v45, %v1490_v45  ;;  %1771 = vst [vmem:[#allocation2 + $0xb0] sm:$0xf] %v7066_v15  ;;  %1627 = vst [vmem:[#allocation2 + $0xa8] sm:$0xf] %v7034_v20  ;;  %7426 = vmatprep.subr.bf16.mxu0 %v8724_v62  ;;  %vm891_vm2 = vcmp.lt.s32.totalorder %v11998_v14, 7  ;;  %vm10816_vm7 = vcmp.gt.s32.totalorder %v741_v37, 0  ;;  %v6641_v46 = vcombine.high %v10812_v53, %v10814_v31 }
 0x3d8   : > { %7347 = vmatpush3.bf16.msra.mxu1 %v8697_v29  ;;  %v8729_v61 = vld [vmem:[#allocation16 + $0x1b0] sm:$0xff]   ;;  %v10821_v63 = vsel %vm891_vm2, 1.0, %v11989_v34  ;;  %v10824_v49 = vsel %vm892_vm3, 1.0, %v11989_v34  ;;  %v10827_v27 = vsel %vm893_vm4, 1.0, %v11989_v34  ;;  %v8732_v51 = vld [vmem:[#allocation16 + $0x1f8] sm:$0xff]   ;;  %v10835_v29 = vsel %vm844_vm6, 1.0, %v11989_v34 }
 0x3d9   : > { %1628 = vst [vmem:[#allocation2 + $0xb4] sm:$0xf] %v7035_v9  ;;  %7348 = vmatprep.subr.bf16.mxu1 %v8698_v42  ;;  %12001 = vst [vmem:[#allocation53_spill] sm:$0xff] %v10821_v63  ;;  %v12004_v62 = vld [vmem:[#allocation44_spill] sm:$0xff]  ;;  %v12006_v37 = vld [vmem:[#allocation42_spill] sm:$0xff]  ;;  %v10843_v9 = vsel %vm10816_vm7, 1.0, %v11989_v34 }
 0x3da   : > { %7427 = vmatpush3.bf16.msra.mxu0 %v8726_v25  ;;  %12002 = vst [vmem:[#allocation54_spill] sm:$0xff] %v10824_v49  ;;  %12003 = vst [vmem:[#allocation55_spill] sm:$0xff] %v10827_v27  ;;  %v12007_v45 = vand.u32 7, %v12006_v37  ;;  %v12008_v15 = vld [vmem:[#allocation45_spill] sm:$0xff]  ;;  %v8704_v20 = vld [vmem:[#allocation16 + $0x38] sm:$0xff]  }
 0x3db   : > { %v8953_v50 = vpop.eup %8952  ;;  %7428 = vmatprep.subr.bf16.mxu0 %v8728_v52  ;;  %12005 = vst [vmem:[#allocation44_spill] sm:$0xff] %v10835_v29  ;;  %12009 = vst [vmem:[#allocation42_spill] sm:$0xff] %v10843_v9  ;;  %v10845_v14 = vld [vmem:[#allocation16 + $0x80] sm:$0xff]  }
 0x3dc   : > { %v1434_v23 = vmul.f32 %v8953_v50, %v12004_v62  ;;  %7349 = vmatpush3.bf16.msra.mxu1 %v8700_v54  ;;  %vm846_vm8 = vcmp.gt.s32.totalorder %v12007_v45, 0 }
 0x3dd   : > { %v8955_v3 = vpop.eup %8954  ;;  %2275 = vmatmul.mubr.bf16.gmra.mrb[12].mxu0 %v6637_v39  ;;  %7350 = vmatprep.subr.bf16.mxu1 %v8703_v21  ;;  %v10848_v37 = vsel %vm846_vm8, 1.0, %v11989_v34  ;;  %v8734_v21 = vld [vmem:[#allocation16 + $0x1b8] sm:$0xff]   ;;  %v6640_v39 = vcombine.low %v10812_v53, %v10814_v31 }
 0x3de   : > { %v1435_v42 = vmul.f32 %v8955_v3, %v12008_v15  ;;  %v8691_v25 = vld [vmem:[#allocation2 + $0xa4] ss:$12 sps:$4 sm:$0xff]   ;;  %v1515_v52 = vrot.slane %v1434_v23, 1  ;;  %2282 = vmatprep.mubr.bf16.mxu0 %v6641_v46  ;;  %v7052_v54 = vpack.c.bf16 %v1434_v23, %v1434_v23  ;;  %7429 = vmatpush3.bf16.msra.mxu0 %v8729_v61  ;;  %v1458_v62 = vrot.slane %v1434_v23, 7  ;;  %12010 = vst [vmem:[#allocation45_spill] sm:$0xff] %v10848_v37  ;;  %v10856_v3 = vld [vmem:[#allocation2 + $0x9c] sm:$0xff] }
 0x3df   : > { %7430 = vmatprep.subr.bf16.mxu0 %v8732_v51  ;;  %7881 = vmatmul.mubr.bf16.gmra.mrb[12].mxu1 %v8691_v25  ;;  %v10858_v46 = vld [vmem:[#allocation2 + $0xa8] sm:$0xff] }
 0x3e0   : > { %v1516_v50 = vrot.slane %v1435_v42, 1  ;;  %v1521_v10 = vsel %vm1518_vm5, %v1514_v55, %v1515_v52  ;;  %1701 = vst [vmem:[#allocation2 + $0xc4] sm:$0xf] %v7052_v54  ;;  %v1459_v61 = vrot.slane %v1435_v42, 7  ;;  %v7053_v23 = vpack.c.bf16 %v1435_v42, %v1435_v42  ;;  %7351 = vmatpush3.bf16.msra.mxu1 %v8704_v20 }
 0x3e1   : > { %v1547_v45 = vmul.f32 %v10821_v63, %v1521_v10  ;;  %v1464_v15 = vsel %vm1461_vm10, %v1457_v2, %v1458_v62  ;;  %7888 = vmatprep.subr.bf16.mxu1 %v10845_v14  ;;  %v12011_v54 = vrot.slane %v10569_v1, 7  ;;  %v6644_v47 = vcombine.high %v10856_v3, %v10858_v46  ;;  %v3503_v63 = vld [vmem:[#allocation9 + $0x60] sm:$0xff] }
 0x3e2   : > { %v1520_v51 = vsel %vm1518_vm5, %v1515_v52, %v1516_v50  ;;  %v1519_v55 = vsel %vm1518_vm5, %v1516_v50, %v1517_v7  ;;  %v1491_v52 = vmul.f32 %v10835_v29, %v1464_v15  ;;  %1702 = vst [vmem:[#allocation2 + $0xd0] sm:$0xf] %v7053_v23  ;;  %v1463_v2 = vsel %vm1461_vm10, %v1458_v62, %v1459_v61 }
 0x3e3   : > { %v1548_v25 = vmul.f32 %v10824_v49, %v1520_v51  ;;  %v1549_v42 = vmul.f32 %v10827_v27, %v1519_v55  ;;  %v1462_v10 = vsel %vm1461_vm10, %v1459_v61, %v12011_v54  ;;  %v7067_v7 = vpack.c.bf16 %v1547_v45, %v1547_v45  ;;  %7431 = vmatpush3.bf16.msra.mxu0 %v8734_v21  ;;  %v10888_v21 = vld [vmem:[#allocation2 + $0xb4] sm:$0xff] }
 0x3e4   : > { %v1493_v20 = vmul.f32 %v10848_v37, %v1462_v10  ;;  %v7036_v55 = vpack.c.bf16 %v1491_v52, %v1491_v52  ;;  %v1492_v15 = vmul.f32 %v10843_v9, %v1463_v2  ;;  %v12012_v1 = vmov 0.0|0.0  }
 0x3e5   : > { %v7068_v50 = vpack.c.bf16 %v1548_v25, %v1548_v25  ;;  %v7069_v51 = vpack.c.bf16 %v1549_v42, %v1549_v42  ;;  %8198 = vmatprep.subr.bf16.mxu0 %v12012_v1  ;;  %1772 = vst [vmem:[#allocation2 + $0xbc] sm:$0xf] %v7067_v7  ;;  %2283 = vmatmul.mubr.bf16.gmra.mrb[16].mxu0 %v6640_v39  ;;  %v10892_v39 = vld [vmem:[#allocation2] sm:$0xff] }
 0x3e6   : > { %v7038_v23 = vpack.c.bf16 %v1493_v20, %v1493_v20  ;;  %2290 = vmatprep.mubr.bf16.mxu0 %v6644_v47  ;;  %1629 = vst [vmem:[#allocation2 + $0xc0] sm:$0xf] %v7036_v55  ;;  %v7037_v45 = vpack.c.bf16 %v1492_v15, %v1492_v15  ;;  %v6643_v62 = vcombine.low %v10856_v3, %v10858_v46  ;;  %v2879_v55 = vld [vmem:[#allocation2 + $0x18] sm:$0xff] }
 0x3e7   : > { %1773 = vst [vmem:[#allocation2 + $0xc8] sm:$0xf] %v7068_v50  ;;  %1774 = vst [vmem:[#allocation2 + $0xd4] sm:$0xf] %v7069_v51  ;;  %v6677_v52 = vcombine.high %v10892_v39, %v10664_v58  ;;  %v6676_v20 = vcombine.low %v10892_v39, %v10664_v58  ;;  %v8711_v50 = vld [vmem:[#allocation16 + $0x88] sm:$0xff]   ;;  %v6680_v51 = vcombine.high %v10666_v48, %v10692_v24  ;;  %v8718_v15 = vld [vmem:[#allocation16 + $0x90] sm:$0xff]  }
 0x3e8   : > { %1631 = vst [vmem:[#allocation2 + $0xd8] sm:$0xf] %v7038_v23  ;;  %1630 = vst [vmem:[#allocation2 + $0xcc] sm:$0xf] %v7037_v45  ;;  %v6725_v45 = vcombine.high %v2879_v55, %v10692_v24  ;;  %v6679_v58 = vcombine.low %v10666_v48, %v10692_v24  ;;  %v8735_v48 = vld [vmem:[#allocation16 + $0xa8] sm:$0xff]  }
 0x3ed   : > { %2291 = vmatmul.mubr.bf16.gmra.mrb[20].mxu0 %v6643_v62  ;;  %v10890_v42 = vld [vmem:[#allocation2 + $0xc0] sm:$0xff] }
 0x3ee   : > { %v8693_v61 = vld [vmem:[#allocation2 + $0xbc] ss:$12 sps:$4 sm:$0xff]   ;;  %v8699_v25 = vld [vmem:[#allocation2 + $0xd4] ss:$12 sps:$4 sm:$0xff]   ;;  %v6647_v54 = vcombine.high %v10888_v21, %v10890_v42  ;;  %v6646_v47 = vcombine.low %v10888_v21, %v10890_v42 }
 0x3ef   : > { %7884 = vmatprep.mubr.bf16.mxu1 %v8693_v61  ;;  %v10898_v10 = vld [vmem:[#allocation2 + $0xd8] sm:$0xff]  ;;  %v10900_v7 = vld [vmem:[#allocation2 + $0xcc] sm:$0xff]  ;;  %v8725_v62 = vld [vmem:[#allocation16 + $0x98] sm:$0xff]  }
 0x3f0   : > { %7885 = vmatmul.mubr.bf16.gmra.mrb[16].mxu1 %v8699_v25  ;;  %2298 = vmatprep.mubr.bf16.mxu0 %v6647_v54  ;;  %v6650_v2 = vcombine.high %v10900_v7, %v10898_v10  ;;  %v6649_v23 = vcombine.low %v10900_v7, %v10898_v10  ;;  %v8733_v61 = vld [vmem:[#allocation16 + $0xa0] sm:$0xff]   ;;  %v6724_v25 = vcombine.low %v2879_v55, %v10692_v24 }
 0x3f1   : > { %2716 = vmatprep.mubr.bf16.mxu1 %v6677_v52  ;;  %v6682_v52 = vcombine.low %v10694_v38, %v10723_v57  ;;  %v6686_v54 = vcombine.high %v10743_v35, %v10784_v12  ;;  %v6685_v24 = vcombine.low %v10743_v35, %v10784_v12  ;;  %v6692_v35 = vcombine.high %v10814_v31, %v10856_v3 }
 0x3f2   : > { %v6733_v12 = vcombine.low %v10786_v16, %v10892_v39  ;;  %v6695_v55 = vcombine.high %v10858_v46, %v10888_v21 }
 0x3f5   : > { %2299 = vmatmul.mubr.bf16.gmra.mrb[24].mxu0 %v6646_v47  ;;  %v8736_v47 = vld [vmem:[#allocation16 + $0xb0] sm:$0xff]  }
 0x3f6   : > { %2306 = vmatprep.mubr.bf16.mxu0 %v6650_v2  ;;  %v8737_v2 = vld [vmem:[#allocation16 + $0xb8] sm:$0xff]  }
 0x3f8   : > { %2717 = vmatmul.mubr.bf16.vlgmr.msra.gmra.mrb[20].mxu1 %v6676_v20  ;;  %v6734_v20 = vcombine.high %v10786_v16, %v10892_v39  ;;  %v6697_v16 = vcombine.low %v10890_v42, %v10900_v7 }
 0x3f9   : > { %7889 = vmatpush3.bf16.msra.mxu1 %v10845_v14  ;;  %2724 = vmatprep.mubr.bf16.mxu1 %v6680_v51  ;;  %v6683_v14 = vcombine.high %v10694_v38, %v10723_v57  ;;  %v6689_v38 = vcombine.high %v10892_v39, %v10812_v53  ;;  %v8739_v57 = vld [vmem:[#allocation16 + $0x200] sm:$0xff]   ;;  %v6691_v51 = vcombine.low %v10814_v31, %v10856_v3 }
 0x3fa   : > { %7890 = vmatprep.subr.bf16.mxu1 %v8711_v50  ;;  %v8738_v31 = vld [vmem:[#allocation2 + $0x8] ss:$12 sps:$4 sm:$0xff]   ;;  %v6746_v3 = vcombine.high %v10898_v10, %v10892_v39 }
 0x3fd   : > { %7891 = vmatpush3.bf16.msra.mxu1 %v8711_v50  ;;  %2307 = vmatmul.mubr.bf16.gmra.mrb[28].mxu0 %v6649_v23  ;;  %v6688_v50 = vcombine.low %v10892_v39, %v10812_v53  ;;  %v6694_v53 = vcombine.low %v10858_v46, %v10888_v21  ;;  %v8740_v23 = vld [vmem:[#allocation2 + $0x20] ss:$12 sps:$4 sm:$0xff]   ;;  %v8742_v46 = vld [vmem:[#allocation16 + $0x208] sm:$0xff]   ;;  %v8741_v21 = vld [vmem:[#allocation2 + $0x38] ss:$12 sps:$4 sm:$0xff]  }
 0x3fe   : > { %7892 = vmatprep.subr.bf16.mxu1 %v8718_v15  ;;  %3264 = vmatprep.mubr.bf16.mxu0 %v6725_v45  ;;  %v8743_v45 = vld [vmem:[#allocation16 + $0x210] sm:$0xff]  }
 0x400   : > { %2725 = vmatmul.mubr.bf16.gmra.mrb[24].mxu1 %v6679_v58  ;;  %v8746_v58 = vld [vmem:[#allocation16 + $0x218] sm:$0xff]  }
 0x401   : > { %2732 = vmatprep.mubr.bf16.mxu1 %v6683_v14  ;;  %7893 = vmatpush3.bf16.msra.mxu1 %v8718_v15  ;;  %v6698_v15 = vcombine.high %v10890_v42, %v10900_v7  ;;  %v6745_v42 = vcombine.low %v10898_v10, %v10892_v39  ;;  %v8744_v7 = vld [vmem:[#allocation2 + $0x50] ss:$12 sps:$4 sm:$0xff]   ;;  %v8752_v10 = vld [vmem:[#allocation2 + $0xc8] ss:$12 sps:$4 sm:$0xff]  }
 0x402   : > { %7894 = vmatprep.subr.bf16.mxu1 %v8725_v62  ;;  %v8751_v39 = vld [vmem:[#allocation16 + $0x230] sm:$0xff]  }
 0x405   : > { %7895 = vmatpush3.bf16.msra.mxu1 %v8725_v62  ;;  %3265 = vmatmul.mubr.bf16.vlgmr.msra.gmra.mrb[32].mxu0 %v6724_v25  ;;  %v8745_v62 = vld [vmem:[#allocation2 + $0x80] ss:$12 sps:$4 sm:$0xff]   ;;  %v8750_v25 = vld [vmem:[#allocation16 + $0x228] sm:$0xff]  }
 0x406   : > { %7896 = vmatprep.subr.bf16.mxu1 %v8733_v61  ;;  %3272 = vmatprep.mubr.bf16.mxu0 %v6683_v14  ;;  %v8747_v14 = vld [vmem:[#allocation16 + $0x220] sm:$0xff]  }
 0x408   : > { %2733 = vmatmul.mubr.bf16.gmra.mrb[28].mxu1 %v6682_v52 }
 0x409   : > { %2740 = vmatprep.mubr.bf16.mxu1 %v6686_v54  ;;  %7897 = vmatpush3.bf16.msra.mxu1 %v8733_v61  ;;  %v8748_v61 = vld [vmem:[#allocation2 + $0x98] ss:$12 sps:$4 sm:$0xff]  }
 0x40a   : > { %7898 = vmatprep.subr.bf16.mxu1 %v8735_v48 }
 0x40d   : > { %7899 = vmatpush3.bf16.msra.mxu1 %v8735_v48  ;;  %3273 = vmatmul.mubr.bf16.gmra.mrb[36].mxu0 %v6682_v52  ;;  %v8749_v52 = vld [vmem:[#allocation2 + $0xb0] ss:$12 sps:$4 sm:$0xff]   ;;  %v8754_v48 = vld [vmem:[#allocation16 + $0x238] sm:$0xff]  }
 0x40e   : > { %3280 = vmatprep.mubr.bf16.mxu0 %v6686_v54  ;;  %7900 = vmatprep.subr.bf16.mxu1 %v8736_v47  ;;  %v8753_v54 = vld [vmem:[#allocation2 + $0x20] ss:$12 sps:$4 sm:$0xff]  }
 0x410   : > { %2741 = vmatmul.mubr.bf16.gmra.mrb[32].mxu1 %v6685_v24 }
 0x411   : > { %2748 = vmatprep.mubr.bf16.mxu1 %v6689_v38  ;;  %7901 = vmatpush3.bf16.msra.mxu1 %v8736_v47  ;;  %v8755_v47 = vld [vmem:[#allocation2 + $0x38] ss:$12 sps:$4 sm:$0xff]  }
 0x412   : > { %7902 = vmatprep.subr.bf16.mxu1 %v8737_v2  ;;  %v8758_v38 = vld [vmem:[#allocation2 + $0x98] ss:$12 sps:$4 sm:$0xff]  }
 0x415   : > { %3281 = vmatmul.mubr.bf16.gmra.mrb[40].mxu0 %v6685_v24  ;;  %7903 = vmatpush3.bf16.msra.mxu1 %v8737_v2  ;;  %v8756_v24 = vld [vmem:[#allocation2 + $0x50] ss:$12 sps:$4 sm:$0xff]   ;;  %v8757_v2 = vld [vmem:[#allocation2 + $0x68] ss:$12 sps:$4 sm:$0xff]  }
 0x416   : > { %3288 = vmatprep.mubr.bf16.mxu0 %v6734_v20  ;;  %7920 = vmatprep.subr.bf16.mxu1 %v8739_v57  ;;  %v8760_v20 = vld [vmem:[#allocation2 + $0xc8] ss:$12 sps:$4 sm:$0xff]  }
 0x418   : > { %2749 = vmatmul.mubr.bf16.gmra.mrb[36].mxu1 %v6688_v50  ;;  %v8761_v50 = vld [vmem:[#allocation2 + $0xe0] ss:$12 sps:$4 sm:$0xff]  }
 0x419   : > { %2756 = vmatprep.mubr.bf16.mxu1 %v6692_v35 }
 0x41d   : > { %3289 = vmatmul.mubr.bf16.gmra.mrb[44].mxu0 %v6733_v12  ;;  %v3492_v12 = vld [vmem:[#allocation9 + $0x8] sm:$0xff] }
 0x41e   : > { %3296 = vmatprep.mubr.bf16.mxu0 %v6692_v35  ;;  %v3491_v35 = vld [vmem:[#allocation9] sm:$0xff] }
 0x420   : > { %2757 = vmatmul.mubr.bf16.gmra.mrb[40].mxu1 %v6691_v51 }
 0x421   : > { %2764 = vmatprep.mubr.bf16.mxu1 %v6695_v55 }
 0x425   : > { %3297 = vmatmul.mubr.bf16.gmra.mrb[48].mxu0 %v6691_v51  ;;  %v10951_v51 = vpack.c.bf16 %v3492_v12, %v3491_v35 }
 0x426   : > { %3304 = vmatprep.mubr.bf16.mxu0 %v6695_v55  ;;  %v3493_v55 = vld [vmem:[#allocation9 + $0x10] sm:$0xff] }
 0x427   : > { %8200 = vmatpush3.bf16.msra.mxu0 %v10951_v51 }
 0x428   : > { %2765 = vmatmul.mubr.bf16.gmra.mrb[44].mxu1 %v6694_v53  ;;  %8201 = vmatprep.subr.bf16.mxu0 %v12012_v1 }
 0x429   : > { %2772 = vmatprep.mubr.bf16.mxu1 %v6698_v15 }
 0x42d   : > { %3305 = vmatmul.mubr.bf16.gmra.mrb[52].mxu0 %v6694_v53  ;;  %v3494_v53 = vld [vmem:[#allocation9 + $0x18] sm:$0xff] }
 0x42e   : > { %3312 = vmatprep.mubr.bf16.mxu0 %v6698_v15  ;;  %v10955_v15 = vpack.c.bf16 %v3494_v53, %v3493_v55 }
 0x430   : > { %2773 = vmatmul.mubr.bf16.gmra.mrb[48].mxu1 %v6697_v16  ;;  %8203 = vmatpush3.bf16.msra.mxu0 %v10955_v15 }
 0x431   : > { %7904 = vmatprep.mubr.bf16.mxu1 %v8738_v31  ;;  %8204 = vmatprep.subr.bf16.mxu0 %v12012_v1 }
 0x435   : > { %3313 = vmatmul.mubr.bf16.gmra.mrb[56].mxu0 %v6697_v16 }
 0x436   : > { %3320 = vmatprep.mubr.bf16.mxu0 %v6746_v3 }
 0x438   : > { %7905 = vmatmul.mubr.bf16.vlgmr.msra.gmra.mrb[4].mxu1 %v8740_v23 }
 0x439   : > { %7921 = vmatpush3.bf16.msra.mxu1 %v8739_v57  ;;  %7908 = vmatprep.mubr.bf16.mxu1 %v8741_v21  ;;  %v8759_v57 = vld [vmem:[#allocation2 + $0xb0] ss:$12 sps:$4 sm:$0xff]  }
 0x43a   : > { %7922 = vmatprep.subr.bf16.mxu1 %v8742_v46 }
 0x43d   : > { %7923 = vmatpush3.bf16.msra.mxu1 %v8742_v46  ;;  %3321 = vmatmul.mubr.bf16.gmra.mrb[60].mxu0 %v6745_v42 }
 0x43e   : > { %7924 = vmatprep.subr.bf16.mxu1 %v8743_v45  ;;  %7984 = vmatprep.mubr.msk.f32.mxu0 %vm9500_vm0, %v11989_v34 }
 0x440   : > { %7909 = vmatmul.mubr.bf16.gmra.mrb[8].mxu1 %v8744_v7 }
 0x441   : > { %7925 = vmatpush3.bf16.msra.mxu1 %v8743_v45  ;;  %7912 = vmatprep.mubr.bf16.mxu1 %v8745_v62 }
 0x442   : > { %7926 = vmatprep.subr.bf16.mxu1 %v8746_v58 }
 0x445   : > { %7927 = vmatpush3.bf16.msra.mxu1 %v8746_v58 }
 0x446   : > { %7928 = vmatprep.subr.bf16.mxu1 %v8747_v14 }
 0x448   : > { %7913 = vmatmul.mubr.bf16.gmra.mrb[12].mxu1 %v8748_v61 }
 0x449   : > { %7929 = vmatpush3.bf16.msra.mxu1 %v8747_v14  ;;  %7916 = vmatprep.mubr.bf16.mxu1 %v8749_v52 }
 0x44a   : > { %7930 = vmatprep.subr.bf16.mxu1 %v8750_v25 }
 0x44d   : > { %7931 = vmatpush3.bf16.msra.mxu1 %v8750_v25 }
 0x44e   : > { %7932 = vmatprep.subr.bf16.mxu1 %v8751_v39 }
 0x450   : > { %7917 = vmatmul.mubr.bf16.gmra.mrb[16].mxu1 %v8752_v10 }
 0x451   : > { %7933 = vmatpush3.bf16.msra.mxu1 %v8751_v39  ;;  %7936 = vmatprep.mubr.bf16.mxu1 %v8753_v54 }
 0x452   : > { %7934 = vmatprep.subr.bf16.mxu1 %v8754_v48 }
 0x455   : > { %7935 = vmatpush3.bf16.msra.mxu1 %v8754_v48 }
 0x458   : > { %7937 = vmatmul.mubr.bf16.vlgmr.msra.gmra.mrb[4].mxu1 %v8755_v47 }
 0x459   : > { %7940 = vmatprep.mubr.bf16.mxu1 %v8756_v24 }
 0x460   : > { %7941 = vmatmul.mubr.bf16.gmra.mrb[8].mxu1 %v8757_v2 }
 0x461   : > { %7944 = vmatprep.mubr.bf16.mxu1 %v8758_v38 }
 0x468   : > { %7945 = vmatmul.mubr.bf16.gmra.mrb[12].mxu1 %v8759_v57 }
 0x469   : > { %7948 = vmatprep.mubr.bf16.mxu1 %v8760_v20  ;;  %v3495_v20 = vld [vmem:[#allocation9 + $0x20] sm:$0xff] }
 0x470   : > { %7949 = vmatmul.mubr.bf16.gmra.mrb[16].mxu1 %v8761_v50  ;;  %v3496_v50 = vld [vmem:[#allocation9 + $0x28] sm:$0xff] }
 0x471   : > { %v10971_v35 = vpack.c.bf16 %v3496_v50, %v3495_v20 }
 0x473   : > { %8206 = vmatpush3.bf16.msra.mxu0 %v10971_v35 }
 0x474   : > { %8207 = vmatprep.subr.bf16.mxu0 %v12012_v1 }
 0x496   : > { %v7272_v16 = vpop.f32.mrb[0].mxu0 }
 0x497   : > { %v7273_v31 = vpop.f32.mrb[1].mxu0 }
 0x498   : > { %v7274_v3 = vadd.f32 %v7273_v31, %v7272_v16  ;;  %v7275_v23 = vpop.f32.mrb[2].mxu0 }
 0x499   : > { %v7276_v46 = vpop.f32.mrb[3].mxu0 }
 0x49a   : > { %v7277_v21 = vadd.f32 %v7276_v46, %v7275_v23 }
 0x4a0   : > { %v7278_v45 = vpop.f32.mrb[4].mxu0 }
 0x4a1   : > { %v7279_v42 = vpop.f32.mrb[5].mxu0 }
 0x4a2   : > { %v10959_v7 = vadd.f32 %v7279_v42, %v7278_v45  ;;  %v7281_v58 = vpop.f32.mrb[6].mxu0 }
 0x4a3   : > { %v7282_v62 = vpop.f32.mrb[7].mxu0 }
 0x4a4   : > { %v10961_v14 = vadd.f32 %v7282_v62, %v7281_v58 }
 0x4a8   : > { %v7284_v61 = vpop.f32.mrb[8].mxu0 }
 0x4a9   : > { %v7285_v25 = vpop.f32.mrb[9].mxu0 }
 0x4aa   : > { %v10963_v52 = vadd.f32 %v7285_v25, %v7284_v61  ;;  %v7287_v39 = vpop.f32.mrb[10].mxu0  ;;  %v3497_v25 = vld [vmem:[#allocation9 + $0x30] sm:$0xff] }
 0x4ab   : > { %v7288_v10 = vpop.f32.mrb[11].mxu0 }
 0x4ac   : > { %v10965_v48 = vadd.f32 %v7288_v10, %v7287_v39  ;;  %v3498_v39 = vld [vmem:[#allocation9 + $0x38] sm:$0xff]  ;;  %v3499_v10 = vld [vmem:[#allocation9 + $0x40] sm:$0xff] }
 0x4b0   : > { %v7290_v54 = vpop.f32.mrb[12].mxu0 }
 0x4b1   : > { %v7291_v47 = vpop.f32.mrb[13].mxu0 }
 0x4b2   : > { %v10967_v24 = vadd.f32 %v7291_v47, %v7290_v54  ;;  %v7293_v2 = vpop.f32.mrb[14].mxu0  ;;  %v10983_v54 = vpack.c.bf16 %v3498_v39, %v3497_v25  ;;  %v3500_v47 = vld [vmem:[#allocation9 + $0x48] sm:$0xff] }
 0x4b3   : > { %v7294_v38 = vpop.f32.mrb[15].mxu0 }
 0x4b4   : > { %v10969_v57 = vadd.f32 %v7294_v38, %v7293_v2  ;;  %8209 = vmatpush3.bf16.msra.mxu0 %v10983_v54  ;;  %v10986_v38 = vpack.c.bf16 %v3500_v47, %v3499_v10 }
 0x4b5   : > { %8210 = vmatprep.subr.bf16.mxu0 %v12012_v1 }
 0x4b8   : > { %v7296_v12 = vpop.f32.mrb[16].mxu0  ;;  %8212 = vmatpush3.bf16.msra.mxu0 %v10986_v38 }
 0x4b9   : > { %v7297_v55 = vpop.f32.mrb[17].mxu0  ;;  %8213 = vmatprep.subr.bf16.mxu0 %v12012_v1 }
 0x4ba   : > { %v10975_v53 = vadd.f32 %v7297_v55, %v7296_v12  ;;  %v7299_v16 = vpop.f32.mrb[18].mxu0 }
 0x4bb   : > { %v7300_v31 = vpop.f32.mrb[19].mxu0 }
 0x4bc   : > { %v10977_v23 = vadd.f32 %v7300_v31, %v7299_v16 }
 0x4c0   : > { %v7302_v46 = vpop.f32.mrb[20].mxu0 }
 0x4c1   : > { %v7303_v45 = vpop.f32.mrb[21].mxu0 }
 0x4c2   : > { %v10979_v42 = vadd.f32 %v7303_v45, %v7302_v46  ;;  %v7305_v58 = vpop.f32.mrb[22].mxu0 }
 0x4c3   : > { %v7306_v62 = vpop.f32.mrb[23].mxu0 }
 0x4c4   : > { %v10981_v61 = vadd.f32 %v7306_v62, %v7305_v58 }
 0x4c8   : > { %v7308_v2 = vpop.f32.mrb[24].mxu0 }
 0x4c9   : > { %v7309_v20 = vpop.f32.mrb[25].mxu0 }
 0x4ca   : > { %v10989_v50 = vadd.f32 %v7309_v20, %v7308_v2  ;;  %v7311_v12 = vpop.f32.mrb[26].mxu0 }
 0x4cb   : > { %v7352_v55 = vpop.f32.mrb[20].mxu1  ;;  %v7312_v16 = vpop.f32.mrb[27].mxu0 }
 0x4cc   : > { %v7353_v31 = vpop.f32.mrb[21].mxu1  ;;  %v10991_v46 = vadd.f32 %v7312_v16, %v7311_v12 }
 0x4cd   : > { %v7354_v45 = vadd.f32 %v7353_v31, %v7352_v55  ;;  %v7355_v58 = vpop.f32.mrb[22].mxu1  ;;  %v3501_v55 = vld [vmem:[#allocation9 + $0x50] sm:$0xff]  ;;  %v3502_v31 = vld [vmem:[#allocation9 + $0x58] sm:$0xff] }
 0x4ce   : > { %v7356_v62 = vpop.f32.mrb[23].mxu1  ;;  %v10999_v40 = vpack.c.bf16 %v3502_v31, %v3501_v55 }
 0x4cf   : > { %v8265_v25 = vadd.f32 %v7354_v45, %v7274_v3  ;;  %v7357_v39 = vadd.f32 %v7356_v62, %v7355_v58  ;;  %v3504_v3 = vld [vmem:[#allocation9 + $0x68] sm:$0xff] }
 0x4d0   : > { %v7314_v10 = vpop.f32.mrb[28].mxu0  ;;  %8215 = vmatpush3.bf16.msra.mxu0 %v10999_v40  ;;  %v11003_v58 = vpack.c.bf16 %v3504_v3, %v3503_v63 }
 0x4d1   : > { %v8271_v47 = vadd.f32 %v7357_v39, %v7277_v21  ;;  %v7315_v9 = vpop.f32.mrb[29].mxu0  ;;  %8216 = vmatprep.subr.bf16.mxu0 %v12012_v1 }
 0x4d2   : > { %v10995_v2 = vadd.f32 %v7315_v9, %v7314_v10  ;;  %v7317_v20 = vpop.f32.mrb[30].mxu0 }
 0x4d3   : > { %v7358_v37 = vpop.f32.mrb[24].mxu1  ;;  %v7318_v29 = vpop.f32.mrb[31].mxu0 }
 0x4d4   : > { %v7359_v27 = vpop.f32.mrb[25].mxu1  ;;  %v10997_v12 = vadd.f32 %v7318_v29, %v7317_v20  ;;  %8218 = vmatpush3.bf16.msra.mxu0 %v11003_v58 }
 0x4d5   : > { %v7360_v16 = vadd.f32 %v7359_v27, %v7358_v37  ;;  %v7361_v49 = vpop.f32.mrb[26].mxu1  ;;  %v3505_v27 = vld [vmem:[#allocation9 + $0x70] sm:$0xff]  ;;  %v3506_v37 = vld [vmem:[#allocation9 + $0x78] sm:$0xff]  ;;  %8219 = vmatprep.subr.bf16.mxu0 %v12012_v1 }
 0x4d6   : > { %v7362_v6 = vpop.f32.mrb[27].mxu1 }
 0x4d7   : > { %v8262_v21 = vadd.f32 %v7360_v16, %v10959_v7  ;;  %v7363_v45 = vadd.f32 %v7362_v6, %v7361_v49  ;;  %v11010_v6 = vpack.c.bf16 %v3506_v37, %v3505_v27 }
 0x4d8   : > { %v7432_v9 = vpop.f32.mrb[32].mxu0 }
 0x4d9   : > { %v8268_v29 = vadd.f32 %v7363_v45, %v10961_v14  ;;  %v7433_v62 = vpop.f32.mrb[33].mxu0  ;;  %8221 = vmatpush3.bf16.msra.mxu0 %v11010_v6 }
 0x4da   : > { %v7434_v39 = vadd.f32 %v7433_v62, %v7432_v9  ;;  %v7435_v10 = vpop.f32.mrb[34].mxu0  ;;  %8222 = vmatprep.subr.bf16.mxu0 %v12012_v1 }
 0x4db   : > { %v7364_v20 = vpop.f32.mrb[28].mxu1  ;;  %v7436_v55 = vpop.f32.mrb[35].mxu0 }
 0x4dc   : > { %v7365_v31 = vpop.f32.mrb[29].mxu1  ;;  %v7437_v26 = vadd.f32 %v7436_v55, %v7435_v10  ;;  %v11007_v7 = vadd.f32 %v8265_v25, %v7434_v39 }
 0x4dd   : > { %v7366_v63 = vadd.f32 %v7365_v31, %v7364_v20  ;;  %v7367_v49 = vpop.f32.mrb[30].mxu1 }
 0x4de   : > { %v7368_v14 = vpop.f32.mrb[31].mxu1  ;;  %v11013_v16 = vadd.f32 %v8271_v47, %v7437_v26 }
 0x4df   : > { %v8277_v3 = vadd.f32 %v7366_v63, %v10963_v52  ;;  %v7369_v45 = vadd.f32 %v7368_v14, %v7367_v49 }
 0x4e0   : > { %v7438_v9 = vpop.f32.mrb[36].mxu0 }
 0x4e1   : > { %v8283_v25 = vadd.f32 %v7369_v45, %v10965_v48  ;;  %v7439_v62 = vpop.f32.mrb[37].mxu0 }
 0x4e2   : > { %v7440_v27 = vadd.f32 %v7439_v62, %v7438_v9  ;;  %v7441_v37 = vpop.f32.mrb[38].mxu0 }
 0x4e3   : > { %v7370_v39 = vpop.f32.mrb[32].mxu1  ;;  %v7442_v10 = vpop.f32.mrb[39].mxu0 }
 0x4e4   : > { %v7371_v20 = vpop.f32.mrb[33].mxu1  ;;  %v7443_v55 = vadd.f32 %v7442_v10, %v7441_v37  ;;  %v11019_v31 = vadd.f32 %v8262_v21, %v7440_v27 }
 0x4e5   : > { %v7372_v26 = vadd.f32 %v7371_v20, %v7370_v39  ;;  %v7373_v47 = vpop.f32.mrb[34].mxu1 }
 0x4e6   : > { %v7374_v52 = vpop.f32.mrb[35].mxu1  ;;  %v11021_v63 = vadd.f32 %v8268_v29, %v7443_v55 }
 0x4e7   : > { %v8274_v49 = vadd.f32 %v7372_v26, %v10967_v24  ;;  %v7375_v14 = vadd.f32 %v7374_v52, %v7373_v47 }
 0x4e8   : > { %v7444_v48 = vpop.f32.mrb[40].mxu0 }
 0x4e9   : > { %v8280_v45 = vadd.f32 %v7375_v14, %v10969_v57  ;;  %v7445_v60 = vpop.f32.mrb[41].mxu0 }
 0x4ea   : > { %v7446_v9 = vadd.f32 %v7445_v60, %v7444_v48  ;;  %v7447_v62 = vpop.f32.mrb[42].mxu0 }
 0x4eb   : > { %v7376_v33 = vpop.f32.mrb[36].mxu1  ;;  %v7448_v18 = vpop.f32.mrb[43].mxu0 }
 0x4ec   : > { %v7377_v13 = vpop.f32.mrb[37].mxu1  ;;  %v7449_v37 = vadd.f32 %v7448_v18, %v7447_v62  ;;  %v11025_v21 = vadd.f32 %v8277_v3, %v7446_v9 }
 0x4ed   : > { %v7378_v27 = vadd.f32 %v7377_v13, %v7376_v33  ;;  %v7379_v39 = vpop.f32.mrb[38].mxu1 }
 0x4ee   : > { %v7380_v10 = vpop.f32.mrb[39].mxu1  ;;  %v11027_v29 = vadd.f32 %v8283_v25, %v7449_v37 }
 0x4ef   : > { %v8289_v24 = vadd.f32 %v7378_v27, %v10975_v53  ;;  %v7381_v20 = vadd.f32 %v7380_v10, %v7379_v39 }
 0x4f0   : > { %v7450_v55 = vpop.f32.mrb[44].mxu0 }
 0x4f1   : > { %v8295_v57 = vadd.f32 %v7381_v20, %v10977_v23  ;;  %v7451_v26 = vpop.f32.mrb[45].mxu0 }
 0x4f2   : > { %v7452_v60 = vadd.f32 %v7451_v26, %v7450_v55  ;;  %v7453_v47 = vpop.f32.mrb[46].mxu0 }
 0x4f3   : > { %v7382_v52 = vpop.f32.mrb[40].mxu1  ;;  %v7454_v14 = vpop.f32.mrb[47].mxu0 }
 0x4f4   : > { %v7383_v48 = vpop.f32.mrb[41].mxu1  ;;  %v7455_v18 = vadd.f32 %v7454_v14, %v7453_v47  ;;  %v11031_v3 = vadd.f32 %v8274_v49, %v7452_v60 }
 0x4f5   : > { %v7384_v13 = vadd.f32 %v7383_v48, %v7382_v52  ;;  %v7385_v33 = vpop.f32.mrb[42].mxu1 }
 0x4f6   : > { %v7386_v9 = vpop.f32.mrb[43].mxu1  ;;  %v11033_v25 = vadd.f32 %v8280_v45, %v7455_v18 }
 0x4f7   : > { %v8286_v53 = vadd.f32 %v7384_v13, %v10979_v42  ;;  %v7387_v62 = vadd.f32 %v7386_v9, %v7385_v33 }
 0x4f8   : > { %v7456_v37 = vpop.f32.mrb[48].mxu0 }
 0x4f9   : > { %v8292_v23 = vadd.f32 %v7387_v62, %v10981_v61  ;;  %v7457_v27 = vpop.f32.mrb[49].mxu0 }
 0x4fa   : > { %v7458_v39 = vadd.f32 %v7457_v27, %v7456_v37  ;;  %v7459_v10 = vpop.f32.mrb[50].mxu0 }
 0x4fb   : > { %v7388_v20 = vpop.f32.mrb[44].mxu1  ;;  %v7460_v55 = vpop.f32.mrb[51].mxu0 }
 0x4fc   : > { %v7389_v26 = vpop.f32.mrb[45].mxu1  ;;  %v7461_v47 = vadd.f32 %v7460_v55, %v7459_v10  ;;  %v11037_v49 = vadd.f32 %v8289_v24, %v7458_v39 }
 0x4fd   : > { %v7390_v60 = vadd.f32 %v7389_v26, %v7388_v20  ;;  %v7391_v52 = vpop.f32.mrb[46].mxu1 }
 0x4fe   : > { %v7392_v14 = vpop.f32.mrb[47].mxu1  ;;  %v11039_v45 = vadd.f32 %v8295_v57, %v7461_v47 }
 0x4ff   : > { %v8301_v42 = vadd.f32 %v7390_v60, %v10989_v50  ;;  %v7393_v48 = vadd.f32 %v7392_v14, %v7391_v52 }
 0x500   : > { %v7462_v18 = vpop.f32.mrb[52].mxu0 }
 0x501   : > { %v8307_v61 = vadd.f32 %v7393_v48, %v10991_v46  ;;  %v7463_v13 = vpop.f32.mrb[53].mxu0 }
 0x502   : > { %v7464_v33 = vadd.f32 %v7463_v13, %v7462_v18  ;;  %v7465_v9 = vpop.f32.mrb[54].mxu0 }
 0x503   : > { %v7394_v62 = vpop.f32.mrb[48].mxu1  ;;  %v7466_v37 = vpop.f32.mrb[55].mxu0 }
 0x504   : > { %v7395_v27 = vpop.f32.mrb[49].mxu1  ;;  %v7467_v10 = vadd.f32 %v7466_v37, %v7465_v9  ;;  %v8287_v24 = vadd.f32 %v8286_v53, %v7464_v33 }
 0x505   : > { %v7396_v39 = vadd.f32 %v7395_v27, %v7394_v62  ;;  %v7397_v20 = vpop.f32.mrb[50].mxu1 }
 0x506   : > { %v7398_v55 = vpop.f32.mrb[51].mxu1  ;;  %v8293_v26 = vadd.f32 %v8292_v23, %v7467_v10 }
 0x507   : > { %v8298_v57 = vadd.f32 %v7396_v39, %v10995_v2  ;;  %v7399_v47 = vadd.f32 %v7398_v55, %v7397_v20 }
 0x508   : > { %v7468_v50 = vpop.f32.mrb[56].mxu0 }
 0x509   : > { %v8304_v60 = vadd.f32 %v7399_v47, %v10997_v12  ;;  %v7469_v52 = vpop.f32.mrb[57].mxu0  ;;  %v6772_v47 = vld [vmem:[#allocation18] ss:$0 sm:$0xff] }
 0x50a   : > { %v7470_v46 = vadd.f32 %v7469_v52, %v7468_v50  ;;  %v7471_v14 = vpop.f32.mrb[58].mxu0 }
 0x50b   : > { %v7472_v48 = vpop.f32.mrb[59].mxu0 }
 0x50c   : > { %v7473_v18 = vadd.f32 %v7472_v48, %v7471_v14  ;;  %v8302_v13 = vadd.f32 %v8301_v42, %v7470_v46 }
 0x50e   : > { %v11045_v0 = vadd.f32 %v8307_v61, %v7473_v18 }
 0x510   : > { %v7474_v9 = vpop.f32.mrb[60].mxu0 }
 0x511   : > { %v7475_v53 = vpop.f32.mrb[61].mxu0 }
 0x512   : > { %v7476_v33 = vadd.f32 %v7475_v53, %v7474_v9  ;;  %v7477_v62 = vpop.f32.mrb[62].mxu0 }
 0x513   : > { %v7478_v37 = vpop.f32.mrb[63].mxu0 }
 0x514   : > { %v7479_v23 = vadd.f32 %v7478_v37, %v7477_v62  ;;  %v8299_v27 = vadd.f32 %v8298_v57, %v7476_v33 }
 0x516   : > { %v8305_v2 = vadd.f32 %v8304_v60, %v7479_v23 }
 0x52b   : > { %v7938_v10 = vpop.f32.mrb[4].mxu1 }
 0x52c   : > { %v8264_v39 = vadd.f32 %v11019_v31, %v7938_v10  ;;  %v3363_v12 = vpop.f32.mrb[5].mxu1 }
 0x52d   : > { %v8267_v20 = vadd.f32 %v11007_v7, %v3363_v12  ;;  %v7939_v55 = vpop.f32.mrb[6].mxu1 }
 0x52e   : > { %v8270_v42 = vadd.f32 %v11021_v63, %v7939_v55  ;;  %v3366_v61 = vpop.f32.mrb[7].mxu1  ;;  %v11055_v14 = vadd.f32 %v8264_v39, %v6772_v47 }
 0x52f   : > { %v8273_v50 = vadd.f32 %v11013_v16, %v3366_v61  ;;  %v11051_v52 = vadd.f32 %v8267_v20, %v6772_v47 }
 0x530   : > { %v11060_v48 = vadd.f32 %v8270_v42, %v6772_v47 }
 0x531   : > { %v11053_v46 = vadd.f32 %v8273_v50, %v6772_v47 }
 0x533   : > { %v3465_v57 = vadd.f32 %v11053_v46, %v11051_v52  ;;  %v7942_v31 = vpop.f32.mrb[8].mxu1 }
 0x534   : > { %v8276_v60 = vadd.f32 %v11031_v3, %v7942_v31  ;;  %v3379_v7 = vpop.f32.mrb[9].mxu1 }
 0x535   : > { %v3466_v63 = vadd.f32 %v3465_v57, %v11055_v14  ;;  %v8279_v18 = vadd.f32 %v11025_v21, %v3379_v7  ;;  %v7943_v16 = vpop.f32.mrb[10].mxu1 }
 0x536   : > { %v8282_v9 = vadd.f32 %v11033_v25, %v7943_v16  ;;  %v3382_v53 = vpop.f32.mrb[11].mxu1  ;;  %v11073_v21 = vadd.f32 %v8276_v60, %v6772_v47 }
 0x537   : > { %v11065_v33 = vadd.f32 %v8279_v18, %v6772_v47  ;;  %v3467_v62 = vadd.f32 %v3466_v63, %v11060_v48  ;;  %v8285_v37 = vadd.f32 %v11027_v29, %v3382_v53 }
 0x538   : > { %v11078_v57 = vadd.f32 %v8282_v9, %v6772_v47 }
 0x539   : > { %v3468_v23 = vadd.f32 %v3467_v62, %v11065_v33  ;;  %v11070_v3 = vadd.f32 %v8285_v37, %v6772_v47 }
 0x53b   : > { %v3469_v10 = vadd.f32 %v3468_v23, %v11070_v3  ;;  %v7946_v39 = vpop.f32.mrb[12].mxu1 }
 0x53c   : > { %v8288_v12 = vadd.f32 %v8287_v24, %v7946_v39  ;;  %v3395_v20 = vpop.f32.mrb[13].mxu1 }
 0x53d   : > { %v8291_v25 = vadd.f32 %v11037_v49, %v3395_v20  ;;  %v7947_v55 = vpop.f32.mrb[14].mxu1  ;;  %v3470_v50 = vadd.f32 %v3469_v10, %v11073_v21 }
 0x53e   : > { %v8294_v42 = vadd.f32 %v8293_v26, %v7947_v55  ;;  %v3398_v61 = vpop.f32.mrb[15].mxu1  ;;  %v11085_v63 = vadd.f32 %v8288_v12, %v6772_v47 }
 0x53f   : > { %v8297_v29 = vadd.f32 %v11039_v45, %v3398_v61  ;;  %v11080_v31 = vadd.f32 %v8291_v25, %v6772_v47  ;;  %v3471_v24 = vadd.f32 %v3470_v50, %v11078_v57 }
 0x540   : > { %v11089_v16 = vadd.f32 %v8294_v42, %v6772_v47 }
 0x541   : > { %v11082_v7 = vadd.f32 %v8297_v29, %v6772_v47  ;;  %v3472_v23 = vrot.slane %v3471_v24, 4 }
 0x543   : > { %v3478_v49 = vadd.f32 %v11082_v7, %v11080_v31  ;;  %v7950_v60 = vpop.f32.mrb[16].mxu1  ;;  %v3473_v55 = vadd.f32 %v3472_v23, %v3471_v24 }
 0x544   : > { %v8300_v26 = vadd.f32 %v8299_v27, %v7950_v60  ;;  %v3411_v18 = vpop.f32.mrb[17].mxu1 }
 0x545   : > { %v3479_v45 = vadd.f32 %v3478_v49, %v11085_v63  ;;  %v8303_v9 = vadd.f32 %v8302_v13, %v3411_v18  ;;  %v7951_v53 = vpop.f32.mrb[18].mxu1 }
 0x546   : > { %v8306_v62 = vadd.f32 %v8305_v2, %v7951_v53  ;;  %v3414_v37 = vpop.f32.mrb[19].mxu1  ;;  %v11096_v27 = vadd.f32 %v8300_v26, %v6772_v47  ;;  %v3474_v2 = vrot.slane %v3473_v55, 2 }
 0x547   : > { %v3461_v10 = vadd.f32 %v8303_v9, %v6772_v47  ;;  %v3480_v39 = vadd.f32 %v3479_v45, %v11089_v16  ;;  %v8309_v12 = vadd.f32 %v11045_v0, %v3414_v37  ;;  %v12014_v37 = vld [vmem:[#allocation38_spill] sm:$0xff] }
 0x548   : > { %v11099_v61 = vadd.f32 %v8306_v62, %v6772_v47  ;;  %v3475_v60 = vadd.f32 %v3474_v2, %v3473_v55 }
 0x549   : > { %v3481_v20 = vadd.f32 %v3480_v39, %v3461_v10  ;;  %v11094_v25 = vadd.f32 %v8309_v12, %v6772_v47 }
 0x54a   : > { %v3476_v0 = vrot.slane %v3475_v60, 1 }
 0x54b   : > { %v3482_v42 = vadd.f32 %v3481_v20, %v11094_v25 }
 0x54c   : > { %v3477_v53 = vadd.f32 %v3476_v0, %v3475_v60 }
 0x54d   : > { %v3483_v13 = vadd.f32 %v3482_v42, %v11096_v27 }
 0x54f   : > { %v3484_v50 = vadd.f32 %v3483_v13, %v11099_v61 }
 0x551   : > { %v3485_v29 = vrot.slane %v3484_v50, 4 }
 0x553   : > { %v3486_v49 = vadd.f32 %v3485_v29, %v3484_v50 }
 0x555   : > { %v3487_v18 = vrot.slane %v3486_v49, 2 }
 0x557   : > { %v3488_v45 = vadd.f32 %v3487_v18, %v3486_v49 }
 0x559   : > { %v3489_v9 = vrot.slane %v3488_v45, 1 }
 0x55b   : > { %v3490_v24 = vadd.f32 %v3489_v9, %v3488_v45 }
 0x55d   : > { %v3509_v26 = vsel %vm1003_vm1, %v3490_v24, %v3477_v53 }
 0x55e   : > { %7985 = vmatmul.mubr.f32.vlgmr.msra.gmra.mrb[64].mxu0 %v3509_v26 }
 0x55f   : > { %8224 = vmatpush3.bf16.msra.mxu0 %v10951_v51  ;;  %8019 = vmatprep.mubr.msk.f32.mxu0 %vm9500_vm0, %v11989_v34 }
 0x560   : > { %8225 = vmatprep.subr.bf16.mxu0 %v12012_v1 }
 0x563   : > { %8227 = vmatpush3.bf16.msra.mxu0 %v10955_v15 }
 0x564   : > { %8228 = vmatprep.subr.bf16.mxu0 %v12012_v1 }
 0x567   : > { %8230 = vmatpush3.bf16.msra.mxu0 %v10971_v35  ;;  %v12013_v35 = vld [vmem:[#allocation37_spill] sm:$0xff] }
 0x568   : > { %8231 = vmatprep.subr.bf16.mxu0 %v12012_v1 }
 0x56b   : > { %8233 = vmatpush3.bf16.msra.mxu0 %v10983_v54 }
 0x56c   : > { %8234 = vmatprep.subr.bf16.mxu0 %v12012_v1 }
 0x56f   : > { %8236 = vmatpush3.bf16.msra.mxu0 %v10986_v38 }
 0x570   : > { %8237 = vmatprep.subr.bf16.mxu0 %v12012_v1 }
 0x573   : > { %8239 = vmatpush3.bf16.msra.mxu0 %v10999_v40 }
 0x574   : > { %8240 = vmatprep.subr.bf16.mxu0 %v12012_v1 }
 0x577   : > { %8242 = vmatpush3.bf16.msra.mxu0 %v11003_v58 }
 0x578   : > { %8243 = vmatprep.subr.bf16.mxu0 %v12012_v1 }
 0x57b   : > { %8245 = vmatpush3.bf16.msra.mxu0 %v11010_v6 }
 0x631   : > { %v3577_v34 = vpop.f32.mrb[64].mxu0 }
 0x632   : > { %v3581_v51 = vmul.f32 0.0078125, %v3577_v34  ;;  %v7986_v15 = vpop.f32.mrb[65].mxu0 }
 0x634   : > { %v3589_v54 = vrot.slane %v3581_v51, %v12013_v35 }
 0x636   : > { %v3590_v47 = vcombine.high %v3589_v54, %v3589_v54  ;;  %v3597_v38 = vrot.slane %v3589_v54, %v12013_v35 }
 0x638   : > { %v3604_v62 = vrot.slane %v3590_v47, %v12013_v35  ;;  %v3608_v40 = vrot.slane %v3597_v38, %v12014_v37 }
 0x63a   : > { %v3612_v23 = vrot.slane %v3604_v62, %v12014_v37  ;;  %v11127_v58 = vsub.f32 %v11051_v52, %v3608_v40  ;;  %v11130_v1 = vsub.f32 %v11053_v46, %v3608_v40  ;;  %v11139_v12 = vsub.f32 %v11055_v14, %v3608_v40 }
 0x63b   : > { %v11149_v46 = vsub.f32 %v11060_v48, %v3608_v40  ;;  %v11168_v50 = vsub.f32 %v11070_v3, %v3608_v40  ;;  %v11178_v18 = vsub.f32 %v11073_v21, %v3608_v40  ;;  %v11188_v53 = vsub.f32 %v11078_v57, %v3608_v40 }
 0x63c   : > { %v11133_v6 = vsub.f32 %v11080_v31, %v3612_v23  ;;  %v11136_v39 = vsub.f32 %v11082_v7, %v3612_v23  ;;  %v11142_v20 = vsub.f32 %v11085_v63, %v3612_v23  ;;  %v3631_v55 = vmul.f32 %v11127_v58, %v11127_v58 }
 0x63d   : > { %v3632_v52 = vmul.f32 %v11130_v1, %v11130_v1  ;;  %v11152_v31 = vsub.f32 %v11089_v16, %v3612_v23  ;;  %v11159_v63 = vsub.f32 %v11065_v33, %v3608_v40  ;;  %v11161_v42 = vsub.f32 %v3461_v10, %v3612_v23 }
 0x63e   : > { %v3639_v7 = vmul.f32 %v11133_v6, %v11133_v6  ;;  %v3640_v14 = vmul.f32 %v11136_v39, %v11136_v39  ;;  %v3633_v13 = vmul.f32 %v11139_v12, %v11139_v12  ;;  %v3641_v48 = vmul.f32 %v11142_v20, %v11142_v20 }
 0x63f   : > { %v3647_v2 = vadd.f32 %v3632_v52, %v3631_v55  ;;  %v11171_v29 = vsub.f32 %v11094_v25, %v3612_v23  ;;  %v3634_v33 = vmul.f32 %v11149_v46, %v11149_v46  ;;  %v3642_v10 = vmul.f32 %v11152_v31, %v11152_v31 }
 0x640   : > { %v3660_v16 = vadd.f32 %v3640_v14, %v3639_v7  ;;  %v11181_v0 = vsub.f32 %v11096_v27, %v3612_v23  ;;  %v3635_v3 = vmul.f32 %v11159_v63, %v11159_v63  ;;  %v3643_v25 = vmul.f32 %v11161_v42, %v11161_v42 }
 0x641   : > { %v3648_v49 = vadd.f32 %v3647_v2, %v3633_v13  ;;  %v11191_v24 = vsub.f32 %v11099_v61, %v3612_v23  ;;  %v3636_v21 = vmul.f32 %v11168_v50, %v11168_v50  ;;  %v3644_v27 = vmul.f32 %v11171_v29, %v11171_v29 }
 0x642   : > { %v3661_v60 = vadd.f32 %v3660_v16, %v3641_v48  ;;  %v3637_v51 = vmul.f32 %v11178_v18, %v11178_v18  ;;  %v3645_v15 = vmul.f32 %v11181_v0, %v11181_v0  ;;  %v3638_v61 = vmul.f32 %v11188_v53, %v11188_v53 }
 0x643   : > { %v3649_v45 = vadd.f32 %v3648_v49, %v3634_v33  ;;  %v3646_v47 = vmul.f32 %v11191_v24, %v11191_v24 }
 0x644   : > { %v3662_v9 = vadd.f32 %v3661_v60, %v3642_v10 }
 0x645   : > { %v3650_v26 = vadd.f32 %v3649_v45, %v3635_v3  ;;  %v8763_v45 = vld [vmem:[#allocation19 + $0x100] sm:$0xff]  }
 0x646   : > { %v3663_v34 = vadd.f32 %v3662_v9, %v3643_v25  ;;  %v8762_v25 = vld [vmem:[#allocation19 + $0x140] sm:$0xff]   ;;  %7530 = vmatprep.subr.bf16.mxu1 %v8763_v45 }
 0x647   : > { %v3651_v54 = vadd.f32 %v3650_v26, %v3636_v21  ;;  %v8764_v9 = vld [vmem:[#allocation19 + $0xc0] sm:$0xff]   ;;  %v8765_v21 = vld [vmem:[#allocation19 + $0x148] sm:$0xff]   ;;  %8022 = vmatprep.subr.bf16.mxu0 %v8762_v25 }
 0x648   : > { %v3664_v57 = vadd.f32 %v3663_v34, %v3644_v27  ;;  %v8766_v27 = vld [vmem:[#allocation19 + $0x108] sm:$0xff]   ;;  %7531 = vmatpush3.bf16.msra.mxu1 %v8764_v9  ;;  %v8768_v34 = vld [vmem:[#allocation19 + $0x150] sm:$0xff]  }
 0x649   : > { %v3652_v38 = vadd.f32 %v3651_v54, %v3637_v51  ;;  %v8767_v26 = vld [vmem:[#allocation19 + $0xc8] sm:$0xff]   ;;  %7532 = vmatprep.subr.bf16.mxu1 %v8766_v27  ;;  %v8769_v51 = vld [vmem:[#allocation19 + $0x110] sm:$0xff]   ;;  %v8771_v54 = vld [vmem:[#allocation19 + $0x158] sm:$0xff]  }
 0x64a   : > { %v3665_v62 = vadd.f32 %v3664_v57, %v3645_v15  ;;  %v8770_v15 = vld [vmem:[#allocation19 + $0xd0] sm:$0xff]   ;;  %v8772_v57 = vld [vmem:[#allocation19 + $0x118] sm:$0xff]  }
 0x64b   : > { %v3653_v40 = vadd.f32 %v3652_v38, %v3638_v61  ;;  %v8773_v61 = vld [vmem:[#allocation19 + $0xd8] sm:$0xff]   ;;  %v8775_v38 = vld [vmem:[#allocation19 + $0x120] sm:$0xff]  }
 0x64c   : > { %v3666_v23 = vadd.f32 %v3665_v62, %v3646_v47  ;;  %7533 = vmatpush3.bf16.msra.mxu1 %v8767_v26  ;;  %v8774_v47 = vld [vmem:[#allocation19 + $0x160] sm:$0xff]  }
 0x64d   : > { %v3654_v55 = vrot.slane %v3653_v40, 4  ;;  %7534 = vmatprep.subr.bf16.mxu1 %v8769_v51  ;;  %v8776_v62 = vld [vmem:[#allocation19 + $0xe0] sm:$0xff]  }
 0x64e   : > { %v3667_v52 = vrot.slane %v3666_v23, 4 }
 0x64f   : > { %v3655_v7 = vadd.f32 %v3654_v55, %v3653_v40  ;;  %v8777_v40 = vld [vmem:[#allocation19 + $0x168] sm:$0xff]  }
 0x650   : > { %v3668_v14 = vadd.f32 %v3667_v52, %v3666_v23  ;;  %7535 = vmatpush3.bf16.msra.mxu1 %v8770_v15  ;;  %v8778_v23 = vld [vmem:[#allocation19 + $0x128] sm:$0xff]   ;;  %v8780_v52 = vld [vmem:[#allocation19 + $0x170] sm:$0xff]  }
 0x651   : > { %v3656_v13 = vrot.slane %v3655_v7, 2  ;;  %7536 = vmatprep.subr.bf16.mxu1 %v8772_v57  ;;  %v8779_v55 = vld [vmem:[#allocation19 + $0xe8] sm:$0xff]  }
 0x652   : > { %v3669_v48 = vrot.slane %v3668_v14, 2 }
 0x653   : > { %v3657_v2 = vadd.f32 %v3656_v13, %v3655_v7  ;;  %v8781_v7 = vld [vmem:[#allocation19 + $0x130] sm:$0xff]   ;;  %v8783_v13 = vld [vmem:[#allocation19 + $0x178] sm:$0xff]  }
 0x654   : > { %v3670_v16 = vadd.f32 %v3669_v48, %v3668_v14  ;;  %7537 = vmatpush3.bf16.msra.mxu1 %v8773_v61  ;;  %v8782_v14 = vld [vmem:[#allocation19 + $0xf0] sm:$0xff]   ;;  %v8784_v48 = vld [vmem:[#allocation19 + $0x138] sm:$0xff]  }
 0x655   : > { %v3658_v33 = vrot.slane %v3657_v2, 1  ;;  %7538 = vmatprep.subr.bf16.mxu1 %v8775_v38 }
 0x656   : > { %v3671_v10 = vrot.slane %v3670_v16, 1 }
 0x657   : > { %v3659_v49 = vadd.f32 %v3658_v33, %v3657_v2  ;;  %v8785_v2 = vld [vmem:[#allocation19 + $0xf8] sm:$0xff]   ;;  %v8820_v33 = vld [vmem:[#allocation19 + $0x1c0] sm:$0xff]  }
 0x658   : > { %v3672_v60 = vadd.f32 %v3671_v10, %v3670_v16  ;;  %7539 = vmatpush3.bf16.msra.mxu1 %v8776_v62  ;;  %v8787_v16 = vld [vmem:[#allocation19 + $0x40] sm:$0xff]  }
 0x659   : > { %7540 = vmatprep.subr.bf16.mxu1 %v8778_v23 }
 0x65a   : > { %v3675_v3 = vsel %vm1003_vm1, %v3672_v60, %v3659_v49 }
 0x65b   : > { %8020 = vmatmul.mubr.f32.vlgmr.msra.gmra.mrb[66].mxu0 %v3675_v3 }
 0x65c   : > { %8023 = vmatpush3.bf16.msra.mxu0 %v8762_v25  ;;  %7541 = vmatpush3.bf16.msra.mxu1 %v8779_v55  ;;  %v6773_v25 = vld [vmem:[#allocation13] ss:$0 sm:$0xff] }
 0x65d   : > { %8024 = vmatprep.subr.bf16.mxu0 %v8765_v21  ;;  %7542 = vmatprep.subr.bf16.mxu1 %v8781_v7 }
 0x660   : > { %8025 = vmatpush3.bf16.msra.mxu0 %v8765_v21  ;;  %7543 = vmatpush3.bf16.msra.mxu1 %v8782_v14 }
 0x661   : > { %8026 = vmatprep.subr.bf16.mxu0 %v8768_v34  ;;  %7544 = vmatprep.subr.bf16.mxu1 %v8784_v48 }
 0x664   : > { %8027 = vmatpush3.bf16.msra.mxu0 %v8768_v34  ;;  %7545 = vmatpush3.bf16.msra.mxu1 %v8785_v2 }
 0x665   : > { %8028 = vmatprep.subr.bf16.mxu0 %v8771_v54  ;;  %7690 = vmatprep.subr.bf16.mxu1 %v8820_v33 }
 0x668   : > { %8029 = vmatpush3.bf16.msra.mxu0 %v8771_v54 }
 0x669   : > { %8030 = vmatprep.subr.bf16.mxu0 %v8774_v47 }
 0x66c   : > { %8031 = vmatpush3.bf16.msra.mxu0 %v8774_v47 }
 0x66d   : > { %8032 = vmatprep.subr.bf16.mxu0 %v8777_v40 }
 0x670   : > { %8033 = vmatpush3.bf16.msra.mxu0 %v8777_v40  ;;  %v11219_v40 = vld [vmem:[#allocation15] ss:$0 sm:$0xff] }
 0x671   : > { %8034 = vmatprep.subr.bf16.mxu0 %v8780_v52 }
 0x674   : > { %8035 = vmatpush3.bf16.msra.mxu0 %v8780_v52 }
 0x675   : > { %8036 = vmatprep.subr.bf16.mxu0 %v8783_v13 }
 0x678   : > { %8037 = vmatpush3.bf16.msra.mxu0 %v8783_v13 }
 0x679   : > { %7610 = vmatprep.subr.bf16.mxu0 %v8787_v16 }
 0x72e   : > { %v3743_v10 = vpop.f32.mrb[66].mxu0 }
 0x72f   : > { %v3747_v49 = vmul.f32 0.0078125, %v3743_v10  ;;  %v8021_v60 = vpop.f32.mrb[67].mxu0 }
 0x731   : > { %v3748_v3 = vadd.f32 1e-06, %v3747_v49 }
 0x733   : > { %8956 = vrsqrt.f32 %v3748_v3 }
 0x73d   : > { %v8957_v45 = vpop.eup %8956 }
 0x73e   : > { %v3757_v9 = vmul.f32 %v8957_v45, %v6773_v25 }
 0x740   : > { %v3765_v21 = vrot.slane %v3757_v9, %v12013_v35 }
 0x742   : > { %v3766_v27 = vcombine.high %v3765_v21, %v3765_v21  ;;  %v3773_v26 = vrot.slane %v3765_v21, %v12013_v35 }
 0x744   : > { %v3780_v34 = vrot.slane %v3766_v27, %v12013_v35  ;;  %v3784_v51 = vrot.slane %v3773_v26, %v12014_v37 }
 0x746   : > { %v11211_v15 = vrot.slane %v3780_v34, %v12014_v37  ;;  %v3791_v54 = vmul.f32 %v3784_v51, %v11127_v58  ;;  %v3792_v57 = vmul.f32 %v3784_v51, %v11130_v1  ;;  %v3793_v61 = vmul.f32 %v3784_v51, %v11139_v12 }
 0x747   : > { %v3794_v47 = vmul.f32 %v3784_v51, %v11149_v46  ;;  %v3795_v38 = vmul.f32 %v3784_v51, %v11159_v63  ;;  %v3796_v62 = vmul.f32 %v3784_v51, %v11168_v50  ;;  %v3797_v35 = vmul.f32 %v3784_v51, %v11178_v18 }
 0x748   : > { %v3798_v23 = vmul.f32 %v3784_v51, %v11188_v53  ;;  %v3799_v37 = vmul.f32 %v11211_v15, %v11133_v6  ;;  %v3806_v58 = vmul.f32 %v11211_v15, %v11191_v24  ;;  %v11234_v46 = vadd.f32 %v11219_v40, %v3791_v54 }
 0x749   : > { %v11228_v1 = vadd.f32 %v11219_v40, %v3794_v47  ;;  %v11231_v12 = vadd.f32 %v11219_v40, %v3795_v38  ;;  %v3800_v63 = vmul.f32 %v11211_v15, %v11136_v39  ;;  %v11239_v50 = vadd.f32 %v11219_v40, %v3792_v57 }
 0x74a   : > { %v11242_v6 = vadd.f32 %v11219_v40, %v3793_v61  ;;  %v11245_v18 = vadd.f32 %v11219_v40, %v3796_v62  ;;  %v6775_v55 = vmul.f32 -1.442695, %v11234_v46  ;;  %v11251_v52 = vadd.f32 %v11219_v40, %v3806_v58 }
 0x74b   : > { %v6778_v53 = vmul.f32 -1.442695, %v11228_v1  ;;  %v6779_v24 = vmul.f32 -1.442695, %v11231_v12  ;;  %v3801_v39 = vmul.f32 %v11211_v15, %v11142_v20  ;;  %v6776_v7 = vmul.f32 -1.442695, %v11239_v50 }
 0x74c   : > { %v11257_v14 = vadd.f32 %v11219_v40, %v3797_v35  ;;  %v3802_v13 = vmul.f32 %v11211_v15, %v11152_v31  ;;  %v6777_v48 = vmul.f32 -1.442695, %v11242_v6  ;;  %v11263_v2 = vadd.f32 %v11219_v40, %v3798_v23 }
 0x74d   : > { %8958 = vpow2.f32 %v6778_v53  ;;  %v6790_v16 = vmul.f32 -1.442695, %v11251_v52  ;;  %v11267_v33 = vadd.f32 %v11219_v40, %v3799_v37  ;;  %v6780_v20 = vmul.f32 -1.442695, %v11245_v18 }
 0x74e   : > { %8960 = vpow2.f32 %v6779_v24  ;;  %v11271_v10 = vadd.f32 %v11219_v40, %v3800_v63  ;;  %v6781_v31 = vmul.f32 -1.442695, %v11257_v14  ;;  %v11275_v49 = vadd.f32 %v11219_v40, %v3801_v39 }
 0x74f   : > { %8962 = vpow2.f32 %v6775_v55  ;;  %v6782_v60 = vmul.f32 -1.442695, %v11263_v2  ;;  %v11279_v3 = vadd.f32 %v11219_v40, %v3802_v13  ;;  %v6783_v25 = vmul.f32 -1.442695, %v11267_v33 }
 0x750   : > { %8964 = vpow2.f32 %v6776_v7  ;;  %v6784_v45 = vmul.f32 -1.442695, %v11271_v10  ;;  %v6785_v9 = vmul.f32 -1.442695, %v11275_v49  ;;  %v3803_v61 = vmul.f32 %v11211_v15, %v11161_v42 }
 0x751   : > { %8966 = vpow2.f32 %v6777_v48  ;;  %v6786_v21 = vmul.f32 -1.442695, %v11279_v3  ;;  %v3804_v58 = vmul.f32 %v11211_v15, %v11171_v29  ;;  %v3805_v24 = vmul.f32 %v11211_v15, %v11181_v0 }
 0x752   : > { %8968 = vpow2.f32 %v6790_v16  ;;  %v11292_v55 = vadd.f32 %v11219_v40, %v3803_v61 }
 0x753   : > { %8970 = vpow2.f32 %v6780_v20  ;;  %v11295_v20 = vadd.f32 %v11219_v40, %v3804_v58 }
 0x754   : > { %8972 = vpow2.f32 %v6781_v31  ;;  %v6787_v15 = vmul.f32 -1.442695, %v11292_v55 }
 0x755   : > { %8974 = vpow2.f32 %v6782_v60  ;;  %v11299_v60 = vadd.f32 %v11219_v40, %v3805_v24 }
 0x756   : > { %8976 = vpow2.f32 %v6783_v25 }
 0x757   : > { %v8959_v27 = vpop.eup %8958  ;;  %8978 = vpow2.f32 %v6784_v45 }
 0x758   : > { %v8961_v26 = vpop.eup %8960  ;;  %v3881_v34 = vadd.f32 1.0, %v8959_v27  ;;  %8980 = vpow2.f32 %v6785_v9 }
 0x759   : > { %v8963_v51 = vpop.eup %8962  ;;  %v3882_v54 = vadd.f32 1.0, %v8961_v26  ;;  %8982 = vpow2.f32 %v6786_v21  ;;  %v11305_v26 = vmul.f32 -1.442695, %v11295_v20 }
 0x75a   : > { %v8965_v57 = vpop.eup %8964  ;;  %8984 = vrcp.f32 %v3881_v34  ;;  %v3878_v47 = vadd.f32 1.0, %v8963_v51 }
 0x75b   : > { %v8967_v38 = vpop.eup %8966  ;;  %8986 = vrcp.f32 %v3882_v54  ;;  %v3879_v62 = vadd.f32 1.0, %v8965_v57  ;;  %v11313_v54 = vmul.f32 -1.442695, %v11299_v60 }
 0x75c   : > { %v8969_v35 = vpop.eup %8968  ;;  %v3880_v23 = vadd.f32 1.0, %v8967_v38  ;;  %8988 = vrcp.f32 %v3878_v47 }
 0x75d   : > { %v8971_v37 = vpop.eup %8970  ;;  %8990 = vrcp.f32 %v3879_v62  ;;  %v3893_v63 = vadd.f32 1.0, %v8969_v35 }
 0x75e   : > { %v8973_v53 = vpop.eup %8972  ;;  %8992 = vrcp.f32 %v3880_v23  ;;  %v3883_v42 = vadd.f32 1.0, %v8971_v37 }
 0x75f   : > { %v8975_v39 = vpop.eup %8974  ;;  %8994 = vrcp.f32 %v3893_v63  ;;  %v3884_v7 = vadd.f32 1.0, %v8973_v53 }
 0x760   : > { %v8977_v13 = vpop.eup %8976  ;;  %8996 = vrcp.f32 %v3883_v42  ;;  %v3885_v48 = vadd.f32 1.0, %v8975_v39 }
 0x761   : > { %v8979_v16 = vpop.eup %8978  ;;  %8998 = vrcp.f32 %v3884_v7  ;;  %v3886_v29 = vadd.f32 1.0, %v8977_v13 }
 0x762   : > { %v8981_v31 = vpop.eup %8980  ;;  %9000 = vrcp.f32 %v3885_v48  ;;  %v3887_v0 = vadd.f32 1.0, %v8979_v16  ;;  %v12015_v16 = vld [vmem:[#allocation41_spill] sm:$0xff] }
 0x763   : > { %v8983_v25 = vpop.eup %8982  ;;  %9002 = vrcp.f32 %v3886_v29  ;;  %v3888_v45 = vadd.f32 1.0, %v8981_v31 }
 0x764   : > { %v8985_v9 = vpop.eup %8984  ;;  %9004 = vrcp.f32 %v3887_v0  ;;  %v11310_v40 = vadd.f32 1.0, %v8983_v25 }
 0x765   : > { %v8987_v21 = vpop.eup %8986  ;;  %v11302_v27 = vmul.f32 %v8985_v9, %v11228_v1  ;;  %9006 = vrcp.f32 %v3888_v45 }
 0x766   : > { %v8989_v34 = vpop.eup %8988  ;;  %v11308_v51 = vmul.f32 %v8987_v21, %v11231_v12  ;;  %9008 = vpow2.f32 %v6787_v15 }
 0x767   : > { %v8991_v57 = vpop.eup %8990  ;;  %v11316_v61 = vmul.f32 %v8989_v34, %v11234_v46  ;;  %v4009_v1 = vrot.slane %v11302_v27, 1  ;;  %v3953_v47 = vrot.slane %v11302_v27, 7  ;;  %v7090_v38 = vpack.c.bf16 %v11302_v27, %v11302_v27 }
 0x768   : > { %v8993_v62 = vpop.eup %8992  ;;  %v3927_v12 = vmul.f32 %v8991_v57, %v11239_v50  ;;  %v4010_v35 = vrot.slane %v11308_v51, 1  ;;  %v3954_v23 = vrot.slane %v11308_v51, 7  ;;  %v7091_v37 = vpack.c.bf16 %v11308_v51, %v11308_v51  ;;  %v8795_v51 = vld [vmem:[#allocation19 + $0x8] sm:$0xff]  }
 0x769   : > { %v8995_v58 = vpop.eup %8994  ;;  %v3928_v46 = vmul.f32 %v8993_v62, %v11242_v6  ;;  %v4006_v63 = vrot.slane %v11316_v61, 1  ;;  %v3950_v53 = vrot.slane %v11316_v61, 7  ;;  %v7087_v24 = vpack.c.bf16 %v11316_v61, %v11316_v61  ;;  %4194 = vst [vmem:[#allocation3 + $0x34] sm:$0xf] %v7090_v38 }
 0x76a   : > { %v8997_v42 = vpop.eup %8996  ;;  %v4007_v50 = vrot.slane %v3927_v12, 1  ;;  %v4033_v39 = vsel %vm1518_vm5, %v4009_v1, %v4010_v35  ;;  %v11335_v7 = vmul.f32 %v8995_v58, %v11251_v52  ;;  %v3951_v13 = vrot.slane %v3927_v12, 7  ;;  %4195 = vst [vmem:[#allocation3 + $0x40] sm:$0xf] %v7091_v37  ;;  %v12017_v58 = vld [vmem:[#allocation40_spill] sm:$0xff] }
 0x76b   : > { %v8999_v48 = vpop.eup %8998  ;;  %v4008_v6 = vrot.slane %v3928_v46, 1  ;;  %v4041_v29 = vmul.f32 %v12015_v16, %v4033_v39  ;;  %v7088_v31 = vpack.c.bf16 %v3927_v12, %v3927_v12  ;;  %4191 = vst [vmem:[#allocation3 + $0x10] sm:$0xf] %v7087_v24  ;;  %v11339_v0 = vmul.f32 %v8997_v42, %v11245_v18  ;;  %v12016_v12 = vld [vmem:[#allocation39_spill] sm:$0xff] }
 0x76c   : > { %v9001_v15 = vpop.eup %9000  ;;  %v4036_v25 = vsel %vm1518_vm5, %v4006_v63, %v4007_v50  ;;  %v3965_v52 = vrot.slane %v11335_v7, 7  ;;  %v3980_v45 = vsel %vm1461_vm10, %v3950_v53, %v3951_v13  ;;  %v11349_v9 = vmul.f32 %v8999_v48, %v11257_v14 }
 0x76d   : > { %v9003_v21 = vpop.eup %9002  ;;  %v4035_v34 = vsel %vm1518_vm5, %v4007_v50, %v4008_v6  ;;  %v4038_v18 = vmul.f32 %v10261_v19, %v4036_v25  ;;  %v4034_v57 = vsel %vm1518_vm5, %v4008_v6, %v4009_v1  ;;  %v7106_v38 = vpack.c.bf16 %v4041_v29, %v4041_v29  ;;  %4192 = vst [vmem:[#allocation3 + $0x1c] sm:$0xf] %v7088_v31 }
 0x76e   : > { %v9005_v62 = vpop.eup %9004  ;;  %v4039_v37 = vmul.f32 %v12016_v12, %v4035_v34  ;;  %v4040_v24 = vmul.f32 %v12017_v58, %v4034_v57  ;;  %v3981_v14 = vsel %vm1461_vm10, %v3965_v52, %v3950_v53  ;;  %v3983_v42 = vmul.f32 %v10284_v41, %v3980_v45 }
 0x76f   : > { %v9007_v50 = vpop.eup %9006  ;;  %v7103_v39 = vpack.c.bf16 %v4038_v18, %v4038_v18  ;;  %4266 = vst [vmem:[#allocation3 + $0x38] sm:$0xf] %v7106_v38  ;;  %v3982_v19 = vmul.f32 %v10299_v56, %v3981_v14  ;;  %v4011_v1 = vrot.slane %v11339_v0, 1  ;;  %v4012_v48 = vrot.slane %v11349_v9, 1 }
 0x770   : > { %v9009_v6 = vpop.eup %9008  ;;  %v7104_v16 = vpack.c.bf16 %v4039_v37, %v4039_v37  ;;  %v7105_v29 = vpack.c.bf16 %v4040_v24, %v4040_v24  ;;  %v7072_v31 = vpack.c.bf16 %v3983_v42, %v3983_v42  ;;  %v3952_v25 = vrot.slane %v3928_v46, 7 }
 0x771   : > { %4263 = vst [vmem:[#allocation3 + $0x14] sm:$0xf] %v7103_v39  ;;  %v7071_v34 = vpack.c.bf16 %v3982_v19, %v3982_v19  ;;  %v4031_v53 = vsel %vm1518_vm5, %v4011_v1, %v4012_v48  ;;  %v4032_v41 = vsel %vm1518_vm5, %v4010_v35, %v4011_v1  ;;  %v7089_v45 = vpack.c.bf16 %v3928_v46, %v3928_v46  ;;  %v8794_v39 = vld [vmem:[#allocation19 + $0x48] sm:$0xff]  }
 0x772   : > { %4264 = vst [vmem:[#allocation3 + $0x20] sm:$0xf] %v7104_v16  ;;  %4265 = vst [vmem:[#allocation3 + $0x2c] sm:$0xf] %v7105_v29  ;;  %v4042_v56 = vmul.f32 %v10287_v4, %v4032_v41  ;;  %v4043_v18 = vmul.f32 %v10302_v32, %v4031_v53  ;;  %v3978_v57 = vsel %vm1461_vm10, %v3952_v25, %v3953_v47  ;;  %v3890_v41 = vadd.f32 1.0, %v9009_v6 }
 0x773   : > { %4120 = vst [vmem:[#allocation3 + $0x18] sm:$0xf] %v7072_v31  ;;  %v3979_v38 = vsel %vm1461_vm10, %v3951_v13, %v3952_v25  ;;  %4119 = vst [vmem:[#allocation3 + $0xc] sm:$0xf] %v7071_v34  ;;  %v3985_v35 = vmul.f32 %v10405_v22, %v3978_v57  ;;  %v11381_v46 = vmul.f32 %v9001_v15, %v11263_v2  ;;  %v3955_v15 = vrot.slane %v11339_v0, 7 }
 0x774   : > { %v3984_v12 = vmul.f32 %v10389_v8, %v3979_v38  ;;  %4193 = vst [vmem:[#allocation3 + $0x28] sm:$0xf] %v7089_v45  ;;  %v11384_v4 = vmul.f32 %v9003_v21, %v11267_v33  ;;  %v7107_v32 = vpack.c.bf16 %v4042_v56, %v4042_v56  ;;  %v7108_v37 = vpack.c.bf16 %v4043_v18, %v4043_v18  ;;  %v8821_v56 = vld [vmem:[#allocation19 + $0x180] sm:$0xff]   ;;  %v8796_v18 = vld [vmem:[#allocation19 + $0x50] sm:$0xff]   ;;  %v8824_v38 = vld [vmem:[#allocation19 + $0x1c8] sm:$0xff]  }
 0x775   : > { %v11387_v58 = vmul.f32 %v9005_v62, %v11271_v10  ;;  %v11390_v24 = vmul.f32 %v9007_v50, %v11275_v49  ;;  %v7074_v14 = vpack.c.bf16 %v3985_v35, %v3985_v35  ;;  %v4013_v8 = vrot.slane %v11381_v46, 1  ;;  %v8789_v49 = vld [vmem:[#allocation19] sm:$0xff]  }
 0x776   : > { %v7073_v13 = vpack.c.bf16 %v3984_v12, %v3984_v12  ;;  %v4014_v22 = vrot.slane %v11384_v4, 1  ;;  %4267 = vst [vmem:[#allocation3 + $0x44] sm:$0xf] %v7107_v32  ;;  %4268 = vst [vmem:[#allocation3 + $0x50] sm:$0xf] %v7108_v37  ;;  %v3977_v10 = vsel %vm1461_vm10, %v3953_v47, %v3954_v23  ;;  %v7092_v50 = vpack.c.bf16 %v11339_v0, %v11339_v0 }
 0x777   : > { %v4015_v2 = vrot.slane %v11387_v58, 1  ;;  %v4016_v33 = vrot.slane %v11390_v24, 1  ;;  %4122 = vst [vmem:[#allocation3 + $0x30] sm:$0xf] %v7074_v14  ;;  %v4030_v62 = vsel %vm1518_vm5, %v4012_v48, %v4013_v8  ;;  %v3986_v42 = vmul.f32 %v10424_v36, %v3977_v10  ;;  %v8828_v10 = vld [vmem:[#allocation19 + $0x1d0] sm:$0xff]  }
 0x778   : > { %4121 = vst [vmem:[#allocation3 + $0x24] sm:$0xf] %v7073_v13  ;;  %v4029_v21 = vsel %vm1518_vm5, %v4013_v8, %v4014_v22  ;;  %v4044_v27 = vmul.f32 %v10410_v30, %v4030_v62  ;;  %v3976_v30 = vsel %vm1461_vm10, %v3954_v23, %v3955_v15  ;;  %4196 = vst [vmem:[#allocation3 + $0x4c] sm:$0xf] %v7092_v50  ;;  %9010 = vrcp.f32 %v11310_v40 }
 0x779   : > { %v4045_v19 = vmul.f32 %v10413_v5, %v4029_v21  ;;  %v4027_v47 = vsel %vm1518_vm5, %v4015_v2, %v4016_v33  ;;  %v4028_v1 = vsel %vm1518_vm5, %v4014_v22, %v4015_v2  ;;  %v8786_v16 = vld [vmem:[#allocation3 + $0x14] ss:$12 sps:$4 sm:$0xff]   ;;  %v7075_v0 = vpack.c.bf16 %v3986_v42, %v3986_v42  ;;  %v8788_v5 = vld [vmem:[#allocation3 + $0x2c] ss:$12 sps:$4 sm:$0xff]  }
 0x77a   : > { %v4046_v48 = vmul.f32 %v10448_v28, %v4028_v1  ;;  %v4047_v36 = vmul.f32 %v10453_v59, %v4027_v47  ;;  %v11424_v29 = vld [vmem:[#allocation3 + $0xc] sm:$0xff]  ;;  %v11426_v31 = vld [vmem:[#allocation3 + $0x18] sm:$0xff]  ;;  %v7109_v25 = vpack.c.bf16 %v4044_v27, %v4044_v27  ;;  %v3987_v53 = vmul.f32 %v10439_v44, %v3976_v30  ;;  %8038 = vmatprep.mubr.bf16.mxu0 %v8786_v16 }
 0x77b   : > { %v7110_v34 = vpack.c.bf16 %v4045_v19, %v4045_v19  ;;  %v6839_v28 = vcombine.low %v11424_v29, %v11426_v31  ;;  %v6840_v59 = vcombine.high %v11424_v29, %v11426_v31  ;;  %4123 = vst [vmem:[#allocation3 + $0x3c] sm:$0xf] %v7075_v0  ;;  %8039 = vmatmul.mubr.bf16.vlgmr.msra.gmra.mrb[68].mxu0 %v8788_v5  ;;  %v3956_v44 = vrot.slane %v11349_v9, 7  ;;  %v12018_v21 = vld [vmem:[#allocation46_spill] sm:$0xff]  ;;  %v12019_v16 = vld [vmem:[#allocation47_spill] sm:$0xff]  ;;  %v12020_v30 = vld [vmem:[#allocation48_spill] sm:$0xff] }
 0x77c   : > { %v7111_v23 = vpack.c.bf16 %v4046_v48, %v4046_v48  ;;  %v7112_v45 = vpack.c.bf16 %v4047_v36, %v4047_v36  ;;  %4269 = vst [vmem:[#allocation3 + $0x5c] sm:$0xf] %v7109_v25  ;;  %v7076_v57 = vpack.c.bf16 %v3987_v53, %v3987_v53  ;;  %v3957_v6 = vrot.slane %v11381_v46, 7  ;;  %7611 = vmatpush3.bf16.msra.mxu0 %v8789_v49  ;;  %v8830_v27 = vld [vmem:[#allocation19 + $0x190] sm:$0xff]   ;;  %v8831_v53 = vld [vmem:[#allocation19 + $0x1d8] sm:$0xff]  }
 0x77d   : > { %4270 = vst [vmem:[#allocation3 + $0x68] sm:$0xf] %v7110_v34  ;;  %4753 = vmatprep.mubr.bf16.mxu1 %v6840_v59  ;;  %v8792_v12 = vld [vmem:[#allocation3 + $0x44] ss:$12 sps:$4 sm:$0xff]   ;;  %9012 = vrcp.f32 %v3890_v41  ;;  %v7093_v35 = vpack.c.bf16 %v11349_v9, %v11349_v9  ;;  %v7094_v32 = vpack.c.bf16 %v11381_v46, %v11381_v46  ;;  %7612 = vmatprep.subr.bf16.mxu0 %v8794_v39  ;;  %v4021_v9 = vrot.slane %v11335_v7, 1 }
 0x77e   : > { %4271 = vst [vmem:[#allocation3 + $0x8c] sm:$0xf] %v7111_v23  ;;  %4272 = vst [vmem:[#allocation3 + $0x98] sm:$0xf] %v7112_v45  ;;  %4754 = vmatmul.mubr.bf16.vlgmr.msra.gmra.mrb[52].mxu1 %v6839_v28  ;;  %v11442_v40 = vld [vmem:[#allocation3 + $0x30] sm:$0xff]  ;;  %9014 = vpow2.f32 %v11305_v26  ;;  %v3974_v13 = vsel %vm1461_vm10, %v3956_v44, %v3957_v6  ;;  %v3975_v14 = vsel %vm1461_vm10, %v3955_v15, %v3956_v44  ;;  %8042 = vmatprep.mubr.bf16.mxu0 %v8792_v12  ;;  %v8826_v26 = vld [vmem:[#allocation19 + $0x188] sm:$0xff]  }
 0x77f   : > { %v11440_v37 = vld [vmem:[#allocation3 + $0x24] sm:$0xff]  ;;  %4124 = vst [vmem:[#allocation3 + $0x48] sm:$0xf] %v7076_v57  ;;  %9016 = vpow2.f32 %v11313_v54  ;;  %v3988_v8 = vmul.f32 %v10513_v11, %v3975_v14  ;;  %4197 = vst [vmem:[#allocation3 + $0x58] sm:$0xf] %v7093_v35  ;;  %7691 = vmatpush3.bf16.msra.mxu1 %v8821_v56  ;;  %v3989_v22 = vmul.f32 %v10518_v43, %v3974_v13  ;;  %v3958_v15 = vrot.slane %v11384_v4, 7 }
 0x780   : > { %v6843_v46 = vcombine.high %v11440_v37, %v11442_v40  ;;  %4198 = vst [vmem:[#allocation3 + $0x64] sm:$0xf] %v7094_v32  ;;  %v4037_v2 = vsel %vm1518_vm5, %v4021_v9, %v4006_v63  ;;  %7692 = vmatprep.subr.bf16.mxu1 %v8824_v38  ;;  %7613 = vmatpush3.bf16.msra.mxu0 %v8795_v51  ;;  %v8798_v11 = vld [vmem:[#allocation19 + $0x10] sm:$0xff]   ;;  %v8802_v54 = vld [vmem:[#allocation19 + $0x58] sm:$0xff]   ;;  %v3959_v43 = vrot.slane %v11387_v58, 7  ;;  %v3960_v34 = vrot.slane %v11390_v24, 7 }
 0x781   : > { %v7077_v49 = vpack.c.bf16 %v3988_v8, %v3988_v8  ;;  %v4053_v62 = vmul.f32 %v12018_v21, %v4037_v2  ;;  %v7095_v61 = vpack.c.bf16 %v11384_v4, %v11384_v4  ;;  %7614 = vmatprep.subr.bf16.mxu0 %v8796_v18  ;;  %v7078_v63 = vpack.c.bf16 %v3989_v22, %v3989_v22  ;;  %v8803_v51 = vld [vmem:[#allocation19 + $0x18] sm:$0xff]   ;;  %v8804_v56 = vld [vmem:[#allocation19 + $0x60] sm:$0xff]  }
 0x782   : > { %4761 = vmatprep.mubr.bf16.mxu1 %v6843_v46  ;;  %v11466_v42 = vld [vmem:[#allocation3 + $0x3c] sm:$0xff]  ;;  %v3973_v50 = vsel %vm1461_vm10, %v3957_v6, %v3958_v15  ;;  %v7096_v39 = vpack.c.bf16 %v11387_v58, %v11387_v58  ;;  %v3972_v1 = vsel %vm1461_vm10, %v3958_v15, %v3959_v43  ;;  %v7097_v4 = vpack.c.bf16 %v11390_v24, %v11390_v24  ;;  %v9011_v28 = vpop.eup %9010  ;;  %v8833_v35 = vld [vmem:[#allocation19 + $0x198] sm:$0xff]  }
 0x783   : > { %4125 = vst [vmem:[#allocation3 + $0x54] sm:$0xf] %v7077_v49  ;;  %v7118_v47 = vpack.c.bf16 %v4053_v62, %v4053_v62  ;;  %v3990_v48 = vmul.f32 %v12019_v16, %v3973_v50  ;;  %4199 = vst [vmem:[#allocation3 + $0x88] sm:$0xf] %v7095_v61  ;;  %7693 = vmatpush3.bf16.msra.mxu1 %v8826_v26  ;;  %v3991_v0 = vmul.f32 %v12020_v30, %v3972_v1  ;;  %v12021_v38 = vld [vmem:[#allocation49_spill] sm:$0xff] }
 0x784   : > { %v8797_v19 = vld [vmem:[#allocation3 + $0x5c] ss:$12 sps:$4 sm:$0xff]   ;;  %4126 = vst [vmem:[#allocation3 + $0x60] sm:$0xf] %v7078_v63  ;;  %4200 = vst [vmem:[#allocation3 + $0x94] sm:$0xf] %v7096_v39  ;;  %7694 = vmatprep.subr.bf16.mxu1 %v8828_v10  ;;  %v6842_v58 = vcombine.low %v11440_v37, %v11442_v40  ;;  %v7102_v41 = vpack.c.bf16 %v11335_v7, %v11335_v7  ;;  %7615 = vmatpush3.bf16.msra.mxu0 %v8798_v11 }
 0x785   : > { %v8799_v36 = vld [vmem:[#allocation3 + $0x8c] ss:$12 sps:$4 sm:$0xff]   ;;  %8043 = vmatmul.mubr.bf16.gmra.mrb[72].mxu0 %v8797_v19  ;;  %4278 = vst [vmem:[#allocation3 + $0xe0] sm:$0xf] %v7118_v47  ;;  %v7079_v25 = vpack.c.bf16 %v3990_v48, %v3990_v48  ;;  %4201 = vst [vmem:[#allocation3 + $0xa0] sm:$0xf] %v7097_v4  ;;  %v7080_v23 = vpack.c.bf16 %v3991_v0, %v3991_v0  ;;  %7616 = vmatprep.subr.bf16.mxu0 %v8802_v54 }
 0x786   : > { %v11480_v5 = vld [vmem:[#allocation3 + $0x48] sm:$0xff]  ;;  %8046 = vmatprep.mubr.bf16.mxu0 %v8799_v36  ;;  %4762 = vmatmul.mubr.bf16.gmra.mrb[56].mxu1 %v6842_v58  ;;  %v3937_v18 = vmul.f32 %v9011_v28, %v11279_v3  ;;  %v3971_v57 = vsel %vm1461_vm10, %v3959_v43, %v3960_v34  ;;  %4206 = vst [vmem:[#allocation3 + $0xdc] sm:$0xf] %v7102_v41  ;;  %v8835_v8 = vld [vmem:[#allocation19 + $0x1e0] sm:$0xff]  }
 0x787   : > { %v6846_v59 = vcombine.high %v11466_v42, %v11480_v5  ;;  %v9013_v45 = vpop.eup %9012  ;;  %4127 = vst [vmem:[#allocation3 + $0x84] sm:$0xf] %v7079_v25  ;;  %4128 = vst [vmem:[#allocation3 + $0x90] sm:$0xf] %v7080_v23  ;;  %v3992_v12 = vmul.f32 %v12021_v38, %v3971_v57  ;;  %7695 = vmatpush3.bf16.msra.mxu1 %v8830_v27  ;;  %v8806_v22 = vld [vmem:[#allocation19 + $0x20] sm:$0xff]   ;;  %v8810_v49 = vld [vmem:[#allocation19 + $0x68] sm:$0xff]   ;;  %v6845_v39 = vcombine.low %v11466_v42, %v11480_v5 }
 0x788   : > { %v9015_v44 = vpop.eup %9014  ;;  %v11491_v6 = vmul.f32 %v9013_v45, %v11292_v55  ;;  %v4017_v13 = vrot.slane %v3937_v18, 1  ;;  %v3961_v46 = vrot.slane %v3937_v18, 7  ;;  %v7098_v3 = vpack.c.bf16 %v3937_v18, %v3937_v18  ;;  %7696 = vmatprep.subr.bf16.mxu1 %v8831_v53  ;;  %7617 = vmatpush3.bf16.msra.mxu0 %v8803_v51  ;;  %v12022_v43 = vld [vmem:[#allocation43_spill] sm:$0xff]  ;;  %v8837_v61 = vld [vmem:[#allocation19 + $0x1a0] sm:$0xff]   ;;  %v12023_v63 = vld [vmem:[#allocation50_spill] sm:$0xff] }
 0x789   : > { %4769 = vmatprep.mubr.bf16.mxu1 %v6846_v59  ;;  %v9017_v32 = vpop.eup %9016  ;;  %v3891_v14 = vadd.f32 1.0, %v9015_v44  ;;  %v7081_v15 = vpack.c.bf16 %v3992_v12, %v3992_v12  ;;  %7618 = vmatprep.subr.bf16.mxu0 %v8804_v56  ;;  %v12024_v27 = vld [vmem:[#allocation51_spill] sm:$0xff]  ;;  %v8838_v1 = vld [vmem:[#allocation19 + $0x1e8] sm:$0xff]   ;;  %v12025_v36 = vld [vmem:[#allocation52_spill] sm:$0xff] }
 0x78a   : > { %v4018_v26 = vrot.slane %v11491_v6, 1  ;;  %v3892_v2 = vadd.f32 1.0, %v9017_v32  ;;  %v3962_v55 = vrot.slane %v11491_v6, 7  ;;  %v4026_v10 = vsel %vm1518_vm5, %v4016_v33, %v4017_v13  ;;  %v11500_v11 = vld [vmem:[#allocation3 + $0x54] sm:$0xff]  ;;  %4202 = vst [vmem:[#allocation3 + $0xac] sm:$0xf] %v7098_v3 }
 0x78b   : > { %9018 = vrcp.f32 %v3891_v14  ;;  %v11502_v54 = vld [vmem:[#allocation3 + $0x60] sm:$0xff]  ;;  %v3970_v21 = vsel %vm1461_vm10, %v3960_v34, %v3961_v46  ;;  %v7099_v62 = vpack.c.bf16 %v11491_v6, %v11491_v6  ;;  %v4048_v33 = vmul.f32 %v12022_v43, %v4026_v10  ;;  %4129 = vst [vmem:[#allocation3 + $0x9c] sm:$0xf] %v7081_v15  ;;  %7697 = vmatpush3.bf16.msra.mxu1 %v8833_v35  ;;  %v8812_v58 = vld [vmem:[#allocation19 + $0x70] sm:$0xff]   ;;  %v8817_v23 = vld [vmem:[#allocation19 + $0x78] sm:$0xff]  }
 0x78c   : > { %v4025_v24 = vsel %vm1518_vm5, %v4017_v13, %v4018_v26  ;;  %9020 = vrcp.f32 %v3892_v2  ;;  %v3993_v19 = vmul.f32 %v12024_v27, %v3970_v21  ;;  %v3969_v47 = vsel %vm1461_vm10, %v3961_v46, %v3962_v55  ;;  %7698 = vmatprep.subr.bf16.mxu1 %v8835_v8  ;;  %7619 = vmatpush3.bf16.msra.mxu0 %v8806_v22  ;;  %v8811_v4 = vld [vmem:[#allocation19 + $0x28] sm:$0xff]   ;;  %v8842_v41 = vld [vmem:[#allocation19 + $0x1f0] sm:$0xff]   ;;  %v8844_v57 = vld [vmem:[#allocation19 + $0x1f8] sm:$0xff]  }
 0x78d   : > { %v4049_v50 = vmul.f32 %v12023_v63, %v4025_v24  ;;  %4203 = vst [vmem:[#allocation3 + $0xb8] sm:$0xf] %v7099_v62  ;;  %v7113_v16 = vpack.c.bf16 %v4048_v33, %v4048_v33  ;;  %v6849_v48 = vcombine.high %v11500_v11, %v11502_v54  ;;  %v3994_v30 = vmul.f32 %v12025_v36, %v3969_v47  ;;  %v8840_v53 = vld [vmem:[#allocation19 + $0x1a8] sm:$0xff]   ;;  %v8814_v28 = vld [vmem:[#allocation19 + $0x30] sm:$0xff]   ;;  %v8818_v32 = vld [vmem:[#allocation19 + $0x38] sm:$0xff]  }
 0x78e   : > { %4770 = vmatmul.mubr.bf16.gmra.mrb[60].mxu1 %v6845_v39  ;;  %7620 = vmatprep.subr.bf16.mxu0 %v8810_v49  ;;  %v7082_v25 = vpack.c.bf16 %v3993_v19, %v3993_v19  ;;  %v11524_v59 = vld [vmem:[#allocation3 + $0x84] sm:$0xff]  ;;  %v11526_v51 = vld [vmem:[#allocation3 + $0x90] sm:$0xff]  ;;  %v6848_v18 = vcombine.low %v11500_v11, %v11502_v54  ;;  %v11534_v46 = vld [vmem:[#allocation19 + $0x80] sm:$0xff]  }
 0x78f   : > { %v7114_v0 = vpack.c.bf16 %v4049_v50, %v4049_v50  ;;  %4273 = vst [vmem:[#allocation3 + $0xa4] sm:$0xf] %v7113_v16  ;;  %4777 = vmatprep.mubr.bf16.mxu1 %v6849_v48  ;;  %v7083_v34 = vpack.c.bf16 %v3994_v30, %v3994_v30  ;;  %7699 = vmatpush3.bf16.msra.mxu1 %v8837_v61  ;;  %v8843_v45 = vld [vmem:[#allocation19 + $0x1b0] sm:$0xff]   ;;  %v11536_v2 = vld [vmem:[#allocation22] sm:$0xff]  }
 0x790   : > { %4130 = vst [vmem:[#allocation3 + $0xa8] sm:$0xf] %v7082_v25  ;;  %7700 = vmatprep.subr.bf16.mxu1 %v8838_v1  ;;  %7621 = vmatpush3.bf16.msra.mxu0 %v8811_v4  ;;  %v6852_v12 = vcombine.high %v11524_v59, %v11526_v51  ;;  %v6851_v15 = vcombine.low %v11524_v59, %v11526_v51  ;;  %v12026_v43 = vld [vmem:[#allocation53_spill] sm:$0xff]  ;;  %v12027_v63 = vld [vmem:[#allocation54_spill] sm:$0xff]  ;;  %v12028_v39 = vld [vmem:[#allocation55_spill] sm:$0xff] }
 0x791   : > { %4274 = vst [vmem:[#allocation3 + $0xb0] sm:$0xf] %v7114_v0  ;;  %4131 = vst [vmem:[#allocation3 + $0xb4] sm:$0xf] %v7083_v34  ;;  %7622 = vmatprep.subr.bf16.mxu0 %v8812_v58  ;;  %v12029_v19 = vld [vmem:[#allocation44_spill] sm:$0xff]  ;;  %v12030_v16 = vld [vmem:[#allocation45_spill] sm:$0xff] }
 0x792   : > { %v11544_v10 = vld [vmem:[#allocation3 + $0x9c] sm:$0xff]  ;;  %v12031_v0 = vld [vmem:[#allocation42_spill] sm:$0xff] }
 0x793   : > { %7701 = vmatpush3.bf16.msra.mxu1 %v8840_v53 }
 0x794   : > { %7702 = vmatprep.subr.bf16.mxu1 %v8842_v41  ;;  %7623 = vmatpush3.bf16.msra.mxu0 %v8814_v28  ;;  %v11580_v28 = vld [vmem:[#allocation2] sm:$0xff] }
 0x795   : > { %v9019_v56 = vpop.eup %9018  ;;  %7624 = vmatprep.subr.bf16.mxu0 %v8817_v23  ;;  %v6888_v23 = vcombine.high %v11580_v28, %v11424_v29 }
 0x796   : > { %v9021_v44 = vpop.eup %9020  ;;  %v3939_v38 = vmul.f32 %v9019_v56, %v11295_v20  ;;  %4778 = vmatmul.mubr.bf16.gmra.mrb[64].mxu1 %v6848_v18  ;;  %v8846_v20 = vld [vmem:[#allocation19 + $0x1b8] sm:$0xff]  }
 0x797   : > { %v3940_v35 = vmul.f32 %v9021_v44, %v11299_v60  ;;  %4785 = vmatprep.mubr.bf16.mxu1 %v6852_v12  ;;  %7703 = vmatpush3.bf16.msra.mxu1 %v8843_v45  ;;  %v11546_v49 = vld [vmem:[#allocation3 + $0xa8] sm:$0xff] }
 0x798   : > { %v8805_v13 = vld [vmem:[#allocation3 + $0xa4] ss:$12 sps:$4 sm:$0xff]   ;;  %v4019_v14 = vrot.slane %v3939_v38, 1  ;;  %v7100_v3 = vpack.c.bf16 %v3939_v38, %v3939_v38  ;;  %v3963_v22 = vrot.slane %v3939_v38, 7  ;;  %7704 = vmatprep.subr.bf16.mxu1 %v8844_v57  ;;  %7625 = vmatpush3.bf16.msra.mxu0 %v8818_v32  ;;  %v6855_v6 = vcombine.high %v11544_v10, %v11546_v49  ;;  %v11576_v25 = vld [vmem:[#allocation3 + $0xb4] sm:$0xff] }
 0x799   : > { %v4020_v8 = vrot.slane %v3940_v35, 1  ;;  %8047 = vmatmul.mubr.bf16.gmra.mrb[76].mxu0 %v8805_v13  ;;  %v3964_v21 = vrot.slane %v3940_v35, 7  ;;  %v7101_v62 = vpack.c.bf16 %v3940_v35, %v3940_v35  ;;  %8054 = vmatprep.subr.bf16.mxu0 %v11534_v46  ;;  %v6854_v17 = vcombine.low %v11544_v10, %v11546_v49  ;;  %v8825_v12 = vld [vmem:[#allocation19 + $0x88] sm:$0xff]   ;;  %v8832_v32 = vld [vmem:[#allocation19 + $0x90] sm:$0xff]  }
 0x79a   : > { %v4024_v60 = vsel %vm1518_vm5, %v4018_v26, %v4019_v14  ;;  %4204 = vst [vmem:[#allocation3 + $0xc4] sm:$0xf] %v7100_v3  ;;  %v3968_v61 = vsel %vm1461_vm10, %v3962_v55, %v3963_v22  ;;  %v6887_v38 = vcombine.low %v11580_v28, %v11424_v29  ;;  %v6891_v35 = vcombine.high %v11426_v31, %v11440_v37  ;;  %v8839_v29 = vld [vmem:[#allocation19 + $0x98] sm:$0xff]  }
 0x79b   : > { %v4023_v24 = vsel %vm1518_vm5, %v4019_v14, %v4020_v8  ;;  %v4050_v33 = vmul.f32 %v12026_v43, %v4024_v60  ;;  %v4022_v26 = vsel %vm1518_vm5, %v4020_v8, %v4021_v9  ;;  %v3995_v47 = vmul.f32 %v12029_v19, %v3968_v61  ;;  %4205 = vst [vmem:[#allocation3 + $0xd0] sm:$0xf] %v7101_v62  ;;  %v11605_v8 = vld [vmem:[#allocation22 + $0x8] sm:$0xff]   ;;  %v11625_v62 = vld [vmem:[#allocation22 + $0x20] sm:$0xff]  }
 0x79c   : > { %v4051_v50 = vmul.f32 %v12027_v63, %v4023_v24  ;;  %v4052_v27 = vmul.f32 %v12028_v39, %v4022_v26  ;;  %v3966_v1 = vsel %vm1461_vm10, %v3964_v21, %v3965_v52  ;;  %v3967_v55 = vsel %vm1461_vm10, %v3963_v22, %v3964_v21  ;;  %7705 = vmatpush3.bf16.msra.mxu1 %v8846_v20  ;;  %v11613_v20 = vld [vmem:[#allocation22 + $0x10] sm:$0xff]   ;;  %v8851_v24 = vld [vmem:[#allocation19 + $0x200] sm:$0xff]   ;;  %v8850_v39 = vld [vmem:[#allocation3 + $0x8] ss:$12 sps:$4 sm:$0xff]  }
 0x79d   : > { %v7115_v9 = vpack.c.bf16 %v4050_v33, %v4050_v33  ;;  %v3997_v48 = vmul.f32 %v12030_v16, %v3966_v1  ;;  %v7084_v30 = vpack.c.bf16 %v3995_v47, %v3995_v47  ;;  %v3996_v58 = vmul.f32 %v12031_v0, %v3967_v55  ;;  %8246 = vmatprep.subr.bf16.mxu1 %v11536_v2  ;;  %v8848_v60 = vld [vmem:[#allocation19 + $0xb0] sm:$0xff]   ;;  %v8855_v19 = vld [vmem:[#allocation19 + $0x208] sm:$0xff]   ;;  %v8860_v16 = vld [vmem:[#allocation19 + $0x218] sm:$0xff]  }
 0x79e   : > { %v7116_v4 = vpack.c.bf16 %v4051_v50, %v4051_v50  ;;  %v7117_v36 = vpack.c.bf16 %v4052_v27, %v4052_v27  ;;  %4786 = vmatmul.mubr.bf16.gmra.mrb[68].mxu1 %v6851_v15  ;;  %v6890_v14 = vcombine.low %v11426_v31, %v11440_v37  ;;  %v6894_v3 = vcombine.high %v11442_v40, %v11466_v42  ;;  %v8847_v31 = vld [vmem:[#allocation19 + $0xa8] sm:$0xff]   ;;  %v8849_v15 = vld [vmem:[#allocation19 + $0xb8] sm:$0xff]   ;;  %v8856_v1 = vld [vmem:[#allocation19 + $0x210] sm:$0xff]  }
 0x79f   : > { %4275 = vst [vmem:[#allocation3 + $0xbc] sm:$0xf] %v7115_v9  ;;  %v7086_v7 = vpack.c.bf16 %v3997_v48, %v3997_v48  ;;  %4793 = vmatprep.mubr.bf16.mxu1 %v6855_v6  ;;  %4132 = vst [vmem:[#allocation3 + $0xc0] sm:$0xf] %v7084_v30  ;;  %v7085_v52 = vpack.c.bf16 %v3996_v58, %v3996_v58  ;;  %v6893_v22 = vcombine.low %v11442_v40, %v11466_v42  ;;  %v11617_v40 = vld [vmem:[#allocation22 + $0x18] sm:$0xff]   ;;  %v11639_v26 = vld [vmem:[#allocation22 + $0x30] sm:$0xff]  }
 0x7a0   : > { %4276 = vst [vmem:[#allocation3 + $0xc8] sm:$0xf] %v7116_v4  ;;  %4277 = vst [vmem:[#allocation3 + $0xd4] sm:$0xf] %v7117_v36  ;;  %v6897_v37 = vcombine.high %v11480_v5, %v11500_v11  ;;  %v6896_v42 = vcombine.low %v11480_v5, %v11500_v11  ;;  %v6900_v21 = vcombine.high %v11580_v28, %v11524_v59  ;;  %v11631_v11 = vld [vmem:[#allocation22 + $0x28] sm:$0xff]   ;;  %v8881_v9 = vld [vmem:[%s9997_s14 + $0x20] sm:$0xff]  }
 0x7a1   : > { %4134 = vst [vmem:[#allocation3 + $0xd8] sm:$0xf] %v7086_v7  ;;  %4133 = vst [vmem:[#allocation3 + $0xcc] sm:$0xf] %v7085_v52  ;;  %v6945_v5 = vcombine.high %v11502_v54, %v11580_v28  ;;  %v6899_v43 = vcombine.low %v11580_v28, %v11524_v59  ;;  %v6903_v33 = vcombine.high %v11526_v51, %v11544_v10  ;;  %v11645_v59 = vld [vmem:[#allocation22 + $0x38] sm:$0xff]   ;;  %v8884_v30 = vld [vmem:[%s9997_s14 + $0x30] sm:$0xff]  }
 0x7a2   : > { %v6944_v61 = vcombine.low %v11502_v54, %v11580_v28  ;;  %v6902_v63 = vcombine.low %v11526_v51, %v11544_v10  ;;  %v6906_v50 = vcombine.high %v11546_v49, %v11576_v25  ;;  %v6905_v54 = vcombine.low %v11546_v49, %v11576_v25  ;;  %v8853_v49 = vld [vmem:[#allocation3 + $0x20] ss:$12 sps:$4 sm:$0xff]   ;;  %v8854_v47 = vld [vmem:[#allocation3 + $0x38] ss:$12 sps:$4 sm:$0xff]   ;;  %v8858_v55 = vld [vmem:[#allocation3 + $0x50] ss:$12 sps:$4 sm:$0xff]  }
 0x7a3   : > { %v8859_v48 = vld [vmem:[#allocation3 + $0x80] ss:$12 sps:$4 sm:$0xff]   ;;  %v8882_v4 = vld [vmem:[%s9997_s14 + $0x28] sm:$0xff]  }
 0x7a4   : > { %v8861_v36 = vld [vmem:[#allocation19 + $0x220] sm:$0xff]   ;;  %v8865_v58 = vld [vmem:[#allocation19 + $0x228] sm:$0xff]  }
 0x7a5   : > { %v8863_v0 = vld [vmem:[#allocation3 + $0x98] ss:$12 sps:$4 sm:$0xff]   ;;  %v8885_v52 = vld [vmem:[%s9997_s14 + $0x38] sm:$0xff]  }
 0x7a6   : > { %4794 = vmatmul.mubr.bf16.gmra.mrb[72].mxu1 %v6854_v17  ;;  %v11578_v41 = vld [vmem:[#allocation3 + $0xc0] sm:$0xff]  ;;  %v8864_v7 = vld [vmem:[#allocation3 + $0xb0] ss:$12 sps:$4 sm:$0xff]  }
 0x7a7   : > { %v8807_v34 = vld [vmem:[#allocation3 + $0xbc] ss:$12 sps:$4 sm:$0xff]   ;;  %v8813_v53 = vld [vmem:[#allocation3 + $0xd4] ss:$12 sps:$4 sm:$0xff]   ;;  %v6858_v45 = vcombine.high %v11576_v25, %v11578_v41  ;;  %v6857_v57 = vcombine.low %v11576_v25, %v11578_v41 }
 0x7a8   : > { %8050 = vmatprep.mubr.bf16.mxu0 %v8807_v34  ;;  %v11586_v56 = vld [vmem:[#allocation3 + $0xd8] sm:$0xff]  ;;  %v11588_v18 = vld [vmem:[#allocation3 + $0xcc] sm:$0xff]  ;;  %v8868_v25 = vld [vmem:[#allocation3 + $0xc8] ss:$12 sps:$4 sm:$0xff]  }
 0x7a9   : > { %8051 = vmatmul.mubr.bf16.gmra.mrb[80].mxu0 %v8813_v53  ;;  %4801 = vmatprep.mubr.bf16.mxu1 %v6858_v45  ;;  %v6861_v44 = vcombine.high %v11588_v18, %v11586_v56  ;;  %v6860_v13 = vcombine.low %v11588_v18, %v11586_v56  ;;  %v6909_v51 = vcombine.high %v11578_v41, %v11588_v18  ;;  %v8866_v17 = vld [vmem:[#allocation19 + $0x230] sm:$0xff]   ;;  %v8870_v34 = vld [vmem:[#allocation19 + $0x238] sm:$0xff]  }
 0x7aa   : > { %5219 = vmatprep.mubr.bf16.mxu0 %v6888_v23  ;;  %v6908_v10 = vcombine.low %v11578_v41, %v11588_v18  ;;  %v6957_v27 = vcombine.high %v11586_v56, %v11580_v28  ;;  %v6956_v6 = vcombine.low %v11586_v56, %v11580_v28  ;;  %v8869_v53 = vld [vmem:[#allocation3 + $0x20] ss:$12 sps:$4 sm:$0xff]   ;;  %v8872_v41 = vld [vmem:[#allocation3 + $0x38] ss:$12 sps:$4 sm:$0xff]   ;;  %v8873_v28 = vld [vmem:[#allocation3 + $0x50] ss:$12 sps:$4 sm:$0xff]  }
 0x7ab   : > { %v8875_v23 = vld [vmem:[#allocation3 + $0x68] ss:$12 sps:$4 sm:$0xff]   ;;  %v8876_v45 = vld [vmem:[#allocation3 + $0x98] ss:$12 sps:$4 sm:$0xff]  }
 0x7ac   : > { %v8879_v56 = vld [vmem:[#allocation3 + $0xc8] ss:$12 sps:$4 sm:$0xff]  }
 0x7ad   : > { %v8886_v18 = vld [vmem:[%s9997_s14] sm:$0xff]  }
 0x7ae   : > { %4802 = vmatmul.mubr.bf16.gmra.mrb[76].mxu1 %v6857_v57  ;;  %v8883_v57 = vld [vmem:[#allocation3 + $0xe0] ss:$12 sps:$4 sm:$0xff]  }
 0x7af   : > { %4809 = vmatprep.mubr.bf16.mxu1 %v6861_v44  ;;  %v8887_v44 = vld [vmem:[%s9997_s14 + $0x8] sm:$0xff]  }
 0x7b1   : > { %5220 = vmatmul.mubr.bf16.vlgmr.msra.gmra.mrb[84].mxu0 %v6887_v38  ;;  %v8888_v38 = vld [vmem:[%s9997_s14 + $0x10] sm:$0xff]  }
 0x7b2   : > { %8055 = vmatpush3.bf16.msra.mxu0 %v11534_v46  ;;  %5227 = vmatprep.mubr.bf16.mxu0 %v6891_v35  ;;  %v8845_v46 = vld [vmem:[#allocation19 + $0xa0] sm:$0xff]  }
 0x7b3   : > { %8056 = vmatprep.subr.bf16.mxu0 %v8825_v12 }
 0x7b6   : > { %8057 = vmatpush3.bf16.msra.mxu0 %v8825_v12  ;;  %4810 = vmatmul.mubr.bf16.gmra.mrb[80].mxu1 %v6860_v13  ;;  %v8889_v12 = vld [vmem:[%s9997_s14 + $0x18] sm:$0xff]   ;;  %s9504_s14 = smov [#allocation25]  }
 0x7b7   : > { %8058 = vmatprep.subr.bf16.mxu0 %v8832_v32  ;;  %5767 = vmatprep.mubr.bf16.mxu1 %v6891_v35  ;;  %s9394_s1 = sshll.u32 %s9504_s14, 4  ;;  %s9395_s1 = int_to_ptr.vmem [resolvable:$false] %s9394_s1 }
 0x7b8   : > { %s9396_s2 = scalar_lea.vmem %s9395_s1, 2048  ;;  %p9397_p11 = scmp.lt.s32.totalorder %s11796_s13, %s9395_s1 }
 0x7b9   : > { %5228 = vmatmul.mubr.bf16.gmra.mrb[88].mxu0 %v6890_v14  ;;  %p9398_p3 = scmp.lt.s32.totalorder %s9396_s2, %s9390_s0 }
 0x7ba   : > { %5235 = vmatprep.mubr.bf16.mxu0 %v6894_v3  ;;  %8059 = vmatpush3.bf16.msra.mxu0 %v8832_v32 }
 0x7bb   : > { %8060 = vmatprep.subr.bf16.mxu0 %v8839_v29  ;;  %p9399_p5 = por %p9398_p3, %p9397_p11 }
 0x7bd   : > { %p9400_p7 = pnand %p9399_p5, %p9393_p10 }
 0x7be   : > { %8061 = vmatpush3.bf16.msra.mxu0 %v8839_v29  ;;  %5768 = vmatmul.mubr.bf16.vlgmr.msra.gmra.mrb[84].mxu1 %v6890_v14 }
 0x7bf   : > { %8062 = vmatprep.subr.bf16.mxu0 %v8845_v46  ;;  %5775 = vmatprep.mubr.bf16.mxu1 %v6894_v3 }
 0x7c0   : > { %8254 = vmatpush3.bf16.msra.mxu1 %v11536_v2 }
 0x7c1   : > { %5236 = vmatmul.mubr.bf16.gmra.mrb[92].mxu0 %v6893_v22  ;;  %8247 = vmatprep.subr.bf16.mxu1 %v11605_v8 }
 0x7c2   : > { %5243 = vmatprep.mubr.bf16.mxu0 %v6897_v37  ;;  %8063 = vmatpush3.bf16.msra.mxu0 %v8845_v46 }
 0x7c3   : > { %8064 = vmatprep.subr.bf16.mxu0 %v8847_v31 }
 0x7c4   : > { %8255 = vmatpush3.bf16.msra.mxu1 %v11605_v8 }
 0x7c5   : > { %8248 = vmatprep.subr.bf16.mxu1 %v11613_v20 }
 0x7c6   : > { %8065 = vmatpush3.bf16.msra.mxu0 %v8847_v31  ;;  %5776 = vmatmul.mubr.bf16.gmra.mrb[88].mxu1 %v6893_v22 }
 0x7c7   : > { %5783 = vmatprep.mubr.bf16.mxu1 %v6897_v37  ;;  %8066 = vmatprep.subr.bf16.mxu0 %v8848_v60 }
 0x7c8   : > { %8256 = vmatpush3.bf16.msra.mxu1 %v11613_v20 }
 0x7c9   : > { %5244 = vmatmul.mubr.bf16.gmra.mrb[96].mxu0 %v6896_v42  ;;  %8249 = vmatprep.subr.bf16.mxu1 %v11617_v40 }
 0x7ca   : > { %5251 = vmatprep.mubr.bf16.mxu0 %v6900_v21  ;;  %8067 = vmatpush3.bf16.msra.mxu0 %v8848_v60 }
 0x7cb   : > { %8068 = vmatprep.subr.bf16.mxu0 %v8849_v15 }
 0x7cc   : > { %8257 = vmatpush3.bf16.msra.mxu1 %v11617_v40 }
 0x7cd   : > { %8250 = vmatprep.subr.bf16.mxu1 %v11625_v62 }
 0x7ce   : > { %5784 = vmatmul.mubr.bf16.gmra.mrb[92].mxu1 %v6896_v42  ;;  %8069 = vmatpush3.bf16.msra.mxu0 %v8849_v15 }
 0x7cf   : > { %5791 = vmatprep.mubr.bf16.mxu1 %v6945_v5  ;;  %8086 = vmatprep.subr.bf16.mxu0 %v8851_v24 }
 0x7d0   : > { %8258 = vmatpush3.bf16.msra.mxu1 %v11625_v62 }
 0x7d1   : > { %5252 = vmatmul.mubr.bf16.gmra.mrb[100].mxu0 %v6899_v43  ;;  %8251 = vmatprep.subr.bf16.mxu1 %v11631_v11 }
 0x7d2   : > { %5259 = vmatprep.mubr.bf16.mxu0 %v6903_v33 }
 0x7d4   : > { %8259 = vmatpush3.bf16.msra.mxu1 %v11631_v11 }
 0x7d5   : > { %8252 = vmatprep.subr.bf16.mxu1 %v11639_v26 }
 0x7d6   : > { %5792 = vmatmul.mubr.bf16.gmra.mrb[96].mxu1 %v6944_v61 }
 0x7d7   : > { %5799 = vmatprep.mubr.bf16.mxu1 %v6903_v33 }
 0x7d8   : > { %8260 = vmatpush3.bf16.msra.mxu1 %v11639_v26 }
 0x7d9   : > { %5260 = vmatmul.mubr.bf16.gmra.mrb[104].mxu0 %v6902_v63  ;;  %8253 = vmatprep.subr.bf16.mxu1 %v11645_v59 }
 0x7da   : > { %5267 = vmatprep.mubr.bf16.mxu0 %v6906_v50 }
 0x7dc   : > { %8261 = vmatpush3.bf16.msra.mxu1 %v11645_v59 }
 0x7de   : > { %5800 = vmatmul.mubr.bf16.gmra.mrb[100].mxu1 %v6902_v63 }
 0x7df   : > { %5807 = vmatprep.mubr.bf16.mxu1 %v6906_v50 }
 0x7e1   : > { %5268 = vmatmul.mubr.bf16.gmra.mrb[108].mxu0 %v6905_v54 }
 0x7e2   : > { %5275 = vmatprep.mubr.bf16.mxu0 %v6909_v51 }
 0x7e6   : > { %5808 = vmatmul.mubr.bf16.gmra.mrb[104].mxu1 %v6905_v54 }
 0x7e7   : > { %5815 = vmatprep.mubr.bf16.mxu1 %v6909_v51 }
 0x7e9   : > { %5276 = vmatmul.mubr.bf16.gmra.mrb[112].mxu0 %v6908_v10 }
 0x7ea   : > { %8070 = vmatprep.mubr.bf16.mxu0 %v8850_v39 }
 0x7ee   : > { %5816 = vmatmul.mubr.bf16.gmra.mrb[108].mxu1 %v6908_v10 }
 0x7ef   : > { %5823 = vmatprep.mubr.bf16.mxu1 %v6957_v27 }
 0x7f1   : > { %8071 = vmatmul.mubr.bf16.vlgmr.msra.gmra.mrb[68].mxu0 %v8853_v49 }
 0x7f2   : > { %8087 = vmatpush3.bf16.msra.mxu0 %v8851_v24  ;;  %8074 = vmatprep.mubr.bf16.mxu0 %v8854_v47 }
 0x7f3   : > { %8088 = vmatprep.subr.bf16.mxu0 %v8855_v19 }
 0x7f6   : > { %8089 = vmatpush3.bf16.msra.mxu0 %v8855_v19  ;;  %5824 = vmatmul.mubr.bf16.gmra.mrb[112].mxu1 %v6956_v6 }
 0x7f7   : > { %8090 = vmatprep.subr.bf16.mxu0 %v8856_v1  ;;  %8142 = vmatprep.mubr.bf16.mxu1 %v8881_v9 }
 0x7f9   : > { %8075 = vmatmul.mubr.bf16.gmra.mrb[72].mxu0 %v8858_v55 }
 0x7fa   : > { %8091 = vmatpush3.bf16.msra.mxu0 %v8856_v1  ;;  %8078 = vmatprep.mubr.bf16.mxu0 %v8859_v48 }
 0x7fb   : > { %8092 = vmatprep.subr.bf16.mxu0 %v8860_v16 }
 0x7fe   : > { %8093 = vmatpush3.bf16.msra.mxu0 %v8860_v16  ;;  %8143 = vmatmul.mubr.bf16.vlgmr.msra.gmra.mrb[116].mxu1 %v8882_v4 }
 0x7ff   : > { %8094 = vmatprep.subr.bf16.mxu0 %v8861_v36  ;;  %8146 = vmatprep.mubr.bf16.mxu1 %v8884_v30 }
 0x801   : > { %8079 = vmatmul.mubr.bf16.gmra.mrb[76].mxu0 %v8863_v0 }
 0x802   : > { %8095 = vmatpush3.bf16.msra.mxu0 %v8861_v36  ;;  %8082 = vmatprep.mubr.bf16.mxu0 %v8864_v7 }
 0x803   : > { %8096 = vmatprep.subr.bf16.mxu0 %v8865_v58 }
 0x806   : > { %8097 = vmatpush3.bf16.msra.mxu0 %v8865_v58  ;;  %8147 = vmatmul.mubr.bf16.gmra.mrb[120].mxu1 %v8885_v52 }
 0x807   : > { %8098 = vmatprep.subr.bf16.mxu0 %v8866_v17 }
 0x809   : > { %8083 = vmatmul.mubr.bf16.gmra.mrb[80].mxu0 %v8868_v25 }
 0x80a   : > { %8099 = vmatpush3.bf16.msra.mxu0 %v8866_v17  ;;  %8102 = vmatprep.mubr.bf16.mxu0 %v8869_v53 }
 0x80b   : > { %8100 = vmatprep.subr.bf16.mxu0 %v8870_v34 }
 0x80e   : > { %8101 = vmatpush3.bf16.msra.mxu0 %v8870_v34 }
 0x80f   : > { %8118 = vmatprep.subr.bf16.mxu0 %v11536_v2 }
 0x811   : > { %8103 = vmatmul.mubr.bf16.vlgmr.msra.gmra.mrb[68].mxu0 %v8872_v41 }
 0x812   : > { %8119 = vmatpush3.bf16.msra.mxu0 %v11536_v2  ;;  %8106 = vmatprep.mubr.bf16.mxu0 %v8873_v28  ;;  %v8878_v2 = vld [vmem:[#allocation3 + $0xb0] ss:$12 sps:$4 sm:$0xff]  }
 0x813   : > { %8120 = vmatprep.subr.bf16.mxu0 %v11605_v8 }
 0x816   : > { %8121 = vmatpush3.bf16.msra.mxu0 %v11605_v8 }
 0x817   : > { %8122 = vmatprep.subr.bf16.mxu0 %v11613_v20 }
 0x819   : > { %8107 = vmatmul.mubr.bf16.gmra.mrb[72].mxu0 %v8875_v23 }
 0x81a   : > { %8123 = vmatpush3.bf16.msra.mxu0 %v11613_v20  ;;  %8110 = vmatprep.mubr.bf16.mxu0 %v8876_v45 }
 0x81b   : > { %8124 = vmatprep.subr.bf16.mxu0 %v11617_v40 }
 0x81e   : > { %8125 = vmatpush3.bf16.msra.mxu0 %v11617_v40 }
 0x81f   : > { %8126 = vmatprep.subr.bf16.mxu0 %v11625_v62 }
 0x821   : > { %8111 = vmatmul.mubr.bf16.gmra.mrb[76].mxu0 %v8878_v2 }
 0x822   : > { %8127 = vmatpush3.bf16.msra.mxu0 %v11625_v62  ;;  %8114 = vmatprep.mubr.bf16.mxu0 %v8879_v56 }
 0x823   : > { %8128 = vmatprep.subr.bf16.mxu0 %v11631_v11 }
 0x826   : > { %8129 = vmatpush3.bf16.msra.mxu0 %v11631_v11 }
 0x827   : > { %8130 = vmatprep.subr.bf16.mxu0 %v11639_v26 }
 0x829   : > { %8115 = vmatmul.mubr.bf16.gmra.mrb[80].mxu0 %v8883_v57 }
 0x82a   : > { %8131 = vmatpush3.bf16.msra.mxu0 %v11639_v26  ;;  %8134 = vmatprep.mubr.bf16.mxu0 %v8886_v18 }
 0x82b   : > { %8132 = vmatprep.subr.bf16.mxu0 %v11645_v59 }
 0x82e   : > { %8133 = vmatpush3.bf16.msra.mxu0 %v11645_v59 }
 0x831   : > { %8135 = vmatmul.mubr.bf16.vlgmr.msra.gmra.mrb[68].mxu0 %v8887_v44 }
 0x832   : > { %8138 = vmatprep.mubr.bf16.mxu0 %v8888_v38 }
 0x839   : > { %8139 = vmatmul.mubr.bf16.gmra.mrb[72].mxu0 %v8889_v12 }
 0x851   : > { %v7546_v35 = vpop.f32.mrb[52].mxu1 }
 0x852   : > { %v7547_v32 = vpop.f32.mrb[53].mxu1 }
 0x853   : > { %v7548_v13 = vadd.f32 %v7547_v32, %v7546_v35  ;;  %v7549_v14 = vpop.f32.mrb[54].mxu1 }
 0x854   : > { %v7550_v29 = vpop.f32.mrb[55].mxu1 }
 0x855   : > { %v7551_v3 = vadd.f32 %v7550_v29, %v7549_v14 }
 0x859   : > { %v7552_v46 = vpop.f32.mrb[56].mxu1 }
 0x85a   : > { %v7553_v8 = vpop.f32.mrb[57].mxu1 }
 0x85b   : > { %v7554_v22 = vadd.f32 %v7553_v8, %v7552_v46  ;;  %v7555_v31 = vpop.f32.mrb[58].mxu1 }
 0x85c   : > { %v7556_v37 = vpop.f32.mrb[59].mxu1 }
 0x85d   : > { %v7557_v20 = vadd.f32 %v7556_v37, %v7555_v31 }
 0x861   : > { %v7558_v60 = vpop.f32.mrb[60].mxu1 }
 0x862   : > { %v7559_v40 = vpop.f32.mrb[61].mxu1 }
 0x863   : > { %v11688_v42 = vadd.f32 %v7559_v40, %v7558_v60  ;;  %v7561_v15 = vpop.f32.mrb[62].mxu1 }
 0x864   : > { %v7562_v21 = vpop.f32.mrb[63].mxu1 }
 0x865   : > { %v11690_v62 = vadd.f32 %v7562_v21, %v7561_v15 }
 0x869   : > { %v7564_v24 = vpop.f32.mrb[64].mxu1 }
 0x86a   : > { %v7565_v5 = vpop.f32.mrb[65].mxu1 }
 0x86b   : > { %v11692_v11 = vadd.f32 %v7565_v5, %v7564_v24  ;;  %v7567_v43 = vpop.f32.mrb[66].mxu1 }
 0x86c   : > { %v7568_v33 = vpop.f32.mrb[67].mxu1 }
 0x86d   : > { %v11694_v26 = vadd.f32 %v7568_v33, %v7567_v43 }
 0x871   : > { %v7570_v61 = vpop.f32.mrb[68].mxu1 }
 0x872   : > { %v7571_v59 = vpop.f32.mrb[69].mxu1 }
 0x873   : > { %v11696_v63 = vadd.f32 %v7571_v59, %v7570_v61  ;;  %v7573_v50 = vpop.f32.mrb[70].mxu1 }
 0x874   : > { %v7574_v54 = vpop.f32.mrb[71].mxu1 }
 0x875   : > { %v11698_v51 = vadd.f32 %v7574_v54, %v7573_v50 }
 0x879   : > { %v7576_v10 = vpop.f32.mrb[72].mxu1 }
 0x87a   : > { %v7577_v39 = vpop.f32.mrb[73].mxu1 }
 0x87b   : > { %v11700_v27 = vadd.f32 %v7577_v39, %v7576_v10  ;;  %v7579_v49 = vpop.f32.mrb[74].mxu1 }
 0x87c   : > { %v7580_v19 = vpop.f32.mrb[75].mxu1 }
 0x87d   : > { %v11702_v47 = vadd.f32 %v7580_v19, %v7579_v49 }
 0x881   : > { %v7582_v1 = vpop.f32.mrb[76].mxu1 }
 0x882   : > { %v7583_v9 = vpop.f32.mrb[77].mxu1 }
 0x883   : > { %v11704_v6 = vadd.f32 %v7583_v9, %v7582_v1  ;;  %v7585_v55 = vpop.f32.mrb[78].mxu1 }
 0x884   : > { %v7626_v16 = vpop.f32.mrb[84].mxu0  ;;  %v7586_v48 = vpop.f32.mrb[79].mxu1 }
 0x885   : > { %v7627_v4 = vpop.f32.mrb[85].mxu0  ;;  %v11706_v36 = vadd.f32 %v7586_v48, %v7585_v55 }
 0x886   : > { %v7628_v30 = vadd.f32 %v7627_v4, %v7626_v16  ;;  %v7629_v0 = vpop.f32.mrb[86].mxu0 }
 0x887   : > { %v7630_v58 = vpop.f32.mrb[87].mxu0 }
 0x888   : > { %v8315_v7 = vadd.f32 %v7628_v30, %v7548_v13  ;;  %v7631_v52 = vadd.f32 %v7630_v58, %v7629_v0 }
 0x889   : > { %v7588_v17 = vpop.f32.mrb[80].mxu1 }
 0x88a   : > { %v8325_v25 = vadd.f32 %v7631_v52, %v7551_v3  ;;  %v7589_v34 = vpop.f32.mrb[81].mxu1 }
 0x88b   : > { %v11708_v53 = vadd.f32 %v7589_v34, %v7588_v17  ;;  %v7591_v41 = vpop.f32.mrb[82].mxu1 }
 0x88c   : > { %v7632_v28 = vpop.f32.mrb[88].mxu0  ;;  %v7592_v23 = vpop.f32.mrb[83].mxu1 }
 0x88d   : > { %v7633_v45 = vpop.f32.mrb[89].mxu0  ;;  %v11710_v2 = vadd.f32 %v7592_v23, %v7591_v41 }
 0x88e   : > { %v7634_v56 = vadd.f32 %v7633_v45, %v7632_v28  ;;  %v7635_v18 = vpop.f32.mrb[90].mxu0 }
 0x88f   : > { %v7636_v57 = vpop.f32.mrb[91].mxu0 }
 0x890   : > { %v8310_v44 = vadd.f32 %v7634_v56, %v7554_v22  ;;  %v7637_v38 = vadd.f32 %v7636_v57, %v7635_v18 }
 0x891   : > { %v7706_v12 = vpop.f32.mrb[84].mxu1 }
 0x892   : > { %v8320_v35 = vadd.f32 %v7637_v38, %v7557_v20  ;;  %v7707_v32 = vpop.f32.mrb[85].mxu1 }
 0x893   : > { %v7708_v13 = vadd.f32 %v7707_v32, %v7706_v12  ;;  %v7709_v14 = vpop.f32.mrb[86].mxu1 }
 0x894   : > { %v7638_v29 = vpop.f32.mrb[92].mxu0  ;;  %v7710_v3 = vpop.f32.mrb[87].mxu1 }
 0x895   : > { %v7639_v46 = vpop.f32.mrb[93].mxu0  ;;  %v11712_v8 = vadd.f32 %v8315_v7, %v7708_v13  ;;  %v7711_v31 = vadd.f32 %v7710_v3, %v7709_v14 }
 0x896   : > { %v7640_v37 = vadd.f32 %v7639_v46, %v7638_v29  ;;  %v7641_v60 = vpop.f32.mrb[94].mxu0 }
 0x897   : > { %v7642_v40 = vpop.f32.mrb[95].mxu0  ;;  %v11714_v15 = vadd.f32 %v8325_v25, %v7711_v31 }
 0x898   : > { %v8335_v21 = vadd.f32 %v7640_v37, %v11688_v42  ;;  %v7643_v22 = vadd.f32 %v7642_v40, %v7641_v60 }
 0x899   : > { %v7712_v24 = vpop.f32.mrb[88].mxu1 }
 0x89a   : > { %v8345_v20 = vadd.f32 %v7643_v22, %v11690_v62  ;;  %v7713_v5 = vpop.f32.mrb[89].mxu1 }
 0x89b   : > { %v7714_v43 = vadd.f32 %v7713_v5, %v7712_v24  ;;  %v7715_v33 = vpop.f32.mrb[90].mxu1 }
 0x89c   : > { %v7644_v61 = vpop.f32.mrb[96].mxu0  ;;  %v7716_v59 = vpop.f32.mrb[91].mxu1 }
 0x89d   : > { %v7645_v50 = vpop.f32.mrb[97].mxu0  ;;  %v11718_v54 = vadd.f32 %v8310_v44, %v7714_v43  ;;  %v7717_v10 = vadd.f32 %v7716_v59, %v7715_v33 }
 0x89e   : > { %v7646_v39 = vadd.f32 %v7645_v50, %v7644_v61  ;;  %v7647_v49 = vpop.f32.mrb[98].mxu0 }
 0x89f   : > { %v7648_v19 = vpop.f32.mrb[99].mxu0  ;;  %v11720_v1 = vadd.f32 %v8320_v35, %v7717_v10 }
 0x8a0   : > { %v8330_v42 = vadd.f32 %v7646_v39, %v11692_v11  ;;  %v7649_v9 = vadd.f32 %v7648_v19, %v7647_v49 }
 0x8a1   : > { %v7718_v55 = vpop.f32.mrb[92].mxu1 }
 0x8a2   : > { %v8340_v62 = vadd.f32 %v7649_v9, %v11694_v26  ;;  %v7719_v16 = vpop.f32.mrb[93].mxu1 }
 0x8a3   : > { %v7720_v48 = vadd.f32 %v7719_v16, %v7718_v55  ;;  %v7721_v4 = vpop.f32.mrb[94].mxu1 }
 0x8a4   : > { %v7650_v30 = vpop.f32.mrb[100].mxu0  ;;  %v7722_v0 = vpop.f32.mrb[95].mxu1 }
 0x8a5   : > { %v7651_v58 = vpop.f32.mrb[101].mxu0  ;;  %v11724_v7 = vadd.f32 %v8335_v21, %v7720_v48  ;;  %v7723_v52 = vadd.f32 %v7722_v0, %v7721_v4 }
 0x8a6   : > { %v7652_v17 = vadd.f32 %v7651_v58, %v7650_v30  ;;  %v7653_v25 = vpop.f32.mrb[102].mxu0 }
 0x8a7   : > { %v7654_v34 = vpop.f32.mrb[103].mxu0  ;;  %v11726_v41 = vadd.f32 %v8345_v20, %v7723_v52 }
 0x8a8   : > { %v8356_v11 = vadd.f32 %v7652_v17, %v11696_v63  ;;  %v7655_v28 = vadd.f32 %v7654_v34, %v7653_v25 }
 0x8a9   : > { %v7724_v23 = vpop.f32.mrb[96].mxu1 }
 0x8aa   : > { %v8368_v26 = vadd.f32 %v7655_v28, %v11698_v51  ;;  %v7725_v45 = vpop.f32.mrb[97].mxu1 }
 0x8ab   : > { %v7726_v56 = vadd.f32 %v7725_v45, %v7724_v23  ;;  %v7727_v18 = vpop.f32.mrb[98].mxu1 }
 0x8ac   : > { %v7656_v57 = vpop.f32.mrb[104].mxu0  ;;  %v7728_v44 = vpop.f32.mrb[99].mxu1 }
 0x8ad   : > { %v7657_v38 = vpop.f32.mrb[105].mxu0  ;;  %v11730_v12 = vadd.f32 %v8330_v42, %v7726_v56  ;;  %v7729_v35 = vadd.f32 %v7728_v44, %v7727_v18 }
 0x8ae   : > { %v7658_v32 = vadd.f32 %v7657_v38, %v7656_v57  ;;  %v7659_v13 = vpop.f32.mrb[106].mxu0 }
 0x8af   : > { %v7660_v14 = vpop.f32.mrb[107].mxu0  ;;  %v11732_v29 = vadd.f32 %v8340_v62, %v7729_v35 }
 0x8b0   : > { %v8350_v63 = vadd.f32 %v7658_v32, %v11700_v27  ;;  %v7661_v3 = vadd.f32 %v7660_v14, %v7659_v13 }
 0x8b1   : > { %v7730_v46 = vpop.f32.mrb[100].mxu1 }
 0x8b2   : > { %v8362_v51 = vadd.f32 %v7661_v3, %v11702_v47  ;;  %v7731_v31 = vpop.f32.mrb[101].mxu1 }
 0x8b3   : > { %v7732_v37 = vadd.f32 %v7731_v31, %v7730_v46  ;;  %v7733_v60 = vpop.f32.mrb[102].mxu1 }
 0x8b4   : > { %v7662_v40 = vpop.f32.mrb[108].mxu0  ;;  %v7734_v21 = vpop.f32.mrb[103].mxu1 }
 0x8b5   : > { %v7663_v22 = vpop.f32.mrb[109].mxu0  ;;  %v7735_v24 = vadd.f32 %v7734_v21, %v7733_v60  ;;  %v8357_v20 = vadd.f32 %v8356_v11, %v7732_v37  ;;  %v11740_v60 = vld [vmem:[#allocation21] ss:$0 sm:$0xff] }
 0x8b6   : > { %v7664_v5 = vadd.f32 %v7663_v22, %v7662_v40  ;;  %v7665_v43 = vpop.f32.mrb[110].mxu0 }
 0x8b7   : > { %v7666_v33 = vpop.f32.mrb[111].mxu0  ;;  %v8369_v61 = vadd.f32 %v8368_v26, %v7735_v24 }
 0x8b8   : > { %v8380_v59 = vadd.f32 %v7664_v5, %v11704_v6  ;;  %v7667_v50 = vadd.f32 %v7666_v33, %v7665_v43 }
 0x8b9   : > { %v7736_v27 = vpop.f32.mrb[104].mxu1 }
 0x8ba   : > { %v8392_v10 = vadd.f32 %v7667_v50, %v11706_v36  ;;  %v7737_v39 = vpop.f32.mrb[105].mxu1 }
 0x8bb   : > { %v7738_v47 = vadd.f32 %v7737_v39, %v7736_v27  ;;  %v7739_v49 = vpop.f32.mrb[106].mxu1 }
 0x8bc   : > { %v7668_v19 = vpop.f32.mrb[112].mxu0  ;;  %v7740_v42 = vpop.f32.mrb[107].mxu1 }
 0x8bd   : > { %v7669_v9 = vpop.f32.mrb[113].mxu0  ;;  %v7741_v55 = vadd.f32 %v7740_v42, %v7739_v49  ;;  %v8351_v62 = vadd.f32 %v8350_v63, %v7738_v47 }
 0x8be   : > { %v7670_v16 = vadd.f32 %v7669_v9, %v7668_v19  ;;  %v7671_v48 = vpop.f32.mrb[114].mxu0 }
 0x8bf   : > { %v7672_v4 = vpop.f32.mrb[115].mxu0  ;;  %v8363_v30 = vadd.f32 %v8362_v51, %v7741_v55 }
 0x8c0   : > { %v8374_v0 = vadd.f32 %v7670_v16, %v11708_v53  ;;  %v7673_v58 = vadd.f32 %v7672_v4, %v7671_v48 }
 0x8c1   : > { %v7742_v6 = vpop.f32.mrb[108].mxu1 }
 0x8c2   : > { %v8386_v52 = vadd.f32 %v7673_v58, %v11710_v2  ;;  %v7743_v17 = vpop.f32.mrb[109].mxu1 }
 0x8c3   : > { %v7744_v36 = vadd.f32 %v7743_v17, %v7742_v6  ;;  %v7745_v25 = vpop.f32.mrb[110].mxu1 }
 0x8c4   : > { %v7746_v34 = vpop.f32.mrb[111].mxu1 }
 0x8c5   : > { %v7747_v11 = vadd.f32 %v7746_v34, %v7745_v25  ;;  %v8381_v28 = vadd.f32 %v8380_v59, %v7744_v36  ;;  %v11744_v59 = vld [vmem:[#allocation24] ss:$0 sm:$0xff]  ;;  %v8322_v34 = vadd.f32 %v11720_v1, %v11740_v60 }
 0x8c7   : > { %v8393_v23 = vadd.f32 %v8392_v10, %v7747_v11 }
 0x8c9   : > { %v7748_v26 = vpop.f32.mrb[112].mxu1 }
 0x8ca   : > { %v7749_v45 = vpop.f32.mrb[113].mxu1 }
 0x8cb   : > { %v7750_v56 = vadd.f32 %v7749_v45, %v7748_v26  ;;  %v7751_v18 = vpop.f32.mrb[114].mxu1  ;;  %v8312_v45 = vadd.f32 %v11718_v54, %v11740_v60 }
 0x8cc   : > { %v7752_v57 = vpop.f32.mrb[115].mxu1 }
 0x8cd   : > { %v7753_v44 = vadd.f32 %v7752_v57, %v7751_v18  ;;  %v8375_v38 = vadd.f32 %v8374_v0, %v7750_v56 }
 0x8cf   : > { %v8387_v35 = vadd.f32 %v8386_v52, %v7753_v44  ;;  %v8317_v44 = vadd.f32 %v11712_v8, %v11740_v60 }
 0x8d1   : > { %v8144_v53 = vpop.f32.mrb[116].mxu1 }
 0x8d2   : > { %v6169_v32 = vpop.f32.mrb[117].mxu1 }
 0x8d3   : > { %v8145_v13 = vpop.f32.mrb[118].mxu1 }
 0x8d4   : > { %v6172_v14 = vpop.f32.mrb[119].mxu1 }
 0x8d9   : > { %v8148_v2 = vpop.f32.mrb[120].mxu1 }
 0x8da   : > { %v6185_v63 = vpop.f32.mrb[121].mxu1 }
 0x8db   : > { %v8149_v3 = vpop.f32.mrb[122].mxu1 }
 0x8dc   : > { %v6188_v46 = vpop.f32.mrb[123].mxu1 }
 0x8f4   : > { %v8112_v51 = vpop.f32.mrb[76].mxu0 }
 0x8f5   : > { %v8352_v31 = vadd.f32 %v8351_v62, %v8112_v51  ;;  %v5898_v37 = vpop.f32.mrb[77].mxu0 }
 0x8f6   : > { %v8358_v40 = vadd.f32 %v8357_v20, %v5898_v37  ;;  %v8113_v21 = vpop.f32.mrb[78].mxu0 }
 0x8f7   : > { %v8353_v22 = vadd.f32 %v8352_v31, %v11740_v60  ;;  %v8364_v24 = vadd.f32 %v8363_v30, %v8113_v21  ;;  %v5901_v5 = vpop.f32.mrb[79].mxu0 }
 0x8f8   : > { %v8359_v43 = vadd.f32 %v8358_v40, %v11740_v60  ;;  %v8370_v33 = vadd.f32 %v8369_v61, %v5901_v5  ;;  %v8347_v5 = vadd.f32 %v11726_v41, %v11740_v60 }
 0x8f9   : > { %v8365_v50 = vadd.f32 %v8364_v24, %v11740_v60  ;;  %v8354_v27 = vadd.f32 %v8353_v22, %v11744_v59  ;;  %v8342_v22 = vadd.f32 %v11732_v29, %v11740_v60 }
 0x8fa   : > { %v8371_v10 = vadd.f32 %v8370_v33, %v11740_v60  ;;  %v8360_v39 = vadd.f32 %v8359_v43, %v11744_v59  ;;  %v8348_v41 = vadd.f32 %v8347_v5, %v11744_v59 }
 0x8fb   : > { %v8355_v47 = vadd.f32 %v8354_v27, %v8144_v53  ;;  %v8366_v20 = vadd.f32 %v8365_v50, %v11744_v59  ;;  %v8343_v29 = vadd.f32 %v8342_v22, %v11744_v59 }
 0x8fc   : > { %v8361_v49 = vadd.f32 %v8360_v39, %v6169_v32  ;;  %v8116_v19 = vpop.f32.mrb[80].mxu0  ;;  %v8372_v42 = vadd.f32 %v8371_v10, %v11744_v59  ;;  %v8323_v32 = vadd.f32 %v8322_v34, %v11744_v59 }
 0x8fd   : > { %v8376_v9 = vadd.f32 %v8375_v38, %v8116_v19  ;;  %v8367_v61 = vadd.f32 %v8366_v20, %v8145_v13  ;;  %v5914_v55 = vpop.f32.mrb[81].mxu0 }
 0x8fe   : > { %v8382_v62 = vadd.f32 %v8381_v28, %v5914_v55  ;;  %v8373_v16 = vadd.f32 %v8372_v42, %v6172_v14  ;;  %v8117_v48 = vpop.f32.mrb[82].mxu0 }
 0x8ff   : > { %v8377_v4 = vadd.f32 %v8376_v9, %v11740_v60  ;;  %v7196_v30 = vpack.c.bf16 %v8367_v61, %v8355_v47  ;;  %v8388_v0 = vadd.f32 %v8387_v35, %v8117_v48  ;;  %v5917_v58 = vpop.f32.mrb[83].mxu0 }
 0x900   : > { %v8383_v6 = vadd.f32 %v8382_v62, %v11740_v60  ;;  %v7191_v52 = vpack.c.bf16 %v8373_v16, %v8361_v49  ;;  %v8394_v17 = vadd.f32 %v8393_v23, %v5917_v58  ;;  %v8327_v23 = vadd.f32 %v11714_v15, %v11740_v60 }
 0x901   : > { %7219 = vst [vmem:[%s11756_s30 + $0x28] sm:$0xff] %v7196_v30   ;;  %v8389_v36 = vadd.f32 %v8388_v0, %v11740_v60  ;;  %v8378_v25 = vadd.f32 %v8377_v4, %v11744_v59 }
 0x902   : > { %7218 = vst [vmem:[%s11756_s30 + $0x20] sm:$0xff] %v7191_v52   ;;  %v8395_v11 = vadd.f32 %v8394_v17, %v11740_v60  ;;  %v8384_v28 = vadd.f32 %v8383_v6, %v11744_v59  ;;  %v8328_v54 = vadd.f32 %v8327_v23, %v11744_v59 }
 0x903   : > { %v8379_v26 = vadd.f32 %v8378_v25, %v8148_v2  ;;  %v8390_v56 = vadd.f32 %v8389_v36, %v11744_v59 }
 0x904   : > { %v8385_v18 = vadd.f32 %v8384_v28, %v6185_v63  ;;  %v8136_v57 = vpop.f32.mrb[68].mxu0  ;;  %v8396_v1 = vadd.f32 %v8395_v11, %v11744_v59 }
 0x905   : > { %v8313_v38 = vadd.f32 %v8312_v45, %v8136_v57  ;;  %v8391_v35 = vadd.f32 %v8390_v56, %v8149_v3  ;;  %v6137_v53 = vpop.f32.mrb[69].mxu0  ;;  %v8332_v3 = vadd.f32 %v11730_v12, %v11740_v60 }
 0x906   : > { %v8318_v15 = vadd.f32 %v8317_v44, %v6137_v53  ;;  %v8397_v13 = vadd.f32 %v8396_v1, %v6188_v46  ;;  %v8137_v14 = vpop.f32.mrb[70].mxu0  ;;  %v8337_v46 = vadd.f32 %v11724_v7, %v11740_v60 }
 0x907   : > { %v8314_v2 = vadd.f32 %v8313_v38, %v11744_v59  ;;  %v7206_v63 = vpack.c.bf16 %v8391_v35, %v8379_v26  ;;  %v8324_v8 = vadd.f32 %v8323_v32, %v8137_v14  ;;  %v6140_v51 = vpop.f32.mrb[71].mxu0  ;;  %v8333_v12 = vadd.f32 %v8332_v3, %v11744_v59 }
 0x908   : > { %v8319_v31 = vadd.f32 %v8318_v15, %v11744_v59  ;;  %v7201_v37 = vpack.c.bf16 %v8397_v13, %v8385_v18  ;;  %v8329_v40 = vadd.f32 %v8328_v54, %v6140_v51  ;;  %v8338_v33 = vadd.f32 %v8337_v46, %v11744_v59 }
 0x909   : > { %7221 = vst [vmem:[%s11756_s30 + $0x38] sm:$0xff] %v7206_v63   ;;  %v7176_v21 = vpack.c.bf16 %v8324_v8, %v8314_v2 }
 0x90a   : > { %7220 = vst [vmem:[%s11756_s30 + $0x30] sm:$0xff] %v7201_v37   ;;  %v7171_v24 = vpack.c.bf16 %v8329_v40, %v8319_v31 }
 0x90b   : > { %7215 = vst [vmem:[%s11756_s30 + $0x8] sm:$0xff] %v7176_v21  }
 0x90c   : > { %7172 = vst [vmem:[%s11756_s30] sm:$0xff] %v7171_v24   ;;  %v8140_v43 = vpop.f32.mrb[72].mxu0 }
 0x90d   : > { %v8334_v7 = vadd.f32 %v8333_v12, %v8140_v43  ;;  %v6153_v50 = vpop.f32.mrb[73].mxu0 }
 0x90e   : > { %v8339_v27 = vadd.f32 %v8338_v33, %v6153_v50  ;;  %v8141_v10 = vpop.f32.mrb[74].mxu0 }
 0x90f   : > { %v8344_v60 = vadd.f32 %v8343_v29, %v8141_v10  ;;  %v6156_v39 = vpop.f32.mrb[75].mxu0 }
 0x910   : > { %v8349_v47 = vadd.f32 %v8348_v41, %v6156_v39 }
 0x911   : > { %v7186_v20 = vpack.c.bf16 %v8344_v60, %v8334_v7 }
 0x912   : > { %v7181_v49 = vpack.c.bf16 %v8349_v47, %v8339_v27 }
 0x913   : > { %7217 = vst [vmem:[%s11756_s30 + $0x18] sm:$0xff] %v7186_v20  }
 0x914   : > { %7216 = vst [vmem:[%s11756_s30 + $0x10] sm:$0xff] %v7181_v49  }
 0x915   : > { %9403 = shalt.err (!%p9400_p7)
}
 0x916   : > { %s9404_s30 = scalar_lea.hbm %s11801_s24, 1024  ;;  %s9408_s15 = scalar_lea.hbm %s12032_s20, 2048 }
 0x917   : > { %p9405_p6 = scmp.ne.s32.totalorder %s11801_s24, %s9404_s30  ;;  %p9409_p1 = scmp.lt.u32.totalorder %s11801_s24, %s12032_s20 }
 0x918   : > { %p9410_p13 = scmp.lt.u32.totalorder %s9408_s15, %s9404_s30  ;;  %p9412_p2 = scmp.lt.u32.totalorder %s9404_s30, %s11801_s24 }
 0x919   : > { %p9406_p9 = pnand %p9405_p6, %p12033_p8 }
 0x91a   : > { %p9411_p0 = por %p9410_p13, %p9409_p1 }
 0x91b   : > { %p9407_p12 = pneg %p9406_p9 }
 0x91c   : > { %p9413_p4 = por %p9412_p2, %p9411_p0 }
 0x91e   : > { %p9414_p10 = pnand %p9413_p4, %p9407_p12 }
 0x920   : > { %9417 = shalt.err (!%p9414_p10)
}
 0x921   : > { %s9505_s2 = smov 64   ;;  %s9506_s0 = smov 4  }
 0x922   : > { %8520 = dma.vmem_to_hbm [thread:$0]  (%p12033_p8), %s11796_s13, 1024, %s11801_s24, %s6297_s25, %s9505_s2, %s9505_s2, %s9506_s0  }
 0x923 PF: > { %s12034_s18 = sld [smem:[#allocation34_spill]]  ;;  %p12035_p11 = scmp.ne.s32.totalorder %s11924_s19, 0 }
 0x924   : > { %p12036_p3 = scmp.ge.s32.totalorder %s9480_s28, 2 }
 0x926   : > { %p8564_p5 = pnand %p12036_p3, %p12035_p11 }
 0x929   : > { %s6325_s16 = sand.u32 1, %s12034_s18  }
 0x92a   : > { %s6326_s30 = scalar_lea.sflag [#allocation6], %s6325_s16 }
 0x92b   : > { %9463 = dma.done.wait (!%p8564_p5), %s6326_s30, 1024  }
 0x92c   : > { %9465 = vsyncadd (!%p8564_p5), %s6326_s30, 4294966272  ;;  %p32_p7 = scmp.ge.s32.totalorder %s9909_s22, 4   ;;  %s12037_s25 = smov %s9472_s26 }
 0x92d   : > { %s12038_s26 = smov %s9476_s27  ;;  %s12039_s27 = smov %s9920_s17 }
 0x92e   : > { %s12040_s28 = smov %s9909_s22  ;;  %34 = sbr.rel (!%p32_p7) target bundleno = 16 (0x10), region = 175 }
 0x935   :  { %6331 = vsyncpa [#allocation5], 1 }
 0x936   :  { %6333 = vsyncpa [#allocation5 + $0x1], 1 }
 0x937   :  { %6334 = vsyncpa [#allocation8], 1 }
 0x938   :  { %6335 = vsyncpa [#allocation11], 1 }
 0x939   :  { %6336 = vsyncpa [#allocation14], 1 }
 0x93a   :  { %6337 = vsyncpa [#allocation17], 1 }
 0x93b   :  { %6338 = vsyncpa [#allocation20], 1 }
 0x93c   :  { %6339 = vsyncpa [#allocation23], 1 }
 0x93d   :  { %6340 = vsyncpa [#allocation6], 1 }
 0x93e   :  { %6342 = vsyncpa [#allocation6 + $0x1], 1 }

</bundles_post_ra>
